<compile_context>
chip_gen: v7x
topology: tpu7x:2x2x1
jax: 0.10.0
libtpu: 0.0.40
codegen_flags: <defaults>
</compile_context>

<pallas_src>
import math

import jax
import jax.numpy as jnp
from jax.experimental import pallas as pl
from jax.experimental.pallas import tpu as pltpu


def _pair(v):
    return (v, v) if isinstance(v, int) else tuple(v)


# --------------------------- chip introspection ---------------------------

def _chip_info():
    """Returns (vmem_capacity_bytes, num_tensorcores, vpu_has_bf16) with safe fallbacks."""
    vmem_cap = 64 << 20
    try:
        info = pltpu.get_tpu_info()
        vmem_cap = int(getattr(info, "vmem_capacity_bytes", vmem_cap))
    except Exception:
        pass
    kind = ""
    try:
        kind = jax.devices()[0].device_kind.lower()
    except Exception:
        pass
    old_gen = any(t in kind for t in ("v2", "v3", "v4", "v5"))
    vpu_bf16 = bool(kind) and not old_gen          # v6e / v7x VPUs have bf16 math
    num_cores = 2 if ("7" in kind) else 1          # v7x: 2 TensorCores per chip
    return vmem_cap, num_cores, vpu_bf16


# ------------------------------- kernel -----------------------------------

def _build_kernel(C_in, kH, kW, outW, dW, sW, compute_dtype, has_bias):
    """Locally-connected conv tap loop.

    Refs (leading batch dim already squeezed by the BlockSpecs):
      x_ref: (C_in, kH, th, W_pad)   height taps of the padded input rows
      w_ref: (K, C_out, th, outW)    K = C_in*kH*kW, tap order (ci, kh, kw)
      b_ref: (C_out, th, outW)       f32 (bias variant only)
      o_ref: (C_out, th, outW)
    """

    def accumulate(x_ref, w_ref, acc):
        k = 0
        for ci in range(C_in):
            for kh in range(kH):
                row = x_ref[ci, kh]                       # (th, W_pad)
                for kw in range(kW):
                    lo = kw * dW
                    if sW == 1:
                        win = row[:, lo:lo + outW]        # static lane slice
                    else:
                        # TODO(synk): width-strided (sW > 1) lane slicing is
                        # functional but untuned; very large strided inputs may
                        # prefer a wrapper-side im2col path instead.
                        win = row[:, lo:lo + (outW - 1) * sW + 1:sW]
                    # bf16 multiply on v6e/v7x, f32 multiply on v5e; f32 accumulation.
                    prod = (win[None].astype(compute_dtype)
                            * w_ref[k].astype(compute_dtype))
                    acc = acc + prod.astype(jnp.float32)
                    k += 1
        return acc

    if has_bias:
        def kernel(x_ref, w_ref, b_ref, o_ref):
            acc = accumulate(x_ref, w_ref, b_ref[...].astype(jnp.float32))
            o_ref[...] = acc.astype(o_ref.dtype)
    else:
        def kernel(x_ref, w_ref, o_ref):
            acc = accumulate(x_ref, w_ref, jnp.zeros(o_ref.shape, jnp.float32))
            o_ref[...] = acc.astype(o_ref.dtype)
    return kernel


# ------------------------------ packing ------------------------------------

def prepack_conv2d_local(weight, bias, storage_dtype=jnp.bfloat16):
    """Hoist the per-call weight/bias relayout out of the forward path.

    weight: (outH, outW, C_out, C_in, kH, kW) -> (K, C_out, outH, outW), K=(ci,kh,kw)
    bias:   (C_out, outH, outW) -> f32 (or None)
    """
    outH, outW, C_out, C_in, kH, kW = weight.shape
    K = C_in * kH * kW
    w = jnp.transpose(weight, (3, 4, 5, 2, 0, 1)).reshape(K, C_out, outH, outW)
    w = w.astype(storage_dtype)
    b = None if bias is None else bias.astype(jnp.float32)
    return w, b


def _select_tile_rows(outH, row_bytes, vmem_cap, num_cores):
    """Output rows per grid step: multiples of 16 (bf16 sublane tile) or the full
    extent; sized from a generation-scaled VMEM budget; on v7x aim for >= 2
    blocks per TensorCore so each core keeps double-buffering."""
    if outH <= 16:
        return int(outH)                       # full-extent block: always legal
    budget = int(min(32 << 20, vmem_cap // 4))  # ~32MiB on 128MiB chips, 16MiB on v7x
    max_th = max(16, (budget // max(row_bytes, 1)) // 16 * 16)
    target_blocks = 1 if num_cores <= 1 else 2 * num_cores
    th = pl.cdiv(pl.cdiv(outH, target_blocks), 16) * 16
    th = min(th, max_th, pl.cdiv(outH, 16) * 16)
    return int(max(16, th))


# ------------------------------ wrapper -------------------------------------

def conv2d_local_pallas(x, weight, bias, stride=(1, 1), padding=(0, 0),
                        dilation=(1, 1), *, packed=None,
                        storage_dtype=jnp.bfloat16):
    """Locally-connected conv2d matching F.conv2d_local semantics.

    x:      (N, C_in, H, W)
    weight: (outH, outW, C_out, C_in, kH, kW)
    bias:   (C_out, outH, outW) or None
    packed: optional result of prepack_conv2d_local(weight, bias) (reused params)
    returns (N, C_out, outH, outW)
    """
    sH, sW = _pair(stride)
    pH, pW = _pair(padding)
    dH, dW = _pair(dilation)

    N, C_in, H, W = x.shape
    outH, outW, C_out, C_in_w, kH, kW = weight.shape
    assert C_in == C_in_w
    K = C_in * kH * kW
    W_pad = W + 2 * pW
    out_dtype = x.dtype

    if packed is None:
        packed = prepack_conv2d_local(weight, bias, storage_dtype)
    w_packed, b_packed = packed
    has_bias = b_packed is not None
    storage_dtype = w_packed.dtype

    vmem_cap, num_cores, vpu_bf16 = _chip_info()
    compute_dtype = (storage_dtype
                     if (vpu_bf16 and storage_dtype == jnp.bfloat16)
                     else jnp.float32)

    # ---- glue: pre-gather only the kH height taps (absorbs sH/dH, keeps every
    # in-kernel block sublane-aligned); the kW width taps are sliced inside the
    # kernel, so no kH*kW-expanded patches tensor ever hits HBM. ----
    x_pad = jnp.pad(x, ((0, 0), (0, 0), (pH, pH), (pW, pW)))
    rows = (jnp.arange(kH) * dH)[:, None] + (jnp.arange(outH) * sH)[None, :]  # (kH,outH)
    x_rows = x_pad[:, :, rows, :].astype(storage_dtype)   # (N, C_in, kH, outH, W_pad)

    # ---- generation-aware tiling over output rows ----
    sb = jnp.dtype(storage_dtype).itemsize
    ob = jnp.dtype(out_dtype).itemsize
    row_bytes = 2 * (K * C_out * outW * sb             # weights (dominant), double-buffered
                     + C_in * kH * W_pad * sb          # input height taps
                     + (C_out * outW * 4 if has_bias else 0)
                     + C_out * outW * ob)              # output
    th = _select_tile_rows(outH, row_bytes, vmem_cap, num_cores)

    outH_p = pl.cdiv(outH, th) * th
    if outH_p != outH:
        ph = outH_p - outH
        x_rows = jnp.pad(x_rows, ((0, 0), (0, 0), (0, 0), (0, ph), (0, 0)))
        w_packed = jnp.pad(w_packed, ((0, 0), (0, 0), (0, ph), (0, 0)))
        if has_bias:
            b_packed = jnp.pad(b_packed, ((0, 0), (0, ph), (0, 0)))

    # vmem_limit from actual need: row_bytes already carries the 2x double-buffer
    # factor; add ~2 MiB headroom for Mosaic scratch; cap well under physical VMEM.
    vmem_limit = int(min(max(row_bytes * th + (2 << 20), 4 << 20),
                         min(vmem_cap // 2, 48 << 20)))

    kernel = _build_kernel(C_in, kH, kW, outW, dW, sW, compute_dtype, has_bias)

    # oh-blocks outer / batch inner: the (large) weight block index is unchanged
    # across the N inner steps, so it is not re-DMA'd per batch element.
    grid = (outH_p // th, N)
    in_specs = [
        pl.BlockSpec((None, C_in, kH, th, W_pad), lambda i, n: (n, 0, 0, i, 0)),
        # NOTE: if an xprof trace shows the weight DMA exposed, add
        #   pipeline_mode=pl.Buffered(3)
        # to this spec (weights are the dominant stream).
        pl.BlockSpec((K, C_out, th, outW), lambda i, n: (0, 0, i, 0)),
    ]
    args = [x_rows, w_packed]
    if has_bias:
        in_specs.append(pl.BlockSpec((C_out, th, outW), lambda i, n: (0, i, 0)))
        args.append(b_packed)

    out = pl.pallas_call(
        kernel,
        out_shape=jax.ShapeDtypeStruct((N, C_out, outH_p, outW), out_dtype),
        grid_spec=pltpu.PrefetchScalarGridSpec(
            num_scalar_prefetch=0,
            grid=grid,
            in_specs=in_specs,
            out_specs=pl.BlockSpec((None, C_out, th, outW),
                                   lambda i, n: (n, 0, i, 0)),
        ),
        compiler_params=pltpu.CompilerParams(
            dimension_semantics=("parallel", "parallel"),
            vmem_limit_bytes=vmem_limit,
        ),
    )(*args)

    return out[:, :, :outH, :]


# ----------------------- reference (pure JAX) -------------------------------

def conv2d_local_ref(x, weight, bias, stride, padding, dilation, cast_dtype=None):
    N, C_in, H, W = x.shape
    outH, outW, C_out, _, kH, kW = weight.shape
    sH, sW = stride
    pH, pW = padding
    dH, dW = dilation
    x_pad = jnp.pad(x, ((0, 0), (0, 0), (pH, pH), (pW, pW)))
    rows = (jnp.arange(outH) * sH)[:, None] + (jnp.arange(kH) * dH)[None, :]
    cols = (jnp.arange(outW) * sW)[:, None] + (jnp.arange(kW) * dW)[None, :]
    patches = x_pad[:, :, rows[:, :, None, None], cols[None, None, :, :]]
    if cast_dtype is not None:
        patches = patches.astype(cast_dtype)
        weight = weight.astype(cast_dtype)
    out = jnp.einsum("nihkwl,hwoikl->nohw", patches, weight,
                     preferred_element_type=jnp.float32).astype(x.dtype)
    if bias is not None:
        out = out + bias[None, :, :, :]
    return out


# --------------------------------- main --------------------------------------

if __name__ == "__main__":
    key = jax.random.PRNGKey(0)

    in_height, in_width = 16, 16
    in_channels, out_channels = 4, 8
    kernel_size = _pair(3)
    stride = _pair(1)
    padding = _pair(1)
    dilation = _pair(1)
    batch = 2

    kH, kW = kernel_size
    out_height = int(math.floor(
        (in_height + 2 * padding[0] - dilation[0] * (kH - 1) - 1) / stride[0] + 1))
    out_width = int(math.floor(
        (in_width + 2 * padding[1] - dilation[1] * (kW - 1) - 1) / stride[1] + 1))

    # Deterministic parameter init mirroring reset_parameters: U(-stdv, stdv)
    n = in_channels * kH * kW
    stdv = 1.0 / math.sqrt(n)
    kw_key, kb_key, kx_key = jax.random.split(key, 3)
    weight = jax.random.uniform(
        kw_key,
        (out_height, out_width, out_channels, in_channels, kH, kW),
        minval=-stdv, maxval=stdv, dtype=jnp.float32)
    bias = jax.random.uniform(
        kb_key, (out_channels, out_height, out_width),
        minval=-stdv, maxval=stdv, dtype=jnp.float32)

    x = jax.random.normal(kx_key, (batch, in_channels, in_height, in_width),
                          dtype=jnp.float32)

    # Parameters are packed once (module init), not per forward call.
    packed = prepack_conv2d_local(weight, bias)

    out = conv2d_local_pallas(x, weight, bias, stride, padding, dilation,
                              packed=packed)
    out = jax.block_until_ready(out)

    assert out.shape == (batch, out_channels, out_height, out_width)

    # Matched-precision reference (bf16 inputs, f32 accumulation).  On v6e/v7x
    # the kernel additionally rounds each tap product to bf16, so the tolerance
    # is a bit looser than pure summation-order noise.
    ref_bf16 = conv2d_local_ref(x, weight, bias, stride, padding, dilation,
                                cast_dtype=jnp.bfloat16)
    assert jnp.allclose(out, ref_bf16, atol=2e-2, rtol=2e-2)

    # Loose sanity check against the full-f32 reference (covers bf16 rounding).
    ref_f32 = conv2d_local_ref(x, weight, bias, stride, padding, dilation)
    assert jnp.allclose(out, ref_f32, atol=5e-2, rtol=5e-2)

    print("KERNEL_OK")
</pallas_src>

<mosaic_0001>
module attributes {stable_mosaic.version = 11 : i64} {
  func.func @kernel(%arg0: i32, %arg1: i32, %arg2: memref<1x4x3x16x18xbf16, #tpu.memory_space<vmem>>, %arg3: memref<36x8x16x16xbf16, #tpu.memory_space<vmem>>, %arg4: memref<8x16x16xf32, #tpu.memory_space<vmem>>, %arg5: memref<1x8x16x16xf32, #tpu.memory_space<vmem>>) attributes {dimension_semantics = [#tpu.dimension_semantics<parallel>, #tpu.dimension_semantics<parallel>], iteration_bounds = array<i64: 1, 2>, scalar_prefetch = 0 : i64, scratch_operands = 0 : i64, tpu.core_type = #tpu.core_type<tc>, window_params = [{transform_indices = @transform_0, window_bounds = array<i64: 1, 4, 3, 16, 18>}, {transform_indices = @transform_1, window_bounds = array<i64: 36, 8, 16, 16>}, {transform_indices = @transform_2, window_bounds = array<i64: 8, 16, 16>}, {transform_indices = @transform_3, window_bounds = array<i64: 1, 8, 16, 16>}]} {
    %c0 = arith.constant 0 : index
    %c0_0 = arith.constant 0 : index
    %c0_1 = arith.constant 0 : index
    %0 = vector.load %arg4[%c0, %c0_0, %c0_1] : memref<8x16x16xf32, #tpu.memory_space<vmem>>, vector<8x16x16xf32>
    %c0_2 = arith.constant 0 : index
    %c0_3 = arith.constant 0 : index
    %c0_4 = arith.constant 0 : index
    %c0_5 = arith.constant 0 : index
    %c0_6 = arith.constant 0 : index
    %1 = vector.load %arg2[%c0_2, %c0_3, %c0_4, %c0_5, %c0_6] : memref<1x4x3x16x18xbf16, #tpu.memory_space<vmem>>, vector<1x1x1x16x18xbf16>
    %2 = vector.shape_cast %1 : vector<1x1x1x16x18xbf16> to vector<16x18xbf16>
    %3 = vector.extract_strided_slice %2 {offsets = [0, 0], sizes = [16, 16], strides = [1, 1]} : vector<16x18xbf16> to vector<16x16xbf16>
    %4 = vector.shape_cast %3 : vector<16x16xbf16> to vector<1x16x16xbf16>
    %c0_7 = arith.constant 0 : index
    %c0_8 = arith.constant 0 : index
    %c0_9 = arith.constant 0 : index
    %c0_10 = arith.constant 0 : index
    %5 = vector.load %arg3[%c0_7, %c0_8, %c0_9, %c0_10] : memref<36x8x16x16xbf16, #tpu.memory_space<vmem>>, vector<1x8x16x16xbf16>
    %6 = vector.shape_cast %5 : vector<1x8x16x16xbf16> to vector<8x16x16xbf16>
    %7 = vector.broadcast %4 : vector<1x16x16xbf16> to vector<8x16x16xbf16>
    %8 = arith.mulf %7, %6 : vector<8x16x16xbf16>
    %9 = arith.extf %8 : vector<8x16x16xbf16> to vector<8x16x16xf32>
    %10 = arith.addf %0, %9 : vector<8x16x16xf32>
    %11 = vector.extract_strided_slice %2 {offsets = [0, 1], sizes = [16, 16], strides = [1, 1]} : vector<16x18xbf16> to vector<16x16xbf16>
    %12 = vector.shape_cast %11 : vector<16x16xbf16> to vector<1x16x16xbf16>
    %c1 = arith.constant 1 : index
    %c0_11 = arith.constant 0 : index
    %c0_12 = arith.constant 0 : index
    %c0_13 = arith.constant 0 : index
    %13 = vector.load %arg3[%c1, %c0_11, %c0_12, %c0_13] : memref<36x8x16x16xbf16, #tpu.memory_space<vmem>>, vector<1x8x16x16xbf16>
    %14 = vector.shape_cast %13 : vector<1x8x16x16xbf16> to vector<8x16x16xbf16>
    %15 = vector.broadcast %12 : vector<1x16x16xbf16> to vector<8x16x16xbf16>
    %16 = arith.mulf %15, %14 : vector<8x16x16xbf16>
    %17 = arith.extf %16 : vector<8x16x16xbf16> to vector<8x16x16xf32>
    %18 = arith.addf %10, %17 : vector<8x16x16xf32>
    %19 = vector.extract_strided_slice %2 {offsets = [0, 2], sizes = [16, 16], strides = [1, 1]} : vector<16x18xbf16> to vector<16x16xbf16>
    %20 = vector.shape_cast %19 : vector<16x16xbf16> to vector<1x16x16xbf16>
    %c2 = arith.constant 2 : index
    %c0_14 = arith.constant 0 : index
    %c0_15 = arith.constant 0 : index
    %c0_16 = arith.constant 0 : index
    %21 = vector.load %arg3[%c2, %c0_14, %c0_15, %c0_16] : memref<36x8x16x16xbf16, #tpu.memory_space<vmem>>, vector<1x8x16x16xbf16>
    %22 = vector.shape_cast %21 : vector<1x8x16x16xbf16> to vector<8x16x16xbf16>
    %23 = vector.broadcast %20 : vector<1x16x16xbf16> to vector<8x16x16xbf16>
    %24 = arith.mulf %23, %22 : vector<8x16x16xbf16>
    %25 = arith.extf %24 : vector<8x16x16xbf16> to vector<8x16x16xf32>
    %26 = arith.addf %18, %25 : vector<8x16x16xf32>
    %c0_17 = arith.constant 0 : index
    %c0_18 = arith.constant 0 : index
    %c1_19 = arith.constant 1 : index
    %c0_20 = arith.constant 0 : index
    %c0_21 = arith.constant 0 : index
    %27 = vector.load %arg2[%c0_17, %c0_18, %c1_19, %c0_20, %c0_21] : memref<1x4x3x16x18xbf16, #tpu.memory_space<vmem>>, vector<1x1x1x16x18xbf16>
    %28 = vector.shape_cast %27 : vector<1x1x1x16x18xbf16> to vector<16x18xbf16>
    %29 = vector.extract_strided_slice %28 {offsets = [0, 0], sizes = [16, 16], strides = [1, 1]} : vector<16x18xbf16> to vector<16x16xbf16>
    %30 = vector.shape_cast %29 : vector<16x16xbf16> to vector<1x16x16xbf16>
    %c3 = arith.constant 3 : index
    %c0_22 = arith.constant 0 : index
    %c0_23 = arith.constant 0 : index
    %c0_24 = arith.constant 0 : index
    %31 = vector.load %arg3[%c3, %c0_22, %c0_23, %c0_24] : memref<36x8x16x16xbf16, #tpu.memory_space<vmem>>, vector<1x8x16x16xbf16>
    %32 = vector.shape_cast %31 : vector<1x8x16x16xbf16> to vector<8x16x16xbf16>
    %33 = vector.broadcast %30 : vector<1x16x16xbf16> to vector<8x16x16xbf16>
    %34 = arith.mulf %33, %32 : vector<8x16x16xbf16>
    %35 = arith.extf %34 : vector<8x16x16xbf16> to vector<8x16x16xf32>
    %36 = arith.addf %26, %35 : vector<8x16x16xf32>
    %37 = vector.extract_strided_slice %28 {offsets = [0, 1], sizes = [16, 16], strides = [1, 1]} : vector<16x18xbf16> to vector<16x16xbf16>
    %38 = vector.shape_cast %37 : vector<16x16xbf16> to vector<1x16x16xbf16>
    %c4 = arith.constant 4 : index
    %c0_25 = arith.constant 0 : index
    %c0_26 = arith.constant 0 : index
    %c0_27 = arith.constant 0 : index
    %39 = vector.load %arg3[%c4, %c0_25, %c0_26, %c0_27] : memref<36x8x16x16xbf16, #tpu.memory_space<vmem>>, vector<1x8x16x16xbf16>
    %40 = vector.shape_cast %39 : vector<1x8x16x16xbf16> to vector<8x16x16xbf16>
    %41 = vector.broadcast %38 : vector<1x16x16xbf16> to vector<8x16x16xbf16>
    %42 = arith.mulf %41, %40 : vector<8x16x16xbf16>
    %43 = arith.extf %42 : vector<8x16x16xbf16> to vector<8x16x16xf32>
    %44 = arith.addf %36, %43 : vector<8x16x16xf32>
    %45 = vector.extract_strided_slice %28 {offsets = [0, 2], sizes = [16, 16], strides = [1, 1]} : vector<16x18xbf16> to vector<16x16xbf16>
    %46 = vector.shape_cast %45 : vector<16x16xbf16> to vector<1x16x16xbf16>
    %c5 = arith.constant 5 : index
    %c0_28 = arith.constant 0 : index
    %c0_29 = arith.constant 0 : index
    %c0_30 = arith.constant 0 : index
    %47 = vector.load %arg3[%c5, %c0_28, %c0_29, %c0_30] : memref<36x8x16x16xbf16, #tpu.memory_space<vmem>>, vector<1x8x16x16xbf16>
    %48 = vector.shape_cast %47 : vector<1x8x16x16xbf16> to vector<8x16x16xbf16>
    %49 = vector.broadcast %46 : vector<1x16x16xbf16> to vector<8x16x16xbf16>
    %50 = arith.mulf %49, %48 : vector<8x16x16xbf16>
    %51 = arith.extf %50 : vector<8x16x16xbf16> to vector<8x16x16xf32>
    %52 = arith.addf %44, %51 : vector<8x16x16xf32>
    %c0_31 = arith.constant 0 : index
    %c0_32 = arith.constant 0 : index
    %c2_33 = arith.constant 2 : index
    %c0_34 = arith.constant 0 : index
    %c0_35 = arith.constant 0 : index
    %53 = vector.load %arg2[%c0_31, %c0_32, %c2_33, %c0_34, %c0_35] : memref<1x4x3x16x18xbf16, #tpu.memory_space<vmem>>, vector<1x1x1x16x18xbf16>
    %54 = vector.shape_cast %53 : vector<1x1x1x16x18xbf16> to vector<16x18xbf16>
    %55 = vector.extract_strided_slice %54 {offsets = [0, 0], sizes = [16, 16], strides = [1, 1]} : vector<16x18xbf16> to vector<16x16xbf16>
    %56 = vector.shape_cast %55 : vector<16x16xbf16> to vector<1x16x16xbf16>
    %c6 = arith.constant 6 : index
    %c0_36 = arith.constant 0 : index
    %c0_37 = arith.constant 0 : index
    %c0_38 = arith.constant 0 : index
    %57 = vector.load %arg3[%c6, %c0_36, %c0_37, %c0_38] : memref<36x8x16x16xbf16, #tpu.memory_space<vmem>>, vector<1x8x16x16xbf16>
    %58 = vector.shape_cast %57 : vector<1x8x16x16xbf16> to vector<8x16x16xbf16>
    %59 = vector.broadcast %56 : vector<1x16x16xbf16> to vector<8x16x16xbf16>
    %60 = arith.mulf %59, %58 : vector<8x16x16xbf16>
    %61 = arith.extf %60 : vector<8x16x16xbf16> to vector<8x16x16xf32>
    %62 = arith.addf %52, %61 : vector<8x16x16xf32>
    %63 = vector.extract_strided_slice %54 {offsets = [0, 1], sizes = [16, 16], strides = [1, 1]} : vector<16x18xbf16> to vector<16x16xbf16>
    %64 = vector.shape_cast %63 : vector<16x16xbf16> to vector<1x16x16xbf16>
    %c7 = arith.constant 7 : index
    %c0_39 = arith.constant 0 : index
    %c0_40 = arith.constant 0 : index
    %c0_41 = arith.constant 0 : index
    %65 = vector.load %arg3[%c7, %c0_39, %c0_40, %c0_41] : memref<36x8x16x16xbf16, #tpu.memory_space<vmem>>, vector<1x8x16x16xbf16>
    %66 = vector.shape_cast %65 : vector<1x8x16x16xbf16> to vector<8x16x16xbf16>
    %67 = vector.broadcast %64 : vector<1x16x16xbf16> to vector<8x16x16xbf16>
    %68 = arith.mulf %67, %66 : vector<8x16x16xbf16>
    %69 = arith.extf %68 : vector<8x16x16xbf16> to vector<8x16x16xf32>
    %70 = arith.addf %62, %69 : vector<8x16x16xf32>
    %71 = vector.extract_strided_slice %54 {offsets = [0, 2], sizes = [16, 16], strides = [1, 1]} : vector<16x18xbf16> to vector<16x16xbf16>
    %72 = vector.shape_cast %71 : vector<16x16xbf16> to vector<1x16x16xbf16>
    %c8 = arith.constant 8 : index
    %c0_42 = arith.constant 0 : index
    %c0_43 = arith.constant 0 : index
    %c0_44 = arith.constant 0 : index
    %73 = vector.load %arg3[%c8, %c0_42, %c0_43, %c0_44] : memref<36x8x16x16xbf16, #tpu.memory_space<vmem>>, vector<1x8x16x16xbf16>
    %74 = vector.shape_cast %73 : vector<1x8x16x16xbf16> to vector<8x16x16xbf16>
    %75 = vector.broadcast %72 : vector<1x16x16xbf16> to vector<8x16x16xbf16>
    %76 = arith.mulf %75, %74 : vector<8x16x16xbf16>
    %77 = arith.extf %76 : vector<8x16x16xbf16> to vector<8x16x16xf32>
    %78 = arith.addf %70, %77 : vector<8x16x16xf32>
    %c0_45 = arith.constant 0 : index
    %c1_46 = arith.constant 1 : index
    %c0_47 = arith.constant 0 : index
    %c0_48 = arith.constant 0 : index
    %c0_49 = arith.constant 0 : index
    %79 = vector.load %arg2[%c0_45, %c1_46, %c0_47, %c0_48, %c0_49] : memref<1x4x3x16x18xbf16, #tpu.memory_space<vmem>>, vector<1x1x1x16x18xbf16>
    %80 = vector.shape_cast %79 : vector<1x1x1x16x18xbf16> to vector<16x18xbf16>
    %81 = vector.extract_strided_slice %80 {offsets = [0, 0], sizes = [16, 16], strides = [1, 1]} : vector<16x18xbf16> to vector<16x16xbf16>
    %82 = vector.shape_cast %81 : vector<16x16xbf16> to vector<1x16x16xbf16>
    %c9 = arith.constant 9 : index
    %c0_50 = arith.constant 0 : index
    %c0_51 = arith.constant 0 : index
    %c0_52 = arith.constant 0 : index
    %83 = vector.load %arg3[%c9, %c0_50, %c0_51, %c0_52] : memref<36x8x16x16xbf16, #tpu.memory_space<vmem>>, vector<1x8x16x16xbf16>
    %84 = vector.shape_cast %83 : vector<1x8x16x16xbf16> to vector<8x16x16xbf16>
    %85 = vector.broadcast %82 : vector<1x16x16xbf16> to vector<8x16x16xbf16>
    %86 = arith.mulf %85, %84 : vector<8x16x16xbf16>
    %87 = arith.extf %86 : vector<8x16x16xbf16> to vector<8x16x16xf32>
    %88 = arith.addf %78, %87 : vector<8x16x16xf32>
    %89 = vector.extract_strided_slice %80 {offsets = [0, 1], sizes = [16, 16], strides = [1, 1]} : vector<16x18xbf16> to vector<16x16xbf16>
    %90 = vector.shape_cast %89 : vector<16x16xbf16> to vector<1x16x16xbf16>
    %c10 = arith.constant 10 : index
    %c0_53 = arith.constant 0 : index
    %c0_54 = arith.constant 0 : index
    %c0_55 = arith.constant 0 : index
    %91 = vector.load %arg3[%c10, %c0_53, %c0_54, %c0_55] : memref<36x8x16x16xbf16, #tpu.memory_space<vmem>>, vector<1x8x16x16xbf16>
    %92 = vector.shape_cast %91 : vector<1x8x16x16xbf16> to vector<8x16x16xbf16>
    %93 = vector.broadcast %90 : vector<1x16x16xbf16> to vector<8x16x16xbf16>
    %94 = arith.mulf %93, %92 : vector<8x16x16xbf16>
    %95 = arith.extf %94 : vector<8x16x16xbf16> to vector<8x16x16xf32>
    %96 = arith.addf %88, %95 : vector<8x16x16xf32>
    %97 = vector.extract_strided_slice %80 {offsets = [0, 2], sizes = [16, 16], strides = [1, 1]} : vector<16x18xbf16> to vector<16x16xbf16>
    %98 = vector.shape_cast %97 : vector<16x16xbf16> to vector<1x16x16xbf16>
    %c11 = arith.constant 11 : index
    %c0_56 = arith.constant 0 : index
    %c0_57 = arith.constant 0 : index
    %c0_58 = arith.constant 0 : index
    %99 = vector.load %arg3[%c11, %c0_56, %c0_57, %c0_58] : memref<36x8x16x16xbf16, #tpu.memory_space<vmem>>, vector<1x8x16x16xbf16>
    %100 = vector.shape_cast %99 : vector<1x8x16x16xbf16> to vector<8x16x16xbf16>
    %101 = vector.broadcast %98 : vector<1x16x16xbf16> to vector<8x16x16xbf16>
    %102 = arith.mulf %101, %100 : vector<8x16x16xbf16>
    %103 = arith.extf %102 : vector<8x16x16xbf16> to vector<8x16x16xf32>
    %104 = arith.addf %96, %103 : vector<8x16x16xf32>
    %c0_59 = arith.constant 0 : index
    %c1_60 = arith.constant 1 : index
    %c1_61 = arith.constant 1 : index
    %c0_62 = arith.constant 0 : index
    %c0_63 = arith.constant 0 : index
    %105 = vector.load %arg2[%c0_59, %c1_60, %c1_61, %c0_62, %c0_63] : memref<1x4x3x16x18xbf16, #tpu.memory_space<vmem>>, vector<1x1x1x16x18xbf16>
    %106 = vector.shape_cast %105 : vector<1x1x1x16x18xbf16> to vector<16x18xbf16>
    %107 = vector.extract_strided_slice %106 {offsets = [0, 0], sizes = [16, 16], strides = [1, 1]} : vector<16x18xbf16> to vector<16x16xbf16>
    %108 = vector.shape_cast %107 : vector<16x16xbf16> to vector<1x16x16xbf16>
    %c12 = arith.constant 12 : index
    %c0_64 = arith.constant 0 : index
    %c0_65 = arith.constant 0 : index
    %c0_66 = arith.constant 0 : index
    %109 = vector.load %arg3[%c12, %c0_64, %c0_65, %c0_66] : memref<36x8x16x16xbf16, #tpu.memory_space<vmem>>, vector<1x8x16x16xbf16>
    %110 = vector.shape_cast %109 : vector<1x8x16x16xbf16> to vector<8x16x16xbf16>
    %111 = vector.broadcast %108 : vector<1x16x16xbf16> to vector<8x16x16xbf16>
    %112 = arith.mulf %111, %110 : vector<8x16x16xbf16>
    %113 = arith.extf %112 : vector<8x16x16xbf16> to vector<8x16x16xf32>
    %114 = arith.addf %104, %113 : vector<8x16x16xf32>
    %115 = vector.extract_strided_slice %106 {offsets = [0, 1], sizes = [16, 16], strides = [1, 1]} : vector<16x18xbf16> to vector<16x16xbf16>
    %116 = vector.shape_cast %115 : vector<16x16xbf16> to vector<1x16x16xbf16>
    %c13 = arith.constant 13 : index
    %c0_67 = arith.constant 0 : index
    %c0_68 = arith.constant 0 : index
    %c0_69 = arith.constant 0 : index
    %117 = vector.load %arg3[%c13, %c0_67, %c0_68, %c0_69] : memref<36x8x16x16xbf16, #tpu.memory_space<vmem>>, vector<1x8x16x16xbf16>
    %118 = vector.shape_cast %117 : vector<1x8x16x16xbf16> to vector<8x16x16xbf16>
    %119 = vector.broadcast %116 : vector<1x16x16xbf16> to vector<8x16x16xbf16>
    %120 = arith.mulf %119, %118 : vector<8x16x16xbf16>
    %121 = arith.extf %120 : vector<8x16x16xbf16> to vector<8x16x16xf32>
    %122 = arith.addf %114, %121 : vector<8x16x16xf32>
    %123 = vector.extract_strided_slice %106 {offsets = [0, 2], sizes = [16, 16], strides = [1, 1]} : vector<16x18xbf16> to vector<16x16xbf16>
    %124 = vector.shape_cast %123 : vector<16x16xbf16> to vector<1x16x16xbf16>
    %c14 = arith.constant 14 : index
    %c0_70 = arith.constant 0 : index
    %c0_71 = arith.constant 0 : index
    %c0_72 = arith.constant 0 : index
    %125 = vector.load %arg3[%c14, %c0_70, %c0_71, %c0_72] : memref<36x8x16x16xbf16, #tpu.memory_space<vmem>>, vector<1x8x16x16xbf16>
    %126 = vector.shape_cast %125 : vector<1x8x16x16xbf16> to vector<8x16x16xbf16>
    %127 = vector.broadcast %124 : vector<1x16x16xbf16> to vector<8x16x16xbf16>
    %128 = arith.mulf %127, %126 : vector<8x16x16xbf16>
    %129 = arith.extf %128 : vector<8x16x16xbf16> to vector<8x16x16xf32>
    %130 = arith.addf %122, %129 : vector<8x16x16xf32>
    %c0_73 = arith.constant 0 : index
    %c1_74 = arith.constant 1 : index
    %c2_75 = arith.constant 2 : index
    %c0_76 = arith.constant 0 : index
    %c0_77 = arith.constant 0 : index
    %131 = vector.load %arg2[%c0_73, %c1_74, %c2_75, %c0_76, %c0_77] : memref<1x4x3x16x18xbf16, #tpu.memory_space<vmem>>, vector<1x1x1x16x18xbf16>
    %132 = vector.shape_cast %131 : vector<1x1x1x16x18xbf16> to vector<16x18xbf16>
    %133 = vector.extract_strided_slice %132 {offsets = [0, 0], sizes = [16, 16], strides = [1, 1]} : vector<16x18xbf16> to vector<16x16xbf16>
    %134 = vector.shape_cast %133 : vector<16x16xbf16> to vector<1x16x16xbf16>
    %c15 = arith.constant 15 : index
    %c0_78 = arith.constant 0 : index
    %c0_79 = arith.constant 0 : index
    %c0_80 = arith.constant 0 : index
    %135 = vector.load %arg3[%c15, %c0_78, %c0_79, %c0_80] : memref<36x8x16x16xbf16, #tpu.memory_space<vmem>>, vector<1x8x16x16xbf16>
    %136 = vector.shape_cast %135 : vector<1x8x16x16xbf16> to vector<8x16x16xbf16>
    %137 = vector.broadcast %134 : vector<1x16x16xbf16> to vector<8x16x16xbf16>
    %138 = arith.mulf %137, %136 : vector<8x16x16xbf16>
    %139 = arith.extf %138 : vector<8x16x16xbf16> to vector<8x16x16xf32>
    %140 = arith.addf %130, %139 : vector<8x16x16xf32>
    %141 = vector.extract_strided_slice %132 {offsets = [0, 1], sizes = [16, 16], strides = [1, 1]} : vector<16x18xbf16> to vector<16x16xbf16>
    %142 = vector.shape_cast %141 : vector<16x16xbf16> to vector<1x16x16xbf16>
    %c16 = arith.constant 16 : index
    %c0_81 = arith.constant 0 : index
    %c0_82 = arith.constant 0 : index
    %c0_83 = arith.constant 0 : index
    %143 = vector.load %arg3[%c16, %c0_81, %c0_82, %c0_83] : memref<36x8x16x16xbf16, #tpu.memory_space<vmem>>, vector<1x8x16x16xbf16>
    %144 = vector.shape_cast %143 : vector<1x8x16x16xbf16> to vector<8x16x16xbf16>
    %145 = vector.broadcast %142 : vector<1x16x16xbf16> to vector<8x16x16xbf16>
    %146 = arith.mulf %145, %144 : vector<8x16x16xbf16>
    %147 = arith.extf %146 : vector<8x16x16xbf16> to vector<8x16x16xf32>
    %148 = arith.addf %140, %147 : vector<8x16x16xf32>
    %149 = vector.extract_strided_slice %132 {offsets = [0, 2], sizes = [16, 16], strides = [1, 1]} : vector<16x18xbf16> to vector<16x16xbf16>
    %150 = vector.shape_cast %149 : vector<16x16xbf16> to vector<1x16x16xbf16>
    %c17 = arith.constant 17 : index
    %c0_84 = arith.constant 0 : index
    %c0_85 = arith.constant 0 : index
    %c0_86 = arith.constant 0 : index
    %151 = vector.load %arg3[%c17, %c0_84, %c0_85, %c0_86] : memref<36x8x16x16xbf16, #tpu.memory_space<vmem>>, vector<1x8x16x16xbf16>
    %152 = vector.shape_cast %151 : vector<1x8x16x16xbf16> to vector<8x16x16xbf16>
    %153 = vector.broadcast %150 : vector<1x16x16xbf16> to vector<8x16x16xbf16>
    %154 = arith.mulf %153, %152 : vector<8x16x16xbf16>
    %155 = arith.extf %154 : vector<8x16x16xbf16> to vector<8x16x16xf32>
    %156 = arith.addf %148, %155 : vector<8x16x16xf32>
    %c0_87 = arith.constant 0 : index
    %c2_88 = arith.constant 2 : index
    %c0_89 = arith.constant 0 : index
    %c0_90 = arith.constant 0 : index
    %c0_91 = arith.constant 0 : index
    %157 = vector.load %arg2[%c0_87, %c2_88, %c0_89, %c0_90, %c0_91] : memref<1x4x3x16x18xbf16, #tpu.memory_space<vmem>>, vector<1x1x1x16x18xbf16>
    %158 = vector.shape_cast %157 : vector<1x1x1x16x18xbf16> to vector<16x18xbf16>
    %159 = vector.extract_strided_slice %158 {offsets = [0, 0], sizes = [16, 16], strides = [1, 1]} : vector<16x18xbf16> to vector<16x16xbf16>
    %160 = vector.shape_cast %159 : vector<16x16xbf16> to vector<1x16x16xbf16>
    %c18 = arith.constant 18 : index
    %c0_92 = arith.constant 0 : index
    %c0_93 = arith.constant 0 : index
    %c0_94 = arith.constant 0 : index
    %161 = vector.load %arg3[%c18, %c0_92, %c0_93, %c0_94] : memref<36x8x16x16xbf16, #tpu.memory_space<vmem>>, vector<1x8x16x16xbf16>
    %162 = vector.shape_cast %161 : vector<1x8x16x16xbf16> to vector<8x16x16xbf16>
    %163 = vector.broadcast %160 : vector<1x16x16xbf16> to vector<8x16x16xbf16>
    %164 = arith.mulf %163, %162 : vector<8x16x16xbf16>
    %165 = arith.extf %164 : vector<8x16x16xbf16> to vector<8x16x16xf32>
    %166 = arith.addf %156, %165 : vector<8x16x16xf32>
    %167 = vector.extract_strided_slice %158 {offsets = [0, 1], sizes = [16, 16], strides = [1, 1]} : vector<16x18xbf16> to vector<16x16xbf16>
    %168 = vector.shape_cast %167 : vector<16x16xbf16> to vector<1x16x16xbf16>
    %c19 = arith.constant 19 : index
    %c0_95 = arith.constant 0 : index
    %c0_96 = arith.constant 0 : index
    %c0_97 = arith.constant 0 : index
    %169 = vector.load %arg3[%c19, %c0_95, %c0_96, %c0_97] : memref<36x8x16x16xbf16, #tpu.memory_space<vmem>>, vector<1x8x16x16xbf16>
    %170 = vector.shape_cast %169 : vector<1x8x16x16xbf16> to vector<8x16x16xbf16>
    %171 = vector.broadcast %168 : vector<1x16x16xbf16> to vector<8x16x16xbf16>
    %172 = arith.mulf %171, %170 : vector<8x16x16xbf16>
    %173 = arith.extf %172 : vector<8x16x16xbf16> to vector<8x16x16xf32>
    %174 = arith.addf %166, %173 : vector<8x16x16xf32>
    %175 = vector.extract_strided_slice %158 {offsets = [0, 2], sizes = [16, 16], strides = [1, 1]} : vector<16x18xbf16> to vector<16x16xbf16>
    %176 = vector.shape_cast %175 : vector<16x16xbf16> to vector<1x16x16xbf16>
    %c20 = arith.constant 20 : index
    %c0_98 = arith.constant 0 : index
    %c0_99 = arith.constant 0 : index
    %c0_100 = arith.constant 0 : index
    %177 = vector.load %arg3[%c20, %c0_98, %c0_99, %c0_100] : memref<36x8x16x16xbf16, #tpu.memory_space<vmem>>, vector<1x8x16x16xbf16>
    %178 = vector.shape_cast %177 : vector<1x8x16x16xbf16> to vector<8x16x16xbf16>
    %179 = vector.broadcast %176 : vector<1x16x16xbf16> to vector<8x16x16xbf16>
    %180 = arith.mulf %179, %178 : vector<8x16x16xbf16>
    %181 = arith.extf %180 : vector<8x16x16xbf16> to vector<8x16x16xf32>
    %182 = arith.addf %174, %181 : vector<8x16x16xf32>
    %c0_101 = arith.constant 0 : index
    %c2_102 = arith.constant 2 : index
    %c1_103 = arith.constant 1 : index
    %c0_104 = arith.constant 0 : index
    %c0_105 = arith.constant 0 : index
    %183 = vector.load %arg2[%c0_101, %c2_102, %c1_103, %c0_104, %c0_105] : memref<1x4x3x16x18xbf16, #tpu.memory_space<vmem>>, vector<1x1x1x16x18xbf16>
    %184 = vector.shape_cast %183 : vector<1x1x1x16x18xbf16> to vector<16x18xbf16>
    %185 = vector.extract_strided_slice %184 {offsets = [0, 0], sizes = [16, 16], strides = [1, 1]} : vector<16x18xbf16> to vector<16x16xbf16>
    %186 = vector.shape_cast %185 : vector<16x16xbf16> to vector<1x16x16xbf16>
    %c21 = arith.constant 21 : index
    %c0_106 = arith.constant 0 : index
    %c0_107 = arith.constant 0 : index
    %c0_108 = arith.constant 0 : index
    %187 = vector.load %arg3[%c21, %c0_106, %c0_107, %c0_108] : memref<36x8x16x16xbf16, #tpu.memory_space<vmem>>, vector<1x8x16x16xbf16>
    %188 = vector.shape_cast %187 : vector<1x8x16x16xbf16> to vector<8x16x16xbf16>
    %189 = vector.broadcast %186 : vector<1x16x16xbf16> to vector<8x16x16xbf16>
    %190 = arith.mulf %189, %188 : vector<8x16x16xbf16>
    %191 = arith.extf %190 : vector<8x16x16xbf16> to vector<8x16x16xf32>
    %192 = arith.addf %182, %191 : vector<8x16x16xf32>
    %193 = vector.extract_strided_slice %184 {offsets = [0, 1], sizes = [16, 16], strides = [1, 1]} : vector<16x18xbf16> to vector<16x16xbf16>
    %194 = vector.shape_cast %193 : vector<16x16xbf16> to vector<1x16x16xbf16>
    %c22 = arith.constant 22 : index
    %c0_109 = arith.constant 0 : index
    %c0_110 = arith.constant 0 : index
    %c0_111 = arith.constant 0 : index
    %195 = vector.load %arg3[%c22, %c0_109, %c0_110, %c0_111] : memref<36x8x16x16xbf16, #tpu.memory_space<vmem>>, vector<1x8x16x16xbf16>
    %196 = vector.shape_cast %195 : vector<1x8x16x16xbf16> to vector<8x16x16xbf16>
    %197 = vector.broadcast %194 : vector<1x16x16xbf16> to vector<8x16x16xbf16>
    %198 = arith.mulf %197, %196 : vector<8x16x16xbf16>
    %199 = arith.extf %198 : vector<8x16x16xbf16> to vector<8x16x16xf32>
    %200 = arith.addf %192, %199 : vector<8x16x16xf32>
    %201 = vector.extract_strided_slice %184 {offsets = [0, 2], sizes = [16, 16], strides = [1, 1]} : vector<16x18xbf16> to vector<16x16xbf16>
    %202 = vector.shape_cast %201 : vector<16x16xbf16> to vector<1x16x16xbf16>
    %c23 = arith.constant 23 : index
    %c0_112 = arith.constant 0 : index
    %c0_113 = arith.constant 0 : index
    %c0_114 = arith.constant 0 : index
    %203 = vector.load %arg3[%c23, %c0_112, %c0_113, %c0_114] : memref<36x8x16x16xbf16, #tpu.memory_space<vmem>>, vector<1x8x16x16xbf16>
    %204 = vector.shape_cast %203 : vector<1x8x16x16xbf16> to vector<8x16x16xbf16>
    %205 = vector.broadcast %202 : vector<1x16x16xbf16> to vector<8x16x16xbf16>
    %206 = arith.mulf %205, %204 : vector<8x16x16xbf16>
    %207 = arith.extf %206 : vector<8x16x16xbf16> to vector<8x16x16xf32>
    %208 = arith.addf %200, %207 : vector<8x16x16xf32>
    %c0_115 = arith.constant 0 : index
    %c2_116 = arith.constant 2 : index
    %c2_117 = arith.constant 2 : index
    %c0_118 = arith.constant 0 : index
    %c0_119 = arith.constant 0 : index
    %209 = vector.load %arg2[%c0_115, %c2_116, %c2_117, %c0_118, %c0_119] : memref<1x4x3x16x18xbf16, #tpu.memory_space<vmem>>, vector<1x1x1x16x18xbf16>
    %210 = vector.shape_cast %209 : vector<1x1x1x16x18xbf16> to vector<16x18xbf16>
    %211 = vector.extract_strided_slice %210 {offsets = [0, 0], sizes = [16, 16], strides = [1, 1]} : vector<16x18xbf16> to vector<16x16xbf16>
    %212 = vector.shape_cast %211 : vector<16x16xbf16> to vector<1x16x16xbf16>
    %c24 = arith.constant 24 : index
    %c0_120 = arith.constant 0 : index
    %c0_121 = arith.constant 0 : index
    %c0_122 = arith.constant 0 : index
    %213 = vector.load %arg3[%c24, %c0_120, %c0_121, %c0_122] : memref<36x8x16x16xbf16, #tpu.memory_space<vmem>>, vector<1x8x16x16xbf16>
    %214 = vector.shape_cast %213 : vector<1x8x16x16xbf16> to vector<8x16x16xbf16>
    %215 = vector.broadcast %212 : vector<1x16x16xbf16> to vector<8x16x16xbf16>
    %216 = arith.mulf %215, %214 : vector<8x16x16xbf16>
    %217 = arith.extf %216 : vector<8x16x16xbf16> to vector<8x16x16xf32>
    %218 = arith.addf %208, %217 : vector<8x16x16xf32>
    %219 = vector.extract_strided_slice %210 {offsets = [0, 1], sizes = [16, 16], strides = [1, 1]} : vector<16x18xbf16> to vector<16x16xbf16>
    %220 = vector.shape_cast %219 : vector<16x16xbf16> to vector<1x16x16xbf16>
    %c25 = arith.constant 25 : index
    %c0_123 = arith.constant 0 : index
    %c0_124 = arith.constant 0 : index
    %c0_125 = arith.constant 0 : index
    %221 = vector.load %arg3[%c25, %c0_123, %c0_124, %c0_125] : memref<36x8x16x16xbf16, #tpu.memory_space<vmem>>, vector<1x8x16x16xbf16>
    %222 = vector.shape_cast %221 : vector<1x8x16x16xbf16> to vector<8x16x16xbf16>
    %223 = vector.broadcast %220 : vector<1x16x16xbf16> to vector<8x16x16xbf16>
    %224 = arith.mulf %223, %222 : vector<8x16x16xbf16>
    %225 = arith.extf %224 : vector<8x16x16xbf16> to vector<8x16x16xf32>
    %226 = arith.addf %218, %225 : vector<8x16x16xf32>
    %227 = vector.extract_strided_slice %210 {offsets = [0, 2], sizes = [16, 16], strides = [1, 1]} : vector<16x18xbf16> to vector<16x16xbf16>
    %228 = vector.shape_cast %227 : vector<16x16xbf16> to vector<1x16x16xbf16>
    %c26 = arith.constant 26 : index
    %c0_126 = arith.constant 0 : index
    %c0_127 = arith.constant 0 : index
    %c0_128 = arith.constant 0 : index
    %229 = vector.load %arg3[%c26, %c0_126, %c0_127, %c0_128] : memref<36x8x16x16xbf16, #tpu.memory_space<vmem>>, vector<1x8x16x16xbf16>
    %230 = vector.shape_cast %229 : vector<1x8x16x16xbf16> to vector<8x16x16xbf16>
    %231 = vector.broadcast %228 : vector<1x16x16xbf16> to vector<8x16x16xbf16>
    %232 = arith.mulf %231, %230 : vector<8x16x16xbf16>
    %233 = arith.extf %232 : vector<8x16x16xbf16> to vector<8x16x16xf32>
    %234 = arith.addf %226, %233 : vector<8x16x16xf32>
    %c0_129 = arith.constant 0 : index
    %c3_130 = arith.constant 3 : index
    %c0_131 = arith.constant 0 : index
    %c0_132 = arith.constant 0 : index
    %c0_133 = arith.constant 0 : index
    %235 = vector.load %arg2[%c0_129, %c3_130, %c0_131, %c0_132, %c0_133] : memref<1x4x3x16x18xbf16, #tpu.memory_space<vmem>>, vector<1x1x1x16x18xbf16>
    %236 = vector.shape_cast %235 : vector<1x1x1x16x18xbf16> to vector<16x18xbf16>
    %237 = vector.extract_strided_slice %236 {offsets = [0, 0], sizes = [16, 16], strides = [1, 1]} : vector<16x18xbf16> to vector<16x16xbf16>
    %238 = vector.shape_cast %237 : vector<16x16xbf16> to vector<1x16x16xbf16>
    %c27 = arith.constant 27 : index
    %c0_134 = arith.constant 0 : index
    %c0_135 = arith.constant 0 : index
    %c0_136 = arith.constant 0 : index
    %239 = vector.load %arg3[%c27, %c0_134, %c0_135, %c0_136] : memref<36x8x16x16xbf16, #tpu.memory_space<vmem>>, vector<1x8x16x16xbf16>
    %240 = vector.shape_cast %239 : vector<1x8x16x16xbf16> to vector<8x16x16xbf16>
    %241 = vector.broadcast %238 : vector<1x16x16xbf16> to vector<8x16x16xbf16>
    %242 = arith.mulf %241, %240 : vector<8x16x16xbf16>
    %243 = arith.extf %242 : vector<8x16x16xbf16> to vector<8x16x16xf32>
    %244 = arith.addf %234, %243 : vector<8x16x16xf32>
    %245 = vector.extract_strided_slice %236 {offsets = [0, 1], sizes = [16, 16], strides = [1, 1]} : vector<16x18xbf16> to vector<16x16xbf16>
    %246 = vector.shape_cast %245 : vector<16x16xbf16> to vector<1x16x16xbf16>
    %c28 = arith.constant 28 : index
    %c0_137 = arith.constant 0 : index
    %c0_138 = arith.constant 0 : index
    %c0_139 = arith.constant 0 : index
    %247 = vector.load %arg3[%c28, %c0_137, %c0_138, %c0_139] : memref<36x8x16x16xbf16, #tpu.memory_space<vmem>>, vector<1x8x16x16xbf16>
    %248 = vector.shape_cast %247 : vector<1x8x16x16xbf16> to vector<8x16x16xbf16>
    %249 = vector.broadcast %246 : vector<1x16x16xbf16> to vector<8x16x16xbf16>
    %250 = arith.mulf %249, %248 : vector<8x16x16xbf16>
    %251 = arith.extf %250 : vector<8x16x16xbf16> to vector<8x16x16xf32>
    %252 = arith.addf %244, %251 : vector<8x16x16xf32>
    %253 = vector.extract_strided_slice %236 {offsets = [0, 2], sizes = [16, 16], strides = [1, 1]} : vector<16x18xbf16> to vector<16x16xbf16>
    %254 = vector.shape_cast %253 : vector<16x16xbf16> to vector<1x16x16xbf16>
    %c29 = arith.constant 29 : index
    %c0_140 = arith.constant 0 : index
    %c0_141 = arith.constant 0 : index
    %c0_142 = arith.constant 0 : index
    %255 = vector.load %arg3[%c29, %c0_140, %c0_141, %c0_142] : memref<36x8x16x16xbf16, #tpu.memory_space<vmem>>, vector<1x8x16x16xbf16>
    %256 = vector.shape_cast %255 : vector<1x8x16x16xbf16> to vector<8x16x16xbf16>
    %257 = vector.broadcast %254 : vector<1x16x16xbf16> to vector<8x16x16xbf16>
    %258 = arith.mulf %257, %256 : vector<8x16x16xbf16>
    %259 = arith.extf %258 : vector<8x16x16xbf16> to vector<8x16x16xf32>
    %260 = arith.addf %252, %259 : vector<8x16x16xf32>
    %c0_143 = arith.constant 0 : index
    %c3_144 = arith.constant 3 : index
    %c1_145 = arith.constant 1 : index
    %c0_146 = arith.constant 0 : index
    %c0_147 = arith.constant 0 : index
    %261 = vector.load %arg2[%c0_143, %c3_144, %c1_145, %c0_146, %c0_147] : memref<1x4x3x16x18xbf16, #tpu.memory_space<vmem>>, vector<1x1x1x16x18xbf16>
    %262 = vector.shape_cast %261 : vector<1x1x1x16x18xbf16> to vector<16x18xbf16>
    %263 = vector.extract_strided_slice %262 {offsets = [0, 0], sizes = [16, 16], strides = [1, 1]} : vector<16x18xbf16> to vector<16x16xbf16>
    %264 = vector.shape_cast %263 : vector<16x16xbf16> to vector<1x16x16xbf16>
    %c30 = arith.constant 30 : index
    %c0_148 = arith.constant 0 : index
    %c0_149 = arith.constant 0 : index
    %c0_150 = arith.constant 0 : index
    %265 = vector.load %arg3[%c30, %c0_148, %c0_149, %c0_150] : memref<36x8x16x16xbf16, #tpu.memory_space<vmem>>, vector<1x8x16x16xbf16>
    %266 = vector.shape_cast %265 : vector<1x8x16x16xbf16> to vector<8x16x16xbf16>
    %267 = vector.broadcast %264 : vector<1x16x16xbf16> to vector<8x16x16xbf16>
    %268 = arith.mulf %267, %266 : vector<8x16x16xbf16>
    %269 = arith.extf %268 : vector<8x16x16xbf16> to vector<8x16x16xf32>
    %270 = arith.addf %260, %269 : vector<8x16x16xf32>
    %271 = vector.extract_strided_slice %262 {offsets = [0, 1], sizes = [16, 16], strides = [1, 1]} : vector<16x18xbf16> to vector<16x16xbf16>
    %272 = vector.shape_cast %271 : vector<16x16xbf16> to vector<1x16x16xbf16>
    %c31 = arith.constant 31 : index
    %c0_151 = arith.constant 0 : index
    %c0_152 = arith.constant 0 : index
    %c0_153 = arith.constant 0 : index
    %273 = vector.load %arg3[%c31, %c0_151, %c0_152, %c0_153] : memref<36x8x16x16xbf16, #tpu.memory_space<vmem>>, vector<1x8x16x16xbf16>
    %274 = vector.shape_cast %273 : vector<1x8x16x16xbf16> to vector<8x16x16xbf16>
    %275 = vector.broadcast %272 : vector<1x16x16xbf16> to vector<8x16x16xbf16>
    %276 = arith.mulf %275, %274 : vector<8x16x16xbf16>
    %277 = arith.extf %276 : vector<8x16x16xbf16> to vector<8x16x16xf32>
    %278 = arith.addf %270, %277 : vector<8x16x16xf32>
    %279 = vector.extract_strided_slice %262 {offsets = [0, 2], sizes = [16, 16], strides = [1, 1]} : vector<16x18xbf16> to vector<16x16xbf16>
    %280 = vector.shape_cast %279 : vector<16x16xbf16> to vector<1x16x16xbf16>
    %c32 = arith.constant 32 : index
    %c0_154 = arith.constant 0 : index
    %c0_155 = arith.constant 0 : index
    %c0_156 = arith.constant 0 : index
    %281 = vector.load %arg3[%c32, %c0_154, %c0_155, %c0_156] : memref<36x8x16x16xbf16, #tpu.memory_space<vmem>>, vector<1x8x16x16xbf16>
    %282 = vector.shape_cast %281 : vector<1x8x16x16xbf16> to vector<8x16x16xbf16>
    %283 = vector.broadcast %280 : vector<1x16x16xbf16> to vector<8x16x16xbf16>
    %284 = arith.mulf %283, %282 : vector<8x16x16xbf16>
    %285 = arith.extf %284 : vector<8x16x16xbf16> to vector<8x16x16xf32>
    %286 = arith.addf %278, %285 : vector<8x16x16xf32>
    %c0_157 = arith.constant 0 : index
    %c3_158 = arith.constant 3 : index
    %c2_159 = arith.constant 2 : index
    %c0_160 = arith.constant 0 : index
    %c0_161 = arith.constant 0 : index
    %287 = vector.load %arg2[%c0_157, %c3_158, %c2_159, %c0_160, %c0_161] : memref<1x4x3x16x18xbf16, #tpu.memory_space<vmem>>, vector<1x1x1x16x18xbf16>
    %288 = vector.shape_cast %287 : vector<1x1x1x16x18xbf16> to vector<16x18xbf16>
    %289 = vector.extract_strided_slice %288 {offsets = [0, 0], sizes = [16, 16], strides = [1, 1]} : vector<16x18xbf16> to vector<16x16xbf16>
    %290 = vector.shape_cast %289 : vector<16x16xbf16> to vector<1x16x16xbf16>
    %c33 = arith.constant 33 : index
    %c0_162 = arith.constant 0 : index
    %c0_163 = arith.constant 0 : index
    %c0_164 = arith.constant 0 : index
    %291 = vector.load %arg3[%c33, %c0_162, %c0_163, %c0_164] : memref<36x8x16x16xbf16, #tpu.memory_space<vmem>>, vector<1x8x16x16xbf16>
    %292 = vector.shape_cast %291 : vector<1x8x16x16xbf16> to vector<8x16x16xbf16>
    %293 = vector.broadcast %290 : vector<1x16x16xbf16> to vector<8x16x16xbf16>
    %294 = arith.mulf %293, %292 : vector<8x16x16xbf16>
    %295 = arith.extf %294 : vector<8x16x16xbf16> to vector<8x16x16xf32>
    %296 = arith.addf %286, %295 : vector<8x16x16xf32>
    %297 = vector.extract_strided_slice %288 {offsets = [0, 1], sizes = [16, 16], strides = [1, 1]} : vector<16x18xbf16> to vector<16x16xbf16>
    %298 = vector.shape_cast %297 : vector<16x16xbf16> to vector<1x16x16xbf16>
    %c34 = arith.constant 34 : index
    %c0_165 = arith.constant 0 : index
    %c0_166 = arith.constant 0 : index
    %c0_167 = arith.constant 0 : index
    %299 = vector.load %arg3[%c34, %c0_165, %c0_166, %c0_167] : memref<36x8x16x16xbf16, #tpu.memory_space<vmem>>, vector<1x8x16x16xbf16>
    %300 = vector.shape_cast %299 : vector<1x8x16x16xbf16> to vector<8x16x16xbf16>
    %301 = vector.broadcast %298 : vector<1x16x16xbf16> to vector<8x16x16xbf16>
    %302 = arith.mulf %301, %300 : vector<8x16x16xbf16>
    %303 = arith.extf %302 : vector<8x16x16xbf16> to vector<8x16x16xf32>
    %304 = arith.addf %296, %303 : vector<8x16x16xf32>
    %305 = vector.extract_strided_slice %288 {offsets = [0, 2], sizes = [16, 16], strides = [1, 1]} : vector<16x18xbf16> to vector<16x16xbf16>
    %306 = vector.shape_cast %305 : vector<16x16xbf16> to vector<1x16x16xbf16>
    %c35 = arith.constant 35 : index
    %c0_168 = arith.constant 0 : index
    %c0_169 = arith.constant 0 : index
    %c0_170 = arith.constant 0 : index
    %307 = vector.load %arg3[%c35, %c0_168, %c0_169, %c0_170] : memref<36x8x16x16xbf16, #tpu.memory_space<vmem>>, vector<1x8x16x16xbf16>
    %308 = vector.shape_cast %307 : vector<1x8x16x16xbf16> to vector<8x16x16xbf16>
    %309 = vector.broadcast %306 : vector<1x16x16xbf16> to vector<8x16x16xbf16>
    %310 = arith.mulf %309, %308 : vector<8x16x16xbf16>
    %311 = arith.extf %310 : vector<8x16x16xbf16> to vector<8x16x16xf32>
    %312 = arith.addf %304, %311 : vector<8x16x16xf32>
    %c0_171 = arith.constant 0 : index
    %c0_172 = arith.constant 0 : index
    %c0_173 = arith.constant 0 : index
    %c0_174 = arith.constant 0 : index
    %313 = vector.load %arg5[%c0_171, %c0_172, %c0_173, %c0_174] : memref<1x8x16x16xf32, #tpu.memory_space<vmem>>, vector<1x8x16x16xf32>
    %314 = vector.shape_cast %313 : vector<1x8x16x16xf32> to vector<8x16x16xf32>
    %315 = vector.shape_cast %312 : vector<8x16x16xf32> to vector<1x8x16x16xf32>
    tpu.vector_store %arg5[%c0_171, %c0_172, %c0_173, %c0_174], %315 {strides = array<i32>} : memref<1x8x16x16xf32, #tpu.memory_space<vmem>>, vector<1x8x16x16xf32>,
    return
  }
  func.func @transform_0(%arg0: i32, %arg1: i32) -> (i32, i32, i32, i32, i32) {
    %c0_i32 = arith.constant 0 : i32
    %c0_i32_0 = arith.constant 0 : i32
    %c0_i32_1 = arith.constant 0 : i32
    %c0_i32_2 = arith.constant 0 : i32
    return %arg1, %c0_i32, %c0_i32_0, %arg0, %c0_i32_1 : i32, i32, i32, i32, i32
  }
  func.func @transform_1(%arg0: i32, %arg1: i32) -> (i32, i32, i32, i32) {
    %c0_i32 = arith.constant 0 : i32
    %c0_i32_0 = arith.constant 0 : i32
    %c0_i32_1 = arith.constant 0 : i32
    %c0_i32_2 = arith.constant 0 : i32
    return %c0_i32, %c0_i32_0, %arg0, %c0_i32_1 : i32, i32, i32, i32
  }
  func.func @transform_2(%arg0: i32, %arg1: i32) -> (i32, i32, i32) {
    %c0_i32 = arith.constant 0 : i32
    %c0_i32_0 = arith.constant 0 : i32
    %c0_i32_1 = arith.constant 0 : i32
    return %c0_i32, %arg0, %c0_i32_0 : i32, i32, i32
  }
  func.func @transform_3(%arg0: i32, %arg1: i32) -> (i32, i32, i32, i32) {
    %c0_i32 = arith.constant 0 : i32
    %c0_i32_0 = arith.constant 0 : i32
    %c0_i32_1 = arith.constant 0 : i32
    return %arg1, %c0_i32, %arg0, %c0_i32_0 : i32, i32, i32, i32
  }
}

</mosaic_0001>

<bundles_post_ra>
// kernel: tpu_custom_call.1
= control target key start
LH: loop header
LB: loop body
LE: loop exit
PB: predicated region body
PF: predicated region fallthrough
CT: control target
= control target key end

     0   :  { %8 = vsyncpa [#allocation3], 0  ;;  %s12504_s0 = inlined_call_operand.vmem [shape: bf16[2,4,3,16,18], index: 0, kind: input, shape index: {}]   ;;  %s12505_s1 = inlined_call_operand.vmem [shape: bf16[36,8,16,16], index: 1, kind: input, shape index: {}]   ;;  %s12506_s2 = inlined_call_operand.vmem [shape: f32[8,16,16], index: 2, kind: input, shape index: {}]   ;;  %s12507_s3 = inlined_call_operand.hbm [shape: f32[2,8,16,16], index: 3, kind: output, shape index: {}]  }
   0x1   :  { %10 = vsyncpa [#allocation3 + $0x1], 0  ;;  %s7986_s12 = smov 0   ;;  %s7988_s13 = smov 0  }
   0x2   :  { %s7990_s14 = smov 0   ;;  %s7992_s15 = smov 0  }
   0x3   :  { %s7994_s16 = smov 0   ;;  %s7996_s17 = smov 0  }
   0x4 LB: > { %s5848_s18 = sadd.s32 4294967295, %s7957_s17   ;;  %s5849_s19 = sadd.s32 4294967294, %s7957_s17   ;;  %s7957_s17 = sphi %s7996_s17, %s16_s17   ;;  %s7953_s16 = sphi %s7994_s16, %s13008_s16   ;;  %s7949_s15 = sphi %s7992_s15, %s13007_s15   ;;  %s7945_s14 = sphi %s7990_s14, %s13006_s14   ;;  %s7941_s13 = sphi %s7988_s13, %s13005_s13   ;;  %s7937_s12 = sphi %s7986_s12, %s13004_s12  }
   0x5   : > { %s25_s20 = sadd.s32 1, %s7953_s16  ;;  %s117_s21 = sadd.s32 1, %s7945_s14 }
   0x6   : > { %p26_p0 = scmp.ge.s32.totalorder %s25_s20, 2  ;;  %p127_p1 = scmp.ne.s32.totalorder %s7945_s14, %s7941_s13 }
   0x7   : > { %p128_p2 = scmp.eq.s32.totalorder %s5848_s18, 1  ;;  %p133_p3 = scmp.ne.s32.totalorder %s7941_s13, %s7937_s12 }
   0x8   : > { %s13010_s20 = smov (%p26_p0, %s25_s20), 0  ;;  %p134_p5 = scmp.eq.s32.totalorder %s5849_s19, 1 }
   0x9   : > { %p8026_p4 = por %p128_p2, %p127_p1  ;;  %s112_s23 = ssub.s32 %s7953_s16, %s13010_s20 }
   0xa   : > { %p5854_p6 = scmp.ge.s32.totalorder %s7957_s17, 1  ;;  %p115_p7 = scmp.eq.s32.totalorder %s112_s23, 0 }
   0xb   : > { %p8033_p8 = por %p134_p5, %p133_p3  ;;  %p183_p9 = scmp.lt.s32.totalorder %s7957_s17, 3 }
   0xc   : > { %s8039_s25 = scalar_select %p115_p7, %s7945_s14, %s117_s21  }
   0xd   : > { %p184_p10 = pnand %p5854_p6, %p183_p9 }
   0xf   : > { %187 = sbr.rel (%p184_p10) target bundleno = 3553 (0xde1), region = 32 }
  0x16   : > { %v5859_v0 = vld [vmem:[%s12505_s1 + $0x48] sm:$0xf]  ;;  %v5857_v1 = vld [vmem:[%s12505_s1 + $0x40] sm:$0xf]  ;;  %s7959_s30 = smov 1   ;;  %s7960_s4 = smov 2  }
  0x17   : > { %363 = vrot.lane.b32.xlu1 %v5859_v0, %s7959_s30  ;;  %359 = vrot.lane.b32.xlu0 %v5857_v1, %s7959_s30  ;;  %v5860_v2 = vld [vmem:[%s12505_s1 + $0x4c] sm:$0xf]  ;;  %v5858_v3 = vld [vmem:[%s12505_s1 + $0x44] sm:$0xf]  ;;  %p222_p11 = scmp.lt.s32.totalorder %s7949_s15, 1  ;;  %s7961_s6 = smov 127  }
  0x18   : > { %v5862_v4 = vld [vmem:[%s12505_s1 + $0x54] sm:$0xf]  ;;  %v5861_v5 = vld [vmem:[%s12505_s1 + $0x50] sm:$0xf]  ;;  %v5864_v6 = vld [vmem:[%s12505_s1 + $0x5c] sm:$0xf] }
  0x19   : > { %v5863_v7 = vld [vmem:[%s12505_s1 + $0x58] sm:$0xf]  ;;  %v5866_v8 = vld [vmem:[%s12505_s1 + $0x64] sm:$0xf]  ;;  %v5865_v9 = vld [vmem:[%s12505_s1 + $0x60] sm:$0xf] }
  0x1a   : > { %v5868_v10 = vld [vmem:[%s12505_s1 + $0x6c] sm:$0xf]  ;;  %v5867_v11 = vld [vmem:[%s12505_s1 + $0x68] sm:$0xf]  ;;  %v5870_v12 = vld [vmem:[%s12505_s1 + $0x74] sm:$0xf] }
  0x1b   : > { %365 = vrot.lane.b32.xlu1 %v5860_v2, %s7959_s30  ;;  %361 = vrot.lane.b32.xlu0 %v5858_v3, %s7959_s30  ;;  %v5869_v13 = vld [vmem:[%s12505_s1 + $0x70] sm:$0xf]  ;;  %v5872_v14 = vld [vmem:[%s12505_s1 + $0x7c] sm:$0xf]  ;;  %s223_s26 = scalar_select %p222_p11, %s7949_s15, 1  ;;  %vm5706_vm0 = vcmask 130048  }
  0x1c   : > { %v5871_v15 = vld [vmem:[%s12505_s1 + $0x78] sm:$0xf]  ;;  %v5874_v16 = vld [vmem:[%s12505_s1 + $0x84] sm:$0xf]  ;;  %v5873_v17 = vld [vmem:[%s12505_s1 + $0x80] sm:$0xf] }
  0x1d   : > { %v5876_v18 = vld [vmem:[%s12505_s1 + $0x8c] sm:$0xf]  ;;  %v5875_v19 = vld [vmem:[%s12505_s1 + $0x88] sm:$0xf]  ;;  %v5878_v20 = vld [vmem:[%s12505_s1 + $0x94] sm:$0xf] }
  0x1e   : > { %v5877_v21 = vld [vmem:[%s12505_s1 + $0x90] sm:$0xf]  ;;  %v5880_v22 = vld [vmem:[%s12505_s1 + $0x9c] sm:$0xf]  ;;  %v5879_v23 = vld [vmem:[%s12505_s1 + $0x98] sm:$0xf] }
  0x1f   : > { %369 = vrot.lane.b32.xlu1 %v5862_v4, %s7959_s30  ;;  %367 = vrot.lane.b32.xlu0 %v5861_v5, %s7959_s30  ;;  %v5882_v24 = vld [vmem:[%s12505_s1 + $0xa4] sm:$0xf]  ;;  %v5881_v25 = vld [vmem:[%s12505_s1 + $0xa0] sm:$0xf]  ;;  %s6445_s27 = smul.u32 96, %s223_s26  ;;  %s7962_s7 = smov 126  }
  0x20   : > { %v5884_v26 = vld [vmem:[%s12505_s1 + $0xac] sm:$0xf]  ;;  %v5883_v27 = vld [vmem:[%s12505_s1 + $0xa8] sm:$0xf]  ;;  %v5886_v28 = vld [vmem:[%s12505_s1 + $0xb4] sm:$0xf] }
  0x21   : > { %v5885_v29 = vld [vmem:[%s12505_s1 + $0xb0] sm:$0xf]  ;;  %v5888_v30 = vld [vmem:[%s12505_s1 + $0xbc] sm:$0xf]  ;;  %v5887_v31 = vld [vmem:[%s12505_s1 + $0xb8] sm:$0xf]  ;;  %s8230_s5 = scalar_lea.vmem %s12504_s0, %s6445_s27 }
  0x22   : > { %v5908_v32 = vld [vmem:[%s12505_s1 + $0x104] sm:$0xf]  ;;  %v5907_v33 = vld [vmem:[%s12505_s1 + $0x100] sm:$0xf]  ;;  %v5910_v34 = vld [vmem:[%s12505_s1 + $0x10c] sm:$0xf] }
  0x23   : > { %373 = vrot.lane.b32.xlu1 %v5864_v6, %s7959_s30  ;;  %371 = vrot.lane.b32.xlu0 %v5863_v7, %s7959_s30  ;;  %v5909_v35 = vld [vmem:[%s12505_s1 + $0x108] sm:$0xf]  ;;  %v5912_v36 = vld [vmem:[%s12505_s1 + $0x114] sm:$0xf]  ;;  %s218_s11 = sand.u32 1, %s7941_s13   ;;  %s6444_s23 = sshll.u32 %s7949_s15, 11 }
  0x24   : > { %v5911_v37 = vld [vmem:[%s12505_s1 + $0x110] sm:$0xf]  ;;  %v5914_v38 = vld [vmem:[%s12505_s1 + $0x11c] sm:$0xf]  ;;  %v5913_v39 = vld [vmem:[%s12505_s1 + $0x118] sm:$0xf] }
  0x25   : > { %v5916_v40 = vld [vmem:[%s12505_s1 + $0x124] sm:$0xf]  ;;  %v5915_v41 = vld [vmem:[%s12505_s1 + $0x120] sm:$0xf]  ;;  %v5918_v42 = vld [vmem:[%s12505_s1 + $0x12c] sm:$0xf] }
  0x26   : > { %v5917_v43 = vld [vmem:[%s12505_s1 + $0x128] sm:$0xf]  ;;  %v5920_v44 = vld [vmem:[%s12505_s1 + $0x134] sm:$0xf]  ;;  %v5919_v45 = vld [vmem:[%s12505_s1 + $0x130] sm:$0xf] }
  0x27   : > { %377 = vrot.lane.b32.xlu1 %v5866_v8, %s7959_s30  ;;  %375 = vrot.lane.b32.xlu0 %v5865_v9, %s7959_s30  ;;  %v8233_v47 = vld [vmem:[%s8230_s5] sm:$0xf]  ;;  %v8236_v49 = vld [vmem:[%s8230_s5 + $0x4] sm:$0xf]  ;;  %s12458_s15 = scalar_lea.sflag [#allocation3], %s218_s11  ;;  %s7963_s8 = smov [#allocation2]  }
  0x28   : > { %s7883_s9 = sshll.u32 %s7963_s8, 4  ;;  %s7884_s9 = int_to_ptr.vmem [resolvable:$false] %s7883_s9 }
  0x29   : > { %s7885_s10 = scalar_lea.vmem %s7884_s9, 4096 }
  0x2b   : > { %381 = vrot.lane.b32.xlu1 %v5868_v10, %s7959_s30  ;;  %379 = vrot.lane.b32.xlu0 %v5867_v11, %s7959_s30 }
  0x2f   : > { %385 = vrot.lane.b32.xlu1 %v5870_v12, %s7959_s30  ;;  %383 = vrot.lane.b32.xlu0 %v5869_v13, %s7959_s30 }
  0x33   : > { %389 = vrot.lane.b32.xlu1 %v5872_v14, %s7959_s30  ;;  %387 = vrot.lane.b32.xlu0 %v5871_v15, %s7959_s30 }
  0x37   : > { %554 = vrot.lane.b32.xlu1 %v5874_v16, %s7960_s4  ;;  %552 = vrot.lane.b32.xlu0 %v5873_v17, %s7960_s4 }
  0x3b   : > { %558 = vrot.lane.b32.xlu1 %v5876_v18, %s7960_s4  ;;  %556 = vrot.lane.b32.xlu0 %v5875_v19, %s7960_s4 }
  0x3f   : > { %562 = vrot.lane.b32.xlu1 %v5878_v20, %s7960_s4  ;;  %560 = vrot.lane.b32.xlu0 %v5877_v21, %s7960_s4 }
  0x43   : > { %566 = vrot.lane.b32.xlu1 %v5880_v22, %s7960_s4  ;;  %564 = vrot.lane.b32.xlu0 %v5879_v23, %s7960_s4 }
  0x47   : > { %570 = vrot.lane.b32.xlu1 %v5882_v24, %s7960_s4  ;;  %568 = vrot.lane.b32.xlu0 %v5881_v25, %s7960_s4 }
  0x4b   : > { %574 = vrot.lane.b32.xlu1 %v5884_v26, %s7960_s4  ;;  %572 = vrot.lane.b32.xlu0 %v5883_v27, %s7960_s4 }
  0x4f   : > { %578 = vrot.lane.b32.xlu1 %v5886_v28, %s7960_s4  ;;  %576 = vrot.lane.b32.xlu0 %v5885_v29, %s7960_s4 }
  0x53   : > { %582 = vrot.lane.b32.xlu1 %v5888_v30, %s7960_s4  ;;  %580 = vrot.lane.b32.xlu0 %v5887_v31, %s7960_s4 }
  0x57   : > { %815 = vrot.lane.b32.xlu1 %v5908_v32, %s7959_s30  ;;  %813 = vrot.lane.b32.xlu0 %v5907_v33, %s7959_s30 }
  0x5b   : > { %819 = vrot.lane.b32.xlu1 %v5910_v34, %s7959_s30  ;;  %817 = vrot.lane.b32.xlu0 %v5909_v35, %s7959_s30 }
  0x5f   : > { %823 = vrot.lane.b32.xlu1 %v5912_v36, %s7959_s30  ;;  %821 = vrot.lane.b32.xlu0 %v5911_v37, %s7959_s30 }
  0x63   : > { %827 = vrot.lane.b32.xlu1 %v5914_v38, %s7959_s30  ;;  %825 = vrot.lane.b32.xlu0 %v5913_v39, %s7959_s30 }
  0x67   : > { %831 = vrot.lane.b32.xlu1 %v5916_v40, %s7959_s30  ;;  %829 = vrot.lane.b32.xlu0 %v5915_v41, %s7959_s30 }
  0x6b   : > { %835 = vrot.lane.b32.xlu1 %v5918_v42, %s7959_s30  ;;  %833 = vrot.lane.b32.xlu0 %v5917_v43, %s7959_s30 }
  0x6f   : > { %839 = vrot.lane.b32.xlu1 %v5920_v44, %s7959_s30  ;;  %837 = vrot.lane.b32.xlu0 %v5919_v45, %s7959_s30 }
  0x89   : > { %v364_v46 = vpop.permute.xlu1 %363  ;;  %v360_v48 = vpop.permute.xlu0 %359 }
  0x8a   : > { %v409_v50 = vmul.bf16 %v364_v46, %v8233_v47  ;;  %v407_v51 = vmul.bf16 %v360_v48, %v8233_v47 }
  0x8c   : > { %v425_v56 = vunpack.c.l.bf16 %v409_v50  ;;  %v423_v57 = vunpack.c.l.bf16 %v407_v51 }
  0x8d   : > { %v366_v52 = vpop.permute.xlu1 %365  ;;  %v362_v53 = vpop.permute.xlu0 %361 }
  0x8e   : > { %v410_v54 = vmul.bf16 %v366_v52, %v8236_v49  ;;  %v408_v55 = vmul.bf16 %v362_v53, %v8236_v49 }
  0x90   : > { %v426_v58 = vunpack.c.l.bf16 %v410_v54  ;;  %v424_v59 = vunpack.c.l.bf16 %v408_v55 }
  0x91   : > { %v370_v60 = vpop.permute.xlu1 %369  ;;  %v368_v61 = vpop.permute.xlu0 %367 }
  0x92   : > { %v412_v62 = vmul.bf16 %v370_v60, %v8236_v49  ;;  %v411_v63 = vmul.bf16 %v368_v61, %v8233_v47  ;;  %v6512_v0 = vpack.i.bf16 %v426_v58, %v425_v56  ;;  %v6507_v1 = vpack.i.bf16 %v424_v59, %v423_v57 }
  0x94   : > { %v428_v2 = vunpack.c.l.bf16 %v412_v62  ;;  %v427_v3 = vunpack.c.l.bf16 %v411_v63  ;;  %6513 = vrot.lane.b32.xlu1 %v6512_v0, %s7961_s6  ;;  %6508 = vrot.lane.b32.xlu0 %v6507_v1, %s7961_s6 }
  0x95   : > { %v374_v4 = vpop.permute.xlu1 %373  ;;  %v372_v5 = vpop.permute.xlu0 %371 }
  0x96   : > { %v414_v6 = vmul.bf16 %v374_v4, %v8236_v49  ;;  %v413_v7 = vmul.bf16 %v372_v5, %v8233_v47  ;;  %v6517_v8 = vpack.i.bf16 %v428_v2, %v427_v3 }
  0x98   : > { %v430_v9 = vunpack.c.l.bf16 %v414_v6  ;;  %v429_v10 = vunpack.c.l.bf16 %v413_v7  ;;  %6518 = vrot.lane.b32.xlu0 %v6517_v8, %s7961_s6 }
  0x99   : > { %v378_v11 = vpop.permute.xlu1 %377  ;;  %v376_v12 = vpop.permute.xlu0 %375 }
  0x9a   : > { %v416_v13 = vmul.bf16 %v378_v11, %v8236_v49  ;;  %v415_v14 = vmul.bf16 %v376_v12, %v8233_v47  ;;  %v6522_v15 = vpack.i.bf16 %v430_v9, %v429_v10 }
  0x9c   : > { %v432_v16 = vunpack.c.l.bf16 %v416_v13  ;;  %v431_v17 = vunpack.c.l.bf16 %v415_v14  ;;  %6523 = vrot.lane.b32.xlu1 %v6522_v15, %s7961_s6 }
  0x9d   : > { %v382_v18 = vpop.permute.xlu1 %381  ;;  %v380_v19 = vpop.permute.xlu0 %379 }
  0x9e   : > { %v418_v20 = vmul.bf16 %v382_v18, %v8236_v49  ;;  %v417_v21 = vmul.bf16 %v380_v19, %v8233_v47  ;;  %v6527_v22 = vpack.i.bf16 %v432_v16, %v431_v17 }
  0xa0   : > { %v434_v23 = vunpack.c.l.bf16 %v418_v20  ;;  %v433_v24 = vunpack.c.l.bf16 %v417_v21  ;;  %6528 = vrot.lane.b32.xlu0 %v6527_v22, %s7961_s6 }
  0xa1   : > { %v386_v25 = vpop.permute.xlu1 %385  ;;  %v384_v26 = vpop.permute.xlu0 %383 }
  0xa2   : > { %v420_v27 = vmul.bf16 %v386_v25, %v8236_v49  ;;  %v419_v28 = vmul.bf16 %v384_v26, %v8233_v47  ;;  %v6532_v29 = vpack.i.bf16 %v434_v23, %v433_v24 }
  0xa4   : > { %v436_v30 = vunpack.c.l.bf16 %v420_v27  ;;  %v435_v31 = vunpack.c.l.bf16 %v419_v28  ;;  %6533 = vrot.lane.b32.xlu1 %v6532_v29, %s7961_s6 }
  0xa5   : > { %v390_v32 = vpop.permute.xlu1 %389  ;;  %v388_v33 = vpop.permute.xlu0 %387 }
  0xa6   : > { %v422_v34 = vmul.bf16 %v390_v32, %v8236_v49  ;;  %v421_v35 = vmul.bf16 %v388_v33, %v8233_v47  ;;  %v6537_v36 = vpack.i.bf16 %v436_v30, %v435_v31  ;;  %v8285_v31 = vld [vmem:[%s8230_s5 + $0xc] sm:$0xf]  ;;  %v8288_v32 = vld [vmem:[%s8230_s5 + $0x8] sm:$0xf] }
  0xa8   : > { %v438_v37 = vunpack.c.l.bf16 %v422_v34  ;;  %v437_v38 = vunpack.c.l.bf16 %v421_v35  ;;  %6538 = vrot.lane.b32.xlu0 %v6537_v36, %s7961_s6 }
  0xa9   : > { %v555_v39 = vpop.permute.xlu1 %554  ;;  %v553_v40 = vpop.permute.xlu0 %552 }
  0xaa   : > { %v601_v41 = vmul.bf16 %v555_v39, %v8236_v49  ;;  %v600_v42 = vmul.bf16 %v553_v40, %v8233_v47  ;;  %v6542_v43 = vpack.i.bf16 %v438_v37, %v437_v38  ;;  %v5921_v37 = vld [vmem:[%s12505_s1 + $0x138] sm:$0xf] }
  0xac   : > { %v617_v44 = vunpack.c.l.bf16 %v601_v41  ;;  %v616_v45 = vunpack.c.l.bf16 %v600_v42  ;;  %6543 = vrot.lane.b32.xlu1 %v6542_v43, %s7961_s6  ;;  %v5922_v43 = vld [vmem:[%s12505_s1 + $0x13c] sm:$0xf] }
  0xad   : > { %v559_v46 = vpop.permute.xlu1 %558  ;;  %v557_v48 = vpop.permute.xlu0 %556 }
  0xae   : > { %v603_v50 = vmul.bf16 %v559_v46, %v8236_v49  ;;  %v602_v51 = vmul.bf16 %v557_v48, %v8233_v47  ;;  %v6547_v52 = vpack.i.bf16 %v617_v44, %v616_v45 }
  0xb0   : > { %v619_v53 = vunpack.c.l.bf16 %v603_v50  ;;  %v618_v54 = vunpack.c.l.bf16 %v602_v51  ;;  %6548 = vrot.lane.b32.xlu0 %v6547_v52, %s7962_s7 }
  0xb1   : > { %v563_v55 = vpop.permute.xlu1 %562  ;;  %v561_v56 = vpop.permute.xlu0 %560 }
  0xb2   : > { %v605_v57 = vmul.bf16 %v563_v55, %v8236_v49  ;;  %v604_v58 = vmul.bf16 %v561_v56, %v8233_v47  ;;  %v6552_v59 = vpack.i.bf16 %v619_v53, %v618_v54 }
  0xb4   : > { %v621_v60 = vunpack.c.l.bf16 %v605_v57  ;;  %v620_v61 = vunpack.c.l.bf16 %v604_v58  ;;  %6553 = vrot.lane.b32.xlu1 %v6552_v59, %s7962_s7 }
  0xb5   : > { %v567_v62 = vpop.permute.xlu1 %566  ;;  %v565_v63 = vpop.permute.xlu0 %564 }
  0xb6   : > { %v607_v0 = vmul.bf16 %v567_v62, %v8236_v49  ;;  %v606_v1 = vmul.bf16 %v565_v63, %v8233_v47  ;;  %v6557_v2 = vpack.i.bf16 %v621_v60, %v620_v61 }
  0xb8   : > { %v623_v3 = vunpack.c.l.bf16 %v607_v0  ;;  %v622_v4 = vunpack.c.l.bf16 %v606_v1  ;;  %6558 = vrot.lane.b32.xlu0 %v6557_v2, %s7962_s7 }
  0xb9   : > { %v571_v5 = vpop.permute.xlu1 %570  ;;  %v569_v6 = vpop.permute.xlu0 %568 }
  0xba   : > { %v609_v7 = vmul.bf16 %v571_v5, %v8236_v49  ;;  %v608_v8 = vmul.bf16 %v569_v6, %v8233_v47  ;;  %v6562_v9 = vpack.i.bf16 %v623_v3, %v622_v4 }
  0xbc   : > { %v625_v10 = vunpack.c.l.bf16 %v609_v7  ;;  %v624_v11 = vunpack.c.l.bf16 %v608_v8  ;;  %6563 = vrot.lane.b32.xlu1 %v6562_v9, %s7962_s7 }
  0xbd   : > { %v575_v12 = vpop.permute.xlu1 %574  ;;  %v573_v13 = vpop.permute.xlu0 %572 }
  0xbe   : > { %v611_v14 = vmul.bf16 %v575_v12, %v8236_v49  ;;  %v610_v15 = vmul.bf16 %v573_v13, %v8233_v47  ;;  %v6567_v16 = vpack.i.bf16 %v625_v10, %v624_v11 }
  0xc0   : > { %v627_v17 = vunpack.c.l.bf16 %v611_v14  ;;  %v626_v18 = vunpack.c.l.bf16 %v610_v15  ;;  %6568 = vrot.lane.b32.xlu0 %v6567_v16, %s7962_s7 }
  0xc1   : > { %v579_v19 = vpop.permute.xlu1 %578  ;;  %v577_v20 = vpop.permute.xlu0 %576 }
  0xc2   : > { %v613_v21 = vmul.bf16 %v579_v19, %v8236_v49  ;;  %v612_v22 = vmul.bf16 %v577_v20, %v8233_v47  ;;  %v6572_v23 = vpack.i.bf16 %v627_v17, %v626_v18 }
  0xc4   : > { %v629_v24 = vunpack.c.l.bf16 %v613_v21  ;;  %v628_v25 = vunpack.c.l.bf16 %v612_v22  ;;  %6573 = vrot.lane.b32.xlu1 %v6572_v23, %s7962_s7  ;;  %v5923_v23 = vld [vmem:[%s12505_s1 + $0x140] sm:$0xf] }
  0xc5   : > { %v583_v26 = vpop.permute.xlu1 %582  ;;  %v581_v27 = vpop.permute.xlu0 %580 }
  0xc6   : > { %v615_v28 = vmul.bf16 %v583_v26, %v8236_v49  ;;  %v614_v29 = vmul.bf16 %v581_v27, %v8233_v47  ;;  %v6577_v30 = vpack.i.bf16 %v629_v24, %v628_v25  ;;  %v5925_v24 = vld [vmem:[%s12505_s1 + $0x148] sm:$0xf]  ;;  %v5927_v25 = vld [vmem:[%s12505_s1 + $0x150] sm:$0xf]  ;;  %v5929_v26 = vld [vmem:[%s12505_s1 + $0x158] sm:$0xf] }
  0xc7   : > { %v5931_v27 = vld [vmem:[%s12505_s1 + $0x160] sm:$0xf] }
  0xc8   : > { %v631_v33 = vunpack.c.l.bf16 %v615_v28  ;;  %v630_v34 = vunpack.c.l.bf16 %v614_v29  ;;  %6578 = vrot.lane.b32.xlu0 %v6577_v30, %s7962_s7  ;;  %v5933_v28 = vld [vmem:[%s12505_s1 + $0x168] sm:$0xf]  ;;  %v5935_v29 = vld [vmem:[%s12505_s1 + $0x170] sm:$0xf]  ;;  %v5937_v30 = vld [vmem:[%s12505_s1 + $0x178] sm:$0xf] }
  0xc9   : > { %v816_v35 = vpop.permute.xlu1 %815  ;;  %v814_v36 = vpop.permute.xlu0 %813 }
  0xca   : > { %v862_v38 = vmul.bf16 %v8285_v31, %v816_v35  ;;  %v861_v49 = vmul.bf16 %v8288_v32, %v814_v36  ;;  %v6582_v47 = vpack.i.bf16 %v631_v33, %v630_v34 }
  0xcc   : > { %v878_v39 = vunpack.c.l.bf16 %v862_v38  ;;  %v877_v40 = vunpack.c.l.bf16 %v861_v49  ;;  %6583 = vrot.lane.b32.xlu1 %v6582_v47, %s7962_s7  ;;  %841 = vrot.lane.b32.xlu0 %v5921_v37, %s7959_s30 }
  0xcd   : > { %v820_v41 = vpop.permute.xlu1 %819  ;;  %v818_v42 = vpop.permute.xlu0 %817 }
  0xce   : > { %v864_v44 = vmul.bf16 %v8285_v31, %v820_v41  ;;  %v863_v45 = vmul.bf16 %v8288_v32, %v818_v42  ;;  %v6587_v46 = vpack.i.bf16 %v878_v39, %v877_v40 }
  0xd0   : > { %v880_v48 = vunpack.c.l.bf16 %v864_v44  ;;  %v879_v50 = vunpack.c.l.bf16 %v863_v45  ;;  %843 = vrot.lane.b32.xlu1 %v5922_v43, %s7959_s30  ;;  %6588 = vrot.lane.b32.xlu0 %v6587_v46, %s7961_s6 }
  0xd1   : > { %v824_v51 = vpop.permute.xlu1 %823  ;;  %v822_v52 = vpop.permute.xlu0 %821 }
  0xd2   : > { %v866_v53 = vmul.bf16 %v8285_v31, %v824_v51  ;;  %v865_v54 = vmul.bf16 %v8288_v32, %v822_v52  ;;  %v6592_v55 = vpack.i.bf16 %v880_v48, %v879_v50 }
  0xd4   : > { %v882_v56 = vunpack.c.l.bf16 %v866_v53  ;;  %v881_v57 = vunpack.c.l.bf16 %v865_v54  ;;  %6593 = vrot.lane.b32.xlu1 %v6592_v55, %s7961_s6 }
  0xd5   : > { %v828_v58 = vpop.permute.xlu1 %827  ;;  %v826_v59 = vpop.permute.xlu0 %825 }
  0xd6   : > { %v868_v60 = vmul.bf16 %v8285_v31, %v828_v58  ;;  %v867_v61 = vmul.bf16 %v8288_v32, %v826_v59  ;;  %v6597_v62 = vpack.i.bf16 %v882_v56, %v881_v57  ;;  %v5924_v56 = vld [vmem:[%s12505_s1 + $0x144] sm:$0xf]  ;;  %v5926_v57 = vld [vmem:[%s12505_s1 + $0x14c] sm:$0xf]  ;;  %v5928_v58 = vld [vmem:[%s12505_s1 + $0x154] sm:$0xf] }
  0xd7   : > { %v5930_v59 = vld [vmem:[%s12505_s1 + $0x15c] sm:$0xf] }
  0xd8   : > { %v884_v63 = vunpack.c.l.bf16 %v868_v60  ;;  %v883_v0 = vunpack.c.l.bf16 %v867_v61  ;;  %6598 = vrot.lane.b32.xlu0 %v6597_v62, %s7961_s6  ;;  %v5932_v60 = vld [vmem:[%s12505_s1 + $0x164] sm:$0xf]  ;;  %v5934_v61 = vld [vmem:[%s12505_s1 + $0x16c] sm:$0xf]  ;;  %v5936_v62 = vld [vmem:[%s12505_s1 + $0x174] sm:$0xf] }
  0xd9   : > { %v832_v1 = vpop.permute.xlu1 %831  ;;  %v830_v2 = vpop.permute.xlu0 %829 }
  0xda   : > { %v870_v3 = vmul.bf16 %v8285_v31, %v832_v1  ;;  %v869_v4 = vmul.bf16 %v8288_v32, %v830_v2  ;;  %v6602_v5 = vpack.i.bf16 %v884_v63, %v883_v0  ;;  %v5938_v63 = vld [vmem:[%s12505_s1 + $0x17c] sm:$0xf] }
  0xdc   : > { %v886_v6 = vunpack.c.l.bf16 %v870_v3  ;;  %v885_v7 = vunpack.c.l.bf16 %v869_v4  ;;  %6603 = vrot.lane.b32.xlu1 %v6602_v5, %s7961_s6 }
  0xdd   : > { %v836_v8 = vpop.permute.xlu1 %835  ;;  %v834_v9 = vpop.permute.xlu0 %833 }
  0xde   : > { %v872_v10 = vmul.bf16 %v8285_v31, %v836_v8  ;;  %v871_v11 = vmul.bf16 %v8288_v32, %v834_v9  ;;  %v6607_v12 = vpack.i.bf16 %v886_v6, %v885_v7 }
  0xe0   : > { %v888_v13 = vunpack.c.l.bf16 %v872_v10  ;;  %v887_v14 = vunpack.c.l.bf16 %v871_v11  ;;  %6608 = vrot.lane.b32.xlu0 %v6607_v12, %s7961_s6 }
  0xe1   : > { %v840_v15 = vpop.permute.xlu1 %839  ;;  %v838_v16 = vpop.permute.xlu0 %837 }
  0xe2   : > { %v874_v17 = vmul.bf16 %v8285_v31, %v840_v15  ;;  %v873_v18 = vmul.bf16 %v8288_v32, %v838_v16  ;;  %v6612_v19 = vpack.i.bf16 %v888_v13, %v887_v14 }
  0xe4   : > { %v890_v20 = vunpack.c.l.bf16 %v874_v17  ;;  %v889_v21 = vunpack.c.l.bf16 %v873_v18  ;;  %6613 = vrot.lane.b32.xlu1 %v6612_v19, %s7961_s6 }
  0xe6   : > { %v6617_v22 = vpack.i.bf16 %v890_v20, %v889_v21 }
  0xe8   : > { %6618 = vrot.lane.b32.xlu0 %v6617_v22, %s7961_s6 }
  0xec   : > { %1006 = vrot.lane.b32.xlu0 %v5923_v23, %s7960_s4 }
  0xf0   : > { %1010 = vrot.lane.b32.xlu0 %v5925_v24, %s7960_s4 }
  0xf4   : > { %1014 = vrot.lane.b32.xlu0 %v5927_v25, %s7960_s4 }
  0xf8   : > { %1018 = vrot.lane.b32.xlu0 %v5929_v26, %s7960_s4 }
  0xfc   : > { %1022 = vrot.lane.b32.xlu0 %v5931_v27, %s7960_s4 }
 0x100   : > { %1026 = vrot.lane.b32.xlu0 %v5933_v28, %s7960_s4 }
 0x104   : > { %1030 = vrot.lane.b32.xlu0 %v5935_v29, %s7960_s4 }
 0x106   : > { %v8353_v33 = vpop.permute.xlu0 %6508  ;;  %v8355_v34 = vpop.permute.xlu1 %6513 }
 0x108   : > { %1034 = vrot.lane.b32.xlu0 %v5937_v30, %s7960_s4 }
 0x10a   : > { %v8357_v35 = vpop.permute.xlu0 %6518 }
 0x10e   : > { %v8359_v36 = vpop.permute.xlu1 %6523 }
 0x112   : > { %v8361_v37 = vpop.permute.xlu0 %6528 }
 0x116   : > { %v8363_v38 = vpop.permute.xlu1 %6533 }
 0x11a   : > { %v8365_v49 = vpop.permute.xlu0 %6538 }
 0x11e   : > { %v8367_v47 = vpop.permute.xlu1 %6543 }
 0x122   : > { %v8369_v39 = vpop.permute.xlu0 %6548 }
 0x126   : > { %v8371_v40 = vpop.permute.xlu1 %6553 }
 0x12a   : > { %v8373_v41 = vpop.permute.xlu0 %6558 }
 0x12e   : > { %v8375_v42 = vpop.permute.xlu1 %6563 }
 0x132   : > { %v8377_v43 = vpop.permute.xlu0 %6568 }
 0x136   : > { %v8379_v44 = vpop.permute.xlu1 %6573 }
 0x13a   : > { %v8381_v45 = vpop.permute.xlu0 %6578 }
 0x13e   : > { %v8383_v46 = vpop.permute.xlu1 %6583  ;;  %v842_v48 = vpop.permute.xlu0 %841 }
 0x13f   : > { %12659 = vst [vmem:[#allocation5_spill] sm:$0xff] %v8383_v46  ;;  %v875_v50 = vmul.bf16 %v8288_v32, %v842_v48 }
 0x141   : > { %v891_v52 = vunpack.c.l.bf16 %v875_v50 }
 0x142   : > { %v844_v51 = vpop.permute.xlu1 %843  ;;  %v8420_v0 = vpop.permute.xlu0 %6588 }
 0x143   : > { %v876_v53 = vmul.bf16 %v8285_v31, %v844_v51  ;;  %12660 = vst [vmem:[#allocation6_spill] sm:$0xff] %v8420_v0 }
 0x145   : > { %v892_v54 = vunpack.c.l.bf16 %v876_v53 }
 0x146   : > { %v8428_v5 = vpop.permute.xlu1 %6593 }
 0x147   : > { %v6622_v55 = vpack.i.bf16 %v892_v54, %v891_v52  ;;  %12664 = vst [vmem:[#allocation10_spill] sm:$0xff] %v8428_v5 }
 0x149   : > { %6623 = vrot.lane.b32.xlu1 %v6622_v55, %s7961_s6 }
 0x14a   : > { %v8422_v1 = vpop.permute.xlu0 %6598 }
 0x14b   : > { %12661 = vst [vmem:[#allocation7_spill] sm:$0xff] %v8422_v1 }
 0x14d   : > { %1008 = vrot.lane.b32.xlu1 %v5924_v56, %s7960_s4 }
 0x14e   : > { %v8430_v7 = vpop.permute.xlu1 %6603 }
 0x14f   : > { %12665 = vst [vmem:[#allocation11_spill] sm:$0xff] %v8430_v7 }
 0x151   : > { %1012 = vrot.lane.b32.xlu1 %v5926_v57, %s7960_s4 }
 0x152   : > { %v8424_v2 = vpop.permute.xlu0 %6608 }
 0x153   : > { %12662 = vst [vmem:[#allocation8_spill] sm:$0xff] %v8424_v2  ;;  %v5906_v2 = vld [vmem:[%s12505_s1 + $0xfc] sm:$0xf] }
 0x155   : > { %1016 = vrot.lane.b32.xlu1 %v5928_v58, %s7960_s4 }
 0x156   : > { %v8432_v8 = vpop.permute.xlu1 %6613 }
 0x157   : > { %12666 = vst [vmem:[#allocation12_spill] sm:$0xff] %v8432_v8 }
 0x159   : > { %1020 = vrot.lane.b32.xlu1 %v5930_v59, %s7960_s4 }
 0x15a   : > { %v8426_v3 = vpop.permute.xlu0 %6618 }
 0x15b   : > { %12663 = vst [vmem:[#allocation9_spill] sm:$0xff] %v8426_v3 }
 0x15d   : > { %1024 = vrot.lane.b32.xlu1 %v5932_v60, %s7960_s4 }
 0x15e   : > { %v1007_v4 = vpop.permute.xlu0 %1006 }
 0x15f   : > { %v1054_v11 = vmul.bf16 %v8288_v32, %v1007_v4 }
 0x161   : > { %1028 = vrot.lane.b32.xlu1 %v5934_v61, %s7960_s4  ;;  %v1070_v15 = vunpack.c.l.bf16 %v1054_v11 }
 0x162   : > { %v1011_v6 = vpop.permute.xlu0 %1010 }
 0x163   : > { %v1056_v16 = vmul.bf16 %v8288_v32, %v1011_v6 }
 0x165   : > { %1032 = vrot.lane.b32.xlu1 %v5936_v62, %s7960_s4  ;;  %v1072_v21 = vunpack.c.l.bf16 %v1056_v16 }
 0x166   : > { %v1015_v9 = vpop.permute.xlu0 %1014 }
 0x167   : > { %v1058_v23 = vmul.bf16 %v8288_v32, %v1015_v9 }
 0x169   : > { %1036 = vrot.lane.b32.xlu1 %v5938_v63, %s7960_s4  ;;  %v1074_v27 = vunpack.c.l.bf16 %v1058_v23 }
 0x16a   : > { %v1019_v12 = vpop.permute.xlu0 %1018 }
 0x16b   : > { %v1060_v29 = vmul.bf16 %v8288_v32, %v1019_v12 }
 0x16d   : > { %v1076_v52 = vunpack.c.l.bf16 %v1060_v29  ;;  %v5962_v29 = vld [vmem:[%s12505_s1 + $0x1d4] sm:$0xf] }
 0x16e   : > { %v1023_v19 = vpop.permute.xlu0 %1022 }
 0x16f   : > { %v1062_v54 = vmul.bf16 %v8288_v32, %v1023_v19 }
 0x171   : > { %v1078_v59 = vunpack.c.l.bf16 %v1062_v54  ;;  %v5969_v54 = vld [vmem:[%s12505_s1 + $0x1f0] sm:$0xf] }
 0x172   : > { %v1027_v30 = vpop.permute.xlu0 %1026 }
 0x173   : > { %v1064_v61 = vmul.bf16 %v8288_v32, %v1027_v30  ;;  %v5963_v30 = vld [vmem:[%s12505_s1 + $0x1d8] sm:$0xf] }
 0x175   : > { %v1080_v6 = vunpack.c.l.bf16 %v1064_v61 }
 0x176   : > { %v1031_v57 = vpop.permute.xlu0 %1030 }
 0x177   : > { %v1066_v11 = vmul.bf16 %v8288_v32, %v1031_v57  ;;  %v5972_v57 = vld [vmem:[%s12505_s1 + $0x1fc] sm:$0xf] }
 0x179   : > { %v1082_v16 = vunpack.c.l.bf16 %v1066_v11 }
 0x17a   : > { %v1035_v12 = vpop.permute.xlu0 %1034 }
 0x1bb   : > { %v8434_v10 = vpop.permute.xlu1 %6623 }
 0x1bc   : > { %12667 = vst [vmem:[#allocation13_spill] sm:$0xff] %v8434_v10 }
 0x1bf   : > { %v1009_v13 = vpop.permute.xlu1 %1008 }
 0x1c0   : > { %v1055_v14 = vmul.bf16 %v8285_v31, %v1009_v13 }
 0x1c2   : > { %v1071_v17 = vunpack.c.l.bf16 %v1055_v14 }
 0x1c3   : > { %v1013_v18 = vpop.permute.xlu1 %1012 }
 0x1c4   : > { %v1057_v20 = vmul.bf16 %v8285_v31, %v1013_v18  ;;  %v6627_v22 = vpack.i.bf16 %v1071_v17, %v1070_v15  ;;  %v1068_v18 = vmul.bf16 %v8288_v32, %v1035_v12  ;;  %v5958_v32 = vld [vmem:[%s12505_s1 + $0x1c4] sm:$0xf] }
 0x1c6   : > { %v1073_v24 = vunpack.c.l.bf16 %v1057_v20  ;;  %6628 = vrot.lane.b32.xlu0 %v6627_v22, %s7962_s7  ;;  %v1084_v22 = vunpack.c.l.bf16 %v1068_v18 }
 0x1c7   : > { %v1017_v25 = vpop.permute.xlu1 %1016 }
 0x1c8   : > { %v1059_v26 = vmul.bf16 %v8285_v31, %v1017_v25  ;;  %v6632_v28 = vpack.i.bf16 %v1073_v24, %v1072_v21  ;;  %v5957_v25 = vld [vmem:[%s12505_s1 + $0x1c0] sm:$0xf] }
 0x1ca   : > { %v1075_v48 = vunpack.c.l.bf16 %v1059_v26  ;;  %6633 = vrot.lane.b32.xlu1 %v6632_v28, %s7962_s7  ;;  %v5961_v28 = vld [vmem:[%s12505_s1 + $0x1d0] sm:$0xf] }
 0x1cb   : > { %v1021_v50 = vpop.permute.xlu1 %1020 }
 0x1cc   : > { %v1061_v51 = vmul.bf16 %v8285_v31, %v1021_v50  ;;  %v6637_v53 = vpack.i.bf16 %v1075_v48, %v1074_v27  ;;  %v5960_v27 = vld [vmem:[%s12505_s1 + $0x1cc] sm:$0xf]  ;;  %v5964_v48 = vld [vmem:[%s12505_s1 + $0x1dc] sm:$0xf]  ;;  %v5965_v50 = vld [vmem:[%s12505_s1 + $0x1e0] sm:$0xf] }
 0x1ce   : > { %v1077_v55 = vunpack.c.l.bf16 %v1061_v51  ;;  %6638 = vrot.lane.b32.xlu0 %v6637_v53, %s7962_s7  ;;  %v5966_v51 = vld [vmem:[%s12505_s1 + $0x1e4] sm:$0xf]  ;;  %v5968_v53 = vld [vmem:[%s12505_s1 + $0x1ec] sm:$0xf] }
 0x1cf   : > { %v1025_v56 = vpop.permute.xlu1 %1024 }
 0x1d0   : > { %v1063_v58 = vmul.bf16 %v8285_v31, %v1025_v56  ;;  %v6642_v60 = vpack.i.bf16 %v1077_v55, %v1076_v52  ;;  %v5967_v52 = vld [vmem:[%s12505_s1 + $0x1e8] sm:$0xf]  ;;  %v5970_v55 = vld [vmem:[%s12505_s1 + $0x1f4] sm:$0xf]  ;;  %v5971_v56 = vld [vmem:[%s12505_s1 + $0x1f8] sm:$0xf] }
 0x1d2   : > { %v1079_v62 = vunpack.c.l.bf16 %v1063_v58  ;;  %6643 = vrot.lane.b32.xlu1 %v6642_v60, %s7962_s7 }
 0x1d3   : > { %v1029_v63 = vpop.permute.xlu1 %1028 }
 0x1d4   : > { %v1065_v4 = vmul.bf16 %v8285_v31, %v1029_v63  ;;  %v6647_v9 = vpack.i.bf16 %v1079_v62, %v1078_v59 }
 0x1d6   : > { %v1081_v13 = vunpack.c.l.bf16 %v1065_v4  ;;  %6648 = vrot.lane.b32.xlu0 %v6647_v9, %s7962_s7  ;;  %v8541_v9 = vld [vmem:[%s8230_s5 + $0x10] sm:$0xf] }
 0x1d7   : > { %v1033_v14 = vpop.permute.xlu1 %1032 }
 0x1d8   : > { %v1067_v15 = vmul.bf16 %v8285_v31, %v1033_v14  ;;  %v6652_v17 = vpack.i.bf16 %v1081_v13, %v1080_v6  ;;  %v8545_v13 = vld [vmem:[%s8230_s5 + $0x14] sm:$0xf] }
 0x1da   : > { %v1083_v19 = vunpack.c.l.bf16 %v1067_v15  ;;  %6653 = vrot.lane.b32.xlu1 %v6652_v17, %s7962_s7 }
 0x1db   : > { %v1037_v20 = vpop.permute.xlu1 %1036 }
 0x1dc   : > { %v1069_v21 = vmul.bf16 %v8285_v31, %v1037_v20  ;;  %v6657_v23 = vpack.i.bf16 %v1083_v19, %v1082_v16  ;;  %v5959_v31 = vld [vmem:[%s12505_s1 + $0x1c8] sm:$0xf] }
 0x1de   : > { %v1085_v24 = vunpack.c.l.bf16 %v1069_v21  ;;  %6658 = vrot.lane.b32.xlu0 %v6657_v23, %s7962_s7 }
 0x1e0   : > { %v6662_v26 = vpack.i.bf16 %v1085_v24, %v1084_v22 }
 0x1e2   : > { %6663 = vrot.lane.b32.xlu1 %v6662_v26, %s7962_s7  ;;  %1267 = vrot.lane.b32.xlu0 %v5957_v25, %s7959_s30 }
 0x1e6   : > { %1269 = vrot.lane.b32.xlu1 %v5958_v32, %s7959_s30  ;;  %1271 = vrot.lane.b32.xlu0 %v5959_v31, %s7959_s30 }
 0x1ea   : > { %1273 = vrot.lane.b32.xlu1 %v5960_v27, %s7959_s30  ;;  %1275 = vrot.lane.b32.xlu0 %v5961_v28, %s7959_s30 }
 0x1ee   : > { %1277 = vrot.lane.b32.xlu1 %v5962_v29, %s7959_s30  ;;  %1279 = vrot.lane.b32.xlu0 %v5963_v30, %s7959_s30 }
 0x1f2   : > { %1281 = vrot.lane.b32.xlu1 %v5964_v48, %s7959_s30  ;;  %1283 = vrot.lane.b32.xlu0 %v5965_v50, %s7959_s30 }
 0x1f6   : > { %1285 = vrot.lane.b32.xlu1 %v5966_v51, %s7959_s30  ;;  %1287 = vrot.lane.b32.xlu0 %v5967_v52, %s7959_s30 }
 0x1fa   : > { %1289 = vrot.lane.b32.xlu1 %v5968_v53, %s7959_s30  ;;  %1291 = vrot.lane.b32.xlu0 %v5969_v54, %s7959_s30 }
 0x1fe   : > { %1293 = vrot.lane.b32.xlu1 %v5970_v55, %s7959_s30  ;;  %1295 = vrot.lane.b32.xlu0 %v5971_v56, %s7959_s30 }
 0x202   : > { %1297 = vrot.lane.b32.xlu1 %v5972_v57, %s7959_s30 }
 0x238   : > { %v8524_v58 = vpop.permute.xlu0 %6628 }
 0x239   : > { %12668 = vst [vmem:[#allocation14_spill] sm:$0xff] %v8524_v58 }
 0x23c   : > { %v8526_v59 = vpop.permute.xlu1 %6633 }
 0x23d   : > { %12669 = vst [vmem:[#allocation15_spill] sm:$0xff] %v8526_v59 }
 0x240   : > { %v8528_v60 = vpop.permute.xlu0 %6638 }
 0x241   : > { %12670 = vst [vmem:[#allocation16_spill] sm:$0xff] %v8528_v60 }
 0x244   : > { %v8530_v61 = vpop.permute.xlu1 %6643 }
 0x245   : > { %12671 = vst [vmem:[#allocation17_spill] sm:$0xff] %v8530_v61  ;;  %v5897_v61 = vld [vmem:[%s12505_s1 + $0xd8] sm:$0xf] }
 0x248   : > { %v8532_v62 = vpop.permute.xlu0 %6648 }
 0x249   : > { %12672 = vst [vmem:[#allocation18_spill] sm:$0xff] %v8532_v62 }
 0x24c   : > { %v8534_v63 = vpop.permute.xlu1 %6653 }
 0x24d   : > { %12673 = vst [vmem:[#allocation19_spill] sm:$0xff] %v8534_v63  ;;  %v5895_v63 = vld [vmem:[%s12505_s1 + $0xd0] sm:$0xf] }
 0x250   : > { %v8536_v4 = vpop.permute.xlu0 %6658 }
 0x251   : > { %12674 = vst [vmem:[#allocation20_spill] sm:$0xff] %v8536_v4 }
 0x254   : > { %v8538_v6 = vpop.permute.xlu1 %6663  ;;  %v1268_v11 = vpop.permute.xlu0 %1267 }
 0x255   : > { %12675 = vst [vmem:[#allocation21_spill] sm:$0xff] %v8538_v6  ;;  %v1315_v12 = vmul.bf16 %v8541_v9, %v1268_v11  ;;  %v253_v6 = vld [vmem:[%s12506_s2 + $0x48] sm:$0xff] }
 0x257   : > { %v1331_v17 = vunpack.c.l.bf16 %v1315_v12 }
 0x258   : > { %v1270_v14 = vpop.permute.xlu1 %1269  ;;  %v1272_v15 = vpop.permute.xlu0 %1271 }
 0x259   : > { %v1316_v16 = vmul.bf16 %v8545_v13, %v1270_v14  ;;  %v1317_v18 = vmul.bf16 %v8541_v9, %v1272_v15 }
 0x25b   : > { %v1332_v19 = vunpack.c.l.bf16 %v1316_v16  ;;  %v1333_v24 = vunpack.c.l.bf16 %v1317_v18 }
 0x25c   : > { %v1274_v20 = vpop.permute.xlu1 %1273  ;;  %v1276_v21 = vpop.permute.xlu0 %1275 }
 0x25d   : > { %v6667_v22 = vpack.i.bf16 %v1332_v19, %v1331_v17  ;;  %v1318_v23 = vmul.bf16 %v8545_v13, %v1274_v20  ;;  %v1319_v25 = vmul.bf16 %v8541_v9, %v1276_v21 }
 0x25f   : > { %v1334_v26 = vunpack.c.l.bf16 %v1318_v23  ;;  %6668 = vrot.lane.b32.xlu0 %v6667_v22, %s7961_s6  ;;  %v1335_v29 = vunpack.c.l.bf16 %v1319_v25 }
 0x260   : > { %v1278_v32 = vpop.permute.xlu1 %1277  ;;  %v1280_v31 = vpop.permute.xlu0 %1279 }
 0x261   : > { %v6672_v27 = vpack.i.bf16 %v1334_v26, %v1333_v24  ;;  %v1320_v28 = vmul.bf16 %v8545_v13, %v1278_v32  ;;  %v1321_v30 = vmul.bf16 %v8541_v9, %v1280_v31 }
 0x263   : > { %v1336_v48 = vunpack.c.l.bf16 %v1320_v28  ;;  %6673 = vrot.lane.b32.xlu1 %v6672_v27, %s7961_s6  ;;  %v1337_v54 = vunpack.c.l.bf16 %v1321_v30 }
 0x264   : > { %v1282_v50 = vpop.permute.xlu1 %1281  ;;  %v1284_v51 = vpop.permute.xlu0 %1283 }
 0x265   : > { %v6677_v52 = vpack.i.bf16 %v1336_v48, %v1335_v29  ;;  %v1322_v53 = vmul.bf16 %v8545_v13, %v1282_v50  ;;  %v1323_v55 = vmul.bf16 %v8541_v9, %v1284_v51 }
 0x267   : > { %v1338_v56 = vunpack.c.l.bf16 %v1322_v53  ;;  %6678 = vrot.lane.b32.xlu0 %v6677_v52, %s7961_s6  ;;  %v1339_v15 = vunpack.c.l.bf16 %v1323_v55  ;;  %v5973_v53 = vld [vmem:[%s12505_s1 + $0x200] sm:$0xf]  ;;  %v5974_v55 = vld [vmem:[%s12505_s1 + $0x204] sm:$0xf] }
 0x268   : > { %v1286_v57 = vpop.permute.xlu1 %1285  ;;  %v1288_v11 = vpop.permute.xlu0 %1287 }
 0x269   : > { %v6682_v12 = vpack.i.bf16 %v1338_v56, %v1337_v54  ;;  %v1324_v14 = vmul.bf16 %v8545_v13, %v1286_v57  ;;  %v1325_v16 = vmul.bf16 %v8541_v9, %v1288_v11  ;;  %v5975_v56 = vld [vmem:[%s12505_s1 + $0x208] sm:$0xf]  ;;  %v5976_v57 = vld [vmem:[%s12505_s1 + $0x20c] sm:$0xf]  ;;  %v5977_v11 = vld [vmem:[%s12505_s1 + $0x210] sm:$0xf] }
 0x26b   : > { %v1340_v17 = vunpack.c.l.bf16 %v1324_v14  ;;  %6683 = vrot.lane.b32.xlu1 %v6682_v12, %s7961_s6  ;;  %v1341_v22 = vunpack.c.l.bf16 %v1325_v16  ;;  %v5978_v12 = vld [vmem:[%s12505_s1 + $0x214] sm:$0xf]  ;;  %v5979_v14 = vld [vmem:[%s12505_s1 + $0x218] sm:$0xf]  ;;  %v5981_v16 = vld [vmem:[%s12505_s1 + $0x220] sm:$0xf] }
 0x26c   : > { %v1290_v18 = vpop.permute.xlu1 %1289  ;;  %v1292_v19 = vpop.permute.xlu0 %1291 }
 0x26d   : > { %v6687_v20 = vpack.i.bf16 %v1340_v17, %v1339_v15  ;;  %v1326_v21 = vmul.bf16 %v8545_v13, %v1290_v18  ;;  %v1327_v23 = vmul.bf16 %v8541_v9, %v1292_v19  ;;  %v5980_v15 = vld [vmem:[%s12505_s1 + $0x21c] sm:$0xf]  ;;  %v5982_v17 = vld [vmem:[%s12505_s1 + $0x224] sm:$0xf]  ;;  %v5983_v18 = vld [vmem:[%s12505_s1 + $0x228] sm:$0xf] }
 0x26e   : > { %v5984_v19 = vld [vmem:[%s12505_s1 + $0x22c] sm:$0xf] }
 0x26f   : > { %v1342_v24 = vunpack.c.l.bf16 %v1326_v21  ;;  %6688 = vrot.lane.b32.xlu0 %v6687_v20, %s7961_s6  ;;  %v1343_v27 = vunpack.c.l.bf16 %v1327_v23  ;;  %v5985_v20 = vld [vmem:[%s12505_s1 + $0x230] sm:$0xf]  ;;  %v5986_v21 = vld [vmem:[%s12505_s1 + $0x234] sm:$0xf]  ;;  %v5988_v23 = vld [vmem:[%s12505_s1 + $0x23c] sm:$0xf] }
 0x270   : > { %v1294_v25 = vpop.permute.xlu1 %1293  ;;  %v1296_v26 = vpop.permute.xlu0 %1295 }
 0x271   : > { %v6692_v32 = vpack.i.bf16 %v1342_v24, %v1341_v22  ;;  %v1328_v31 = vmul.bf16 %v8545_v13, %v1294_v25  ;;  %v1329_v28 = vmul.bf16 %v8541_v9, %v1296_v26  ;;  %v5987_v22 = vld [vmem:[%s12505_s1 + $0x238] sm:$0xf] }
 0x273   : > { %v1344_v29 = vunpack.c.l.bf16 %v1328_v31  ;;  %6693 = vrot.lane.b32.xlu1 %v6692_v32, %s7961_s6  ;;  %v1345_v51 = vunpack.c.l.bf16 %v1329_v28 }
 0x274   : > { %v1298_v30 = vpop.permute.xlu1 %1297 }
 0x275   : > { %v6697_v48 = vpack.i.bf16 %v1344_v29, %v1343_v27  ;;  %v1330_v50 = vmul.bf16 %v8545_v13, %v1298_v30 }
 0x277   : > { %v1346_v52 = vunpack.c.l.bf16 %v1330_v50  ;;  %6698 = vrot.lane.b32.xlu0 %v6697_v48, %s7961_s6 }
 0x279   : > { %v6702_v54 = vpack.i.bf16 %v1346_v52, %v1345_v51 }
 0x27b   : > { %6703 = vrot.lane.b32.xlu1 %v6702_v54, %s7961_s6  ;;  %1460 = vrot.lane.b32.xlu0 %v5973_v53, %s7960_s4 }
 0x27f   : > { %1462 = vrot.lane.b32.xlu1 %v5974_v55, %s7960_s4  ;;  %1464 = vrot.lane.b32.xlu0 %v5975_v56, %s7960_s4 }
 0x283   : > { %1466 = vrot.lane.b32.xlu1 %v5976_v57, %s7960_s4  ;;  %1468 = vrot.lane.b32.xlu0 %v5977_v11, %s7960_s4 }
 0x287   : > { %1470 = vrot.lane.b32.xlu1 %v5978_v12, %s7960_s4  ;;  %1472 = vrot.lane.b32.xlu0 %v5979_v14, %s7960_s4 }
 0x28b   : > { %1474 = vrot.lane.b32.xlu1 %v5980_v15, %s7960_s4  ;;  %1476 = vrot.lane.b32.xlu0 %v5981_v16, %s7960_s4 }
 0x28f   : > { %1478 = vrot.lane.b32.xlu1 %v5982_v17, %s7960_s4  ;;  %1480 = vrot.lane.b32.xlu0 %v5983_v18, %s7960_s4 }
 0x293   : > { %1482 = vrot.lane.b32.xlu1 %v5984_v19, %s7960_s4  ;;  %1484 = vrot.lane.b32.xlu0 %v5985_v20, %s7960_s4 }
 0x297   : > { %1486 = vrot.lane.b32.xlu1 %v5986_v21, %s7960_s4  ;;  %1488 = vrot.lane.b32.xlu0 %v5987_v22, %s7960_s4 }
 0x29b   : > { %1490 = vrot.lane.b32.xlu1 %v5988_v23, %s7960_s4 }
 0x2d1   : > { %v8634_v24 = vpop.permute.xlu0 %6668 }
 0x2d2   : > { %12676 = vst [vmem:[#allocation22_spill] sm:$0xff] %v8634_v24  ;;  %v251_v24 = vld [vmem:[%s12506_s2 + $0x38] sm:$0xff] }
 0x2d5   : > { %v8636_v25 = vpop.permute.xlu1 %6673 }
 0x2d6   : > { %12677 = vst [vmem:[#allocation23_spill] sm:$0xff] %v8636_v25 }
 0x2d9   : > { %v8638_v26 = vpop.permute.xlu0 %6678 }
 0x2da   : > { %12678 = vst [vmem:[#allocation24_spill] sm:$0xff] %v8638_v26  ;;  %v250_v26 = vld [vmem:[%s12506_s2 + $0x30] sm:$0xff] }
 0x2dd   : > { %v8640_v32 = vpop.permute.xlu1 %6683 }
 0x2de   : > { %12679 = vst [vmem:[#allocation25_spill] sm:$0xff] %v8640_v32 }
 0x2e1   : > { %v8642_v31 = vpop.permute.xlu0 %6688 }
 0x2e2   : > { %12680 = vst [vmem:[#allocation26_spill] sm:$0xff] %v8642_v31  ;;  %v249_v31 = vld [vmem:[%s12506_s2 + $0x28] sm:$0xff] }
 0x2e5   : > { %v8644_v27 = vpop.permute.xlu1 %6693 }
 0x2e6   : > { %12681 = vst [vmem:[#allocation27_spill] sm:$0xff] %v8644_v27 }
 0x2e9   : > { %v8646_v28 = vpop.permute.xlu0 %6698 }
 0x2ea   : > { %12682 = vst [vmem:[#allocation28_spill] sm:$0xff] %v8646_v28  ;;  %v245_v28 = vld [vmem:[%s12506_s2 + $0x8] sm:$0xff] }
 0x2ed   : > { %v8648_v29 = vpop.permute.xlu1 %6703  ;;  %v1461_v30 = vpop.permute.xlu0 %1460 }
 0x2ee   : > { %12683 = vst [vmem:[#allocation29_spill] sm:$0xff] %v8648_v29  ;;  %v1508_v48 = vmul.bf16 %v8541_v9, %v1461_v30 }
 0x2f0   : > { %v1524_v53 = vunpack.c.l.bf16 %v1508_v48 }
 0x2f1   : > { %v1463_v50 = vpop.permute.xlu1 %1462  ;;  %v1465_v51 = vpop.permute.xlu0 %1464 }
 0x2f2   : > { %v1509_v52 = vmul.bf16 %v8545_v13, %v1463_v50  ;;  %v1510_v54 = vmul.bf16 %v8541_v9, %v1465_v51 }
 0x2f4   : > { %v1525_v55 = vunpack.c.l.bf16 %v1509_v52  ;;  %v1526_v14 = vunpack.c.l.bf16 %v1510_v54 }
 0x2f5   : > { %v1467_v56 = vpop.permute.xlu1 %1466  ;;  %v1469_v57 = vpop.permute.xlu0 %1468 }
 0x2f6   : > { %v6707_v11 = vpack.i.bf16 %v1525_v55, %v1524_v53  ;;  %v1511_v12 = vmul.bf16 %v8545_v13, %v1467_v56  ;;  %v1512_v15 = vmul.bf16 %v8541_v9, %v1469_v57 }
 0x2f8   : > { %v1527_v16 = vunpack.c.l.bf16 %v1511_v12  ;;  %6708 = vrot.lane.b32.xlu0 %v6707_v11, %s7962_s7  ;;  %v1528_v21 = vunpack.c.l.bf16 %v1512_v15 }
 0x2f9   : > { %v1471_v17 = vpop.permute.xlu1 %1470  ;;  %v1473_v18 = vpop.permute.xlu0 %1472 }
 0x2fa   : > { %v6712_v19 = vpack.i.bf16 %v1527_v16, %v1526_v14  ;;  %v1513_v20 = vmul.bf16 %v8545_v13, %v1471_v17  ;;  %v1514_v22 = vmul.bf16 %v8541_v9, %v1473_v18 }
 0x2fc   : > { %v1529_v23 = vunpack.c.l.bf16 %v1513_v20  ;;  %6713 = vrot.lane.b32.xlu1 %v6712_v19, %s7962_s7  ;;  %v1530_v52 = vunpack.c.l.bf16 %v1514_v22 }
 0x2fd   : > { %v1475_v30 = vpop.permute.xlu1 %1474  ;;  %v1477_v48 = vpop.permute.xlu0 %1476 }
 0x2fe   : > { %v6717_v50 = vpack.i.bf16 %v1529_v23, %v1528_v21  ;;  %v1515_v51 = vmul.bf16 %v8545_v13, %v1475_v30  ;;  %v1516_v53 = vmul.bf16 %v8541_v9, %v1477_v48 }
 0x300   : > { %v1531_v54 = vunpack.c.l.bf16 %v1515_v51  ;;  %6718 = vrot.lane.b32.xlu0 %v6717_v50, %s7962_s7  ;;  %v1532_v12 = vunpack.c.l.bf16 %v1516_v53 }
 0x301   : > { %v1479_v55 = vpop.permute.xlu1 %1478  ;;  %v1481_v56 = vpop.permute.xlu0 %1480 }
 0x302   : > { %v6722_v57 = vpack.i.bf16 %v1531_v54, %v1530_v52  ;;  %v1517_v11 = vmul.bf16 %v8545_v13, %v1479_v55  ;;  %v1518_v14 = vmul.bf16 %v8541_v9, %v1481_v56 }
 0x304   : > { %v1533_v15 = vunpack.c.l.bf16 %v1517_v11  ;;  %6723 = vrot.lane.b32.xlu1 %v6722_v57, %s7962_s7  ;;  %v1534_v20 = vunpack.c.l.bf16 %v1518_v14 }
 0x305   : > { %v1483_v16 = vpop.permute.xlu1 %1482  ;;  %v1485_v17 = vpop.permute.xlu0 %1484 }
 0x306   : > { %v6727_v18 = vpack.i.bf16 %v1533_v15, %v1532_v12  ;;  %v1519_v19 = vmul.bf16 %v8545_v13, %v1483_v16  ;;  %v1520_v21 = vmul.bf16 %v8541_v9, %v1485_v17  ;;  %v6007_v12 = vld [vmem:[%s12505_s1 + $0x280] sm:$0xf]  ;;  %v6010_v15 = vld [vmem:[%s12505_s1 + $0x28c] sm:$0xf]  ;;  %v6011_v16 = vld [vmem:[%s12505_s1 + $0x290] sm:$0xf] }
 0x307   : > { %v6012_v17 = vld [vmem:[%s12505_s1 + $0x294] sm:$0xf] }
 0x308   : > { %v1535_v22 = vunpack.c.l.bf16 %v1519_v19  ;;  %6728 = vrot.lane.b32.xlu0 %v6727_v18, %s7962_s7  ;;  %v1536_v51 = vunpack.c.l.bf16 %v1520_v21  ;;  %v6013_v18 = vld [vmem:[%s12505_s1 + $0x298] sm:$0xf]  ;;  %v6014_v19 = vld [vmem:[%s12505_s1 + $0x29c] sm:$0xf]  ;;  %v6016_v21 = vld [vmem:[%s12505_s1 + $0x2a4] sm:$0xf] }
 0x309   : > { %v1487_v23 = vpop.permute.xlu1 %1486  ;;  %v1489_v30 = vpop.permute.xlu0 %1488 }
 0x30a   : > { %v6732_v48 = vpack.i.bf16 %v1535_v22, %v1534_v20  ;;  %v1521_v50 = vmul.bf16 %v8545_v13, %v1487_v23  ;;  %v1522_v52 = vmul.bf16 %v8541_v9, %v1489_v30  ;;  %v6008_v9 = vld [vmem:[%s12505_s1 + $0x284] sm:$0xf]  ;;  %v6015_v20 = vld [vmem:[%s12505_s1 + $0x2a0] sm:$0xf]  ;;  %v6017_v22 = vld [vmem:[%s12505_s1 + $0x2a8] sm:$0xf] }
 0x30b   : > { %v6018_v23 = vld [vmem:[%s12505_s1 + $0x2ac] sm:$0xf]  ;;  %v6019_v30 = vld [vmem:[%s12505_s1 + $0x2b0] sm:$0xf] }
 0x30c   : > { %v1537_v53 = vunpack.c.l.bf16 %v1521_v50  ;;  %6733 = vrot.lane.b32.xlu1 %v6732_v48, %s7962_s7  ;;  %v1538_v57 = vunpack.c.l.bf16 %v1522_v52  ;;  %v6020_v48 = vld [vmem:[%s12505_s1 + $0x2b4] sm:$0xf]  ;;  %v6021_v50 = vld [vmem:[%s12505_s1 + $0x2b8] sm:$0xf] }
 0x30d   : > { %v1491_v54 = vpop.permute.xlu1 %1490 }
 0x30e   : > { %v6737_v55 = vpack.i.bf16 %v1537_v53, %v1536_v51  ;;  %v1523_v56 = vmul.bf16 %v8545_v13, %v1491_v54  ;;  %v6009_v13 = vld [vmem:[%s12505_s1 + $0x288] sm:$0xf]  ;;  %v6022_v51 = vld [vmem:[%s12505_s1 + $0x2bc] sm:$0xf] }
 0x310   : > { %v1539_v11 = vunpack.c.l.bf16 %v1523_v56  ;;  %6738 = vrot.lane.b32.xlu0 %v6737_v55, %s7962_s7 }
 0x312   : > { %v6742_v14 = vpack.i.bf16 %v1539_v11, %v1538_v57 }
 0x314   : > { %6743 = vrot.lane.b32.xlu1 %v6742_v14, %s7962_s7  ;;  %1721 = vrot.lane.b32.xlu0 %v6007_v12, %s7959_s30  ;;  %v8755_v14 = vld [vmem:[%s8230_s5 + $0x18] sm:$0xf] }
 0x318   : > { %1723 = vrot.lane.b32.xlu1 %v6008_v9, %s7959_s30  ;;  %1725 = vrot.lane.b32.xlu0 %v6009_v13, %s7959_s30 }
 0x31c   : > { %1727 = vrot.lane.b32.xlu1 %v6010_v15, %s7959_s30  ;;  %1729 = vrot.lane.b32.xlu0 %v6011_v16, %s7959_s30  ;;  %v8759_v15 = vld [vmem:[%s8230_s5 + $0x1c] sm:$0xf] }
 0x320   : > { %1731 = vrot.lane.b32.xlu1 %v6012_v17, %s7959_s30  ;;  %1733 = vrot.lane.b32.xlu0 %v6013_v18, %s7959_s30 }
 0x324   : > { %1735 = vrot.lane.b32.xlu1 %v6014_v19, %s7959_s30  ;;  %1737 = vrot.lane.b32.xlu0 %v6015_v20, %s7959_s30 }
 0x328   : > { %1739 = vrot.lane.b32.xlu1 %v6016_v21, %s7959_s30  ;;  %1741 = vrot.lane.b32.xlu0 %v6017_v22, %s7959_s30 }
 0x32c   : > { %1743 = vrot.lane.b32.xlu1 %v6018_v23, %s7959_s30  ;;  %1745 = vrot.lane.b32.xlu0 %v6019_v30, %s7959_s30 }
 0x330   : > { %1747 = vrot.lane.b32.xlu1 %v6020_v48, %s7959_s30  ;;  %1749 = vrot.lane.b32.xlu0 %v6021_v50, %s7959_s30 }
 0x334   : > { %1751 = vrot.lane.b32.xlu1 %v6022_v51, %s7959_s30 }
 0x36a   : > { %v8738_v52 = vpop.permute.xlu0 %6708 }
 0x36b   : > { %12684 = vst [vmem:[#allocation30_spill] sm:$0xff] %v8738_v52 }
 0x36e   : > { %v8740_v53 = vpop.permute.xlu1 %6713 }
 0x36f   : > { %12685 = vst [vmem:[#allocation31_spill] sm:$0xff] %v8740_v53 }
 0x372   : > { %v8742_v54 = vpop.permute.xlu0 %6718 }
 0x373   : > { %12686 = vst [vmem:[#allocation32_spill] sm:$0xff] %v8742_v54  ;;  %v247_v54 = vld [vmem:[%s12506_s2 + $0x18] sm:$0xff] }
 0x376   : > { %v8744_v55 = vpop.permute.xlu1 %6723 }
 0x377   : > { %12687 = vst [vmem:[#allocation33_spill] sm:$0xff] %v8744_v55 }
 0x37a   : > { %v8746_v56 = vpop.permute.xlu0 %6728 }
 0x37b   : > { %12688 = vst [vmem:[#allocation34_spill] sm:$0xff] %v8746_v56 }
 0x37e   : > { %v8748_v57 = vpop.permute.xlu1 %6733 }
 0x37f   : > { %12689 = vst [vmem:[#allocation35_spill] sm:$0xff] %v8748_v57 }
 0x382   : > { %v8750_v11 = vpop.permute.xlu0 %6738 }
 0x383   : > { %12690 = vst [vmem:[#allocation36_spill] sm:$0xff] %v8750_v11 }
 0x386   : > { %v8752_v12 = vpop.permute.xlu1 %6743  ;;  %v1722_v9 = vpop.permute.xlu0 %1721 }
 0x387   : > { %12691 = vst [vmem:[#allocation37_spill] sm:$0xff] %v8752_v12  ;;  %v1769_v13 = vmul.bf16 %v8755_v14, %v1722_v9 }
 0x389   : > { %v1785_v19 = vunpack.c.l.bf16 %v1769_v13 }
 0x38a   : > { %v1724_v16 = vpop.permute.xlu1 %1723  ;;  %v1726_v17 = vpop.permute.xlu0 %1725 }
 0x38b   : > { %v1770_v18 = vmul.bf16 %v8759_v15, %v1724_v16  ;;  %v1771_v20 = vmul.bf16 %v8755_v14, %v1726_v17 }
 0x38d   : > { %v1786_v21 = vunpack.c.l.bf16 %v1770_v18  ;;  %v1787_v50 = vunpack.c.l.bf16 %v1771_v20 }
 0x38e   : > { %v1728_v22 = vpop.permute.xlu1 %1727  ;;  %v1730_v23 = vpop.permute.xlu0 %1729 }
 0x38f   : > { %v6747_v30 = vpack.i.bf16 %v1786_v21, %v1785_v19  ;;  %v1772_v48 = vmul.bf16 %v8759_v15, %v1728_v22  ;;  %v1773_v51 = vmul.bf16 %v8755_v14, %v1730_v23 }
 0x391   : > { %v1788_v12 = vunpack.c.l.bf16 %v1772_v48  ;;  %6748 = vrot.lane.b32.xlu0 %v6747_v30, %s7961_s6  ;;  %v1789_v13 = vunpack.c.l.bf16 %v1773_v51 }
 0x392   : > { %v1732_v9 = vpop.permute.xlu1 %1731  ;;  %v1734_v11 = vpop.permute.xlu0 %1733 }
 0x393   : > { %v6752_v57 = vpack.i.bf16 %v1788_v12, %v1787_v50  ;;  %v1774_v16 = vmul.bf16 %v8759_v15, %v1732_v9  ;;  %v1775_v17 = vmul.bf16 %v8755_v14, %v1734_v11 }
 0x395   : > { %v1790_v18 = vunpack.c.l.bf16 %v1774_v16  ;;  %6753 = vrot.lane.b32.xlu1 %v6752_v57, %s7961_s6  ;;  %v1791_v23 = vunpack.c.l.bf16 %v1775_v17 }
 0x396   : > { %v1736_v19 = vpop.permute.xlu1 %1735  ;;  %v1738_v21 = vpop.permute.xlu0 %1737 }
 0x397   : > { %v6757_v22 = vpack.i.bf16 %v1790_v18, %v1789_v13  ;;  %v1776_v20 = vmul.bf16 %v8759_v15, %v1736_v19  ;;  %v1777_v48 = vmul.bf16 %v8755_v14, %v1738_v21 }
 0x399   : > { %v1792_v30 = vunpack.c.l.bf16 %v1776_v20  ;;  %6758 = vrot.lane.b32.xlu0 %v6757_v22, %s7961_s6  ;;  %v1793_v11 = vunpack.c.l.bf16 %v1777_v48 }
 0x39a   : > { %v1740_v12 = vpop.permute.xlu1 %1739  ;;  %v1742_v50 = vpop.permute.xlu0 %1741 }
 0x39b   : > { %v6762_v9 = vpack.i.bf16 %v1792_v30, %v1791_v23  ;;  %v1778_v51 = vmul.bf16 %v8759_v15, %v1740_v12  ;;  %v1779_v16 = vmul.bf16 %v8755_v14, %v1742_v50 }
 0x39d   : > { %v1794_v57 = vunpack.c.l.bf16 %v1778_v51  ;;  %6763 = vrot.lane.b32.xlu1 %v6762_v9, %s7961_s6  ;;  %v1795_v21 = vunpack.c.l.bf16 %v1779_v16 }
 0x39e   : > { %v1744_v13 = vpop.permute.xlu1 %1743  ;;  %v1746_v18 = vpop.permute.xlu0 %1745 }
 0x39f   : > { %v6767_v19 = vpack.i.bf16 %v1794_v57, %v1793_v11  ;;  %v1780_v17 = vmul.bf16 %v8759_v15, %v1744_v13  ;;  %v1781_v20 = vmul.bf16 %v8755_v14, %v1746_v18 }
 0x3a1   : > { %v1796_v22 = vunpack.c.l.bf16 %v1780_v17  ;;  %6768 = vrot.lane.b32.xlu0 %v6767_v19, %s7961_s6  ;;  %v1797_v50 = vunpack.c.l.bf16 %v1781_v20  ;;  %v6023_v19 = vld [vmem:[%s12505_s1 + $0x2c0] sm:$0xf]  ;;  %v6025_v20 = vld [vmem:[%s12505_s1 + $0x2c8] sm:$0xf] }
 0x3a2   : > { %v1748_v23 = vpop.permute.xlu1 %1747  ;;  %v1750_v30 = vpop.permute.xlu0 %1749 }
 0x3a3   : > { %v6772_v12 = vpack.i.bf16 %v1796_v22, %v1795_v21  ;;  %v1782_v48 = vmul.bf16 %v8759_v15, %v1748_v23  ;;  %v1783_v51 = vmul.bf16 %v8755_v14, %v1750_v30  ;;  %v6024_v21 = vld [vmem:[%s12505_s1 + $0x2c4] sm:$0xf]  ;;  %v6026_v22 = vld [vmem:[%s12505_s1 + $0x2cc] sm:$0xf]  ;;  %v6027_v23 = vld [vmem:[%s12505_s1 + $0x2d0] sm:$0xf] }
 0x3a4   : > { %v6028_v30 = vld [vmem:[%s12505_s1 + $0x2d4] sm:$0xf] }
 0x3a5   : > { %v1798_v9 = vunpack.c.l.bf16 %v1782_v48  ;;  %6773 = vrot.lane.b32.xlu1 %v6772_v12, %s7961_s6  ;;  %v1799_v13 = vunpack.c.l.bf16 %v1783_v51  ;;  %v6029_v12 = vld [vmem:[%s12505_s1 + $0x2d8] sm:$0xf]  ;;  %v6030_v48 = vld [vmem:[%s12505_s1 + $0x2dc] sm:$0xf]  ;;  %v6032_v51 = vld [vmem:[%s12505_s1 + $0x2e4] sm:$0xf] }
 0x3a6   : > { %v1752_v11 = vpop.permute.xlu1 %1751 }
 0x3a7   : > { %v6777_v57 = vpack.i.bf16 %v1798_v9, %v1797_v50  ;;  %v1784_v16 = vmul.bf16 %v8759_v15, %v1752_v11  ;;  %v6031_v50 = vld [vmem:[%s12505_s1 + $0x2e0] sm:$0xf]  ;;  %v6033_v9 = vld [vmem:[%s12505_s1 + $0x2e8] sm:$0xf]  ;;  %v6034_v11 = vld [vmem:[%s12505_s1 + $0x2ec] sm:$0xf] }
 0x3a9   : > { %v1800_v18 = vunpack.c.l.bf16 %v1784_v16  ;;  %6778 = vrot.lane.b32.xlu0 %v6777_v57, %s7961_s6  ;;  %v6035_v57 = vld [vmem:[%s12505_s1 + $0x2f0] sm:$0xf]  ;;  %v6036_v16 = vld [vmem:[%s12505_s1 + $0x2f4] sm:$0xf] }
 0x3ab   : > { %v6782_v17 = vpack.i.bf16 %v1800_v18, %v1799_v13  ;;  %v6037_v13 = vld [vmem:[%s12505_s1 + $0x2f8] sm:$0xf]  ;;  %v6038_v18 = vld [vmem:[%s12505_s1 + $0x2fc] sm:$0xf] }
 0x3ad   : > { %6783 = vrot.lane.b32.xlu1 %v6782_v17, %s7961_s6  ;;  %1914 = vrot.lane.b32.xlu0 %v6023_v19, %s7960_s4 }
 0x3b1   : > { %1916 = vrot.lane.b32.xlu1 %v6024_v21, %s7960_s4  ;;  %1918 = vrot.lane.b32.xlu0 %v6025_v20, %s7960_s4 }
 0x3b5   : > { %1920 = vrot.lane.b32.xlu1 %v6026_v22, %s7960_s4  ;;  %1922 = vrot.lane.b32.xlu0 %v6027_v23, %s7960_s4 }
 0x3b9   : > { %1924 = vrot.lane.b32.xlu1 %v6028_v30, %s7960_s4  ;;  %1926 = vrot.lane.b32.xlu0 %v6029_v12, %s7960_s4 }
 0x3bd   : > { %1928 = vrot.lane.b32.xlu1 %v6030_v48, %s7960_s4  ;;  %1930 = vrot.lane.b32.xlu0 %v6031_v50, %s7960_s4 }
 0x3c1   : > { %1932 = vrot.lane.b32.xlu1 %v6032_v51, %s7960_s4  ;;  %1934 = vrot.lane.b32.xlu0 %v6033_v9, %s7960_s4 }
 0x3c5   : > { %1936 = vrot.lane.b32.xlu1 %v6034_v11, %s7960_s4  ;;  %1938 = vrot.lane.b32.xlu0 %v6035_v57, %s7960_s4 }
 0x3c9   : > { %1940 = vrot.lane.b32.xlu1 %v6036_v16, %s7960_s4  ;;  %1942 = vrot.lane.b32.xlu0 %v6037_v13, %s7960_s4 }
 0x3cd   : > { %1944 = vrot.lane.b32.xlu1 %v6038_v18, %s7960_s4 }
 0x403   : > { %v8848_v19 = vpop.permute.xlu0 %6748 }
 0x404   : > { %12692 = vst [vmem:[#allocation38_spill] sm:$0xff] %v8848_v19 }
 0x407   : > { %v8850_v17 = vpop.permute.xlu1 %6753 }
 0x408   : > { %12693 = vst [vmem:[#allocation39_spill] sm:$0xff] %v8850_v17 }
 0x40b   : > { %v8852_v21 = vpop.permute.xlu0 %6758 }
 0x40c   : > { %12694 = vst [vmem:[#allocation40_spill] sm:$0xff] %v8852_v21 }
 0x40f   : > { %v8854_v20 = vpop.permute.xlu1 %6763 }
 0x410   : > { %12695 = vst [vmem:[#allocation41_spill] sm:$0xff] %v8854_v20 }
 0x413   : > { %v8856_v22 = vpop.permute.xlu0 %6768 }
 0x414   : > { %12696 = vst [vmem:[#allocation42_spill] sm:$0xff] %v8856_v22 }
 0x417   : > { %v8858_v23 = vpop.permute.xlu1 %6773 }
 0x418   : > { %12697 = vst [vmem:[#allocation43_spill] sm:$0xff] %v8858_v23 }
 0x41b   : > { %v8860_v30 = vpop.permute.xlu0 %6778 }
 0x41c   : > { %12698 = vst [vmem:[#allocation44_spill] sm:$0xff] %v8860_v30 }
 0x41f   : > { %v8862_v12 = vpop.permute.xlu1 %6783  ;;  %v1915_v48 = vpop.permute.xlu0 %1914 }
 0x420   : > { %12699 = vst [vmem:[#allocation45_spill] sm:$0xff] %v8862_v12  ;;  %v1962_v50 = vmul.bf16 %v8755_v14, %v1915_v48 }
 0x422   : > { %v1978_v57 = vunpack.c.l.bf16 %v1962_v50 }
 0x423   : > { %v1917_v51 = vpop.permute.xlu1 %1916  ;;  %v1919_v9 = vpop.permute.xlu0 %1918 }
 0x424   : > { %v1963_v11 = vmul.bf16 %v8759_v15, %v1917_v51  ;;  %v1964_v16 = vmul.bf16 %v8755_v14, %v1919_v9 }
 0x426   : > { %v1979_v13 = vunpack.c.l.bf16 %v1963_v11  ;;  %v1980_v21 = vunpack.c.l.bf16 %v1964_v16 }
 0x427   : > { %v1921_v18 = vpop.permute.xlu1 %1920  ;;  %v1923_v20 = vpop.permute.xlu0 %1922 }
 0x428   : > { %v6787_v22 = vpack.i.bf16 %v1979_v13, %v1978_v57  ;;  %v1965_v23 = vmul.bf16 %v8759_v15, %v1921_v18  ;;  %v1966_v30 = vmul.bf16 %v8755_v14, %v1923_v20 }
 0x42a   : > { %v1981_v12 = vunpack.c.l.bf16 %v1965_v23  ;;  %6788 = vrot.lane.b32.xlu0 %v6787_v22, %s7962_s7  ;;  %v1982_v50 = vunpack.c.l.bf16 %v1966_v30 }
 0x42b   : > { %v1925_v48 = vpop.permute.xlu1 %1924  ;;  %v1927_v17 = vpop.permute.xlu0 %1926 }
 0x42c   : > { %v6792_v19 = vpack.i.bf16 %v1981_v12, %v1980_v21  ;;  %v1967_v51 = vmul.bf16 %v8759_v15, %v1925_v48  ;;  %v1968_v9 = vmul.bf16 %v8755_v14, %v1927_v17 }
 0x42e   : > { %v1983_v11 = vunpack.c.l.bf16 %v1967_v51  ;;  %6793 = vrot.lane.b32.xlu1 %v6792_v19, %s7962_s7  ;;  %v1984_v20 = vunpack.c.l.bf16 %v1968_v9 }
 0x42f   : > { %v1929_v57 = vpop.permute.xlu1 %1928  ;;  %v1931_v13 = vpop.permute.xlu0 %1930 }
 0x430   : > { %v6797_v18 = vpack.i.bf16 %v1983_v11, %v1982_v50  ;;  %v1969_v16 = vmul.bf16 %v8759_v15, %v1929_v57  ;;  %v1970_v23 = vmul.bf16 %v8755_v14, %v1931_v13 }
 0x432   : > { %v1985_v22 = vunpack.c.l.bf16 %v1969_v16  ;;  %6798 = vrot.lane.b32.xlu0 %v6797_v18, %s7962_s7  ;;  %v1986_v17 = vunpack.c.l.bf16 %v1970_v23 }
 0x433   : > { %v1933_v21 = vpop.permute.xlu1 %1932  ;;  %v1935_v12 = vpop.permute.xlu0 %1934 }
 0x434   : > { %v6802_v48 = vpack.i.bf16 %v1985_v22, %v1984_v20  ;;  %v1971_v30 = vmul.bf16 %v8759_v15, %v1933_v21  ;;  %v1972_v51 = vmul.bf16 %v8755_v14, %v1935_v12 }
 0x436   : > { %v1987_v19 = vunpack.c.l.bf16 %v1971_v30  ;;  %6803 = vrot.lane.b32.xlu1 %v6802_v48, %s7962_s7  ;;  %v1988_v13 = vunpack.c.l.bf16 %v1972_v51 }
 0x437   : > { %v1937_v50 = vpop.permute.xlu1 %1936  ;;  %v1939_v11 = vpop.permute.xlu0 %1938 }
 0x438   : > { %v6807_v57 = vpack.i.bf16 %v1987_v19, %v1986_v17  ;;  %v1973_v9 = vmul.bf16 %v8759_v15, %v1937_v50  ;;  %v1974_v16 = vmul.bf16 %v8755_v14, %v1939_v11 }
 0x43a   : > { %v1989_v18 = vunpack.c.l.bf16 %v1973_v9  ;;  %6808 = vrot.lane.b32.xlu0 %v6807_v57, %s7962_s7  ;;  %v1990_v12 = vunpack.c.l.bf16 %v1974_v16  ;;  %v6057_v57 = vld [vmem:[%s12505_s1 + $0x340] sm:$0xf]  ;;  %v6061_v16 = vld [vmem:[%s12505_s1 + $0x350] sm:$0xf] }
 0x43b   : > { %v1941_v20 = vpop.permute.xlu1 %1940  ;;  %v1943_v22 = vpop.permute.xlu0 %1942 }
 0x43c   : > { %v6812_v21 = vpack.i.bf16 %v1989_v18, %v1988_v13  ;;  %v1975_v23 = vmul.bf16 %v8759_v15, %v1941_v20  ;;  %v1976_v30 = vmul.bf16 %v8755_v14, %v1943_v22  ;;  %v6058_v14 = vld [vmem:[%s12505_s1 + $0x344] sm:$0xf]  ;;  %v6060_v13 = vld [vmem:[%s12505_s1 + $0x34c] sm:$0xf]  ;;  %v6062_v18 = vld [vmem:[%s12505_s1 + $0x354] sm:$0xf] }
 0x43d   : > { %v6063_v20 = vld [vmem:[%s12505_s1 + $0x358] sm:$0xf]  ;;  %v6064_v22 = vld [vmem:[%s12505_s1 + $0x35c] sm:$0xf] }
 0x43e   : > { %v1991_v48 = vunpack.c.l.bf16 %v1975_v23  ;;  %6813 = vrot.lane.b32.xlu1 %v6812_v21, %s7962_s7  ;;  %v1992_v50 = vunpack.c.l.bf16 %v1976_v30  ;;  %v6065_v21 = vld [vmem:[%s12505_s1 + $0x360] sm:$0xf]  ;;  %v6066_v23 = vld [vmem:[%s12505_s1 + $0x364] sm:$0xf]  ;;  %v6068_v30 = vld [vmem:[%s12505_s1 + $0x36c] sm:$0xf] }
 0x43f   : > { %v1945_v17 = vpop.permute.xlu1 %1944 }
 0x440   : > { %v6817_v19 = vpack.i.bf16 %v1991_v48, %v1990_v12  ;;  %v1977_v51 = vmul.bf16 %v8759_v15, %v1945_v17  ;;  %v6059_v15 = vld [vmem:[%s12505_s1 + $0x348] sm:$0xf]  ;;  %v6069_v48 = vld [vmem:[%s12505_s1 + $0x370] sm:$0xf]  ;;  %v6070_v17 = vld [vmem:[%s12505_s1 + $0x374] sm:$0xf] }
 0x441   : > { %v6067_v12 = vld [vmem:[%s12505_s1 + $0x368] sm:$0xf] }
 0x442   : > { %v1993_v11 = vunpack.c.l.bf16 %v1977_v51  ;;  %6818 = vrot.lane.b32.xlu0 %v6817_v19, %s7962_s7  ;;  %v6071_v19 = vld [vmem:[%s12505_s1 + $0x378] sm:$0xf]  ;;  %v6072_v51 = vld [vmem:[%s12505_s1 + $0x37c] sm:$0xf] }
 0x444   : > { %v6822_v9 = vpack.i.bf16 %v1993_v11, %v1992_v50 }
 0x446   : > { %6823 = vrot.lane.b32.xlu1 %v6822_v9, %s7962_s7  ;;  %2175 = vrot.lane.b32.xlu0 %v6057_v57, %s7959_s30 }
 0x44a   : > { %2177 = vrot.lane.b32.xlu1 %v6058_v14, %s7959_s30  ;;  %2179 = vrot.lane.b32.xlu0 %v6059_v15, %s7959_s30 }
 0x44e   : > { %2181 = vrot.lane.b32.xlu1 %v6060_v13, %s7959_s30  ;;  %2183 = vrot.lane.b32.xlu0 %v6061_v16, %s7959_s30 }
 0x452   : > { %2185 = vrot.lane.b32.xlu1 %v6062_v18, %s7959_s30  ;;  %2187 = vrot.lane.b32.xlu0 %v6063_v20, %s7959_s30  ;;  %v8969_v18 = vld [vmem:[%s8230_s5 + $0x20] sm:$0xf] }
 0x456   : > { %2189 = vrot.lane.b32.xlu1 %v6064_v22, %s7959_s30  ;;  %2191 = vrot.lane.b32.xlu0 %v6065_v21, %s7959_s30  ;;  %v8973_v21 = vld [vmem:[%s8230_s5 + $0x24] sm:$0xf] }
 0x45a   : > { %2193 = vrot.lane.b32.xlu1 %v6066_v23, %s7959_s30  ;;  %2195 = vrot.lane.b32.xlu0 %v6067_v12, %s7959_s30 }
 0x45e   : > { %2197 = vrot.lane.b32.xlu1 %v6068_v30, %s7959_s30  ;;  %2199 = vrot.lane.b32.xlu0 %v6069_v48, %s7959_s30 }
 0x462   : > { %2201 = vrot.lane.b32.xlu1 %v6070_v17, %s7959_s30  ;;  %2203 = vrot.lane.b32.xlu0 %v6071_v19, %s7959_s30 }
 0x466   : > { %2205 = vrot.lane.b32.xlu1 %v6072_v51, %s7959_s30 }
 0x49c   : > { %v8952_v50 = vpop.permute.xlu0 %6788 }
 0x49d   : > { %12700 = vst [vmem:[#allocation46_spill] sm:$0xff] %v8952_v50 }
 0x4a0   : > { %v8954_v11 = vpop.permute.xlu1 %6793 }
 0x4a1   : > { %12701 = vst [vmem:[#allocation47_spill] sm:$0xff] %v8954_v11 }
 0x4a4   : > { %v8956_v57 = vpop.permute.xlu0 %6798 }
 0x4a5   : > { %12702 = vst [vmem:[#allocation48_spill] sm:$0xff] %v8956_v57 }
 0x4a8   : > { %v8958_v9 = vpop.permute.xlu1 %6803 }
 0x4a9   : > { %12703 = vst [vmem:[#allocation49_spill] sm:$0xff] %v8958_v9 }
 0x4ac   : > { %v8960_v14 = vpop.permute.xlu0 %6808 }
 0x4ad   : > { %12704 = vst [vmem:[#allocation50_spill] sm:$0xff] %v8960_v14 }
 0x4b0   : > { %v8962_v15 = vpop.permute.xlu1 %6813 }
 0x4b1   : > { %12705 = vst [vmem:[#allocation51_spill] sm:$0xff] %v8962_v15 }
 0x4b4   : > { %v8964_v13 = vpop.permute.xlu0 %6818 }
 0x4b5   : > { %12706 = vst [vmem:[#allocation52_spill] sm:$0xff] %v8964_v13 }
 0x4b8   : > { %v8966_v16 = vpop.permute.xlu1 %6823  ;;  %v2176_v20 = vpop.permute.xlu0 %2175 }
 0x4b9   : > { %12707 = vst [vmem:[#allocation53_spill] sm:$0xff] %v8966_v16  ;;  %v2223_v22 = vmul.bf16 %v8969_v18, %v2176_v20 }
 0x4bb   : > { %v2239_v48 = vunpack.c.l.bf16 %v2223_v22 }
 0x4bc   : > { %v2178_v23 = vpop.permute.xlu1 %2177  ;;  %v2180_v12 = vpop.permute.xlu0 %2179 }
 0x4bd   : > { %v2224_v30 = vmul.bf16 %v8973_v21, %v2178_v23  ;;  %v2225_v17 = vmul.bf16 %v8969_v18, %v2180_v12 }
 0x4bf   : > { %v2240_v19 = vunpack.c.l.bf16 %v2224_v30  ;;  %v2241_v57 = vunpack.c.l.bf16 %v2225_v17 }
 0x4c0   : > { %v2182_v51 = vpop.permute.xlu1 %2181  ;;  %v2184_v15 = vpop.permute.xlu0 %2183 }
 0x4c1   : > { %v6827_v14 = vpack.i.bf16 %v2240_v19, %v2239_v48  ;;  %v2226_v9 = vmul.bf16 %v8973_v21, %v2182_v51  ;;  %v2227_v16 = vmul.bf16 %v8969_v18, %v2184_v15 }
 0x4c3   : > { %v2242_v11 = vunpack.c.l.bf16 %v2226_v9  ;;  %6828 = vrot.lane.b32.xlu0 %v6827_v14, %s7961_s6  ;;  %v2243_v22 = vunpack.c.l.bf16 %v2227_v16 }
 0x4c4   : > { %v2186_v20 = vpop.permute.xlu1 %2185  ;;  %v2188_v13 = vpop.permute.xlu0 %2187 }
 0x4c5   : > { %v6832_v50 = vpack.i.bf16 %v2242_v11, %v2241_v57  ;;  %v2228_v23 = vmul.bf16 %v8973_v21, %v2186_v20  ;;  %v2229_v12 = vmul.bf16 %v8969_v18, %v2188_v13 }
 0x4c7   : > { %v2244_v30 = vunpack.c.l.bf16 %v2228_v23  ;;  %6833 = vrot.lane.b32.xlu1 %v6832_v50, %s7961_s6  ;;  %v2245_v15 = vunpack.c.l.bf16 %v2229_v12 }
 0x4c8   : > { %v2190_v48 = vpop.permute.xlu1 %2189  ;;  %v2192_v19 = vpop.permute.xlu0 %2191 }
 0x4c9   : > { %v6837_v51 = vpack.i.bf16 %v2244_v30, %v2243_v22  ;;  %v2230_v17 = vmul.bf16 %v8973_v21, %v2190_v48  ;;  %v2231_v9 = vmul.bf16 %v8969_v18, %v2192_v19 }
 0x4cb   : > { %v2246_v14 = vunpack.c.l.bf16 %v2230_v17  ;;  %6838 = vrot.lane.b32.xlu0 %v6837_v51, %s7961_s6  ;;  %v2247_v13 = vunpack.c.l.bf16 %v2231_v9 }
 0x4cc   : > { %v2194_v11 = vpop.permute.xlu1 %2193  ;;  %v2196_v57 = vpop.permute.xlu0 %2195 }
 0x4cd   : > { %v6842_v20 = vpack.i.bf16 %v2246_v14, %v2245_v15  ;;  %v2232_v16 = vmul.bf16 %v8973_v21, %v2194_v11  ;;  %v2233_v23 = vmul.bf16 %v8969_v18, %v2196_v57 }
 0x4cf   : > { %v2248_v50 = vunpack.c.l.bf16 %v2232_v16  ;;  %6843 = vrot.lane.b32.xlu1 %v6842_v20, %s7961_s6  ;;  %v2249_v19 = vunpack.c.l.bf16 %v2233_v23 }
 0x4d0   : > { %v2198_v22 = vpop.permute.xlu1 %2197  ;;  %v2200_v30 = vpop.permute.xlu0 %2199 }
 0x4d1   : > { %v6847_v48 = vpack.i.bf16 %v2248_v50, %v2247_v13  ;;  %v2234_v12 = vmul.bf16 %v8973_v21, %v2198_v22  ;;  %v2235_v17 = vmul.bf16 %v8969_v18, %v2200_v30 }
 0x4d3   : > { %v2250_v51 = vunpack.c.l.bf16 %v2234_v12  ;;  %6848 = vrot.lane.b32.xlu0 %v6847_v48, %s7961_s6  ;;  %v2251_v57 = vunpack.c.l.bf16 %v2235_v17  ;;  %v6073_v48 = vld [vmem:[%s12505_s1 + $0x380] sm:$0xf]  ;;  %v6075_v17 = vld [vmem:[%s12505_s1 + $0x388] sm:$0xf] }
 0x4d4   : > { %v2202_v15 = vpop.permute.xlu1 %2201  ;;  %v2204_v14 = vpop.permute.xlu0 %2203 }
 0x4d5   : > { %v6852_v11 = vpack.i.bf16 %v2250_v51, %v2249_v19  ;;  %v2236_v9 = vmul.bf16 %v8973_v21, %v2202_v15  ;;  %v2237_v16 = vmul.bf16 %v8969_v18, %v2204_v14  ;;  %v6074_v19 = vld [vmem:[%s12505_s1 + $0x384] sm:$0xf]  ;;  %v6076_v51 = vld [vmem:[%s12505_s1 + $0x38c] sm:$0xf]  ;;  %v6077_v15 = vld [vmem:[%s12505_s1 + $0x390] sm:$0xf] }
 0x4d6   : > { %v6078_v14 = vld [vmem:[%s12505_s1 + $0x394] sm:$0xf] }
 0x4d7   : > { %v2252_v20 = vunpack.c.l.bf16 %v2236_v9  ;;  %6853 = vrot.lane.b32.xlu1 %v6852_v11, %s7961_s6  ;;  %v2253_v22 = vunpack.c.l.bf16 %v2237_v16  ;;  %v6079_v11 = vld [vmem:[%s12505_s1 + $0x398] sm:$0xf]  ;;  %v6080_v9 = vld [vmem:[%s12505_s1 + $0x39c] sm:$0xf]  ;;  %v6082_v16 = vld [vmem:[%s12505_s1 + $0x3a4] sm:$0xf] }
 0x4d8   : > { %v2206_v13 = vpop.permute.xlu1 %2205 }
 0x4d9   : > { %v6857_v50 = vpack.i.bf16 %v2252_v20, %v2251_v57  ;;  %v2238_v23 = vmul.bf16 %v8973_v21, %v2206_v13  ;;  %v6081_v57 = vld [vmem:[%s12505_s1 + $0x3a0] sm:$0xf]  ;;  %v6083_v20 = vld [vmem:[%s12505_s1 + $0x3a8] sm:$0xf]  ;;  %v6084_v13 = vld [vmem:[%s12505_s1 + $0x3ac] sm:$0xf] }
 0x4db   : > { %v2254_v30 = vunpack.c.l.bf16 %v2238_v23  ;;  %6858 = vrot.lane.b32.xlu0 %v6857_v50, %s7961_s6  ;;  %v6085_v50 = vld [vmem:[%s12505_s1 + $0x3b0] sm:$0xf]  ;;  %v6086_v23 = vld [vmem:[%s12505_s1 + $0x3b4] sm:$0xf] }
 0x4dd   : > { %v6862_v12 = vpack.i.bf16 %v2254_v30, %v2253_v22  ;;  %v6087_v22 = vld [vmem:[%s12505_s1 + $0x3b8] sm:$0xf]  ;;  %v6088_v30 = vld [vmem:[%s12505_s1 + $0x3bc] sm:$0xf] }
 0x4df   : > { %6863 = vrot.lane.b32.xlu1 %v6862_v12, %s7961_s6  ;;  %2368 = vrot.lane.b32.xlu0 %v6073_v48, %s7960_s4 }
 0x4e3   : > { %2370 = vrot.lane.b32.xlu1 %v6074_v19, %s7960_s4  ;;  %2372 = vrot.lane.b32.xlu0 %v6075_v17, %s7960_s4 }
 0x4e7   : > { %2374 = vrot.lane.b32.xlu1 %v6076_v51, %s7960_s4  ;;  %2376 = vrot.lane.b32.xlu0 %v6077_v15, %s7960_s4 }
 0x4eb   : > { %2378 = vrot.lane.b32.xlu1 %v6078_v14, %s7960_s4  ;;  %2380 = vrot.lane.b32.xlu0 %v6079_v11, %s7960_s4 }
 0x4ef   : > { %2382 = vrot.lane.b32.xlu1 %v6080_v9, %s7960_s4  ;;  %2384 = vrot.lane.b32.xlu0 %v6081_v57, %s7960_s4 }
 0x4f3   : > { %2386 = vrot.lane.b32.xlu1 %v6082_v16, %s7960_s4  ;;  %2388 = vrot.lane.b32.xlu0 %v6083_v20, %s7960_s4 }
 0x4f7   : > { %2390 = vrot.lane.b32.xlu1 %v6084_v13, %s7960_s4  ;;  %2392 = vrot.lane.b32.xlu0 %v6085_v50, %s7960_s4 }
 0x4fb   : > { %2394 = vrot.lane.b32.xlu1 %v6086_v23, %s7960_s4  ;;  %2396 = vrot.lane.b32.xlu0 %v6087_v22, %s7960_s4 }
 0x4ff   : > { %2398 = vrot.lane.b32.xlu1 %v6088_v30, %s7960_s4 }
 0x535   : > { %v9062_v48 = vpop.permute.xlu0 %6828 }
 0x536   : > { %12708 = vst [vmem:[#allocation54_spill] sm:$0xff] %v9062_v48 }
 0x539   : > { %v9064_v12 = vpop.permute.xlu1 %6833 }
 0x53a   : > { %12709 = vst [vmem:[#allocation55_spill] sm:$0xff] %v9064_v12 }
 0x53d   : > { %v9066_v19 = vpop.permute.xlu0 %6838 }
 0x53e   : > { %12710 = vst [vmem:[#allocation56_spill] sm:$0xff] %v9066_v19 }
 0x541   : > { %v9068_v17 = vpop.permute.xlu1 %6843 }
 0x542   : > { %12711 = vst [vmem:[#allocation57_spill] sm:$0xff] %v9068_v17 }
 0x545   : > { %v9070_v51 = vpop.permute.xlu0 %6848 }
 0x546   : > { %12712 = vst [vmem:[#allocation58_spill] sm:$0xff] %v9070_v51 }
 0x549   : > { %v9072_v15 = vpop.permute.xlu1 %6853 }
 0x54a   : > { %12713 = vst [vmem:[#allocation59_spill] sm:$0xff] %v9072_v15 }
 0x54d   : > { %v9074_v14 = vpop.permute.xlu0 %6858 }
 0x54e   : > { %12714 = vst [vmem:[#allocation60_spill] sm:$0xff] %v9074_v14 }
 0x551   : > { %v9076_v11 = vpop.permute.xlu1 %6863  ;;  %v2369_v9 = vpop.permute.xlu0 %2368 }
 0x552   : > { %12715 = vst [vmem:[#allocation61_spill] sm:$0xff] %v9076_v11  ;;  %v2416_v57 = vmul.bf16 %v8969_v18, %v2369_v9 }
 0x554   : > { %v2432_v50 = vunpack.c.l.bf16 %v2416_v57 }
 0x555   : > { %v2371_v16 = vpop.permute.xlu1 %2370  ;;  %v2373_v20 = vpop.permute.xlu0 %2372 }
 0x556   : > { %v2417_v13 = vmul.bf16 %v8973_v21, %v2371_v16  ;;  %v2418_v23 = vmul.bf16 %v8969_v18, %v2373_v20 }
 0x558   : > { %v2433_v22 = vunpack.c.l.bf16 %v2417_v13  ;;  %v2434_v19 = vunpack.c.l.bf16 %v2418_v23 }
 0x559   : > { %v2375_v30 = vpop.permute.xlu1 %2374  ;;  %v2377_v17 = vpop.permute.xlu0 %2376 }
 0x55a   : > { %v6867_v51 = vpack.i.bf16 %v2433_v22, %v2432_v50  ;;  %v2419_v15 = vmul.bf16 %v8973_v21, %v2375_v30  ;;  %v2420_v12 = vmul.bf16 %v8969_v18, %v2377_v17 }
 0x55c   : > { %v2435_v48 = vunpack.c.l.bf16 %v2419_v15  ;;  %6868 = vrot.lane.b32.xlu0 %v6867_v51, %s7962_s7  ;;  %v2436_v57 = vunpack.c.l.bf16 %v2420_v12 }
 0x55d   : > { %v2379_v9 = vpop.permute.xlu1 %2378  ;;  %v2381_v11 = vpop.permute.xlu0 %2380 }
 0x55e   : > { %v6872_v14 = vpack.i.bf16 %v2435_v48, %v2434_v19  ;;  %v2421_v16 = vmul.bf16 %v8973_v21, %v2379_v9  ;;  %v2422_v20 = vmul.bf16 %v8969_v18, %v2381_v11 }
 0x560   : > { %v2437_v13 = vunpack.c.l.bf16 %v2421_v16  ;;  %6873 = vrot.lane.b32.xlu1 %v6872_v14, %s7962_s7  ;;  %v2438_v17 = vunpack.c.l.bf16 %v2422_v20 }
 0x561   : > { %v2383_v50 = vpop.permute.xlu1 %2382  ;;  %v2385_v22 = vpop.permute.xlu0 %2384 }
 0x562   : > { %v6877_v30 = vpack.i.bf16 %v2437_v13, %v2436_v57  ;;  %v2423_v23 = vmul.bf16 %v8973_v21, %v2383_v50  ;;  %v2424_v15 = vmul.bf16 %v8969_v18, %v2385_v22 }
 0x564   : > { %v2439_v51 = vunpack.c.l.bf16 %v2423_v23  ;;  %6878 = vrot.lane.b32.xlu0 %v6877_v30, %s7962_s7  ;;  %v2440_v11 = vunpack.c.l.bf16 %v2424_v15 }
 0x565   : > { %v2387_v48 = vpop.permute.xlu1 %2386  ;;  %v2389_v19 = vpop.permute.xlu0 %2388 }
 0x566   : > { %v6882_v9 = vpack.i.bf16 %v2439_v51, %v2438_v17  ;;  %v2425_v12 = vmul.bf16 %v8973_v21, %v2387_v48  ;;  %v2426_v16 = vmul.bf16 %v8969_v18, %v2389_v19 }
 0x568   : > { %v2441_v14 = vunpack.c.l.bf16 %v2425_v12  ;;  %6883 = vrot.lane.b32.xlu1 %v6882_v9, %s7962_s7  ;;  %v2442_v22 = vunpack.c.l.bf16 %v2426_v16 }
 0x569   : > { %v2391_v57 = vpop.permute.xlu1 %2390  ;;  %v2393_v13 = vpop.permute.xlu0 %2392 }
 0x56a   : > { %v6887_v50 = vpack.i.bf16 %v2441_v14, %v2440_v11  ;;  %v2427_v20 = vmul.bf16 %v8973_v21, %v2391_v57  ;;  %v2428_v23 = vmul.bf16 %v8969_v18, %v2393_v13 }
 0x56c   : > { %v2443_v30 = vunpack.c.l.bf16 %v2427_v20  ;;  %6888 = vrot.lane.b32.xlu0 %v6887_v50, %s7962_s7  ;;  %v2444_v19 = vunpack.c.l.bf16 %v2428_v23  ;;  %v6107_v50 = vld [vmem:[%s12505_s1 + $0x400] sm:$0xf]  ;;  %v6111_v23 = vld [vmem:[%s12505_s1 + $0x410] sm:$0xf] }
 0x56d   : > { %v2395_v17 = vpop.permute.xlu1 %2394  ;;  %v2397_v51 = vpop.permute.xlu0 %2396 }
 0x56e   : > { %v6892_v48 = vpack.i.bf16 %v2443_v30, %v2442_v22  ;;  %v2429_v15 = vmul.bf16 %v8973_v21, %v2395_v17  ;;  %v2430_v12 = vmul.bf16 %v8969_v18, %v2397_v51  ;;  %v6108_v18 = vld [vmem:[%s12505_s1 + $0x404] sm:$0xf]  ;;  %v6110_v22 = vld [vmem:[%s12505_s1 + $0x40c] sm:$0xf]  ;;  %v6112_v30 = vld [vmem:[%s12505_s1 + $0x414] sm:$0xf] }
 0x56f   : > { %v6113_v17 = vld [vmem:[%s12505_s1 + $0x418] sm:$0xf]  ;;  %v6114_v51 = vld [vmem:[%s12505_s1 + $0x41c] sm:$0xf] }
 0x570   : > { %v2445_v9 = vunpack.c.l.bf16 %v2429_v15  ;;  %6893 = vrot.lane.b32.xlu1 %v6892_v48, %s7962_s7  ;;  %v2446_v57 = vunpack.c.l.bf16 %v2430_v12  ;;  %v6115_v48 = vld [vmem:[%s12505_s1 + $0x420] sm:$0xf]  ;;  %v6116_v15 = vld [vmem:[%s12505_s1 + $0x424] sm:$0xf]  ;;  %v6118_v12 = vld [vmem:[%s12505_s1 + $0x42c] sm:$0xf] }
 0x571   : > { %v2399_v11 = vpop.permute.xlu1 %2398 }
 0x572   : > { %v6897_v14 = vpack.i.bf16 %v2445_v9, %v2444_v19  ;;  %v2431_v16 = vmul.bf16 %v8973_v21, %v2399_v11  ;;  %v6109_v21 = vld [vmem:[%s12505_s1 + $0x408] sm:$0xf]  ;;  %v6119_v9 = vld [vmem:[%s12505_s1 + $0x430] sm:$0xf]  ;;  %v6120_v11 = vld [vmem:[%s12505_s1 + $0x434] sm:$0xf] }
 0x573   : > { %v6117_v19 = vld [vmem:[%s12505_s1 + $0x428] sm:$0xf] }
 0x574   : > { %v2447_v13 = vunpack.c.l.bf16 %v2431_v16  ;;  %6898 = vrot.lane.b32.xlu0 %v6897_v14, %s7962_s7  ;;  %v6121_v14 = vld [vmem:[%s12505_s1 + $0x438] sm:$0xf]  ;;  %v6122_v16 = vld [vmem:[%s12505_s1 + $0x43c] sm:$0xf] }
 0x576   : > { %v6902_v20 = vpack.i.bf16 %v2447_v13, %v2446_v57 }
 0x578   : > { %6903 = vrot.lane.b32.xlu1 %v6902_v20, %s7962_s7  ;;  %2629 = vrot.lane.b32.xlu0 %v6107_v50, %s7959_s30 }
 0x57c   : > { %2631 = vrot.lane.b32.xlu1 %v6108_v18, %s7959_s30  ;;  %2633 = vrot.lane.b32.xlu0 %v6109_v21, %s7959_s30 }
 0x580   : > { %2635 = vrot.lane.b32.xlu1 %v6110_v22, %s7959_s30  ;;  %2637 = vrot.lane.b32.xlu0 %v6111_v23, %s7959_s30 }
 0x584   : > { %2639 = vrot.lane.b32.xlu1 %v6112_v30, %s7959_s30  ;;  %2641 = vrot.lane.b32.xlu0 %v6113_v17, %s7959_s30  ;;  %v9183_v30 = vld [vmem:[%s8230_s5 + $0x28] sm:$0xf] }
 0x588   : > { %2643 = vrot.lane.b32.xlu1 %v6114_v51, %s7959_s30  ;;  %2645 = vrot.lane.b32.xlu0 %v6115_v48, %s7959_s30  ;;  %v9187_v48 = vld [vmem:[%s8230_s5 + $0x2c] sm:$0xf] }
 0x58c   : > { %2647 = vrot.lane.b32.xlu1 %v6116_v15, %s7959_s30  ;;  %2649 = vrot.lane.b32.xlu0 %v6117_v19, %s7959_s30 }
 0x590   : > { %2651 = vrot.lane.b32.xlu1 %v6118_v12, %s7959_s30  ;;  %2653 = vrot.lane.b32.xlu0 %v6119_v9, %s7959_s30 }
 0x594   : > { %2655 = vrot.lane.b32.xlu1 %v6120_v11, %s7959_s30  ;;  %2657 = vrot.lane.b32.xlu0 %v6121_v14, %s7959_s30 }
 0x598   : > { %2659 = vrot.lane.b32.xlu1 %v6122_v16, %s7959_s30 }
 0x5ce   : > { %v9166_v57 = vpop.permute.xlu0 %6868 }
 0x5cf   : > { %12716 = vst [vmem:[#allocation62_spill] sm:$0xff] %v9166_v57 }
 0x5d2   : > { %v9168_v13 = vpop.permute.xlu1 %6873 }
 0x5d3   : > { %12717 = vst [vmem:[#allocation63_spill] sm:$0xff] %v9168_v13 }
 0x5d6   : > { %v9170_v50 = vpop.permute.xlu0 %6878 }
 0x5d7   : > { %12718 = vst [vmem:[#allocation64_spill] sm:$0xff] %v9170_v50 }
 0x5da   : > { %v9172_v20 = vpop.permute.xlu1 %6883 }
 0x5db   : > { %12719 = vst [vmem:[#allocation65_spill] sm:$0xff] %v9172_v20 }
 0x5de   : > { %v9174_v18 = vpop.permute.xlu0 %6888 }
 0x5df   : > { %12720 = vst [vmem:[#allocation66_spill] sm:$0xff] %v9174_v18 }
 0x5e2   : > { %v9176_v21 = vpop.permute.xlu1 %6893 }
 0x5e3   : > { %12721 = vst [vmem:[#allocation67_spill] sm:$0xff] %v9176_v21 }
 0x5e6   : > { %v9178_v22 = vpop.permute.xlu0 %6898 }
 0x5e7   : > { %12722 = vst [vmem:[#allocation68_spill] sm:$0xff] %v9178_v22 }
 0x5ea   : > { %v9180_v23 = vpop.permute.xlu1 %6903  ;;  %v2630_v17 = vpop.permute.xlu0 %2629 }
 0x5eb   : > { %12723 = vst [vmem:[#allocation69_spill] sm:$0xff] %v9180_v23  ;;  %v2677_v51 = vmul.bf16 %v9183_v30, %v2630_v17 }
 0x5ed   : > { %v2693_v9 = vunpack.c.l.bf16 %v2677_v51 }
 0x5ee   : > { %v2632_v15 = vpop.permute.xlu1 %2631  ;;  %v2634_v19 = vpop.permute.xlu0 %2633 }
 0x5ef   : > { %v2678_v12 = vmul.bf16 %v9187_v48, %v2632_v15  ;;  %v2679_v11 = vmul.bf16 %v9183_v30, %v2634_v19 }
 0x5f1   : > { %v2694_v14 = vunpack.c.l.bf16 %v2678_v12  ;;  %v2695_v50 = vunpack.c.l.bf16 %v2679_v11 }
 0x5f2   : > { %v2636_v16 = vpop.permute.xlu1 %2635  ;;  %v2638_v21 = vpop.permute.xlu0 %2637 }
 0x5f3   : > { %v6907_v18 = vpack.i.bf16 %v2694_v14, %v2693_v9  ;;  %v2680_v20 = vmul.bf16 %v9187_v48, %v2636_v16  ;;  %v2681_v13 = vmul.bf16 %v9183_v30, %v2638_v21 }
 0x5f5   : > { %v2696_v57 = vunpack.c.l.bf16 %v2680_v20  ;;  %6908 = vrot.lane.b32.xlu0 %v6907_v18, %s7961_s6  ;;  %v2697_v51 = vunpack.c.l.bf16 %v2681_v13 }
 0x5f6   : > { %v2640_v17 = vpop.permute.xlu1 %2639  ;;  %v2642_v23 = vpop.permute.xlu0 %2641 }
 0x5f7   : > { %v6912_v22 = vpack.i.bf16 %v2696_v57, %v2695_v50  ;;  %v2682_v15 = vmul.bf16 %v9187_v48, %v2640_v17  ;;  %v2683_v19 = vmul.bf16 %v9183_v30, %v2642_v23 }
 0x5f9   : > { %v2698_v12 = vunpack.c.l.bf16 %v2682_v15  ;;  %6913 = vrot.lane.b32.xlu1 %v6912_v22, %s7961_s6  ;;  %v2699_v21 = vunpack.c.l.bf16 %v2683_v19 }
 0x5fa   : > { %v2644_v9 = vpop.permute.xlu1 %2643  ;;  %v2646_v14 = vpop.permute.xlu0 %2645 }
 0x5fb   : > { %v6917_v16 = vpack.i.bf16 %v2698_v12, %v2697_v51  ;;  %v2684_v11 = vmul.bf16 %v9187_v48, %v2644_v9  ;;  %v2685_v20 = vmul.bf16 %v9183_v30, %v2646_v14 }
 0x5fd   : > { %v2700_v18 = vunpack.c.l.bf16 %v2684_v11  ;;  %6918 = vrot.lane.b32.xlu0 %v6917_v16, %s7961_s6  ;;  %v2701_v23 = vunpack.c.l.bf16 %v2685_v20 }
 0x5fe   : > { %v2648_v57 = vpop.permute.xlu1 %2647  ;;  %v2650_v50 = vpop.permute.xlu0 %2649 }
 0x5ff   : > { %v6922_v17 = vpack.i.bf16 %v2700_v18, %v2699_v21  ;;  %v2686_v13 = vmul.bf16 %v9187_v48, %v2648_v57  ;;  %v2687_v15 = vmul.bf16 %v9183_v30, %v2650_v50 }
 0x601   : > { %v2702_v22 = vunpack.c.l.bf16 %v2686_v13  ;;  %6923 = vrot.lane.b32.xlu1 %v6922_v17, %s7961_s6  ;;  %v2703_v14 = vunpack.c.l.bf16 %v2687_v15 }
 0x602   : > { %v2652_v51 = vpop.permute.xlu1 %2651  ;;  %v2654_v12 = vpop.permute.xlu0 %2653 }
 0x603   : > { %v6927_v9 = vpack.i.bf16 %v2702_v22, %v2701_v23  ;;  %v2688_v19 = vmul.bf16 %v9187_v48, %v2652_v51  ;;  %v2689_v11 = vmul.bf16 %v9183_v30, %v2654_v12 }
 0x605   : > { %v2704_v16 = vunpack.c.l.bf16 %v2688_v19  ;;  %6928 = vrot.lane.b32.xlu0 %v6927_v9, %s7961_s6  ;;  %v2705_v50 = vunpack.c.l.bf16 %v2689_v11  ;;  %v6123_v9 = vld [vmem:[%s12505_s1 + $0x440] sm:$0xf]  ;;  %v6125_v11 = vld [vmem:[%s12505_s1 + $0x448] sm:$0xf] }
 0x606   : > { %v2656_v21 = vpop.permute.xlu1 %2655  ;;  %v2658_v18 = vpop.permute.xlu0 %2657 }
 0x607   : > { %v6932_v57 = vpack.i.bf16 %v2704_v16, %v2703_v14  ;;  %v2690_v20 = vmul.bf16 %v9187_v48, %v2656_v21  ;;  %v2691_v13 = vmul.bf16 %v9183_v30, %v2658_v18  ;;  %v6124_v14 = vld [vmem:[%s12505_s1 + $0x444] sm:$0xf]  ;;  %v6126_v16 = vld [vmem:[%s12505_s1 + $0x44c] sm:$0xf]  ;;  %v6127_v21 = vld [vmem:[%s12505_s1 + $0x450] sm:$0xf] }
 0x608   : > { %v6128_v18 = vld [vmem:[%s12505_s1 + $0x454] sm:$0xf] }
 0x609   : > { %v2706_v17 = vunpack.c.l.bf16 %v2690_v20  ;;  %6933 = vrot.lane.b32.xlu1 %v6932_v57, %s7961_s6  ;;  %v2707_v51 = vunpack.c.l.bf16 %v2691_v13  ;;  %v6129_v57 = vld [vmem:[%s12505_s1 + $0x458] sm:$0xf]  ;;  %v6130_v20 = vld [vmem:[%s12505_s1 + $0x45c] sm:$0xf]  ;;  %v6132_v13 = vld [vmem:[%s12505_s1 + $0x464] sm:$0xf] }
 0x60a   : > { %v2660_v23 = vpop.permute.xlu1 %2659 }
 0x60b   : > { %v6937_v22 = vpack.i.bf16 %v2706_v17, %v2705_v50  ;;  %v2692_v15 = vmul.bf16 %v9187_v48, %v2660_v23  ;;  %v6131_v50 = vld [vmem:[%s12505_s1 + $0x460] sm:$0xf]  ;;  %v6133_v17 = vld [vmem:[%s12505_s1 + $0x468] sm:$0xf]  ;;  %v6134_v23 = vld [vmem:[%s12505_s1 + $0x46c] sm:$0xf] }
 0x60d   : > { %v2708_v12 = vunpack.c.l.bf16 %v2692_v15  ;;  %6938 = vrot.lane.b32.xlu0 %v6937_v22, %s7961_s6  ;;  %v6135_v22 = vld [vmem:[%s12505_s1 + $0x470] sm:$0xf]  ;;  %v6136_v15 = vld [vmem:[%s12505_s1 + $0x474] sm:$0xf] }
 0x60f   : > { %v6942_v19 = vpack.i.bf16 %v2708_v12, %v2707_v51  ;;  %v6137_v51 = vld [vmem:[%s12505_s1 + $0x478] sm:$0xf]  ;;  %v6138_v12 = vld [vmem:[%s12505_s1 + $0x47c] sm:$0xf] }
 0x611   : > { %6943 = vrot.lane.b32.xlu1 %v6942_v19, %s7961_s6  ;;  %2822 = vrot.lane.b32.xlu0 %v6123_v9, %s7960_s4 }
 0x615   : > { %2824 = vrot.lane.b32.xlu1 %v6124_v14, %s7960_s4  ;;  %2826 = vrot.lane.b32.xlu0 %v6125_v11, %s7960_s4 }
 0x619   : > { %2828 = vrot.lane.b32.xlu1 %v6126_v16, %s7960_s4  ;;  %2830 = vrot.lane.b32.xlu0 %v6127_v21, %s7960_s4 }
 0x61d   : > { %2832 = vrot.lane.b32.xlu1 %v6128_v18, %s7960_s4  ;;  %2834 = vrot.lane.b32.xlu0 %v6129_v57, %s7960_s4 }
 0x621   : > { %2836 = vrot.lane.b32.xlu1 %v6130_v20, %s7960_s4  ;;  %2838 = vrot.lane.b32.xlu0 %v6131_v50, %s7960_s4 }
 0x625   : > { %2840 = vrot.lane.b32.xlu1 %v6132_v13, %s7960_s4  ;;  %2842 = vrot.lane.b32.xlu0 %v6133_v17, %s7960_s4 }
 0x629   : > { %2844 = vrot.lane.b32.xlu1 %v6134_v23, %s7960_s4  ;;  %2846 = vrot.lane.b32.xlu0 %v6135_v22, %s7960_s4 }
 0x62d   : > { %2848 = vrot.lane.b32.xlu1 %v6136_v15, %s7960_s4  ;;  %2850 = vrot.lane.b32.xlu0 %v6137_v51, %s7960_s4 }
 0x631   : > { %2852 = vrot.lane.b32.xlu1 %v6138_v12, %s7960_s4 }
 0x667   : > { %v9276_v9 = vpop.permute.xlu0 %6908 }
 0x668   : > { %12724 = vst [vmem:[#allocation70_spill] sm:$0xff] %v9276_v9 }
 0x66b   : > { %v9278_v19 = vpop.permute.xlu1 %6913 }
 0x66c   : > { %12725 = vst [vmem:[#allocation71_spill] sm:$0xff] %v9278_v19 }
 0x66f   : > { %v9280_v14 = vpop.permute.xlu0 %6918 }
 0x670   : > { %12726 = vst [vmem:[#allocation72_spill] sm:$0xff] %v9280_v14 }
 0x673   : > { %v9282_v11 = vpop.permute.xlu1 %6923 }
 0x674   : > { %12727 = vst [vmem:[#allocation73_spill] sm:$0xff] %v9282_v11 }
 0x677   : > { %v9284_v16 = vpop.permute.xlu0 %6928 }
 0x678   : > { %12728 = vst [vmem:[#allocation74_spill] sm:$0xff] %v9284_v16 }
 0x67b   : > { %v9286_v21 = vpop.permute.xlu1 %6933 }
 0x67c   : > { %12729 = vst [vmem:[#allocation75_spill] sm:$0xff] %v9286_v21 }
 0x67f   : > { %v9288_v18 = vpop.permute.xlu0 %6938 }
 0x680   : > { %12730 = vst [vmem:[#allocation76_spill] sm:$0xff] %v9288_v18 }
 0x683   : > { %v9290_v57 = vpop.permute.xlu1 %6943  ;;  %v2823_v20 = vpop.permute.xlu0 %2822 }
 0x684   : > { %12731 = vst [vmem:[#allocation77_spill] sm:$0xff] %v9290_v57  ;;  %v2870_v50 = vmul.bf16 %v9183_v30, %v2823_v20 }
 0x686   : > { %v2886_v22 = vunpack.c.l.bf16 %v2870_v50 }
 0x687   : > { %v2825_v13 = vpop.permute.xlu1 %2824  ;;  %v2827_v17 = vpop.permute.xlu0 %2826 }
 0x688   : > { %v2871_v23 = vmul.bf16 %v9187_v48, %v2825_v13  ;;  %v2872_v15 = vmul.bf16 %v9183_v30, %v2827_v17 }
 0x68a   : > { %v2887_v51 = vunpack.c.l.bf16 %v2871_v23  ;;  %v2888_v14 = vunpack.c.l.bf16 %v2872_v15 }
 0x68b   : > { %v2829_v12 = vpop.permute.xlu1 %2828  ;;  %v2831_v11 = vpop.permute.xlu0 %2830 }
 0x68c   : > { %v6947_v16 = vpack.i.bf16 %v2887_v51, %v2886_v22  ;;  %v2873_v21 = vmul.bf16 %v9187_v48, %v2829_v12  ;;  %v2874_v19 = vmul.bf16 %v9183_v30, %v2831_v11 }
 0x68e   : > { %v2889_v9 = vunpack.c.l.bf16 %v2873_v21  ;;  %6948 = vrot.lane.b32.xlu0 %v6947_v16, %s7962_s7  ;;  %v2890_v50 = vunpack.c.l.bf16 %v2874_v19 }
 0x68f   : > { %v2833_v20 = vpop.permute.xlu1 %2832  ;;  %v2835_v57 = vpop.permute.xlu0 %2834 }
 0x690   : > { %v6952_v18 = vpack.i.bf16 %v2889_v9, %v2888_v14  ;;  %v2875_v13 = vmul.bf16 %v9187_v48, %v2833_v20  ;;  %v2876_v17 = vmul.bf16 %v9183_v30, %v2835_v57 }
 0x692   : > { %v2891_v23 = vunpack.c.l.bf16 %v2875_v13  ;;  %6953 = vrot.lane.b32.xlu1 %v6952_v18, %s7962_s7  ;;  %v2892_v11 = vunpack.c.l.bf16 %v2876_v17 }
 0x693   : > { %v2837_v22 = vpop.permute.xlu1 %2836  ;;  %v2839_v51 = vpop.permute.xlu0 %2838 }
 0x694   : > { %v6957_v12 = vpack.i.bf16 %v2891_v23, %v2890_v50  ;;  %v2877_v15 = vmul.bf16 %v9187_v48, %v2837_v22  ;;  %v2878_v21 = vmul.bf16 %v9183_v30, %v2839_v51 }
 0x696   : > { %v2893_v16 = vunpack.c.l.bf16 %v2877_v15  ;;  %6958 = vrot.lane.b32.xlu0 %v6957_v12, %s7962_s7  ;;  %v2894_v57 = vunpack.c.l.bf16 %v2878_v21 }
 0x697   : > { %v2841_v9 = vpop.permute.xlu1 %2840  ;;  %v2843_v14 = vpop.permute.xlu0 %2842 }
 0x698   : > { %v6962_v20 = vpack.i.bf16 %v2893_v16, %v2892_v11  ;;  %v2879_v19 = vmul.bf16 %v9187_v48, %v2841_v9  ;;  %v2880_v13 = vmul.bf16 %v9183_v30, %v2843_v14 }
 0x69a   : > { %v2895_v18 = vunpack.c.l.bf16 %v2879_v19  ;;  %6963 = vrot.lane.b32.xlu1 %v6962_v20, %s7962_s7  ;;  %v2896_v51 = vunpack.c.l.bf16 %v2880_v13 }
 0x69b   : > { %v2845_v50 = vpop.permute.xlu1 %2844  ;;  %v2847_v23 = vpop.permute.xlu0 %2846 }
 0x69c   : > { %v6967_v22 = vpack.i.bf16 %v2895_v18, %v2894_v57  ;;  %v2881_v17 = vmul.bf16 %v9187_v48, %v2845_v50  ;;  %v2882_v15 = vmul.bf16 %v9183_v30, %v2847_v23 }
 0x69e   : > { %v2897_v12 = vunpack.c.l.bf16 %v2881_v17  ;;  %6968 = vrot.lane.b32.xlu0 %v6967_v22, %s7962_s7  ;;  %v2898_v14 = vunpack.c.l.bf16 %v2882_v15  ;;  %v6157_v22 = vld [vmem:[%s12505_s1 + $0x4c0] sm:$0xf]  ;;  %v6161_v15 = vld [vmem:[%s12505_s1 + $0x4d0] sm:$0xf] }
 0x69f   : > { %v2849_v11 = vpop.permute.xlu1 %2848  ;;  %v2851_v16 = vpop.permute.xlu0 %2850 }
 0x6a0   : > { %v6972_v9 = vpack.i.bf16 %v2897_v12, %v2896_v51  ;;  %v2883_v21 = vmul.bf16 %v9187_v48, %v2849_v11  ;;  %v2884_v19 = vmul.bf16 %v9183_v30, %v2851_v16  ;;  %v6158_v30 = vld [vmem:[%s12505_s1 + $0x4c4] sm:$0xf]  ;;  %v6160_v51 = vld [vmem:[%s12505_s1 + $0x4cc] sm:$0xf]  ;;  %v6162_v12 = vld [vmem:[%s12505_s1 + $0x4d4] sm:$0xf] }
 0x6a1   : > { %v6163_v11 = vld [vmem:[%s12505_s1 + $0x4d8] sm:$0xf]  ;;  %v6164_v16 = vld [vmem:[%s12505_s1 + $0x4dc] sm:$0xf] }
 0x6a2   : > { %v2899_v20 = vunpack.c.l.bf16 %v2883_v21  ;;  %6973 = vrot.lane.b32.xlu1 %v6972_v9, %s7962_s7  ;;  %v2900_v50 = vunpack.c.l.bf16 %v2884_v19  ;;  %v6165_v9 = vld [vmem:[%s12505_s1 + $0x4e0] sm:$0xf]  ;;  %v6166_v21 = vld [vmem:[%s12505_s1 + $0x4e4] sm:$0xf]  ;;  %v6168_v19 = vld [vmem:[%s12505_s1 + $0x4ec] sm:$0xf] }
 0x6a3   : > { %v2853_v57 = vpop.permute.xlu1 %2852 }
 0x6a4   : > { %v6977_v18 = vpack.i.bf16 %v2899_v20, %v2898_v14  ;;  %v2885_v13 = vmul.bf16 %v9187_v48, %v2853_v57  ;;  %v6159_v48 = vld [vmem:[%s12505_s1 + $0x4c8] sm:$0xf]  ;;  %v6169_v20 = vld [vmem:[%s12505_s1 + $0x4f0] sm:$0xf]  ;;  %v6170_v57 = vld [vmem:[%s12505_s1 + $0x4f4] sm:$0xf] }
 0x6a5   : > { %v6167_v14 = vld [vmem:[%s12505_s1 + $0x4e8] sm:$0xf] }
 0x6a6   : > { %v2901_v23 = vunpack.c.l.bf16 %v2885_v13  ;;  %6978 = vrot.lane.b32.xlu0 %v6977_v18, %s7962_s7  ;;  %v6171_v18 = vld [vmem:[%s12505_s1 + $0x4f8] sm:$0xf]  ;;  %v6172_v13 = vld [vmem:[%s12505_s1 + $0x4fc] sm:$0xf] }
 0x6a8   : > { %v6982_v17 = vpack.i.bf16 %v2901_v23, %v2900_v50 }
 0x6aa   : > { %6983 = vrot.lane.b32.xlu1 %v6982_v17, %s7962_s7  ;;  %3083 = vrot.lane.b32.xlu0 %v6157_v22, %s7959_s30 }
 0x6ae   : > { %3085 = vrot.lane.b32.xlu1 %v6158_v30, %s7959_s30  ;;  %3087 = vrot.lane.b32.xlu0 %v6159_v48, %s7959_s30 }
 0x6b2   : > { %3089 = vrot.lane.b32.xlu1 %v6160_v51, %s7959_s30  ;;  %3091 = vrot.lane.b32.xlu0 %v6161_v15, %s7959_s30 }
 0x6b6   : > { %3093 = vrot.lane.b32.xlu1 %v6162_v12, %s7959_s30  ;;  %3095 = vrot.lane.b32.xlu0 %v6163_v11, %s7959_s30  ;;  %v9397_v12 = vld [vmem:[%s8230_s5 + $0x30] sm:$0xf] }
 0x6ba   : > { %3097 = vrot.lane.b32.xlu1 %v6164_v16, %s7959_s30  ;;  %3099 = vrot.lane.b32.xlu0 %v6165_v9, %s7959_s30  ;;  %v9401_v9 = vld [vmem:[%s8230_s5 + $0x34] sm:$0xf] }
 0x6be   : > { %3101 = vrot.lane.b32.xlu1 %v6166_v21, %s7959_s30  ;;  %3103 = vrot.lane.b32.xlu0 %v6167_v14, %s7959_s30 }
 0x6c2   : > { %3105 = vrot.lane.b32.xlu1 %v6168_v19, %s7959_s30  ;;  %3107 = vrot.lane.b32.xlu0 %v6169_v20, %s7959_s30 }
 0x6c6   : > { %3109 = vrot.lane.b32.xlu1 %v6170_v57, %s7959_s30  ;;  %3111 = vrot.lane.b32.xlu0 %v6171_v18, %s7959_s30 }
 0x6ca   : > { %3113 = vrot.lane.b32.xlu1 %v6172_v13, %s7959_s30 }
 0x700   : > { %v9380_v50 = vpop.permute.xlu0 %6948 }
 0x701   : > { %12732 = vst [vmem:[#allocation78_spill] sm:$0xff] %v9380_v50 }
 0x704   : > { %v9382_v23 = vpop.permute.xlu1 %6953 }
 0x705   : > { %12733 = vst [vmem:[#allocation79_spill] sm:$0xff] %v9382_v23 }
 0x708   : > { %v9384_v22 = vpop.permute.xlu0 %6958 }
 0x709   : > { %12734 = vst [vmem:[#allocation80_spill] sm:$0xff] %v9384_v22 }
 0x70c   : > { %v9386_v17 = vpop.permute.xlu1 %6963 }
 0x70d   : > { %12735 = vst [vmem:[#allocation81_spill] sm:$0xff] %v9386_v17 }
 0x710   : > { %v9388_v30 = vpop.permute.xlu0 %6968 }
 0x711   : > { %12736 = vst [vmem:[#allocation82_spill] sm:$0xff] %v9388_v30 }
 0x714   : > { %v9390_v48 = vpop.permute.xlu1 %6973 }
 0x715   : > { %12737 = vst [vmem:[#allocation83_spill] sm:$0xff] %v9390_v48 }
 0x718   : > { %v9392_v51 = vpop.permute.xlu0 %6978 }
 0x719   : > { %12738 = vst [vmem:[#allocation84_spill] sm:$0xff] %v9392_v51 }
 0x71c   : > { %v9394_v15 = vpop.permute.xlu1 %6983  ;;  %v3084_v11 = vpop.permute.xlu0 %3083 }
 0x71d   : > { %12739 = vst [vmem:[#allocation85_spill] sm:$0xff] %v9394_v15  ;;  %v3131_v16 = vmul.bf16 %v9397_v12, %v3084_v11 }
 0x71f   : > { %v3147_v20 = vunpack.c.l.bf16 %v3131_v16 }
 0x720   : > { %v3086_v21 = vpop.permute.xlu1 %3085  ;;  %v3088_v14 = vpop.permute.xlu0 %3087 }
 0x721   : > { %v3132_v19 = vmul.bf16 %v9401_v9, %v3086_v21  ;;  %v3133_v57 = vmul.bf16 %v9397_v12, %v3088_v14 }
 0x723   : > { %v3148_v18 = vunpack.c.l.bf16 %v3132_v19  ;;  %v3149_v22 = vunpack.c.l.bf16 %v3133_v57 }
 0x724   : > { %v3090_v13 = vpop.permute.xlu1 %3089  ;;  %v3092_v48 = vpop.permute.xlu0 %3091 }
 0x725   : > { %v6987_v30 = vpack.i.bf16 %v3148_v18, %v3147_v20  ;;  %v3134_v17 = vmul.bf16 %v9401_v9, %v3090_v13  ;;  %v3135_v23 = vmul.bf16 %v9397_v12, %v3092_v48 }
 0x727   : > { %v3150_v50 = vunpack.c.l.bf16 %v3134_v17  ;;  %6988 = vrot.lane.b32.xlu0 %v6987_v30, %s7961_s6  ;;  %v3151_v16 = vunpack.c.l.bf16 %v3135_v23 }
 0x728   : > { %v3094_v11 = vpop.permute.xlu1 %3093  ;;  %v3096_v15 = vpop.permute.xlu0 %3095 }
 0x729   : > { %v6992_v51 = vpack.i.bf16 %v3150_v50, %v3149_v22  ;;  %v3136_v21 = vmul.bf16 %v9401_v9, %v3094_v11  ;;  %v3137_v14 = vmul.bf16 %v9397_v12, %v3096_v15 }
 0x72b   : > { %v3152_v19 = vunpack.c.l.bf16 %v3136_v21  ;;  %6993 = vrot.lane.b32.xlu1 %v6992_v51, %s7961_s6  ;;  %v3153_v48 = vunpack.c.l.bf16 %v3137_v14 }
 0x72c   : > { %v3098_v20 = vpop.permute.xlu1 %3097  ;;  %v3100_v18 = vpop.permute.xlu0 %3099 }
 0x72d   : > { %v6997_v13 = vpack.i.bf16 %v3152_v19, %v3151_v16  ;;  %v3138_v57 = vmul.bf16 %v9401_v9, %v3098_v20  ;;  %v3139_v17 = vmul.bf16 %v9397_v12, %v3100_v18 }
 0x72f   : > { %v3154_v30 = vunpack.c.l.bf16 %v3138_v57  ;;  %6998 = vrot.lane.b32.xlu0 %v6997_v13, %s7961_s6  ;;  %v3155_v15 = vunpack.c.l.bf16 %v3139_v17 }
 0x730   : > { %v3102_v50 = vpop.permute.xlu1 %3101  ;;  %v3104_v22 = vpop.permute.xlu0 %3103 }
 0x731   : > { %v7002_v11 = vpack.i.bf16 %v3154_v30, %v3153_v48  ;;  %v3140_v23 = vmul.bf16 %v9401_v9, %v3102_v50  ;;  %v3141_v21 = vmul.bf16 %v9397_v12, %v3104_v22 }
 0x733   : > { %v3156_v51 = vunpack.c.l.bf16 %v3140_v23  ;;  %7003 = vrot.lane.b32.xlu1 %v7002_v11, %s7961_s6  ;;  %v3157_v18 = vunpack.c.l.bf16 %v3141_v21 }
 0x734   : > { %v3106_v16 = vpop.permute.xlu1 %3105  ;;  %v3108_v19 = vpop.permute.xlu0 %3107 }
 0x735   : > { %v7007_v20 = vpack.i.bf16 %v3156_v51, %v3155_v15  ;;  %v3142_v14 = vmul.bf16 %v9401_v9, %v3106_v16  ;;  %v3143_v57 = vmul.bf16 %v9397_v12, %v3108_v19 }
 0x737   : > { %v3158_v13 = vunpack.c.l.bf16 %v3142_v14  ;;  %7008 = vrot.lane.b32.xlu0 %v7007_v20, %s7961_s6  ;;  %v3159_v22 = vunpack.c.l.bf16 %v3143_v57  ;;  %v6173_v20 = vld [vmem:[%s12505_s1 + $0x500] sm:$0xf]  ;;  %v6175_v57 = vld [vmem:[%s12505_s1 + $0x508] sm:$0xf] }
 0x738   : > { %v3110_v48 = vpop.permute.xlu1 %3109  ;;  %v3112_v30 = vpop.permute.xlu0 %3111 }
 0x739   : > { %v7012_v50 = vpack.i.bf16 %v3158_v13, %v3157_v18  ;;  %v3144_v17 = vmul.bf16 %v9401_v9, %v3110_v48  ;;  %v3145_v23 = vmul.bf16 %v9397_v12, %v3112_v30  ;;  %v6174_v18 = vld [vmem:[%s12505_s1 + $0x504] sm:$0xf]  ;;  %v6176_v13 = vld [vmem:[%s12505_s1 + $0x50c] sm:$0xf]  ;;  %v6177_v48 = vld [vmem:[%s12505_s1 + $0x510] sm:$0xf] }
 0x73a   : > { %v6178_v30 = vld [vmem:[%s12505_s1 + $0x514] sm:$0xf] }
 0x73b   : > { %v3160_v11 = vunpack.c.l.bf16 %v3144_v17  ;;  %7013 = vrot.lane.b32.xlu1 %v7012_v50, %s7961_s6  ;;  %v3161_v16 = vunpack.c.l.bf16 %v3145_v23  ;;  %v6179_v50 = vld [vmem:[%s12505_s1 + $0x518] sm:$0xf]  ;;  %v6180_v17 = vld [vmem:[%s12505_s1 + $0x51c] sm:$0xf]  ;;  %v6182_v23 = vld [vmem:[%s12505_s1 + $0x524] sm:$0xf] }
 0x73c   : > { %v3114_v15 = vpop.permute.xlu1 %3113 }
 0x73d   : > { %v7017_v51 = vpack.i.bf16 %v3160_v11, %v3159_v22  ;;  %v3146_v21 = vmul.bf16 %v9401_v9, %v3114_v15  ;;  %v6181_v22 = vld [vmem:[%s12505_s1 + $0x520] sm:$0xf]  ;;  %v6183_v11 = vld [vmem:[%s12505_s1 + $0x528] sm:$0xf]  ;;  %v6184_v15 = vld [vmem:[%s12505_s1 + $0x52c] sm:$0xf] }
 0x73f   : > { %v3162_v19 = vunpack.c.l.bf16 %v3146_v21  ;;  %7018 = vrot.lane.b32.xlu0 %v7017_v51, %s7961_s6  ;;  %v6185_v51 = vld [vmem:[%s12505_s1 + $0x530] sm:$0xf]  ;;  %v6186_v21 = vld [vmem:[%s12505_s1 + $0x534] sm:$0xf] }
 0x741   : > { %v7022_v14 = vpack.i.bf16 %v3162_v19, %v3161_v16  ;;  %v6187_v16 = vld [vmem:[%s12505_s1 + $0x538] sm:$0xf]  ;;  %v6188_v19 = vld [vmem:[%s12505_s1 + $0x53c] sm:$0xf] }
 0x743   : > { %7023 = vrot.lane.b32.xlu1 %v7022_v14, %s7961_s6  ;;  %3276 = vrot.lane.b32.xlu0 %v6173_v20, %s7960_s4 }
 0x747   : > { %3278 = vrot.lane.b32.xlu1 %v6174_v18, %s7960_s4  ;;  %3280 = vrot.lane.b32.xlu0 %v6175_v57, %s7960_s4 }
 0x74b   : > { %3282 = vrot.lane.b32.xlu1 %v6176_v13, %s7960_s4  ;;  %3284 = vrot.lane.b32.xlu0 %v6177_v48, %s7960_s4 }
 0x74f   : > { %3286 = vrot.lane.b32.xlu1 %v6178_v30, %s7960_s4  ;;  %3288 = vrot.lane.b32.xlu0 %v6179_v50, %s7960_s4 }
 0x753   : > { %3290 = vrot.lane.b32.xlu1 %v6180_v17, %s7960_s4  ;;  %3292 = vrot.lane.b32.xlu0 %v6181_v22, %s7960_s4 }
 0x757   : > { %3294 = vrot.lane.b32.xlu1 %v6182_v23, %s7960_s4  ;;  %3296 = vrot.lane.b32.xlu0 %v6183_v11, %s7960_s4 }
 0x75b   : > { %3298 = vrot.lane.b32.xlu1 %v6184_v15, %s7960_s4  ;;  %3300 = vrot.lane.b32.xlu0 %v6185_v51, %s7960_s4 }
 0x75f   : > { %3302 = vrot.lane.b32.xlu1 %v6186_v21, %s7960_s4  ;;  %3304 = vrot.lane.b32.xlu0 %v6187_v16, %s7960_s4 }
 0x763   : > { %3306 = vrot.lane.b32.xlu1 %v6188_v19, %s7960_s4 }
 0x799   : > { %v9490_v20 = vpop.permute.xlu0 %6988 }
 0x79a   : > { %12740 = vst [vmem:[#allocation86_spill] sm:$0xff] %v9490_v20 }
 0x79d   : > { %v9492_v14 = vpop.permute.xlu1 %6993 }
 0x79e   : > { %12741 = vst [vmem:[#allocation87_spill] sm:$0xff] %v9492_v14 }
 0x7a1   : > { %v9494_v18 = vpop.permute.xlu0 %6998 }
 0x7a2   : > { %12742 = vst [vmem:[#allocation88_spill] sm:$0xff] %v9494_v18 }
 0x7a5   : > { %v9496_v57 = vpop.permute.xlu1 %7003 }
 0x7a6   : > { %12743 = vst [vmem:[#allocation89_spill] sm:$0xff] %v9496_v57 }
 0x7a9   : > { %v9498_v13 = vpop.permute.xlu0 %7008 }
 0x7aa   : > { %12744 = vst [vmem:[#allocation90_spill] sm:$0xff] %v9498_v13 }
 0x7ad   : > { %v9500_v48 = vpop.permute.xlu1 %7013 }
 0x7ae   : > { %12745 = vst [vmem:[#allocation91_spill] sm:$0xff] %v9500_v48 }
 0x7b1   : > { %v9502_v30 = vpop.permute.xlu0 %7018 }
 0x7b2   : > { %12746 = vst [vmem:[#allocation92_spill] sm:$0xff] %v9502_v30 }
 0x7b5   : > { %v9504_v50 = vpop.permute.xlu1 %7023  ;;  %v3277_v17 = vpop.permute.xlu0 %3276 }
 0x7b6   : > { %12747 = vst [vmem:[#allocation93_spill] sm:$0xff] %v9504_v50  ;;  %v3324_v22 = vmul.bf16 %v9397_v12, %v3277_v17 }
 0x7b8   : > { %v3340_v51 = vunpack.c.l.bf16 %v3324_v22 }
 0x7b9   : > { %v3279_v23 = vpop.permute.xlu1 %3278  ;;  %v3281_v11 = vpop.permute.xlu0 %3280 }
 0x7ba   : > { %v3325_v15 = vmul.bf16 %v9401_v9, %v3279_v23  ;;  %v3326_v21 = vmul.bf16 %v9397_v12, %v3281_v11 }
 0x7bc   : > { %v3341_v16 = vunpack.c.l.bf16 %v3325_v15  ;;  %v3342_v18 = vunpack.c.l.bf16 %v3326_v21 }
 0x7bd   : > { %v3283_v19 = vpop.permute.xlu1 %3282  ;;  %v3285_v57 = vpop.permute.xlu0 %3284 }
 0x7be   : > { %v7027_v13 = vpack.i.bf16 %v3341_v16, %v3340_v51  ;;  %v3327_v48 = vmul.bf16 %v9401_v9, %v3283_v19  ;;  %v3328_v14 = vmul.bf16 %v9397_v12, %v3285_v57 }
 0x7c0   : > { %v3343_v20 = vunpack.c.l.bf16 %v3327_v48  ;;  %7028 = vrot.lane.b32.xlu0 %v7027_v13, %s7962_s7  ;;  %v3344_v22 = vunpack.c.l.bf16 %v3328_v14 }
 0x7c1   : > { %v3287_v17 = vpop.permute.xlu1 %3286  ;;  %v3289_v50 = vpop.permute.xlu0 %3288 }
 0x7c2   : > { %v7032_v30 = vpack.i.bf16 %v3343_v20, %v3342_v18  ;;  %v3329_v23 = vmul.bf16 %v9401_v9, %v3287_v17  ;;  %v3330_v11 = vmul.bf16 %v9397_v12, %v3289_v50 }
 0x7c4   : > { %v3345_v15 = vunpack.c.l.bf16 %v3329_v23  ;;  %7033 = vrot.lane.b32.xlu1 %v7032_v30, %s7962_s7  ;;  %v3346_v57 = vunpack.c.l.bf16 %v3330_v11 }
 0x7c5   : > { %v3291_v51 = vpop.permute.xlu1 %3290  ;;  %v3293_v16 = vpop.permute.xlu0 %3292 }
 0x7c6   : > { %v7037_v19 = vpack.i.bf16 %v3345_v15, %v3344_v22  ;;  %v3331_v21 = vmul.bf16 %v9401_v9, %v3291_v51  ;;  %v3332_v48 = vmul.bf16 %v9397_v12, %v3293_v16 }
 0x7c8   : > { %v3347_v13 = vunpack.c.l.bf16 %v3331_v21  ;;  %7038 = vrot.lane.b32.xlu0 %v7037_v19, %s7962_s7  ;;  %v3348_v50 = vunpack.c.l.bf16 %v3332_v48 }
 0x7c9   : > { %v3295_v20 = vpop.permute.xlu1 %3294  ;;  %v3297_v18 = vpop.permute.xlu0 %3296 }
 0x7ca   : > { %v7042_v17 = vpack.i.bf16 %v3347_v13, %v3346_v57  ;;  %v3333_v14 = vmul.bf16 %v9401_v9, %v3295_v20  ;;  %v3334_v23 = vmul.bf16 %v9397_v12, %v3297_v18 }
 0x7cc   : > { %v3349_v30 = vunpack.c.l.bf16 %v3333_v14  ;;  %7043 = vrot.lane.b32.xlu1 %v7042_v17, %s7962_s7  ;;  %v3350_v16 = vunpack.c.l.bf16 %v3334_v23 }
 0x7cd   : > { %v3299_v22 = vpop.permute.xlu1 %3298  ;;  %v3301_v15 = vpop.permute.xlu0 %3300 }
 0x7ce   : > { %v7047_v51 = vpack.i.bf16 %v3349_v30, %v3348_v50  ;;  %v3335_v11 = vmul.bf16 %v9401_v9, %v3299_v22  ;;  %v3336_v21 = vmul.bf16 %v9397_v12, %v3301_v15 }
 0x7d0   : > { %v3351_v19 = vunpack.c.l.bf16 %v3335_v11  ;;  %7048 = vrot.lane.b32.xlu0 %v7047_v51, %s7962_s7  ;;  %v3352_v18 = vunpack.c.l.bf16 %v3336_v21  ;;  %v6207_v51 = vld [vmem:[%s12505_s1 + $0x580] sm:$0xf]  ;;  %v6211_v21 = vld [vmem:[%s12505_s1 + $0x590] sm:$0xf] }
 0x7d1   : > { %v3303_v57 = vpop.permute.xlu1 %3302  ;;  %v3305_v13 = vpop.permute.xlu0 %3304 }
 0x7d2   : > { %v7052_v20 = vpack.i.bf16 %v3351_v19, %v3350_v16  ;;  %v3337_v48 = vmul.bf16 %v9401_v9, %v3303_v57  ;;  %v3338_v14 = vmul.bf16 %v9397_v12, %v3305_v13  ;;  %v6208_v12 = vld [vmem:[%s12505_s1 + $0x584] sm:$0xf]  ;;  %v6210_v16 = vld [vmem:[%s12505_s1 + $0x58c] sm:$0xf]  ;;  %v6212_v19 = vld [vmem:[%s12505_s1 + $0x594] sm:$0xf] }
 0x7d3   : > { %v6213_v57 = vld [vmem:[%s12505_s1 + $0x598] sm:$0xf]  ;;  %v6214_v13 = vld [vmem:[%s12505_s1 + $0x59c] sm:$0xf] }
 0x7d4   : > { %v3353_v17 = vunpack.c.l.bf16 %v3337_v48  ;;  %7053 = vrot.lane.b32.xlu1 %v7052_v20, %s7962_s7  ;;  %v3354_v22 = vunpack.c.l.bf16 %v3338_v14  ;;  %v6215_v20 = vld [vmem:[%s12505_s1 + $0x5a0] sm:$0xf]  ;;  %v6216_v48 = vld [vmem:[%s12505_s1 + $0x5a4] sm:$0xf]  ;;  %v6218_v14 = vld [vmem:[%s12505_s1 + $0x5ac] sm:$0xf] }
 0x7d5   : > { %v3307_v50 = vpop.permute.xlu1 %3306 }
 0x7d6   : > { %v7057_v30 = vpack.i.bf16 %v3353_v17, %v3352_v18  ;;  %v3339_v23 = vmul.bf16 %v9401_v9, %v3307_v50  ;;  %v6209_v9 = vld [vmem:[%s12505_s1 + $0x588] sm:$0xf]  ;;  %v6219_v17 = vld [vmem:[%s12505_s1 + $0x5b0] sm:$0xf]  ;;  %v6220_v50 = vld [vmem:[%s12505_s1 + $0x5b4] sm:$0xf] }
 0x7d7   : > { %v6217_v18 = vld [vmem:[%s12505_s1 + $0x5a8] sm:$0xf] }
 0x7d8   : > { %v3355_v15 = vunpack.c.l.bf16 %v3339_v23  ;;  %7058 = vrot.lane.b32.xlu0 %v7057_v30, %s7962_s7  ;;  %v6221_v30 = vld [vmem:[%s12505_s1 + $0x5b8] sm:$0xf]  ;;  %v6222_v23 = vld [vmem:[%s12505_s1 + $0x5bc] sm:$0xf] }
 0x7da   : > { %v7062_v11 = vpack.i.bf16 %v3355_v15, %v3354_v22 }
 0x7dc   : > { %7063 = vrot.lane.b32.xlu1 %v7062_v11, %s7962_s7  ;;  %3537 = vrot.lane.b32.xlu0 %v6207_v51, %s7959_s30 }
 0x7e0   : > { %3539 = vrot.lane.b32.xlu1 %v6208_v12, %s7959_s30  ;;  %3541 = vrot.lane.b32.xlu0 %v6209_v9, %s7959_s30 }
 0x7e4   : > { %3543 = vrot.lane.b32.xlu1 %v6210_v16, %s7959_s30  ;;  %3545 = vrot.lane.b32.xlu0 %v6211_v21, %s7959_s30 }
 0x7e8   : > { %3547 = vrot.lane.b32.xlu1 %v6212_v19, %s7959_s30  ;;  %3549 = vrot.lane.b32.xlu0 %v6213_v57, %s7959_s30  ;;  %v9611_v19 = vld [vmem:[%s8230_s5 + $0x38] sm:$0xf] }
 0x7ec   : > { %3551 = vrot.lane.b32.xlu1 %v6214_v13, %s7959_s30  ;;  %3553 = vrot.lane.b32.xlu0 %v6215_v20, %s7959_s30  ;;  %v9615_v20 = vld [vmem:[%s8230_s5 + $0x3c] sm:$0xf] }
 0x7f0   : > { %3555 = vrot.lane.b32.xlu1 %v6216_v48, %s7959_s30  ;;  %3557 = vrot.lane.b32.xlu0 %v6217_v18, %s7959_s30 }
 0x7f4   : > { %3559 = vrot.lane.b32.xlu1 %v6218_v14, %s7959_s30  ;;  %3561 = vrot.lane.b32.xlu0 %v6219_v17, %s7959_s30 }
 0x7f8   : > { %3563 = vrot.lane.b32.xlu1 %v6220_v50, %s7959_s30  ;;  %3565 = vrot.lane.b32.xlu0 %v6221_v30, %s7959_s30 }
 0x7fc   : > { %3567 = vrot.lane.b32.xlu1 %v6222_v23, %s7959_s30 }
 0x832   : > { %v9594_v22 = vpop.permute.xlu0 %7028 }
 0x833   : > { %12748 = vst [vmem:[#allocation94_spill] sm:$0xff] %v9594_v22 }
 0x836   : > { %v9596_v15 = vpop.permute.xlu1 %7033 }
 0x837   : > { %12749 = vst [vmem:[#allocation95_spill] sm:$0xff] %v9596_v15 }
 0x83a   : > { %v9598_v51 = vpop.permute.xlu0 %7038 }
 0x83b   : > { %12750 = vst [vmem:[#allocation96_spill] sm:$0xff] %v9598_v51 }
 0x83e   : > { %v9600_v11 = vpop.permute.xlu1 %7043 }
 0x83f   : > { %12751 = vst [vmem:[#allocation97_spill] sm:$0xff] %v9600_v11 }
 0x842   : > { %v9602_v12 = vpop.permute.xlu0 %7048 }
 0x843   : > { %12752 = vst [vmem:[#allocation98_spill] sm:$0xff] %v9602_v12 }
 0x846   : > { %v9604_v9 = vpop.permute.xlu1 %7053 }
 0x847   : > { %12753 = vst [vmem:[#allocation99_spill] sm:$0xff] %v9604_v9 }
 0x84a   : > { %v9606_v16 = vpop.permute.xlu0 %7058 }
 0x84b   : > { %12754 = vst [vmem:[#allocation100_spill] sm:$0xff] %v9606_v16 }
 0x84e   : > { %v9608_v21 = vpop.permute.xlu1 %7063  ;;  %v3538_v57 = vpop.permute.xlu0 %3537 }
 0x84f   : > { %12755 = vst [vmem:[#allocation101_spill] sm:$0xff] %v9608_v21  ;;  %v3585_v13 = vmul.bf16 %v9611_v19, %v3538_v57 }
 0x851   : > { %v3601_v17 = vunpack.c.l.bf16 %v3585_v13 }
 0x852   : > { %v3540_v48 = vpop.permute.xlu1 %3539  ;;  %v3542_v18 = vpop.permute.xlu0 %3541 }
 0x853   : > { %v3586_v14 = vmul.bf16 %v9615_v20, %v3540_v48  ;;  %v3587_v50 = vmul.bf16 %v9611_v19, %v3542_v18 }
 0x855   : > { %v3602_v30 = vunpack.c.l.bf16 %v3586_v14  ;;  %v3603_v51 = vunpack.c.l.bf16 %v3587_v50 }
 0x856   : > { %v3544_v23 = vpop.permute.xlu1 %3543  ;;  %v3546_v9 = vpop.permute.xlu0 %3545 }
 0x857   : > { %v7067_v12 = vpack.i.bf16 %v3602_v30, %v3601_v17  ;;  %v3588_v11 = vmul.bf16 %v9615_v20, %v3544_v23  ;;  %v3589_v15 = vmul.bf16 %v9611_v19, %v3546_v9 }
 0x859   : > { %v3604_v22 = vunpack.c.l.bf16 %v3588_v11  ;;  %7068 = vrot.lane.b32.xlu0 %v7067_v12, %s7961_s6  ;;  %v3605_v13 = vunpack.c.l.bf16 %v3589_v15 }
 0x85a   : > { %v3548_v57 = vpop.permute.xlu1 %3547  ;;  %v3550_v21 = vpop.permute.xlu0 %3549 }
 0x85b   : > { %v7072_v16 = vpack.i.bf16 %v3604_v22, %v3603_v51  ;;  %v3590_v48 = vmul.bf16 %v9615_v20, %v3548_v57  ;;  %v3591_v18 = vmul.bf16 %v9611_v19, %v3550_v21 }
 0x85d   : > { %v3606_v14 = vunpack.c.l.bf16 %v3590_v48  ;;  %7073 = vrot.lane.b32.xlu1 %v7072_v16, %s7961_s6  ;;  %v3607_v9 = vunpack.c.l.bf16 %v3591_v18 }
 0x85e   : > { %v3552_v17 = vpop.permute.xlu1 %3551  ;;  %v3554_v30 = vpop.permute.xlu0 %3553 }
 0x85f   : > { %v7077_v23 = vpack.i.bf16 %v3606_v14, %v3605_v13  ;;  %v3592_v50 = vmul.bf16 %v9615_v20, %v3552_v17  ;;  %v3593_v11 = vmul.bf16 %v9611_v19, %v3554_v30 }
 0x861   : > { %v3608_v12 = vunpack.c.l.bf16 %v3592_v50  ;;  %7078 = vrot.lane.b32.xlu0 %v7077_v23, %s7961_s6  ;;  %v3609_v21 = vunpack.c.l.bf16 %v3593_v11 }
 0x862   : > { %v3556_v22 = vpop.permute.xlu1 %3555  ;;  %v3558_v51 = vpop.permute.xlu0 %3557 }
 0x863   : > { %v7082_v57 = vpack.i.bf16 %v3608_v12, %v3607_v9  ;;  %v3594_v15 = vmul.bf16 %v9615_v20, %v3556_v22  ;;  %v3595_v48 = vmul.bf16 %v9611_v19, %v3558_v51 }
 0x865   : > { %v3610_v16 = vunpack.c.l.bf16 %v3594_v15  ;;  %7083 = vrot.lane.b32.xlu1 %v7082_v57, %s7961_s6  ;;  %v3611_v30 = vunpack.c.l.bf16 %v3595_v48 }
 0x866   : > { %v3560_v13 = vpop.permute.xlu1 %3559  ;;  %v3562_v14 = vpop.permute.xlu0 %3561 }
 0x867   : > { %v7087_v17 = vpack.i.bf16 %v3610_v16, %v3609_v21  ;;  %v3596_v18 = vmul.bf16 %v9615_v20, %v3560_v13  ;;  %v3597_v50 = vmul.bf16 %v9611_v19, %v3562_v14 }
 0x869   : > { %v3612_v23 = vunpack.c.l.bf16 %v3596_v18  ;;  %7088 = vrot.lane.b32.xlu0 %v7087_v17, %s7961_s6  ;;  %v3613_v51 = vunpack.c.l.bf16 %v3597_v50  ;;  %v6223_v17 = vld [vmem:[%s12505_s1 + $0x5c0] sm:$0xf]  ;;  %v6225_v50 = vld [vmem:[%s12505_s1 + $0x5c8] sm:$0xf] }
 0x86a   : > { %v3564_v9 = vpop.permute.xlu1 %3563  ;;  %v3566_v12 = vpop.permute.xlu0 %3565 }
 0x86b   : > { %v7092_v22 = vpack.i.bf16 %v3612_v23, %v3611_v30  ;;  %v3598_v11 = vmul.bf16 %v9615_v20, %v3564_v9  ;;  %v3599_v15 = vmul.bf16 %v9611_v19, %v3566_v12  ;;  %v6224_v30 = vld [vmem:[%s12505_s1 + $0x5c4] sm:$0xf]  ;;  %v6226_v23 = vld [vmem:[%s12505_s1 + $0x5cc] sm:$0xf]  ;;  %v6227_v9 = vld [vmem:[%s12505_s1 + $0x5d0] sm:$0xf] }
 0x86c   : > { %v6228_v12 = vld [vmem:[%s12505_s1 + $0x5d4] sm:$0xf] }
 0x86d   : > { %v3614_v57 = vunpack.c.l.bf16 %v3598_v11  ;;  %7093 = vrot.lane.b32.xlu1 %v7092_v22, %s7961_s6  ;;  %v3615_v13 = vunpack.c.l.bf16 %v3599_v15  ;;  %v6229_v22 = vld [vmem:[%s12505_s1 + $0x5d8] sm:$0xf]  ;;  %v6230_v11 = vld [vmem:[%s12505_s1 + $0x5dc] sm:$0xf]  ;;  %v6232_v15 = vld [vmem:[%s12505_s1 + $0x5e4] sm:$0xf] }
 0x86e   : > { %v3568_v21 = vpop.permute.xlu1 %3567 }
 0x86f   : > { %v7097_v16 = vpack.i.bf16 %v3614_v57, %v3613_v51  ;;  %v3600_v48 = vmul.bf16 %v9615_v20, %v3568_v21  ;;  %v6231_v51 = vld [vmem:[%s12505_s1 + $0x5e0] sm:$0xf]  ;;  %v6233_v57 = vld [vmem:[%s12505_s1 + $0x5e8] sm:$0xf]  ;;  %v6234_v21 = vld [vmem:[%s12505_s1 + $0x5ec] sm:$0xf] }
 0x871   : > { %v3616_v14 = vunpack.c.l.bf16 %v3600_v48  ;;  %7098 = vrot.lane.b32.xlu0 %v7097_v16, %s7961_s6  ;;  %v6235_v16 = vld [vmem:[%s12505_s1 + $0x5f0] sm:$0xf]  ;;  %v6236_v48 = vld [vmem:[%s12505_s1 + $0x5f4] sm:$0xf] }
 0x873   : > { %v7102_v18 = vpack.i.bf16 %v3616_v14, %v3615_v13  ;;  %v6237_v13 = vld [vmem:[%s12505_s1 + $0x5f8] sm:$0xf]  ;;  %v6238_v14 = vld [vmem:[%s12505_s1 + $0x5fc] sm:$0xf] }
 0x875   : > { %7103 = vrot.lane.b32.xlu1 %v7102_v18, %s7961_s6  ;;  %3730 = vrot.lane.b32.xlu0 %v6223_v17, %s7960_s4 }
 0x879   : > { %3732 = vrot.lane.b32.xlu1 %v6224_v30, %s7960_s4  ;;  %3734 = vrot.lane.b32.xlu0 %v6225_v50, %s7960_s4 }
 0x87d   : > { %3736 = vrot.lane.b32.xlu1 %v6226_v23, %s7960_s4  ;;  %3738 = vrot.lane.b32.xlu0 %v6227_v9, %s7960_s4 }
 0x881   : > { %3740 = vrot.lane.b32.xlu1 %v6228_v12, %s7960_s4  ;;  %3742 = vrot.lane.b32.xlu0 %v6229_v22, %s7960_s4 }
 0x885   : > { %3744 = vrot.lane.b32.xlu1 %v6230_v11, %s7960_s4  ;;  %3746 = vrot.lane.b32.xlu0 %v6231_v51, %s7960_s4 }
 0x889   : > { %3748 = vrot.lane.b32.xlu1 %v6232_v15, %s7960_s4  ;;  %3750 = vrot.lane.b32.xlu0 %v6233_v57, %s7960_s4 }
 0x88d   : > { %3752 = vrot.lane.b32.xlu1 %v6234_v21, %s7960_s4  ;;  %3754 = vrot.lane.b32.xlu0 %v6235_v16, %s7960_s4 }
 0x891   : > { %3756 = vrot.lane.b32.xlu1 %v6236_v48, %s7960_s4  ;;  %3758 = vrot.lane.b32.xlu0 %v6237_v13, %s7960_s4 }
 0x895   : > { %3760 = vrot.lane.b32.xlu1 %v6238_v14, %s7960_s4 }
 0x8cb   : > { %v9704_v17 = vpop.permute.xlu0 %7068 }
 0x8cc   : > { %12756 = vst [vmem:[#allocation102_spill] sm:$0xff] %v9704_v17 }
 0x8cf   : > { %v9706_v18 = vpop.permute.xlu1 %7073 }
 0x8d0   : > { %12757 = vst [vmem:[#allocation103_spill] sm:$0xff] %v9706_v18 }
 0x8d3   : > { %v9708_v30 = vpop.permute.xlu0 %7078 }
 0x8d4   : > { %12758 = vst [vmem:[#allocation104_spill] sm:$0xff] %v9708_v30 }
 0x8d7   : > { %v9710_v50 = vpop.permute.xlu1 %7083 }
 0x8d8   : > { %12759 = vst [vmem:[#allocation105_spill] sm:$0xff] %v9710_v50 }
 0x8db   : > { %v9712_v23 = vpop.permute.xlu0 %7088 }
 0x8dc   : > { %12760 = vst [vmem:[#allocation106_spill] sm:$0xff] %v9712_v23 }
 0x8df   : > { %v9714_v9 = vpop.permute.xlu1 %7093 }
 0x8e0   : > { %12761 = vst [vmem:[#allocation107_spill] sm:$0xff] %v9714_v9 }
 0x8e3   : > { %v9716_v12 = vpop.permute.xlu0 %7098 }
 0x8e4   : > { %12762 = vst [vmem:[#allocation108_spill] sm:$0xff] %v9716_v12 }
 0x8e7   : > { %v9718_v22 = vpop.permute.xlu1 %7103  ;;  %v3731_v11 = vpop.permute.xlu0 %3730 }
 0x8e8   : > { %12763 = vst [vmem:[#allocation109_spill] sm:$0xff] %v9718_v22  ;;  %v3778_v51 = vmul.bf16 %v9611_v19, %v3731_v11 }
 0x8ea   : > { %v3794_v16 = vunpack.c.l.bf16 %v3778_v51 }
 0x8eb   : > { %v3733_v15 = vpop.permute.xlu1 %3732  ;;  %v3735_v57 = vpop.permute.xlu0 %3734 }
 0x8ec   : > { %v3779_v21 = vmul.bf16 %v9615_v20, %v3733_v15  ;;  %v3780_v48 = vmul.bf16 %v9611_v19, %v3735_v57 }
 0x8ee   : > { %v3795_v13 = vunpack.c.l.bf16 %v3779_v21  ;;  %v3796_v30 = vunpack.c.l.bf16 %v3780_v48 }
 0x8ef   : > { %v3737_v14 = vpop.permute.xlu1 %3736  ;;  %v3739_v50 = vpop.permute.xlu0 %3738 }
 0x8f0   : > { %v7107_v23 = vpack.i.bf16 %v3795_v13, %v3794_v16  ;;  %v3781_v9 = vmul.bf16 %v9615_v20, %v3737_v14  ;;  %v3782_v18 = vmul.bf16 %v9611_v19, %v3739_v50 }
 0x8f2   : > { %v3797_v17 = vunpack.c.l.bf16 %v3781_v9  ;;  %7108 = vrot.lane.b32.xlu0 %v7107_v23, %s7962_s7  ;;  %v3798_v51 = vunpack.c.l.bf16 %v3782_v18 }
 0x8f3   : > { %v3741_v11 = vpop.permute.xlu1 %3740  ;;  %v3743_v22 = vpop.permute.xlu0 %3742 }
 0x8f4   : > { %v7112_v12 = vpack.i.bf16 %v3797_v17, %v3796_v30  ;;  %v3783_v15 = vmul.bf16 %v9615_v20, %v3741_v11  ;;  %v3784_v57 = vmul.bf16 %v9611_v19, %v3743_v22 }
 0x8f6   : > { %v3799_v21 = vunpack.c.l.bf16 %v3783_v15  ;;  %7113 = vrot.lane.b32.xlu1 %v7112_v12, %s7962_s7  ;;  %v3800_v50 = vunpack.c.l.bf16 %v3784_v57 }
 0x8f7   : > { %v3745_v16 = vpop.permute.xlu1 %3744  ;;  %v3747_v13 = vpop.permute.xlu0 %3746 }
 0x8f8   : > { %v7117_v14 = vpack.i.bf16 %v3799_v21, %v3798_v51  ;;  %v3785_v48 = vmul.bf16 %v9615_v20, %v3745_v16  ;;  %v3786_v9 = vmul.bf16 %v9611_v19, %v3747_v13 }
 0x8fa   : > { %v3801_v23 = vunpack.c.l.bf16 %v3785_v48  ;;  %7118 = vrot.lane.b32.xlu0 %v7117_v14, %s7962_s7  ;;  %v3802_v22 = vunpack.c.l.bf16 %v3786_v9 }
 0x8fb   : > { %v3749_v17 = vpop.permute.xlu1 %3748  ;;  %v3751_v30 = vpop.permute.xlu0 %3750 }
 0x8fc   : > { %v7122_v11 = vpack.i.bf16 %v3801_v23, %v3800_v50  ;;  %v3787_v18 = vmul.bf16 %v9615_v20, %v3749_v17  ;;  %v3788_v15 = vmul.bf16 %v9611_v19, %v3751_v30 }
 0x8fe   : > { %v3803_v12 = vunpack.c.l.bf16 %v3787_v18  ;;  %7123 = vrot.lane.b32.xlu1 %v7122_v11, %s7962_s7  ;;  %v3804_v13 = vunpack.c.l.bf16 %v3788_v15 }
 0x8ff   : > { %v3753_v51 = vpop.permute.xlu1 %3752  ;;  %v3755_v21 = vpop.permute.xlu0 %3754 }
 0x900   : > { %v7127_v16 = vpack.i.bf16 %v3803_v12, %v3802_v22  ;;  %v3789_v57 = vmul.bf16 %v9615_v20, %v3753_v51  ;;  %v3790_v48 = vmul.bf16 %v9611_v19, %v3755_v21 }
 0x902   : > { %v3805_v14 = vunpack.c.l.bf16 %v3789_v57  ;;  %7128 = vrot.lane.b32.xlu0 %v7127_v16, %s7962_s7  ;;  %v3806_v30 = vunpack.c.l.bf16 %v3790_v48  ;;  %v6257_v16 = vld [vmem:[%s12505_s1 + $0x640] sm:$0xf]  ;;  %v6261_v48 = vld [vmem:[%s12505_s1 + $0x650] sm:$0xf] }
 0x903   : > { %v3757_v50 = vpop.permute.xlu1 %3756  ;;  %v3759_v23 = vpop.permute.xlu0 %3758 }
 0x904   : > { %v7132_v17 = vpack.i.bf16 %v3805_v14, %v3804_v13  ;;  %v3791_v9 = vmul.bf16 %v9615_v20, %v3757_v50  ;;  %v3792_v18 = vmul.bf16 %v9611_v19, %v3759_v23  ;;  %v6258_v19 = vld [vmem:[%s12505_s1 + $0x644] sm:$0xf]  ;;  %v6260_v13 = vld [vmem:[%s12505_s1 + $0x64c] sm:$0xf]  ;;  %v6262_v14 = vld [vmem:[%s12505_s1 + $0x654] sm:$0xf] }
 0x905   : > { %v6263_v50 = vld [vmem:[%s12505_s1 + $0x658] sm:$0xf]  ;;  %v6264_v23 = vld [vmem:[%s12505_s1 + $0x65c] sm:$0xf] }
 0x906   : > { %v3807_v11 = vunpack.c.l.bf16 %v3791_v9  ;;  %7133 = vrot.lane.b32.xlu1 %v7132_v17, %s7962_s7  ;;  %v3808_v51 = vunpack.c.l.bf16 %v3792_v18  ;;  %v6265_v17 = vld [vmem:[%s12505_s1 + $0x660] sm:$0xf]  ;;  %v6266_v9 = vld [vmem:[%s12505_s1 + $0x664] sm:$0xf]  ;;  %v6268_v18 = vld [vmem:[%s12505_s1 + $0x66c] sm:$0xf] }
 0x907   : > { %v3761_v22 = vpop.permute.xlu1 %3760 }
 0x908   : > { %v7137_v12 = vpack.i.bf16 %v3807_v11, %v3806_v30  ;;  %v3793_v15 = vmul.bf16 %v9615_v20, %v3761_v22  ;;  %v6259_v20 = vld [vmem:[%s12505_s1 + $0x648] sm:$0xf]  ;;  %v6269_v11 = vld [vmem:[%s12505_s1 + $0x670] sm:$0xf]  ;;  %v6270_v22 = vld [vmem:[%s12505_s1 + $0x674] sm:$0xf] }
 0x909   : > { %v6267_v30 = vld [vmem:[%s12505_s1 + $0x668] sm:$0xf] }
 0x90a   : > { %v3809_v21 = vunpack.c.l.bf16 %v3793_v15  ;;  %7138 = vrot.lane.b32.xlu0 %v7137_v12, %s7962_s7  ;;  %v6271_v12 = vld [vmem:[%s12505_s1 + $0x678] sm:$0xf]  ;;  %v6272_v15 = vld [vmem:[%s12505_s1 + $0x67c] sm:$0xf] }
 0x90c   : > { %v7142_v57 = vpack.i.bf16 %v3809_v21, %v3808_v51 }
 0x90e   : > { %7143 = vrot.lane.b32.xlu1 %v7142_v57, %s7962_s7  ;;  %3991 = vrot.lane.b32.xlu0 %v6257_v16, %s7959_s30 }
 0x912   : > { %3993 = vrot.lane.b32.xlu1 %v6258_v19, %s7959_s30  ;;  %3995 = vrot.lane.b32.xlu0 %v6259_v20, %s7959_s30 }
 0x916   : > { %3997 = vrot.lane.b32.xlu1 %v6260_v13, %s7959_s30  ;;  %3999 = vrot.lane.b32.xlu0 %v6261_v48, %s7959_s30 }
 0x91a   : > { %4001 = vrot.lane.b32.xlu1 %v6262_v14, %s7959_s30  ;;  %4003 = vrot.lane.b32.xlu0 %v6263_v50, %s7959_s30  ;;  %v9825_v14 = vld [vmem:[%s8230_s5 + $0x40] sm:$0xf] }
 0x91e   : > { %4005 = vrot.lane.b32.xlu1 %v6264_v23, %s7959_s30  ;;  %4007 = vrot.lane.b32.xlu0 %v6265_v17, %s7959_s30  ;;  %v9829_v17 = vld [vmem:[%s8230_s5 + $0x44] sm:$0xf] }
 0x922   : > { %4009 = vrot.lane.b32.xlu1 %v6266_v9, %s7959_s30  ;;  %4011 = vrot.lane.b32.xlu0 %v6267_v30, %s7959_s30 }
 0x926   : > { %4013 = vrot.lane.b32.xlu1 %v6268_v18, %s7959_s30  ;;  %4015 = vrot.lane.b32.xlu0 %v6269_v11, %s7959_s30 }
 0x92a   : > { %4017 = vrot.lane.b32.xlu1 %v6270_v22, %s7959_s30  ;;  %4019 = vrot.lane.b32.xlu0 %v6271_v12, %s7959_s30 }
 0x92e   : > { %4021 = vrot.lane.b32.xlu1 %v6272_v15, %s7959_s30 }
 0x964   : > { %v9808_v51 = vpop.permute.xlu0 %7108 }
 0x965   : > { %12764 = vst [vmem:[#allocation110_spill] sm:$0xff] %v9808_v51 }
 0x968   : > { %v9810_v21 = vpop.permute.xlu1 %7113 }
 0x969   : > { %12765 = vst [vmem:[#allocation111_spill] sm:$0xff] %v9810_v21 }
 0x96c   : > { %v9812_v16 = vpop.permute.xlu0 %7118 }
 0x96d   : > { %12766 = vst [vmem:[#allocation112_spill] sm:$0xff] %v9812_v16 }
 0x970   : > { %v9814_v57 = vpop.permute.xlu1 %7123 }
 0x971   : > { %12767 = vst [vmem:[#allocation113_spill] sm:$0xff] %v9814_v57 }
 0x974   : > { %v9816_v19 = vpop.permute.xlu0 %7128 }
 0x975   : > { %12768 = vst [vmem:[#allocation114_spill] sm:$0xff] %v9816_v19 }
 0x978   : > { %v9818_v20 = vpop.permute.xlu1 %7133 }
 0x979   : > { %12769 = vst [vmem:[#allocation115_spill] sm:$0xff] %v9818_v20 }
 0x97c   : > { %v9820_v13 = vpop.permute.xlu0 %7138 }
 0x97d   : > { %12770 = vst [vmem:[#allocation116_spill] sm:$0xff] %v9820_v13 }
 0x980   : > { %v9822_v48 = vpop.permute.xlu1 %7143  ;;  %v3992_v50 = vpop.permute.xlu0 %3991 }
 0x981   : > { %12771 = vst [vmem:[#allocation117_spill] sm:$0xff] %v9822_v48  ;;  %v4039_v23 = vmul.bf16 %v9825_v14, %v3992_v50 }
 0x983   : > { %v4055_v11 = vunpack.c.l.bf16 %v4039_v23 }
 0x984   : > { %v3994_v9 = vpop.permute.xlu1 %3993  ;;  %v3996_v30 = vpop.permute.xlu0 %3995 }
 0x985   : > { %v4040_v18 = vmul.bf16 %v9829_v17, %v3994_v9  ;;  %v4041_v22 = vmul.bf16 %v9825_v14, %v3996_v30 }
 0x987   : > { %v4056_v12 = vunpack.c.l.bf16 %v4040_v18  ;;  %v4057_v16 = vunpack.c.l.bf16 %v4041_v22 }
 0x988   : > { %v3998_v15 = vpop.permute.xlu1 %3997  ;;  %v4000_v20 = vpop.permute.xlu0 %3999 }
 0x989   : > { %v7147_v19 = vpack.i.bf16 %v4056_v12, %v4055_v11  ;;  %v4042_v57 = vmul.bf16 %v9829_v17, %v3998_v15  ;;  %v4043_v21 = vmul.bf16 %v9825_v14, %v4000_v20 }
 0x98b   : > { %v4058_v51 = vunpack.c.l.bf16 %v4042_v57  ;;  %7148 = vrot.lane.b32.xlu0 %v7147_v19, %s7961_s6  ;;  %v4059_v23 = vunpack.c.l.bf16 %v4043_v21 }
 0x98c   : > { %v4002_v50 = vpop.permute.xlu1 %4001  ;;  %v4004_v48 = vpop.permute.xlu0 %4003 }
 0x98d   : > { %v7152_v13 = vpack.i.bf16 %v4058_v51, %v4057_v16  ;;  %v4044_v9 = vmul.bf16 %v9829_v17, %v4002_v50  ;;  %v4045_v30 = vmul.bf16 %v9825_v14, %v4004_v48 }
 0x98f   : > { %v4060_v18 = vunpack.c.l.bf16 %v4044_v9  ;;  %7153 = vrot.lane.b32.xlu1 %v7152_v13, %s7961_s6  ;;  %v4061_v20 = vunpack.c.l.bf16 %v4045_v30 }
 0x990   : > { %v4006_v11 = vpop.permute.xlu1 %4005  ;;  %v4008_v12 = vpop.permute.xlu0 %4007 }
 0x991   : > { %v7157_v15 = vpack.i.bf16 %v4060_v18, %v4059_v23  ;;  %v4046_v22 = vmul.bf16 %v9829_v17, %v4006_v11  ;;  %v4047_v57 = vmul.bf16 %v9825_v14, %v4008_v12 }
 0x993   : > { %v4062_v19 = vunpack.c.l.bf16 %v4046_v22  ;;  %7158 = vrot.lane.b32.xlu0 %v7157_v15, %s7961_s6  ;;  %v4063_v48 = vunpack.c.l.bf16 %v4047_v57 }
 0x994   : > { %v4010_v51 = vpop.permute.xlu1 %4009  ;;  %v4012_v16 = vpop.permute.xlu0 %4011 }
 0x995   : > { %v7162_v50 = vpack.i.bf16 %v4062_v19, %v4061_v20  ;;  %v4048_v21 = vmul.bf16 %v9829_v17, %v4010_v51  ;;  %v4049_v9 = vmul.bf16 %v9825_v14, %v4012_v16 }
 0x997   : > { %v4064_v13 = vunpack.c.l.bf16 %v4048_v21  ;;  %7163 = vrot.lane.b32.xlu1 %v7162_v50, %s7961_s6  ;;  %v4065_v12 = vunpack.c.l.bf16 %v4049_v9 }
 0x998   : > { %v4014_v23 = vpop.permute.xlu1 %4013  ;;  %v4016_v18 = vpop.permute.xlu0 %4015 }
 0x999   : > { %v7167_v11 = vpack.i.bf16 %v4064_v13, %v4063_v48  ;;  %v4050_v30 = vmul.bf16 %v9829_v17, %v4014_v23  ;;  %v4051_v22 = vmul.bf16 %v9825_v14, %v4016_v18 }
 0x99b   : > { %v4066_v15 = vunpack.c.l.bf16 %v4050_v30  ;;  %7168 = vrot.lane.b32.xlu0 %v7167_v11, %s7961_s6  ;;  %v4067_v16 = vunpack.c.l.bf16 %v4051_v22  ;;  %v6273_v11 = vld [vmem:[%s12505_s1 + $0x680] sm:$0xf]  ;;  %v6275_v22 = vld [vmem:[%s12505_s1 + $0x688] sm:$0xf] }
 0x99c   : > { %v4018_v20 = vpop.permute.xlu1 %4017  ;;  %v4020_v19 = vpop.permute.xlu0 %4019 }
 0x99d   : > { %v7172_v51 = vpack.i.bf16 %v4066_v15, %v4065_v12  ;;  %v4052_v57 = vmul.bf16 %v9829_v17, %v4018_v20  ;;  %v4053_v21 = vmul.bf16 %v9825_v14, %v4020_v19  ;;  %v6274_v12 = vld [vmem:[%s12505_s1 + $0x684] sm:$0xf]  ;;  %v6276_v15 = vld [vmem:[%s12505_s1 + $0x68c] sm:$0xf]  ;;  %v6277_v20 = vld [vmem:[%s12505_s1 + $0x690] sm:$0xf] }
 0x99e   : > { %v6278_v19 = vld [vmem:[%s12505_s1 + $0x694] sm:$0xf] }
 0x99f   : > { %v4068_v50 = vunpack.c.l.bf16 %v4052_v57  ;;  %7173 = vrot.lane.b32.xlu1 %v7172_v51, %s7961_s6  ;;  %v4069_v23 = vunpack.c.l.bf16 %v4053_v21  ;;  %v6279_v51 = vld [vmem:[%s12505_s1 + $0x698] sm:$0xf]  ;;  %v6280_v57 = vld [vmem:[%s12505_s1 + $0x69c] sm:$0xf]  ;;  %v6282_v21 = vld [vmem:[%s12505_s1 + $0x6a4] sm:$0xf] }
 0x9a0   : > { %v4022_v48 = vpop.permute.xlu1 %4021 }
 0x9a1   : > { %v7177_v13 = vpack.i.bf16 %v4068_v50, %v4067_v16  ;;  %v4054_v9 = vmul.bf16 %v9829_v17, %v4022_v48  ;;  %v6281_v16 = vld [vmem:[%s12505_s1 + $0x6a0] sm:$0xf]  ;;  %v6283_v50 = vld [vmem:[%s12505_s1 + $0x6a8] sm:$0xf]  ;;  %v6284_v48 = vld [vmem:[%s12505_s1 + $0x6ac] sm:$0xf] }
 0x9a3   : > { %v4070_v18 = vunpack.c.l.bf16 %v4054_v9  ;;  %7178 = vrot.lane.b32.xlu0 %v7177_v13, %s7961_s6  ;;  %v6285_v13 = vld [vmem:[%s12505_s1 + $0x6b0] sm:$0xf]  ;;  %v6286_v9 = vld [vmem:[%s12505_s1 + $0x6b4] sm:$0xf] }
 0x9a5   : > { %v7182_v30 = vpack.i.bf16 %v4070_v18, %v4069_v23  ;;  %v6287_v23 = vld [vmem:[%s12505_s1 + $0x6b8] sm:$0xf]  ;;  %v6288_v18 = vld [vmem:[%s12505_s1 + $0x6bc] sm:$0xf] }
 0x9a7   : > { %7183 = vrot.lane.b32.xlu1 %v7182_v30, %s7961_s6  ;;  %4184 = vrot.lane.b32.xlu0 %v6273_v11, %s7960_s4 }
 0x9ab   : > { %4186 = vrot.lane.b32.xlu1 %v6274_v12, %s7960_s4  ;;  %4188 = vrot.lane.b32.xlu0 %v6275_v22, %s7960_s4 }
 0x9af   : > { %4190 = vrot.lane.b32.xlu1 %v6276_v15, %s7960_s4  ;;  %4192 = vrot.lane.b32.xlu0 %v6277_v20, %s7960_s4 }
 0x9b3   : > { %4194 = vrot.lane.b32.xlu1 %v6278_v19, %s7960_s4  ;;  %4196 = vrot.lane.b32.xlu0 %v6279_v51, %s7960_s4 }
 0x9b7   : > { %4198 = vrot.lane.b32.xlu1 %v6280_v57, %s7960_s4  ;;  %4200 = vrot.lane.b32.xlu0 %v6281_v16, %s7960_s4 }
 0x9bb   : > { %4202 = vrot.lane.b32.xlu1 %v6282_v21, %s7960_s4  ;;  %4204 = vrot.lane.b32.xlu0 %v6283_v50, %s7960_s4 }
 0x9bf   : > { %4206 = vrot.lane.b32.xlu1 %v6284_v48, %s7960_s4  ;;  %4208 = vrot.lane.b32.xlu0 %v6285_v13, %s7960_s4 }
 0x9c3   : > { %4210 = vrot.lane.b32.xlu1 %v6286_v9, %s7960_s4  ;;  %4212 = vrot.lane.b32.xlu0 %v6287_v23, %s7960_s4 }
 0x9c7   : > { %4214 = vrot.lane.b32.xlu1 %v6288_v18, %s7960_s4 }
 0x9fd   : > { %v9918_v11 = vpop.permute.xlu0 %7148 }
 0x9fe   : > { %12772 = vst [vmem:[#allocation118_spill] sm:$0xff] %v9918_v11 }
 0xa01   : > { %v9920_v30 = vpop.permute.xlu1 %7153 }
 0xa02   : > { %12773 = vst [vmem:[#allocation119_spill] sm:$0xff] %v9920_v30 }
 0xa05   : > { %v9922_v12 = vpop.permute.xlu0 %7158 }
 0xa06   : > { %12774 = vst [vmem:[#allocation120_spill] sm:$0xff] %v9922_v12 }
 0xa09   : > { %v9924_v22 = vpop.permute.xlu1 %7163 }
 0xa0a   : > { %12775 = vst [vmem:[#allocation121_spill] sm:$0xff] %v9924_v22 }
 0xa0d   : > { %v9926_v15 = vpop.permute.xlu0 %7168 }
 0xa0e   : > { %12776 = vst [vmem:[#allocation122_spill] sm:$0xff] %v9926_v15 }
 0xa11   : > { %v9928_v20 = vpop.permute.xlu1 %7173 }
 0xa12   : > { %12777 = vst [vmem:[#allocation123_spill] sm:$0xff] %v9928_v20 }
 0xa15   : > { %v9930_v19 = vpop.permute.xlu0 %7178 }
 0xa16   : > { %12778 = vst [vmem:[#allocation124_spill] sm:$0xff] %v9930_v19 }
 0xa19   : > { %v9932_v51 = vpop.permute.xlu1 %7183  ;;  %v4185_v57 = vpop.permute.xlu0 %4184 }
 0xa1a   : > { %12779 = vst [vmem:[#allocation125_spill] sm:$0xff] %v9932_v51  ;;  %v4232_v16 = vmul.bf16 %v9825_v14, %v4185_v57 }
 0xa1c   : > { %v4248_v13 = vunpack.c.l.bf16 %v4232_v16 }
 0xa1d   : > { %v4187_v21 = vpop.permute.xlu1 %4186  ;;  %v4189_v50 = vpop.permute.xlu0 %4188 }
 0xa1e   : > { %v4233_v48 = vmul.bf16 %v9829_v17, %v4187_v21  ;;  %v4234_v9 = vmul.bf16 %v9825_v14, %v4189_v50 }
 0xa20   : > { %v4249_v23 = vunpack.c.l.bf16 %v4233_v48  ;;  %v4250_v12 = vunpack.c.l.bf16 %v4234_v9 }
 0xa21   : > { %v4191_v18 = vpop.permute.xlu1 %4190  ;;  %v4193_v22 = vpop.permute.xlu0 %4192 }
 0xa22   : > { %v7187_v15 = vpack.i.bf16 %v4249_v23, %v4248_v13  ;;  %v4235_v20 = vmul.bf16 %v9829_v17, %v4191_v18  ;;  %v4236_v30 = vmul.bf16 %v9825_v14, %v4193_v22 }
 0xa24   : > { %v4251_v11 = vunpack.c.l.bf16 %v4235_v20  ;;  %7188 = vrot.lane.b32.xlu0 %v7187_v15, %s7962_s7  ;;  %v4252_v16 = vunpack.c.l.bf16 %v4236_v30 }
 0xa25   : > { %v4195_v57 = vpop.permute.xlu1 %4194  ;;  %v4197_v51 = vpop.permute.xlu0 %4196 }
 0xa26   : > { %v7192_v19 = vpack.i.bf16 %v4251_v11, %v4250_v12  ;;  %v4237_v21 = vmul.bf16 %v9829_v17, %v4195_v57  ;;  %v4238_v50 = vmul.bf16 %v9825_v14, %v4197_v51 }
 0xa28   : > { %v4253_v48 = vunpack.c.l.bf16 %v4237_v21  ;;  %7193 = vrot.lane.b32.xlu1 %v7192_v19, %s7962_s7  ;;  %v4254_v22 = vunpack.c.l.bf16 %v4238_v50 }
 0xa29   : > { %v4199_v13 = vpop.permute.xlu1 %4198  ;;  %v4201_v23 = vpop.permute.xlu0 %4200 }
 0xa2a   : > { %v7197_v18 = vpack.i.bf16 %v4253_v48, %v4252_v16  ;;  %v4239_v9 = vmul.bf16 %v9829_v17, %v4199_v13  ;;  %v4240_v20 = vmul.bf16 %v9825_v14, %v4201_v23 }
 0xa2c   : > { %v4255_v15 = vunpack.c.l.bf16 %v4239_v9  ;;  %7198 = vrot.lane.b32.xlu0 %v7197_v18, %s7962_s7  ;;  %v4256_v51 = vunpack.c.l.bf16 %v4240_v20 }
 0xa2d   : > { %v4203_v11 = vpop.permute.xlu1 %4202  ;;  %v4205_v12 = vpop.permute.xlu0 %4204 }
 0xa2e   : > { %v7202_v57 = vpack.i.bf16 %v4255_v15, %v4254_v22  ;;  %v4241_v30 = vmul.bf16 %v9829_v17, %v4203_v11  ;;  %v4242_v21 = vmul.bf16 %v9825_v14, %v4205_v12 }
 0xa30   : > { %v4257_v19 = vunpack.c.l.bf16 %v4241_v30  ;;  %7203 = vrot.lane.b32.xlu1 %v7202_v57, %s7962_s7  ;;  %v4258_v23 = vunpack.c.l.bf16 %v4242_v21 }
 0xa31   : > { %v4207_v16 = vpop.permute.xlu1 %4206  ;;  %v4209_v48 = vpop.permute.xlu0 %4208 }
 0xa32   : > { %v7207_v13 = vpack.i.bf16 %v4257_v19, %v4256_v51  ;;  %v4243_v50 = vmul.bf16 %v9829_v17, %v4207_v16  ;;  %v4244_v9 = vmul.bf16 %v9825_v14, %v4209_v48 }
 0xa34   : > { %v4259_v18 = vunpack.c.l.bf16 %v4243_v50  ;;  %7208 = vrot.lane.b32.xlu0 %v7207_v13, %s7962_s7  ;;  %v4260_v12 = vunpack.c.l.bf16 %v4244_v9  ;;  %v6307_v13 = vld [vmem:[%s12505_s1 + $0x700] sm:$0xf]  ;;  %v6311_v9 = vld [vmem:[%s12505_s1 + $0x710] sm:$0xf] }
 0xa35   : > { %v4211_v22 = vpop.permute.xlu1 %4210  ;;  %v4213_v15 = vpop.permute.xlu0 %4212 }
 0xa36   : > { %v7212_v11 = vpack.i.bf16 %v4259_v18, %v4258_v23  ;;  %v4245_v20 = vmul.bf16 %v9829_v17, %v4211_v22  ;;  %v4246_v30 = vmul.bf16 %v9825_v14, %v4213_v15  ;;  %v6308_v14 = vld [vmem:[%s12505_s1 + $0x704] sm:$0xf]  ;;  %v6310_v23 = vld [vmem:[%s12505_s1 + $0x70c] sm:$0xf]  ;;  %v6312_v18 = vld [vmem:[%s12505_s1 + $0x714] sm:$0xf] }
 0xa37   : > { %v6313_v22 = vld [vmem:[%s12505_s1 + $0x718] sm:$0xf]  ;;  %v6314_v15 = vld [vmem:[%s12505_s1 + $0x71c] sm:$0xf] }
 0xa38   : > { %v4261_v57 = vunpack.c.l.bf16 %v4245_v20  ;;  %7213 = vrot.lane.b32.xlu1 %v7212_v11, %s7962_s7  ;;  %v4262_v16 = vunpack.c.l.bf16 %v4246_v30  ;;  %v6315_v11 = vld [vmem:[%s12505_s1 + $0x720] sm:$0xf]  ;;  %v6316_v20 = vld [vmem:[%s12505_s1 + $0x724] sm:$0xf]  ;;  %v6318_v30 = vld [vmem:[%s12505_s1 + $0x72c] sm:$0xf] }
 0xa39   : > { %v4215_v51 = vpop.permute.xlu1 %4214 }
 0xa3a   : > { %v7217_v19 = vpack.i.bf16 %v4261_v57, %v4260_v12  ;;  %v4247_v21 = vmul.bf16 %v9829_v17, %v4215_v51  ;;  %v6309_v17 = vld [vmem:[%s12505_s1 + $0x708] sm:$0xf]  ;;  %v6319_v57 = vld [vmem:[%s12505_s1 + $0x730] sm:$0xf]  ;;  %v6320_v51 = vld [vmem:[%s12505_s1 + $0x734] sm:$0xf] }
 0xa3b   : > { %v6317_v12 = vld [vmem:[%s12505_s1 + $0x728] sm:$0xf] }
 0xa3c   : > { %v4263_v48 = vunpack.c.l.bf16 %v4247_v21  ;;  %7218 = vrot.lane.b32.xlu0 %v7217_v19, %s7962_s7  ;;  %v6321_v19 = vld [vmem:[%s12505_s1 + $0x738] sm:$0xf]  ;;  %v6322_v21 = vld [vmem:[%s12505_s1 + $0x73c] sm:$0xf] }
 0xa3e   : > { %v7222_v50 = vpack.i.bf16 %v4263_v48, %v4262_v16 }
 0xa40   : > { %7223 = vrot.lane.b32.xlu1 %v7222_v50, %s7962_s7  ;;  %4445 = vrot.lane.b32.xlu0 %v6307_v13, %s7959_s30 }
 0xa44   : > { %4447 = vrot.lane.b32.xlu1 %v6308_v14, %s7959_s30  ;;  %4449 = vrot.lane.b32.xlu0 %v6309_v17, %s7959_s30 }
 0xa48   : > { %4451 = vrot.lane.b32.xlu1 %v6310_v23, %s7959_s30  ;;  %4453 = vrot.lane.b32.xlu0 %v6311_v9, %s7959_s30 }
 0xa4c   : > { %4455 = vrot.lane.b32.xlu1 %v6312_v18, %s7959_s30  ;;  %4457 = vrot.lane.b32.xlu0 %v6313_v22, %s7959_s30  ;;  %v10039_v18 = vld [vmem:[%s8230_s5 + $0x48] sm:$0xf] }
 0xa50   : > { %4459 = vrot.lane.b32.xlu1 %v6314_v15, %s7959_s30  ;;  %4461 = vrot.lane.b32.xlu0 %v6315_v11, %s7959_s30  ;;  %v10043_v11 = vld [vmem:[%s8230_s5 + $0x4c] sm:$0xf] }
 0xa54   : > { %4463 = vrot.lane.b32.xlu1 %v6316_v20, %s7959_s30  ;;  %4465 = vrot.lane.b32.xlu0 %v6317_v12, %s7959_s30 }
 0xa58   : > { %4467 = vrot.lane.b32.xlu1 %v6318_v30, %s7959_s30  ;;  %4469 = vrot.lane.b32.xlu0 %v6319_v57, %s7959_s30 }
 0xa5c   : > { %4471 = vrot.lane.b32.xlu1 %v6320_v51, %s7959_s30  ;;  %4473 = vrot.lane.b32.xlu0 %v6321_v19, %s7959_s30 }
 0xa60   : > { %4475 = vrot.lane.b32.xlu1 %v6322_v21, %s7959_s30 }
 0xa96   : > { %v10022_v16 = vpop.permute.xlu0 %7188 }
 0xa97   : > { %12780 = vst [vmem:[#allocation126_spill] sm:$0xff] %v10022_v16 }
 0xa9a   : > { %v10024_v48 = vpop.permute.xlu1 %7193 }
 0xa9b   : > { %12781 = vst [vmem:[#allocation127_spill] sm:$0xff] %v10024_v48 }
 0xa9e   : > { %v10026_v13 = vpop.permute.xlu0 %7198 }
 0xa9f   : > { %12782 = vst [vmem:[#allocation128_spill] sm:$0xff] %v10026_v13 }
 0xaa2   : > { %v10028_v50 = vpop.permute.xlu1 %7203 }
 0xaa3   : > { %12783 = vst [vmem:[#allocation129_spill] sm:$0xff] %v10028_v50 }
 0xaa6   : > { %v10030_v14 = vpop.permute.xlu0 %7208 }
 0xaa7   : > { %12784 = vst [vmem:[#allocation130_spill] sm:$0xff] %v10030_v14 }
 0xaaa   : > { %v10032_v17 = vpop.permute.xlu1 %7213 }
 0xaab   : > { %12785 = vst [vmem:[#allocation131_spill] sm:$0xff] %v10032_v17 }
 0xaae   : > { %v10034_v23 = vpop.permute.xlu0 %7218 }
 0xaaf   : > { %12786 = vst [vmem:[#allocation132_spill] sm:$0xff] %v10034_v23 }
 0xab2   : > { %v10036_v9 = vpop.permute.xlu1 %7223  ;;  %v4446_v22 = vpop.permute.xlu0 %4445 }
 0xab3   : > { %12787 = vst [vmem:[#allocation133_spill] sm:$0xff] %v10036_v9  ;;  %v4493_v15 = vmul.bf16 %v10039_v18, %v4446_v22 }
 0xab5   : > { %v4509_v57 = vunpack.c.l.bf16 %v4493_v15 }
 0xab6   : > { %v4448_v20 = vpop.permute.xlu1 %4447  ;;  %v4450_v12 = vpop.permute.xlu0 %4449 }
 0xab7   : > { %v4494_v30 = vmul.bf16 %v10043_v11, %v4448_v20  ;;  %v4495_v51 = vmul.bf16 %v10039_v18, %v4450_v12 }
 0xab9   : > { %v4510_v19 = vunpack.c.l.bf16 %v4494_v30  ;;  %v4511_v13 = vunpack.c.l.bf16 %v4495_v51 }
 0xaba   : > { %v4452_v21 = vpop.permute.xlu1 %4451  ;;  %v4454_v17 = vpop.permute.xlu0 %4453 }
 0xabb   : > { %v7227_v14 = vpack.i.bf16 %v4510_v19, %v4509_v57  ;;  %v4496_v50 = vmul.bf16 %v10043_v11, %v4452_v21  ;;  %v4497_v48 = vmul.bf16 %v10039_v18, %v4454_v17 }
 0xabd   : > { %v4512_v16 = vunpack.c.l.bf16 %v4496_v50  ;;  %7228 = vrot.lane.b32.xlu0 %v7227_v14, %s7961_s6  ;;  %v4513_v15 = vunpack.c.l.bf16 %v4497_v48 }
 0xabe   : > { %v4456_v22 = vpop.permute.xlu1 %4455  ;;  %v4458_v9 = vpop.permute.xlu0 %4457 }
 0xabf   : > { %v7232_v23 = vpack.i.bf16 %v4512_v16, %v4511_v13  ;;  %v4498_v20 = vmul.bf16 %v10043_v11, %v4456_v22  ;;  %v4499_v12 = vmul.bf16 %v10039_v18, %v4458_v9 }
 0xac1   : > { %v4514_v30 = vunpack.c.l.bf16 %v4498_v20  ;;  %7233 = vrot.lane.b32.xlu1 %v7232_v23, %s7961_s6  ;;  %v4515_v17 = vunpack.c.l.bf16 %v4499_v12 }
 0xac2   : > { %v4460_v57 = vpop.permute.xlu1 %4459  ;;  %v4462_v19 = vpop.permute.xlu0 %4461 }
 0xac3   : > { %v7237_v21 = vpack.i.bf16 %v4514_v30, %v4513_v15  ;;  %v4500_v51 = vmul.bf16 %v10043_v11, %v4460_v57  ;;  %v4501_v50 = vmul.bf16 %v10039_v18, %v4462_v19 }
 0xac5   : > { %v4516_v14 = vunpack.c.l.bf16 %v4500_v51  ;;  %7238 = vrot.lane.b32.xlu0 %v7237_v21, %s7961_s6  ;;  %v4517_v9 = vunpack.c.l.bf16 %v4501_v50 }
 0xac6   : > { %v4464_v16 = vpop.permute.xlu1 %4463  ;;  %v4466_v13 = vpop.permute.xlu0 %4465 }
 0xac7   : > { %v7242_v22 = vpack.i.bf16 %v4516_v14, %v4515_v17  ;;  %v4502_v48 = vmul.bf16 %v10043_v11, %v4464_v16  ;;  %v4503_v20 = vmul.bf16 %v10039_v18, %v4466_v13 }
 0xac9   : > { %v4518_v23 = vunpack.c.l.bf16 %v4502_v48  ;;  %7243 = vrot.lane.b32.xlu1 %v7242_v22, %s7961_s6  ;;  %v4519_v19 = vunpack.c.l.bf16 %v4503_v20 }
 0xaca   : > { %v4468_v15 = vpop.permute.xlu1 %4467  ;;  %v4470_v30 = vpop.permute.xlu0 %4469 }
 0xacb   : > { %v7247_v57 = vpack.i.bf16 %v4518_v23, %v4517_v9  ;;  %v4504_v12 = vmul.bf16 %v10043_v11, %v4468_v15  ;;  %v4505_v51 = vmul.bf16 %v10039_v18, %v4470_v30 }
 0xacd   : > { %v4520_v21 = vunpack.c.l.bf16 %v4504_v12  ;;  %7248 = vrot.lane.b32.xlu0 %v7247_v57, %s7961_s6  ;;  %v4521_v13 = vunpack.c.l.bf16 %v4505_v51  ;;  %v6323_v57 = vld [vmem:[%s12505_s1 + $0x740] sm:$0xf]  ;;  %v6325_v51 = vld [vmem:[%s12505_s1 + $0x748] sm:$0xf] }
 0xace   : > { %v4472_v17 = vpop.permute.xlu1 %4471  ;;  %v4474_v14 = vpop.permute.xlu0 %4473 }
 0xacf   : > { %v7252_v16 = vpack.i.bf16 %v4520_v21, %v4519_v19  ;;  %v4506_v50 = vmul.bf16 %v10043_v11, %v4472_v17  ;;  %v4507_v48 = vmul.bf16 %v10039_v18, %v4474_v14  ;;  %v6324_v19 = vld [vmem:[%s12505_s1 + $0x744] sm:$0xf]  ;;  %v6326_v21 = vld [vmem:[%s12505_s1 + $0x74c] sm:$0xf]  ;;  %v6327_v17 = vld [vmem:[%s12505_s1 + $0x750] sm:$0xf] }
 0xad0   : > { %v6328_v14 = vld [vmem:[%s12505_s1 + $0x754] sm:$0xf] }
 0xad1   : > { %v4522_v22 = vunpack.c.l.bf16 %v4506_v50  ;;  %7253 = vrot.lane.b32.xlu1 %v7252_v16, %s7961_s6  ;;  %v4523_v15 = vunpack.c.l.bf16 %v4507_v48  ;;  %v6329_v16 = vld [vmem:[%s12505_s1 + $0x758] sm:$0xf]  ;;  %v6330_v50 = vld [vmem:[%s12505_s1 + $0x75c] sm:$0xf]  ;;  %v6332_v48 = vld [vmem:[%s12505_s1 + $0x764] sm:$0xf] }
 0xad2   : > { %v4476_v9 = vpop.permute.xlu1 %4475 }
 0xad3   : > { %v7257_v23 = vpack.i.bf16 %v4522_v22, %v4521_v13  ;;  %v4508_v20 = vmul.bf16 %v10043_v11, %v4476_v9  ;;  %v6331_v13 = vld [vmem:[%s12505_s1 + $0x760] sm:$0xf]  ;;  %v6333_v22 = vld [vmem:[%s12505_s1 + $0x768] sm:$0xf]  ;;  %v6334_v9 = vld [vmem:[%s12505_s1 + $0x76c] sm:$0xf] }
 0xad5   : > { %v4524_v30 = vunpack.c.l.bf16 %v4508_v20  ;;  %7258 = vrot.lane.b32.xlu0 %v7257_v23, %s7961_s6  ;;  %v6335_v23 = vld [vmem:[%s12505_s1 + $0x770] sm:$0xf]  ;;  %v6336_v20 = vld [vmem:[%s12505_s1 + $0x774] sm:$0xf] }
 0xad7   : > { %v7262_v12 = vpack.i.bf16 %v4524_v30, %v4523_v15  ;;  %v6337_v15 = vld [vmem:[%s12505_s1 + $0x778] sm:$0xf]  ;;  %v6338_v30 = vld [vmem:[%s12505_s1 + $0x77c] sm:$0xf] }
 0xad9   : > { %7263 = vrot.lane.b32.xlu1 %v7262_v12, %s7961_s6  ;;  %4638 = vrot.lane.b32.xlu0 %v6323_v57, %s7960_s4 }
 0xadd   : > { %4640 = vrot.lane.b32.xlu1 %v6324_v19, %s7960_s4  ;;  %4642 = vrot.lane.b32.xlu0 %v6325_v51, %s7960_s4 }
 0xae1   : > { %4644 = vrot.lane.b32.xlu1 %v6326_v21, %s7960_s4  ;;  %4646 = vrot.lane.b32.xlu0 %v6327_v17, %s7960_s4 }
 0xae5   : > { %4648 = vrot.lane.b32.xlu1 %v6328_v14, %s7960_s4  ;;  %4650 = vrot.lane.b32.xlu0 %v6329_v16, %s7960_s4 }
 0xae9   : > { %4652 = vrot.lane.b32.xlu1 %v6330_v50, %s7960_s4  ;;  %4654 = vrot.lane.b32.xlu0 %v6331_v13, %s7960_s4 }
 0xaed   : > { %4656 = vrot.lane.b32.xlu1 %v6332_v48, %s7960_s4  ;;  %4658 = vrot.lane.b32.xlu0 %v6333_v22, %s7960_s4 }
 0xaf1   : > { %4660 = vrot.lane.b32.xlu1 %v6334_v9, %s7960_s4  ;;  %4662 = vrot.lane.b32.xlu0 %v6335_v23, %s7960_s4 }
 0xaf5   : > { %4664 = vrot.lane.b32.xlu1 %v6336_v20, %s7960_s4  ;;  %4666 = vrot.lane.b32.xlu0 %v6337_v15, %s7960_s4 }
 0xaf9   : > { %4668 = vrot.lane.b32.xlu1 %v6338_v30, %s7960_s4 }
 0xb2f   : > { %v10132_v57 = vpop.permute.xlu0 %7228 }
 0xb30   : > { %12788 = vst [vmem:[#allocation134_spill] sm:$0xff] %v10132_v57 }
 0xb33   : > { %v10134_v12 = vpop.permute.xlu1 %7233 }
 0xb34   : > { %12789 = vst [vmem:[#allocation135_spill] sm:$0xff] %v10134_v12 }
 0xb37   : > { %v10136_v19 = vpop.permute.xlu0 %7238 }
 0xb38   : > { %12790 = vst [vmem:[#allocation136_spill] sm:$0xff] %v10136_v19 }
 0xb3b   : > { %v10138_v51 = vpop.permute.xlu1 %7243 }
 0xb3c   : > { %12791 = vst [vmem:[#allocation137_spill] sm:$0xff] %v10138_v51 }
 0xb3f   : > { %v10140_v21 = vpop.permute.xlu0 %7248 }
 0xb40   : > { %12792 = vst [vmem:[#allocation138_spill] sm:$0xff] %v10140_v21 }
 0xb43   : > { %v10142_v17 = vpop.permute.xlu1 %7253 }
 0xb44   : > { %12793 = vst [vmem:[#allocation139_spill] sm:$0xff] %v10142_v17 }
 0xb47   : > { %v10144_v14 = vpop.permute.xlu0 %7258 }
 0xb48   : > { %12794 = vst [vmem:[#allocation140_spill] sm:$0xff] %v10144_v14 }
 0xb4b   : > { %v10146_v16 = vpop.permute.xlu1 %7263  ;;  %v4639_v50 = vpop.permute.xlu0 %4638 }
 0xb4c   : > { %12795 = vst [vmem:[#allocation141_spill] sm:$0xff] %v10146_v16  ;;  %v4686_v13 = vmul.bf16 %v10039_v18, %v4639_v50 }
 0xb4e   : > { %v4702_v23 = vunpack.c.l.bf16 %v4686_v13 }
 0xb4f   : > { %v4641_v48 = vpop.permute.xlu1 %4640  ;;  %v4643_v22 = vpop.permute.xlu0 %4642 }
 0xb50   : > { %v4687_v9 = vmul.bf16 %v10043_v11, %v4641_v48  ;;  %v4688_v20 = vmul.bf16 %v10039_v18, %v4643_v22 }
 0xb52   : > { %v4703_v15 = vunpack.c.l.bf16 %v4687_v9  ;;  %v4704_v19 = vunpack.c.l.bf16 %v4688_v20 }
 0xb53   : > { %v4645_v30 = vpop.permute.xlu1 %4644  ;;  %v4647_v51 = vpop.permute.xlu0 %4646 }
 0xb54   : > { %v7267_v21 = vpack.i.bf16 %v4703_v15, %v4702_v23  ;;  %v4689_v17 = vmul.bf16 %v10043_v11, %v4645_v30  ;;  %v4690_v12 = vmul.bf16 %v10039_v18, %v4647_v51 }
 0xb56   : > { %v4705_v57 = vunpack.c.l.bf16 %v4689_v17  ;;  %7268 = vrot.lane.b32.xlu0 %v7267_v21, %s7962_s7  ;;  %v4706_v13 = vunpack.c.l.bf16 %v4690_v12 }
 0xb57   : > { %v4649_v50 = vpop.permute.xlu1 %4648  ;;  %v4651_v16 = vpop.permute.xlu0 %4650 }
 0xb58   : > { %v7272_v14 = vpack.i.bf16 %v4705_v57, %v4704_v19  ;;  %v4691_v48 = vmul.bf16 %v10043_v11, %v4649_v50  ;;  %v4692_v22 = vmul.bf16 %v10039_v18, %v4651_v16 }
 0xb5a   : > { %v4707_v9 = vunpack.c.l.bf16 %v4691_v48  ;;  %7273 = vrot.lane.b32.xlu1 %v7272_v14, %s7962_s7  ;;  %v4708_v51 = vunpack.c.l.bf16 %v4692_v22 }
 0xb5b   : > { %v4653_v23 = vpop.permute.xlu1 %4652  ;;  %v4655_v15 = vpop.permute.xlu0 %4654 }
 0xb5c   : > { %v7277_v30 = vpack.i.bf16 %v4707_v9, %v4706_v13  ;;  %v4693_v20 = vmul.bf16 %v10043_v11, %v4653_v23  ;;  %v4694_v17 = vmul.bf16 %v10039_v18, %v4655_v15 }
 0xb5e   : > { %v4709_v21 = vunpack.c.l.bf16 %v4693_v20  ;;  %7278 = vrot.lane.b32.xlu0 %v7277_v30, %s7962_s7  ;;  %v4710_v16 = vunpack.c.l.bf16 %v4694_v17 }
 0xb5f   : > { %v4657_v57 = vpop.permute.xlu1 %4656  ;;  %v4659_v19 = vpop.permute.xlu0 %4658 }
 0xb60   : > { %v7282_v50 = vpack.i.bf16 %v4709_v21, %v4708_v51  ;;  %v4695_v12 = vmul.bf16 %v10043_v11, %v4657_v57  ;;  %v4696_v48 = vmul.bf16 %v10039_v18, %v4659_v19 }
 0xb62   : > { %v4711_v14 = vunpack.c.l.bf16 %v4695_v12  ;;  %7283 = vrot.lane.b32.xlu1 %v7282_v50, %s7962_s7  ;;  %v4712_v15 = vunpack.c.l.bf16 %v4696_v48 }
 0xb63   : > { %v4661_v13 = vpop.permute.xlu1 %4660  ;;  %v4663_v9 = vpop.permute.xlu0 %4662 }
 0xb64   : > { %v7287_v23 = vpack.i.bf16 %v4711_v14, %v4710_v16  ;;  %v4697_v22 = vmul.bf16 %v10043_v11, %v4661_v13  ;;  %v4698_v20 = vmul.bf16 %v10039_v18, %v4663_v9 }
 0xb66   : > { %v4713_v30 = vunpack.c.l.bf16 %v4697_v22  ;;  %7288 = vrot.lane.b32.xlu0 %v7287_v23, %s7962_s7  ;;  %v4714_v19 = vunpack.c.l.bf16 %v4698_v20  ;;  %v6357_v23 = vld [vmem:[%s12505_s1 + $0x7c0] sm:$0xf]  ;;  %v6361_v20 = vld [vmem:[%s12505_s1 + $0x7d0] sm:$0xf] }
 0xb67   : > { %v4665_v51 = vpop.permute.xlu1 %4664  ;;  %v4667_v21 = vpop.permute.xlu0 %4666 }
 0xb68   : > { %v7292_v57 = vpack.i.bf16 %v4713_v30, %v4712_v15  ;;  %v4699_v17 = vmul.bf16 %v10043_v11, %v4665_v51  ;;  %v4700_v12 = vmul.bf16 %v10039_v18, %v4667_v21  ;;  %v6358_v18 = vld [vmem:[%s12505_s1 + $0x7c4] sm:$0xf]  ;;  %v6360_v15 = vld [vmem:[%s12505_s1 + $0x7cc] sm:$0xf]  ;;  %v6362_v30 = vld [vmem:[%s12505_s1 + $0x7d4] sm:$0xf] }
 0xb69   : > { %v6363_v51 = vld [vmem:[%s12505_s1 + $0x7d8] sm:$0xf]  ;;  %v6364_v21 = vld [vmem:[%s12505_s1 + $0x7dc] sm:$0xf] }
 0xb6a   : > { %v4715_v50 = vunpack.c.l.bf16 %v4699_v17  ;;  %7293 = vrot.lane.b32.xlu1 %v7292_v57, %s7962_s7  ;;  %v4716_v13 = vunpack.c.l.bf16 %v4700_v12  ;;  %v6365_v57 = vld [vmem:[%s12505_s1 + $0x7e0] sm:$0xf]  ;;  %v6366_v17 = vld [vmem:[%s12505_s1 + $0x7e4] sm:$0xf]  ;;  %v6368_v12 = vld [vmem:[%s12505_s1 + $0x7ec] sm:$0xf] }
 0xb6b   : > { %v4669_v16 = vpop.permute.xlu1 %4668 }
 0xb6c   : > { %v7297_v14 = vpack.i.bf16 %v4715_v50, %v4714_v19  ;;  %v4701_v48 = vmul.bf16 %v10043_v11, %v4669_v16  ;;  %v6359_v11 = vld [vmem:[%s12505_s1 + $0x7c8] sm:$0xf]  ;;  %v6369_v50 = vld [vmem:[%s12505_s1 + $0x7f0] sm:$0xf]  ;;  %v6370_v16 = vld [vmem:[%s12505_s1 + $0x7f4] sm:$0xf] }
 0xb6d   : > { %v6367_v19 = vld [vmem:[%s12505_s1 + $0x7e8] sm:$0xf] }
 0xb6e   : > { %v4717_v9 = vunpack.c.l.bf16 %v4701_v48  ;;  %7298 = vrot.lane.b32.xlu0 %v7297_v14, %s7962_s7  ;;  %v6371_v14 = vld [vmem:[%s12505_s1 + $0x7f8] sm:$0xf]  ;;  %v6372_v48 = vld [vmem:[%s12505_s1 + $0x7fc] sm:$0xf] }
 0xb70   : > { %v7302_v22 = vpack.i.bf16 %v4717_v9, %v4716_v13  ;;  %v264_v13 = vld [vmem:[%s12505_s1 + $0x8] sm:$0xf]  ;;  %v265_v9 = vld [vmem:[%s12505_s1 + $0xc] sm:$0xf] }
 0xb72   : > { %7303 = vrot.lane.b32.xlu1 %v7302_v22, %s7962_s7  ;;  %4899 = vrot.lane.b32.xlu0 %v6357_v23, %s7959_s30  ;;  %v262_v23 = vld [vmem:[%s12505_s1] sm:$0xf]  ;;  %v263_v22 = vld [vmem:[%s12505_s1 + $0x4] sm:$0xf] }
 0xb76   : > { %4901 = vrot.lane.b32.xlu1 %v6358_v18, %s7959_s30  ;;  %4903 = vrot.lane.b32.xlu0 %v6359_v11, %s7959_s30  ;;  %v266_v18 = vld [vmem:[%s12505_s1 + $0x10] sm:$0xf]  ;;  %v10252_v11 = vld [vmem:[%s8230_s5 + $0x4] sm:$0xf] }
 0xb7a   : > { %4905 = vrot.lane.b32.xlu1 %v6360_v15, %s7959_s30  ;;  %4907 = vrot.lane.b32.xlu0 %v6361_v20, %s7959_s30  ;;  %v281_v15 = vmul.bf16 %v10252_v11, %v265_v9  ;;  %v10256_v20 = vld [vmem:[%s8230_s5] sm:$0xf] }
 0xb7c   : > { %v297_v56 = vunpack.c.l.bf16 %v281_v15 }
 0xb7e   : > { %4909 = vrot.lane.b32.xlu1 %v6362_v30, %s7959_s30  ;;  %4911 = vrot.lane.b32.xlu0 %v6363_v51, %s7959_s30  ;;  %v280_v30 = vmul.bf16 %v10256_v20, %v264_v13  ;;  %v267_v51 = vld [vmem:[%s12505_s1 + $0x14] sm:$0xf] }
 0xb80   : > { %v296_v55 = vunpack.c.l.bf16 %v280_v30  ;;  %v276_v30 = vld [vmem:[%s12505_s1 + $0x38] sm:$0xf] }
 0xb82   : > { %4913 = vrot.lane.b32.xlu1 %v6364_v21, %s7959_s30  ;;  %4915 = vrot.lane.b32.xlu0 %v6365_v57, %s7959_s30  ;;  %v268_v21 = vld [vmem:[%s12505_s1 + $0x18] sm:$0xf]  ;;  %v269_v57 = vld [vmem:[%s12505_s1 + $0x1c] sm:$0xf] }
 0xb83   : > { %v285_v13 = vmul.bf16 %v10252_v11, %v269_v57  ;;  %v284_v9 = vmul.bf16 %v10256_v20, %v268_v21  ;;  %v277_v21 = vld [vmem:[%s12505_s1 + $0x3c] sm:$0xf]  ;;  %v246_v57 = vld [vmem:[%s12506_s2 + $0x10] sm:$0xff] }
 0xb85   : > { %v300_v25 = vunpack.c.l.bf16 %v284_v9  ;;  %v292_v9 = vmul.bf16 %v10256_v20, %v276_v30 }
 0xb86   : > { %4917 = vrot.lane.b32.xlu1 %v6366_v17, %s7959_s30  ;;  %4919 = vrot.lane.b32.xlu0 %v6367_v19, %s7959_s30  ;;  %v279_v17 = vmul.bf16 %v10252_v11, %v263_v22  ;;  %v278_v19 = vmul.bf16 %v10256_v20, %v262_v23  ;;  %v272_v23 = vld [vmem:[%s12505_s1 + $0x28] sm:$0xf]  ;;  %v274_v22 = vld [vmem:[%s12505_s1 + $0x30] sm:$0xf] }
 0xb88   : > { %v295_v53 = vunpack.c.l.bf16 %v279_v17  ;;  %v294_v52 = vunpack.c.l.bf16 %v278_v19  ;;  %v288_v17 = vmul.bf16 %v10256_v20, %v272_v23  ;;  %v293_v23 = vmul.bf16 %v10252_v11, %v277_v21  ;;  %v255_v21 = vld [vmem:[%s12506_s2 + $0x58] sm:$0xff] }
 0xb8a   : > { %4921 = vrot.lane.b32.xlu1 %v6368_v12, %s7959_s30  ;;  %4923 = vrot.lane.b32.xlu0 %v6369_v50, %s7959_s30  ;;  %v271_v12 = vld [vmem:[%s12505_s1 + $0x24] sm:$0xf]  ;;  %v282_v50 = vmul.bf16 %v10256_v20, %v266_v18  ;;  %v275_v18 = vld [vmem:[%s12505_s1 + $0x34] sm:$0xf] }
 0xb8b   : > { %v291_v19 = vmul.bf16 %v10252_v11, %v275_v18  ;;  %v10326_v18 = vadd.f32 %v297_v56, %v247_v54  ;;  %v254_v56 = vld [vmem:[%s12506_s2 + $0x50] sm:$0xff] }
 0xb8c   : > { %v298_v27 = vunpack.c.l.bf16 %v282_v50  ;;  %v301_v50 = vunpack.c.l.bf16 %v285_v13 }
 0xb8e   : > { %4925 = vrot.lane.b32.xlu1 %v6370_v16, %s7959_s30  ;;  %4927 = vrot.lane.b32.xlu0 %v6371_v14, %s7959_s30  ;;  %v270_v16 = vld [vmem:[%s12505_s1 + $0x20] sm:$0xf]  ;;  %v273_v14 = vld [vmem:[%s12505_s1 + $0x2c] sm:$0xf] }
 0xb8f   : > { %v286_v29 = vmul.bf16 %v10256_v20, %v270_v16  ;;  %v289_v15 = vmul.bf16 %v10252_v11, %v273_v14  ;;  %v290_v16 = vmul.bf16 %v10256_v20, %v274_v22  ;;  %v248_v14 = vld [vmem:[%s12506_s2 + $0x20] sm:$0xff]  ;;  %v10328_v22 = vadd.f32 %v296_v55, %v246_v57 }
 0xb90   : > { %v307_v20 = vunpack.c.l.bf16 %v291_v19  ;;  %v259_v19 = vld [vmem:[%s12506_s2 + $0x78] sm:$0xff] }
 0xb91   : > { %v302_v55 = vunpack.c.l.bf16 %v286_v29  ;;  %v305_v57 = vunpack.c.l.bf16 %v289_v15  ;;  %v304_v29 = vunpack.c.l.bf16 %v288_v17  ;;  %v306_v30 = vunpack.c.l.bf16 %v290_v16  ;;  %v5893_v15 = vld [vmem:[%s12505_s1 + $0xc8] sm:$0xf] }
 0xb92   : > { %4929 = vrot.lane.b32.xlu1 %v6372_v48, %s7959_s30  ;;  %v283_v48 = vmul.bf16 %v10252_v11, %v267_v51  ;;  %v287_v51 = vmul.bf16 %v10252_v11, %v271_v12  ;;  %v244_v12 = vld [vmem:[%s12506_s2] sm:$0xff]  ;;  %v10340_v11 = vadd.f32 %v295_v53, %v245_v28  ;;  %v10371_v17 = vadd.f32 %v300_v25, %v250_v26  ;;  %v7470_v25 = vld [vmem:[%s8230_s5 + $0xc] sm:$0xf] }
 0xb93   : > { %v10342_v54 = vadd.f32 %v294_v52, %v244_v12  ;;  %v5892_v28 = vld [vmem:[%s12505_s1 + $0xc4] sm:$0xf]  ;;  %v10356_v52 = vadd.f32 %v298_v27, %v248_v14  ;;  %v5894_v12 = vld [vmem:[%s12505_s1 + $0xcc] sm:$0xf]  ;;  %v10369_v27 = vadd.f32 %v301_v50, %v251_v24  ;;  %v309_v16 = vunpack.c.l.bf16 %v293_v23  ;;  %v7469_v24 = vld [vmem:[%s8230_s5 + $0x8] sm:$0xf] }
 0xb94   : > { %v299_v32 = vunpack.c.l.bf16 %v283_v48  ;;  %v252_v48 = vld [vmem:[%s12506_s2 + $0x40] sm:$0xff]  ;;  %v303_v13 = vunpack.c.l.bf16 %v287_v51  ;;  %v257_v14 = vld [vmem:[%s12506_s2 + $0x68] sm:$0xff]  ;;  %v733_v26 = vmul.bf16 %v7470_v25, %v5892_v28  ;;  %v5896_v50 = vld [vmem:[%s12505_s1 + $0xd4] sm:$0xf]  ;;  %v10405_v59 = vadd.f32 %v304_v29, %v254_v56 }
 0xb95   : > { %v5891_v51 = vld [vmem:[%s12505_s1 + $0xc0] sm:$0xf]  ;;  %v5898_v23 = vld [vmem:[%s12505_s1 + $0xdc] sm:$0xf]  ;;  %v10395_v60 = vadd.f32 %v302_v55, %v252_v48  ;;  %v10407_v58 = vadd.f32 %v307_v20, %v257_v14  ;;  %v736_v48 = vmul.bf16 %v7469_v24, %v5895_v63  ;;  %v5900_v55 = vld [vmem:[%s12505_s1 + $0xe4] sm:$0xf] }
 0xb96   : > { %v256_v53 = vld [vmem:[%s12506_s2 + $0x60] sm:$0xff]  ;;  %v10367_v4 = vadd.f32 %v299_v32, %v249_v31  ;;  %v10382_v62 = vadd.f32 %v303_v13, %v253_v6  ;;  %v308_v32 = vunpack.c.l.bf16 %v292_v9  ;;  %v732_v31 = vmul.bf16 %v7469_v24, %v5891_v51  ;;  %v258_v13 = vld [vmem:[%s12506_s2 + $0x70] sm:$0xff]  ;;  %v5902_v56 = vld [vmem:[%s12505_s1 + $0xec] sm:$0xf] }
 0xb97   : > { %v10397_v6 = vadd.f32 %v305_v57, %v255_v21  ;;  %v734_v9 = vmul.bf16 %v7469_v24, %v5893_v15  ;;  %v735_v51 = vmul.bf16 %v7470_v25, %v5894_v12  ;;  %v5899_v28 = vld [vmem:[%s12505_s1 + $0xe0] sm:$0xf]  ;;  %v10409_v10 = vadd.f32 %v306_v30, %v256_v53  ;;  %v5901_v21 = vld [vmem:[%s12505_s1 + $0xe8] sm:$0xf]  ;;  %v5903_v63 = vld [vmem:[%s12505_s1 + $0xf0] sm:$0xf] }
 0xb98   : > { %v10417_v57 = vadd.f32 %v309_v16, %v259_v19  ;;  %v737_v15 = vmul.bf16 %v7470_v25, %v5896_v50  ;;  %v738_v12 = vmul.bf16 %v7469_v24, %v5897_v61  ;;  %v739_v3 = vmul.bf16 %v7470_v25, %v5898_v23  ;;  %v5904_v29 = vld [vmem:[%s12505_s1 + $0xf4] sm:$0xf]  ;;  %v5905_v19 = vld [vmem:[%s12505_s1 + $0xf8] sm:$0xf] }
 0xb99   : > { %v10430_v20 = vadd.f32 %v308_v32, %v258_v13  ;;  %v748_v30 = vunpack.c.l.bf16 %v732_v31  ;;  %v749_v14 = vunpack.c.l.bf16 %v733_v26  ;;  %v740_v61 = vmul.bf16 %v7469_v24, %v5899_v28 }
 0xb9a   : > { %v750_v16 = vunpack.c.l.bf16 %v734_v9  ;;  %v751_v50 = vunpack.c.l.bf16 %v735_v51  ;;  %v741_v23 = vmul.bf16 %v7470_v25, %v5900_v55  ;;  %v742_v8 = vmul.bf16 %v7469_v24, %v5901_v21 }
 0xb9b   : > { %v752_v7 = vunpack.c.l.bf16 %v736_v48  ;;  %v743_v1 = vmul.bf16 %v7470_v25, %v5902_v56  ;;  %v745_v32 = vmul.bf16 %v7470_v25, %v5904_v29  ;;  %v753_v13 = vunpack.c.l.bf16 %v737_v15 }
 0xb9c   : > { %v754_v31 = vunpack.c.l.bf16 %v738_v12  ;;  %v755_v26 = vunpack.c.l.bf16 %v739_v3  ;;  %v746_v28 = vmul.bf16 %v7469_v24, %v5905_v19  ;;  %v10442_v9 = vunpack.c.l.bf16 %v740_v61 }
 0xb9d   : > { %v747_v51 = vmul.bf16 %v7470_v25, %v5906_v2  ;;  %v10444_v55 = vunpack.c.l.bf16 %v741_v23  ;;  %v10446_v21 = vunpack.c.l.bf16 %v742_v8  ;;  %v10448_v46 = vunpack.c.l.bf16 %v743_v1 }
 0xb9e   : > { %v10452_v56 = vunpack.c.l.bf16 %v745_v32  ;;  %v10454_v15 = vunpack.c.l.bf16 %v746_v28  ;;  %v7495_v12 = vadd.high.f32.bf16 %v10326_v18, %v8355_v34  ;;  %v7496_v2 = vadd.low.f32.bf16 %v10328_v22, %v8355_v34 }
 0xb9f   : > { %v10464_v8 = vunpack.c.l.bf16 %v747_v51  ;;  %v7497_v1 = vadd.high.f32.bf16 %v10340_v11, %v8353_v33  ;;  %v7498_v25 = vadd.low.f32.bf16 %v10342_v54, %v8353_v33  ;;  %v7500_v29 = vadd.low.f32.bf16 %v10356_v52, %v8357_v35 }
 0xba0   : > { %v7501_v18 = vadd.high.f32.bf16 %v10369_v27, %v8359_v36  ;;  %v7502_v34 = vadd.low.f32.bf16 %v10371_v17, %v8359_v36  ;;  %v7503_v11 = vadd.high.f32.bf16 %v10382_v62, %v8361_v37  ;;  %v7504_v33 = vadd.low.f32.bf16 %v10395_v60, %v8361_v37  ;;  %v10495_v17 = vld [vmem:[%s8230_s5 + $0x50] sm:$0xf] }
 0xba1   : > { %v7507_v54 = vadd.high.f32.bf16 %v7497_v1, %v8369_v39  ;;  %v7508_v52 = vadd.low.f32.bf16 %v7496_v2, %v8371_v40  ;;  %v7509_v36 = vadd.high.f32.bf16 %v7495_v12, %v8371_v40  ;;  %v7510_v37 = vadd.low.f32.bf16 %v10405_v59, %v8363_v38 }
 0xba2   : > { %v7511_v60 = vadd.high.f32.bf16 %v10407_v58, %v8365_v49  ;;  %v7513_v61 = vadd.low.f32.bf16 %v10409_v10, %v8365_v49  ;;  %v7514_v40 = vadd.high.f32.bf16 %v10417_v57, %v8367_v47  ;;  %v7515_v19 = vadd.low.f32.bf16 %v10430_v20, %v8367_v47  ;;  %v10521_v49 = vld [vmem:[%s8230_s5 + $0x54] sm:$0xf] }
 0xba3   : > { %v10511_v32 = vadd.f32 %v7507_v54, %v749_v14  ;;  %v7517_v59 = vadd.low.f32.bf16 %v7502_v34, %v8375_v42  ;;  %v7518_v28 = vadd.high.f32.bf16 %v7501_v18, %v8375_v42  ;;  %v10518_v51 = vadd.f32 %v7509_v36, %v751_v50 }
 0xba4   : > { %v7519_v14 = vadd.low.f32.bf16 %v7504_v33, %v8377_v43  ;;  %v7521_v34 = vadd.low.f32.bf16 %v7510_v37, %v8379_v44 }
 0xba5   : > { %v10531_v42 = vadd.f32 %v7517_v59, %v754_v31  ;;  %v10533_v50 = vadd.f32 %v7518_v28, %v755_v26  ;;  %v7523_v31 = vadd.low.f32.bf16 %v7513_v61, %v8381_v45  ;;  %v7524_v26 = vadd.high.f32.bf16 %v7511_v60, %v8381_v45 }
 0xba6   : > { %v10553_v37 = vadd.f32 %v7521_v34, %v10446_v21  ;;  %v12803_v34 = vld [vmem:[#allocation11_spill] sm:$0xff] }
 0xbc8   : > { %v10428_v53 = vpop.permute.xlu0 %7268 }
 0xbc9   : > { %12796 = vst [vmem:[#allocation142_spill] sm:$0xff] %v10428_v53  ;;  %v744_v53 = vmul.bf16 %v7469_v24, %v5903_v63  ;;  %v7499_v63 = vadd.high.f32.bf16 %v10367_v4, %v8357_v35  ;;  %v7505_v4 = vadd.high.f32.bf16 %v10397_v6, %v8363_v38  ;;  %v7506_v35 = vadd.low.f32.bf16 %v7498_v25, %v8369_v39 }
 0xbca   : > { %v7512_v6 = vadd.low.f32.bf16 %v7500_v29, %v8373_v41  ;;  %v10513_v38 = vadd.f32 %v7508_v52, %v750_v16 }
 0xbcb   : > { %v10450_v48 = vunpack.c.l.bf16 %v744_v53  ;;  %v10509_v23 = vadd.f32 %v7506_v35, %v748_v30  ;;  %v7516_v58 = vadd.high.f32.bf16 %v7499_v63, %v8373_v41  ;;  %v7520_v41 = vadd.high.f32.bf16 %v7503_v11, %v8377_v43  ;;  %v12799_v11 = vld [vmem:[#allocation5_spill] sm:$0xff] }
 0xbcc   : > { %v10438_v5 = vpop.permute.xlu1 %7273  ;;  %v10523_v12 = vadd.f32 %v7512_v6, %v752_v7  ;;  %v7522_v33 = vadd.high.f32.bf16 %v7505_v4, %v8379_v44  ;;  %v10540_v43 = vadd.f32 %v7519_v14, %v10442_v9  ;;  %v7525_v35 = vadd.high.f32.bf16 %v7514_v40, %v12799_v11  ;;  %v12800_v40 = vld [vmem:[#allocation6_spill] sm:$0xff]  ;;  %v5942_v14 = vld [vmem:[%s12505_s1 + $0x184] sm:$0xf] }
 0xbcd   : > { %v10529_v2 = vadd.f32 %v7516_v58, %v753_v13  ;;  %v10543_v13 = vadd.f32 %v7520_v41, %v10444_v55  ;;  %v7526_v52 = vadd.low.f32.bf16 %v7515_v19, %v12799_v11  ;;  %v10559_v60 = vadd.f32 %v7523_v31, %v10450_v48  ;;  %v10597_v31 = vld [vmem:[%s8230_s5 + $0x10] sm:$0xf]  ;;  %v10601_v11 = vld [vmem:[%s8230_s5 + $0x14] sm:$0xf] }
 0xbce   : > { %v10556_v45 = vadd.f32 %v7522_v33, %v10448_v46  ;;  %v10562_v6 = vadd.f32 %v7524_v26, %v10452_v56  ;;  %v12801_v46 = vld [vmem:[#allocation10_spill] sm:$0xff] }
 0xbcf   : > { %v10575_v48 = vadd.f32 %v7526_v52, %v10454_v15  ;;  %v5941_v15 = vld [vmem:[%s12505_s1 + $0x180] sm:$0xf]  ;;  %v12804_v52 = vld [vmem:[#allocation8_spill] sm:$0xff] }
 0xbd0   : > { %v10440_v0 = vpop.permute.xlu0 %7278  ;;  %v1186_v26 = vmul.bf16 %v10597_v31, %v5941_v15 }
 0xbd4   : > { %v10456_v3 = vpop.permute.xlu1 %7283 }
 0xbd8   : > { %v10458_v24 = vpop.permute.xlu0 %7288 }
 0xbd9   : > { %12797 = vst [vmem:[#allocation143_spill] sm:$0xff] %v10458_v24 }
 0xbdc   : > { %v10478_v22 = vpop.permute.xlu1 %7293 }
 0xbdd   : > { %12798 = vst [vmem:[#allocation144_spill] sm:$0xff] %v10478_v22 }
 0xbe0   : > { %v10480_v53 = vpop.permute.xlu0 %7298 }
 0xbe4   : > { %v10492_v27 = vpop.permute.xlu1 %7303  ;;  %v4900_v62 = vpop.permute.xlu0 %4899 }
 0xbe5   : > { %v4947_v39 = vmul.bf16 %v10495_v17, %v4900_v62 }
 0xbe7   : > { %v4963_v20 = vunpack.c.l.bf16 %v4947_v39  ;;  %v10565_v39 = vadd.f32 %v7525_v35, %v10464_v8  ;;  %v1187_v35 = vmul.bf16 %v10601_v11, %v5942_v14 }
 0xbe8   : > { %v4902_v10 = vpop.permute.xlu1 %4901  ;;  %v4904_v57 = vpop.permute.xlu0 %4903 }
 0xbe9   : > { %v4948_v47 = vmul.bf16 %v10521_v49, %v4902_v10  ;;  %v4949_v30 = vmul.bf16 %v10495_v17, %v4904_v57 }
 0xbeb   : > { %v4964_v16 = vunpack.c.l.bf16 %v4948_v47  ;;  %v4965_v29 = vunpack.c.l.bf16 %v4949_v30  ;;  %v12807_v30 = vld [vmem:[#allocation13_spill] sm:$0xff] }
 0xbec   : > { %v4906_v1 = vpop.permute.xlu1 %4905  ;;  %v4908_v25 = vpop.permute.xlu0 %4907 }
 0xbed   : > { %v7307_v7 = vpack.i.bf16 %v4964_v16, %v4963_v20  ;;  %v4950_v63 = vmul.bf16 %v10521_v49, %v4906_v1  ;;  %v4951_v18 = vmul.bf16 %v10495_v17, %v4908_v25  ;;  %v12802_v20 = vld [vmem:[#allocation7_spill] sm:$0xff] }
 0xbef   : > { %v4966_v54 = vunpack.c.l.bf16 %v4950_v63  ;;  %7308 = vrot.lane.b32.xlu0 %v7307_v7, %s7961_s6  ;;  %v4967_v4 = vunpack.c.l.bf16 %v4951_v18 }
 0xbf0   : > { %v4910_v36 = vpop.permute.xlu1 %4909  ;;  %v4912_v62 = vpop.permute.xlu0 %4911 }
 0xbf1   : > { %v7312_v44 = vpack.i.bf16 %v4966_v54, %v4965_v29  ;;  %v4952_v9 = vmul.bf16 %v10521_v49, %v4910_v36  ;;  %v4953_v55 = vmul.bf16 %v10495_v17, %v4912_v62  ;;  %v5950_v54 = vld [vmem:[%s12505_s1 + $0x1a4] sm:$0xf] }
 0xbf3   : > { %v4968_v61 = vunpack.c.l.bf16 %v4952_v9  ;;  %7313 = vrot.lane.b32.xlu1 %v7312_v44, %s7961_s6  ;;  %v4969_v10 = vunpack.c.l.bf16 %v4953_v55  ;;  %v5943_v44 = vld [vmem:[%s12505_s1 + $0x188] sm:$0xf]  ;;  %v10642_v55 = vunpack.c.l.bf16 %v1186_v26 }
 0xbf4   : > { %v4914_v56 = vpop.permute.xlu1 %4913  ;;  %v4916_v59 = vpop.permute.xlu0 %4915  ;;  %v1188_v62 = vmul.bf16 %v10597_v31, %v5943_v44 }
 0xbf5   : > { %v7317_v28 = vpack.i.bf16 %v4968_v61, %v4967_v4  ;;  %v4954_v8 = vmul.bf16 %v10521_v49, %v4914_v56  ;;  %v4955_v57 = vmul.bf16 %v10495_v17, %v4916_v59  ;;  %v12805_v4 = vld [vmem:[#allocation12_spill] sm:$0xff]  ;;  %v12806_v56 = vld [vmem:[#allocation9_spill] sm:$0xff]  ;;  %v10644_v61 = vunpack.c.l.bf16 %v1187_v35 }
 0xbf6   : > { %v1204_v58 = vunpack.c.l.bf16 %v1188_v62 }
 0xbf7   : > { %v4970_v41 = vunpack.c.l.bf16 %v4954_v8  ;;  %7318 = vrot.lane.b32.xlu0 %v7317_v28, %s7961_s6  ;;  %v4971_v63 = vunpack.c.l.bf16 %v4955_v57  ;;  %v5944_v8 = vld [vmem:[%s12505_s1 + $0x18c] sm:$0xf]  ;;  %v5946_v57 = vld [vmem:[%s12505_s1 + $0x194] sm:$0xf] }
 0xbf8   : > { %v4918_v16 = vpop.permute.xlu1 %4917  ;;  %v4920_v1 = vpop.permute.xlu0 %4919  ;;  %v1189_v36 = vmul.bf16 %v10601_v11, %v5944_v8  ;;  %v1191_v26 = vmul.bf16 %v10601_v11, %v5946_v57 }
 0xbf9   : > { %v7322_v25 = vpack.i.bf16 %v4970_v41, %v4969_v10  ;;  %v4956_v7 = vmul.bf16 %v10521_v49, %v4918_v16  ;;  %v4957_v29 = vmul.bf16 %v10495_v17, %v4920_v1  ;;  %v5945_v10 = vld [vmem:[%s12505_s1 + $0x190] sm:$0xf]  ;;  %v5947_v41 = vld [vmem:[%s12505_s1 + $0x198] sm:$0xf]  ;;  %v5948_v16 = vld [vmem:[%s12505_s1 + $0x19c] sm:$0xf] }
 0xbfa   : > { %v5949_v1 = vld [vmem:[%s12505_s1 + $0x1a0] sm:$0xf]  ;;  %v1190_v33 = vmul.bf16 %v10597_v31, %v5945_v10  ;;  %v1192_v35 = vmul.bf16 %v10597_v31, %v5947_v41  ;;  %v1193_v44 = vmul.bf16 %v10601_v11, %v5948_v16  ;;  %v1195_v16 = vmul.bf16 %v10601_v11, %v5950_v54 }
 0xbfb   : > { %v4972_v9 = vunpack.c.l.bf16 %v4956_v7  ;;  %7323 = vrot.lane.b32.xlu1 %v7322_v25, %s7961_s6  ;;  %v4973_v28 = vunpack.c.l.bf16 %v4957_v29  ;;  %v1205_v47 = vunpack.c.l.bf16 %v1189_v36  ;;  %v5956_v36 = vld [vmem:[%s12505_s1 + $0x1bc] sm:$0xf] }
 0xbfc   : > { %v4922_v15 = vpop.permute.xlu1 %4921  ;;  %v4924_v14 = vpop.permute.xlu0 %4923  ;;  %v1206_v21 = vunpack.c.l.bf16 %v1190_v33  ;;  %v5955_v33 = vld [vmem:[%s12505_s1 + $0x1b8] sm:$0xf]  ;;  %v1201_v19 = vmul.bf16 %v10601_v11, %v5956_v36 }
 0xbfd   : > { %v7327_v25 = vpack.i.bf16 %v4972_v9, %v4971_v63  ;;  %v4958_v7 = vmul.bf16 %v10521_v49, %v4922_v15  ;;  %v4959_v59 = vmul.bf16 %v10495_v17, %v4924_v14  ;;  %v5951_v63 = vld [vmem:[%s12505_s1 + $0x1a8] sm:$0xf]  ;;  %v1194_v9 = vmul.bf16 %v10597_v31, %v5949_v1  ;;  %v5952_v15 = vld [vmem:[%s12505_s1 + $0x1ac] sm:$0xf] }
 0xbfe   : > { %v1196_v1 = vmul.bf16 %v10597_v31, %v5951_v63  ;;  %v1197_v54 = vmul.bf16 %v10601_v11, %v5952_v15  ;;  %v1200_v15 = vmul.bf16 %v10597_v31, %v5955_v33  ;;  %v6375_v33 = vld [vmem:[%s12505_s1 + $0x808] sm:$0xf] }
 0xbff   : > { %v4974_v29 = vunpack.c.l.bf16 %v4958_v7  ;;  %7328 = vrot.lane.b32.xlu0 %v7327_v25, %s7961_s6  ;;  %v4975_v7 = vunpack.c.l.bf16 %v4959_v59  ;;  %v1210_v63 = vunpack.c.l.bf16 %v1194_v9  ;;  %v6373_v9 = vld [vmem:[%s12505_s1 + $0x800] sm:$0xf] }
 0xc00   : > { %v4926_v8 = vpop.permute.xlu1 %4925  ;;  %v4928_v10 = vpop.permute.xlu0 %4927  ;;  %v1213_v24 = vunpack.c.l.bf16 %v1197_v54 }
 0xc01   : > { %v7332_v14 = vpack.i.bf16 %v4974_v29, %v4973_v28  ;;  %v4960_v18 = vmul.bf16 %v10521_v49, %v4926_v8  ;;  %v4961_v25 = vmul.bf16 %v10495_v17, %v4928_v10  ;;  %v5953_v28 = vld [vmem:[%s12505_s1 + $0x1b0] sm:$0xf]  ;;  %v5954_v17 = vld [vmem:[%s12505_s1 + $0x1b4] sm:$0xf]  ;;  %v1207_v29 = vunpack.c.l.bf16 %v1191_v26 }
 0xc02   : > { %v1208_v8 = vunpack.c.l.bf16 %v1192_v35  ;;  %v1209_v10 = vunpack.c.l.bf16 %v1193_v44  ;;  %v1212_v26 = vunpack.c.l.bf16 %v1196_v1  ;;  %v1198_v35 = vmul.bf16 %v10597_v31, %v5953_v28 }
 0xc03   : > { %v4976_v59 = vunpack.c.l.bf16 %v4960_v18  ;;  %7333 = vrot.lane.b32.xlu1 %v7332_v14, %s7961_s6  ;;  %v4977_v57 = vunpack.c.l.bf16 %v4961_v25  ;;  %v1211_v14 = vunpack.c.l.bf16 %v1195_v16  ;;  %v1199_v44 = vmul.bf16 %v10601_v11, %v5954_v17  ;;  %v12808_v16 = vld [vmem:[#allocation14_spill] sm:$0xff] }
 0xc04   : > { %v4930_v62 = vpop.permute.xlu1 %4929  ;;  %v12809_v1 = vadd.low.f32.bf16 %v10509_v23, %v12800_v40  ;;  %v1216_v17 = vunpack.c.l.bf16 %v1200_v15  ;;  %v1217_v31 = vunpack.c.l.bf16 %v1201_v19  ;;  %v12810_v11 = vadd.high.f32.bf16 %v10511_v32, %v12800_v40  ;;  %v6374_v19 = vld [vmem:[%s12505_s1 + $0x804] sm:$0xf]  ;;  %v12814_v32 = vld [vmem:[#allocation16_spill] sm:$0xff]  ;;  %v12820_v15 = vld [vmem:[#allocation18_spill] sm:$0xff] }
 0xc05   : > { %v7337_v41 = vpack.i.bf16 %v4976_v59, %v4975_v7  ;;  %v4962_v18 = vmul.bf16 %v10521_v49, %v4930_v62  ;;  %v1214_v7 = vunpack.c.l.bf16 %v1198_v35  ;;  %v1215_v25 = vunpack.c.l.bf16 %v1199_v44  ;;  %v12811_v59 = vld [vmem:[#allocation15_spill] sm:$0xff] }
 0xc06   : > { %v7543_v28 = vadd.low.f32.bf16 %v12809_v1, %v12808_v16  ;;  %v12813_v23 = vadd.low.f32.bf16 %v10513_v38, %v12801_v46  ;;  %v12815_v40 = vadd.low.f32.bf16 %v10523_v12, %v12802_v20  ;;  %v12817_v38 = vld [vmem:[#allocation17_spill] sm:$0xff]  ;;  %v12819_v35 = vadd.low.f32.bf16 %v10531_v42, %v12803_v34 }
 0xc07   : > { %v4978_v22 = vunpack.c.l.bf16 %v4962_v18  ;;  %7338 = vrot.lane.b32.xlu0 %v7337_v41, %s7961_s6  ;;  %v7544_v41 = vadd.high.f32.bf16 %v12810_v11, %v12808_v16  ;;  %v12821_v12 = vadd.low.f32.bf16 %v10540_v43, %v12804_v52  ;;  %v12824_v42 = vadd.high.f32.bf16 %v10556_v45, %v12805_v4 }
 0xc08   : > { %v7546_v54 = vadd.low.f32.bf16 %v12813_v23, %v12811_v59  ;;  %v7547_v36 = vadd.low.f32.bf16 %v12815_v40, %v12814_v32  ;;  %v7550_v44 = vadd.low.f32.bf16 %v12819_v35, %v12817_v38  ;;  %v12825_v45 = vadd.low.f32.bf16 %v10553_v37, %v12805_v4  ;;  %v12834_v40 = vld [vmem:[#allocation24_spill] sm:$0xff] }
 0xc09   : > { %v7342_v49 = vpack.i.bf16 %v4978_v22, %v4977_v57  ;;  %v12812_v22 = vadd.high.f32.bf16 %v10518_v51, %v12801_v46  ;;  %v12816_v51 = vadd.high.f32.bf16 %v10529_v2, %v12802_v20  ;;  %v12818_v46 = vadd.high.f32.bf16 %v10533_v50, %v12803_v34  ;;  %v12823_v50 = vld [vmem:[#allocation19_spill] sm:$0xff] }
 0xc0a   : > { %v12822_v2 = vadd.high.f32.bf16 %v10543_v13, %v12804_v52  ;;  %v7553_v34 = vadd.high.f32.bf16 %v12824_v42, %v12823_v50  ;;  %v10752_v43 = vadd.f32 %v7544_v41, %v10644_v61  ;;  %v10756_v1 = vadd.f32 %v7546_v54, %v1204_v58  ;;  %v6376_v13 = vld [vmem:[%s12505_s1 + $0x80c] sm:$0xf]  ;;  %v6377_v52 = vld [vmem:[%s12505_s1 + $0x810] sm:$0xf]  ;;  %v12826_v58 = vld [vmem:[#allocation20_spill] sm:$0xff] }
 0xc0b   : > { %7343 = vrot.lane.b32.xlu1 %v7342_v49, %s7961_s6  ;;  %5092 = vrot.lane.b32.xlu0 %v6373_v9, %s7960_s4  ;;  %v7545_v57 = vadd.high.f32.bf16 %v12812_v22, %v12811_v59  ;;  %v7548_v62 = vadd.high.f32.bf16 %v12816_v51, %v12814_v32  ;;  %v7549_v18 = vadd.high.f32.bf16 %v12818_v46, %v12817_v38  ;;  %v6381_v32 = vld [vmem:[%s12505_s1 + $0x820] sm:$0xf]  ;;  %v5993_v46 = vld [vmem:[%s12505_s1 + $0x248] sm:$0xf] }
 0xc0c   : > { %v7551_v9 = vadd.low.f32.bf16 %v12821_v12, %v12820_v15  ;;  %v7552_v20 = vadd.high.f32.bf16 %v12822_v2, %v12820_v15  ;;  %v10743_v49 = vadd.f32 %v7543_v28, %v10642_v55  ;;  %v7554_v55 = vadd.low.f32.bf16 %v12825_v45, %v12823_v50  ;;  %v5995_v12 = vld [vmem:[%s12505_s1 + $0x250] sm:$0xf]  ;;  %v5997_v2 = vld [vmem:[%s12505_s1 + $0x258] sm:$0xf]  ;;  %v5999_v45 = vld [vmem:[%s12505_s1 + $0x260] sm:$0xf] }
 0xc0d   : > { %v10754_v16 = vadd.f32 %v7545_v57, %v1205_v47  ;;  %v10768_v28 = vadd.f32 %v7547_v36, %v1206_v21  ;;  %v10770_v61 = vadd.f32 %v7548_v62, %v1207_v29  ;;  %v10772_v47 = vadd.f32 %v7549_v18, %v1209_v10  ;;  %v12829_v21 = vld [vmem:[#allocation21_spill] sm:$0xff]  ;;  %v5994_v18 = vld [vmem:[%s12505_s1 + $0x24c] sm:$0xf]  ;;  %v7473_v50 = vld [vmem:[%s8230_s5 + $0x18] sm:$0xf] }
 0xc0e   : > { %v12827_v11 = vadd.low.f32.bf16 %v10559_v60, %v12806_v56  ;;  %v12828_v59 = vadd.high.f32.bf16 %v10562_v6, %v12806_v56  ;;  %v10782_v57 = vadd.f32 %v7550_v44, %v1208_v8  ;;  %v10784_v37 = vadd.f32 %v7551_v9, %v1210_v63  ;;  %v6378_v56 = vld [vmem:[%s12505_s1 + $0x814] sm:$0xf]  ;;  %v12832_v63 = vld [vmem:[#allocation22_spill] sm:$0xff]  ;;  %v12835_v62 = vld [vmem:[#allocation25_spill] sm:$0xff] }
 0xc0f   : > { %5094 = vrot.lane.b32.xlu1 %v6374_v19, %s7960_s4  ;;  %5096 = vrot.lane.b32.xlu0 %v6375_v33, %s7960_s4  ;;  %v12830_v4 = vadd.high.f32.bf16 %v10565_v39, %v12807_v30  ;;  %v12831_v10 = vadd.low.f32.bf16 %v10575_v48, %v12807_v30  ;;  %v10794_v23 = vadd.f32 %v7552_v20, %v1211_v14  ;;  %v6379_v39 = vld [vmem:[%s12505_s1 + $0x818] sm:$0xf]  ;;  %v5991_v19 = vld [vmem:[%s12505_s1 + $0x240] sm:$0xf]  ;;  %v12836_v44 = vld [vmem:[#allocation26_spill] sm:$0xff] }
 0xc10   : > { %v7555_v41 = vadd.low.f32.bf16 %v12827_v11, %v12826_v58  ;;  %v7556_v22 = vadd.high.f32.bf16 %v12828_v59, %v12826_v58  ;;  %v10798_v6 = vadd.f32 %v7553_v34, %v1213_v24  ;;  %v10806_v8 = vadd.f32 %v7554_v55, %v1212_v26  ;;  %v6380_v33 = vld [vmem:[%s12505_s1 + $0x81c] sm:$0xf]  ;;  %v5996_v9 = vld [vmem:[%s12505_s1 + $0x254] sm:$0xf]  ;;  %v6000_v59 = vld [vmem:[%s12505_s1 + $0x264] sm:$0xf] }
 0xc11   : > { %v7557_v29 = vadd.high.f32.bf16 %v12830_v4, %v12829_v21  ;;  %v7558_v60 = vadd.low.f32.bf16 %v12831_v10, %v12829_v21  ;;  %v7559_v14 = vadd.low.f32.bf16 %v10743_v49, %v12832_v63  ;;  %v7560_v26 = vadd.high.f32.bf16 %v10752_v43, %v12832_v63  ;;  %v7474_v34 = vld [vmem:[%s8230_s5 + $0x1c] sm:$0xf]  ;;  %v12837_v55 = vld [vmem:[#allocation27_spill] sm:$0xff]  ;;  %v6383_v21 = vld [vmem:[%s12505_s1 + $0x828] sm:$0xf] }
 0xc12   : > { %v10808_v48 = vadd.f32 %v7555_v41, %v1214_v7  ;;  %v10810_v30 = vadd.f32 %v7556_v22, %v1215_v25  ;;  %v12833_v7 = vld [vmem:[#allocation23_spill] sm:$0xff]  ;;  %v1640_v42 = vmul.bf16 %v7473_v50, %v5991_v19  ;;  %v1642_v11 = vmul.bf16 %v7473_v50, %v5993_v46  ;;  %v6382_v22 = vld [vmem:[%s12505_s1 + $0x824] sm:$0xf]  ;;  %v6002_v46 = vld [vmem:[%s12505_s1 + $0x26c] sm:$0xf] }
 0xc13   : > { %5098 = vrot.lane.b32.xlu1 %v6376_v13, %s7960_s4  ;;  %5100 = vrot.lane.b32.xlu0 %v6377_v52, %s7960_s4  ;;  %v10814_v54 = vadd.f32 %v7557_v29, %v1217_v31  ;;  %v10816_v24 = vadd.f32 %v7558_v60, %v1216_v17  ;;  %v5992_v17 = vld [vmem:[%s12505_s1 + $0x244] sm:$0xf]  ;;  %v5998_v52 = vld [vmem:[%s12505_s1 + $0x25c] sm:$0xf]  ;;  %v1643_v41 = vmul.bf16 %v7474_v34, %v5994_v18 }
 0xc14   : > { %v1641_v13 = vmul.bf16 %v7474_v34, %v5992_v17  ;;  %v1644_v29 = vmul.bf16 %v7473_v50, %v5995_v12  ;;  %v1645_v10 = vmul.bf16 %v7474_v34, %v5996_v9  ;;  %v1646_v60 = vmul.bf16 %v7473_v50, %v5997_v2  ;;  %v6003_v18 = vld [vmem:[%s12505_s1 + $0x270] sm:$0xf]  ;;  %v12839_v12 = vld [vmem:[#allocation29_spill] sm:$0xff]  ;;  %v6004_v17 = vld [vmem:[%s12505_s1 + $0x274] sm:$0xf] }
 0xc15   : > { %v1656_v2 = vunpack.c.l.bf16 %v1640_v42  ;;  %v1649_v58 = vmul.bf16 %v7474_v34, %v6000_v59  ;;  %v1658_v19 = vunpack.c.l.bf16 %v1642_v11  ;;  %v1659_v9 = vunpack.c.l.bf16 %v1643_v41  ;;  %v6384_v59 = vld [vmem:[%s12505_s1 + $0x82c] sm:$0xf]  ;;  %v6386_v25 = vld [vmem:[%s12505_s1 + $0x834] sm:$0xf] }
 0xc16   : > { %v1657_v4 = vunpack.c.l.bf16 %v1641_v13  ;;  %v6006_v13 = vld [vmem:[%s12505_s1 + $0x27c] sm:$0xf]  ;;  %v1660_v20 = vunpack.c.l.bf16 %v1644_v29  ;;  %v1662_v15 = vunpack.c.l.bf16 %v1646_v60  ;;  %v1651_v35 = vmul.bf16 %v7474_v34, %v6002_v46  ;;  %v6387_v29 = vld [vmem:[%s12505_s1 + $0x838] sm:$0xf]  ;;  %v12841_v46 = vld [vmem:[#allocation31_spill] sm:$0xff] }
 0xc17   : > { %5102 = vrot.lane.b32.xlu1 %v6378_v56, %s7960_s4  ;;  %5104 = vrot.lane.b32.xlu0 %v6379_v39, %s7960_s4  ;;  %v6001_v56 = vld [vmem:[%s12505_s1 + $0x268] sm:$0xf]  ;;  %v12838_v39 = vld [vmem:[#allocation28_spill] sm:$0xff]  ;;  %v1652_v41 = vmul.bf16 %v7473_v50, %v6003_v18  ;;  %v1665_v38 = vunpack.c.l.bf16 %v1649_v58  ;;  %v1655_v36 = vmul.bf16 %v7474_v34, %v6006_v13  ;;  %v12843_v49 = vadd.low.f32.bf16 %v10756_v1, %v12833_v7 }
 0xc18   : > { %v1650_v42 = vmul.bf16 %v7473_v50, %v6001_v56  ;;  %v1653_v56 = vmul.bf16 %v7474_v34, %v6004_v17  ;;  %v12840_v17 = vld [vmem:[#allocation30_spill] sm:$0xff]  ;;  %v12846_v63 = vadd.high.f32.bf16 %v10770_v61, %v12834_v40  ;;  %v12852_v61 = vadd.high.f32.bf16 %v10794_v23, %v12836_v44 }
 0xc19   : > { %v1668_v60 = vunpack.c.l.bf16 %v1652_v41  ;;  %v1671_v58 = vunpack.c.l.bf16 %v1655_v36  ;;  %v12844_v36 = vld [vmem:[#allocation32_spill] sm:$0xff]  ;;  %v12850_v13 = vld [vmem:[#allocation34_spill] sm:$0xff]  ;;  %v12854_v41 = vadd.high.f32.bf16 %v10798_v6, %v12837_v55  ;;  %v12855_v23 = vadd.low.f32.bf16 %v10806_v8, %v12837_v55 }
 0xc1a   : > { %v1666_v31 = vunpack.c.l.bf16 %v1650_v42  ;;  %v12857_v6 = vadd.low.f32.bf16 %v10808_v48, %v12838_v39  ;;  %v12860_v55 = vadd.high.f32.bf16 %v10814_v54, %v12839_v12 }
 0xc1b   : > { %5106 = vrot.lane.b32.xlu1 %v6380_v33, %s7960_s4  ;;  %5108 = vrot.lane.b32.xlu0 %v6381_v32, %s7960_s4  ;;  %v1647_v33 = vmul.bf16 %v7474_v34, %v5998_v52  ;;  %v1648_v32 = vmul.bf16 %v7473_v50, %v5999_v45  ;;  %v6005_v52 = vld [vmem:[%s12505_s1 + $0x278] sm:$0xf]  ;;  %v7574_v45 = vadd.low.f32.bf16 %v10816_v24, %v12839_v12 }
 0xc1c   : > { %v1654_v51 = vmul.bf16 %v7473_v50, %v6005_v52  ;;  %v7575_v50 = vadd.low.f32.bf16 %v7559_v14, %v12840_v17  ;;  %v7578_v14 = vadd.low.f32.bf16 %v12843_v49, %v12841_v46  ;;  %v12848_v52 = vadd.high.f32.bf16 %v10772_v47, %v12835_v62  ;;  %v12853_v47 = vld [vmem:[#allocation35_spill] sm:$0xff] }
 0xc1d   : > { %v1663_v24 = vunpack.c.l.bf16 %v1647_v33  ;;  %v1664_v11 = vunpack.c.l.bf16 %v1648_v32  ;;  %v1669_v33 = vunpack.c.l.bf16 %v1653_v56  ;;  %v7576_v32 = vadd.high.f32.bf16 %v7560_v26, %v12840_v17  ;;  %v12847_v26 = vld [vmem:[#allocation33_spill] sm:$0xff] }
 0xc1e   : > { %v1670_v34 = vunpack.c.l.bf16 %v1654_v51  ;;  %v12845_v51 = vadd.low.f32.bf16 %v10768_v28, %v12834_v40  ;;  %v7581_v1 = vadd.high.f32.bf16 %v12848_v52, %v12847_v26  ;;  %v12851_v28 = vadd.low.f32.bf16 %v10784_v37, %v12836_v44  ;;  %v6047_v52 = vld [vmem:[%s12505_s1 + $0x318] sm:$0xf] }
 0xc1f   : > { %5110 = vrot.lane.b32.xlu1 %v6382_v22, %s7960_s4  ;;  %5112 = vrot.lane.b32.xlu0 %v6383_v21, %s7960_s4  ;;  %v6385_v22 = vld [vmem:[%s12505_s1 + $0x830] sm:$0xf]  ;;  %v1661_v21 = vunpack.c.l.bf16 %v1645_v10  ;;  %v1667_v10 = vunpack.c.l.bf16 %v1651_v35  ;;  %v12842_v35 = vadd.high.f32.bf16 %v10754_v16, %v12833_v7  ;;  %v7580_v16 = vadd.high.f32.bf16 %v12846_v63, %v12844_v36 }
 0xc20   : > { %v7579_v43 = vadd.low.f32.bf16 %v12845_v51, %v12844_v36  ;;  %v12849_v7 = vadd.low.f32.bf16 %v10782_v57, %v12835_v62  ;;  %v7584_v40 = vadd.high.f32.bf16 %v12852_v61, %v12850_v13  ;;  %v7585_v57 = vadd.high.f32.bf16 %v12854_v41, %v12853_v47  ;;  %v6044_v36 = vld [vmem:[%s12505_s1 + $0x30c] sm:$0xf]  ;;  %v6049_v61 = vld [vmem:[%s12505_s1 + $0x320] sm:$0xf]  ;;  %v12870_v51 = vld [vmem:[#allocation52_spill] sm:$0xff] }
 0xc21   : > { %v7577_v18 = vadd.high.f32.bf16 %v12842_v35, %v12841_v46  ;;  %v10982_v62 = vadd.f32 %v7576_v32, %v1657_v4  ;;  %v10986_v37 = vadd.f32 %v7578_v14, %v1658_v19  ;;  %v7586_v44 = vadd.low.f32.bf16 %v12855_v23, %v12853_v47 }
 0xc22   : > { %v7582_v42 = vadd.low.f32.bf16 %v12849_v7, %v12847_v26  ;;  %v10996_v17 = vadd.f32 %v7581_v1, %v1663_v24  ;;  %v12858_v19 = vadd.high.f32.bf16 %v10810_v30, %v12838_v39  ;;  %v11015_v46 = vadd.f32 %v7584_v40, %v1665_v38  ;;  %v12862_v38 = vld [vmem:[#allocation39_spill] sm:$0xff]  ;;  %v7475_v7 = vld [vmem:[%s8230_s5 + $0x20] sm:$0xf] }
 0xc23   : > { %5114 = vrot.lane.b32.xlu1 %v6384_v59, %s7960_s4  ;;  %5116 = vrot.lane.b32.xlu0 %v6385_v22, %s7960_s4  ;;  %v7583_v59 = vadd.low.f32.bf16 %v12851_v28, %v12850_v13  ;;  %v10975_v22 = vadd.f32 %v7575_v50, %v1656_v2  ;;  %v10984_v56 = vadd.f32 %v7577_v18, %v1659_v9  ;;  %v12856_v50 = vld [vmem:[#allocation36_spill] sm:$0xff]  ;;  %v6046_v26 = vld [vmem:[%s12505_s1 + $0x314] sm:$0xf]  ;;  %v7476_v13 = vld [vmem:[%s8230_s5 + $0x24] sm:$0xf] }
 0xc24   : > { %v10992_v2 = vadd.f32 %v7579_v43, %v1660_v20  ;;  %v7587_v4 = vadd.low.f32.bf16 %v12857_v6, %v12856_v50  ;;  %v7588_v9 = vadd.high.f32.bf16 %v12858_v19, %v12856_v50  ;;  %v11006_v32 = vadd.f32 %v7582_v42, %v1662_v15  ;;  %v12859_v20 = vld [vmem:[#allocation37_spill] sm:$0xff]  ;;  %v12861_v15 = vld [vmem:[#allocation38_spill] sm:$0xff]  ;;  %v12866_v40 = vld [vmem:[#allocation43_spill] sm:$0xff] }
 0xc25   : > { %v11008_v8 = vadd.f32 %v7583_v59, %v1664_v11  ;;  %v7590_v24 = vadd.low.f32.bf16 %v7574_v45, %v12859_v20  ;;  %v11017_v48 = vadd.f32 %v7585_v57, %v1667_v10  ;;  %v11019_v35 = vadd.f32 %v7586_v44, %v1666_v31  ;;  %v6041_v45 = vld [vmem:[%s12505_s1 + $0x300] sm:$0xf]  ;;  %v6042_v10 = vld [vmem:[%s12505_s1 + $0x304] sm:$0xf]  ;;  %v12865_v43 = vld [vmem:[#allocation42_spill] sm:$0xff] }
 0xc26   : > { %v11021_v18 = vadd.f32 %v7587_v4, %v1668_v60  ;;  %v11023_v30 = vadd.f32 %v7588_v9, %v1669_v33  ;;  %v7591_v39 = vadd.low.f32.bf16 %v10975_v22, %v12861_v15  ;;  %v7592_v54 = vadd.high.f32.bf16 %v10982_v62, %v12861_v15  ;;  %v12863_v60 = vld [vmem:[#allocation40_spill] sm:$0xff]  ;;  %v6050_v57 = vld [vmem:[%s12505_s1 + $0x324] sm:$0xf] }
 0xc27   : > { %5118 = vrot.lane.b32.xlu1 %v6386_v25, %s7960_s4  ;;  %5120 = vrot.lane.b32.xlu0 %v6387_v29, %s7960_s4  ;;  %v6388_v25 = vld [vmem:[%s12505_s1 + $0x83c] sm:$0xf]  ;;  %v10994_v29 = vadd.f32 %v7580_v16, %v1661_v21  ;;  %v7589_v21 = vadd.high.f32.bf16 %v12860_v55, %v12859_v20  ;;  %v11029_v49 = vadd.f32 %v7590_v24, %v1670_v34  ;;  %v6045_v16 = vld [vmem:[%s12505_s1 + $0x310] sm:$0xf]  ;;  %v12868_v55 = vld [vmem:[#allocation45_spill] sm:$0xff] }
 0xc28   : > { %v7593_v12 = vadd.high.f32.bf16 %v10984_v56, %v12862_v38  ;;  %v7594_v31 = vadd.low.f32.bf16 %v10986_v37, %v12862_v38  ;;  %v7595_v33 = vadd.low.f32.bf16 %v10992_v2, %v12863_v60  ;;  %v2094_v42 = vmul.bf16 %v7475_v7, %v6041_v45  ;;  %v6048_v59 = vld [vmem:[%s12505_s1 + $0x31c] sm:$0xf] }
 0xc29   : > { %v11027_v11 = vadd.f32 %v7589_v21, %v1671_v58  ;;  %v7596_v34 = vadd.high.f32.bf16 %v10994_v29, %v12863_v60  ;;  %v12864_v58 = vld [vmem:[#allocation41_spill] sm:$0xff]  ;;  %v2095_v28 = vmul.bf16 %v7476_v13, %v6042_v10  ;;  %v2097_v41 = vmul.bf16 %v7476_v13, %v6044_v36  ;;  %v12867_v6 = vld [vmem:[#allocation44_spill] sm:$0xff]  ;;  %v6051_v10 = vld [vmem:[%s12505_s1 + $0x328] sm:$0xf] }
 0xc2a   : > { %v2098_v23 = vmul.bf16 %v7475_v7, %v6045_v16  ;;  %v2099_v44 = vmul.bf16 %v7476_v13, %v6046_v26  ;;  %v2100_v50 = vmul.bf16 %v7475_v7, %v6047_v52  ;;  %v7603_v4 = vadd.low.f32.bf16 %v11021_v18, %v12867_v6  ;;  %v6106_v38 = vld [vmem:[%s12505_s1 + $0x3fc] sm:$0xf]  ;;  %v6105_v29 = vld [vmem:[%s12505_s1 + $0x3f8] sm:$0xf] }
 0xc2b   : > { %5122 = vrot.lane.b32.xlu1 %v6388_v25, %s7960_s4  ;;  %v6043_v25 = vld [vmem:[%s12505_s1 + $0x308] sm:$0xf]  ;;  %v7604_v19 = vadd.high.f32.bf16 %v11023_v30, %v12867_v6  ;;  %v2101_v9 = vmul.bf16 %v7476_v13, %v6048_v59  ;;  %v2102_v20 = vmul.bf16 %v7475_v7, %v6049_v61  ;;  %v7605_v21 = vadd.high.f32.bf16 %v11027_v11, %v12868_v55  ;;  %v6054_v11 = vld [vmem:[%s12505_s1 + $0x334] sm:$0xf] }
 0xc2c   : > { %v2096_v47 = vmul.bf16 %v7475_v7, %v6043_v25  ;;  %v2110_v24 = vunpack.c.l.bf16 %v2094_v42  ;;  %v2111_v15 = vunpack.c.l.bf16 %v2095_v28  ;;  %v2103_v45 = vmul.bf16 %v7476_v13, %v6050_v57  ;;  %v6053_v25 = vld [vmem:[%s12505_s1 + $0x330] sm:$0xf]  ;;  %v6052_v42 = vld [vmem:[%s12505_s1 + $0x32c] sm:$0xf]  ;;  %v6055_v28 = vld [vmem:[%s12505_s1 + $0x338] sm:$0xf] }
 0xc2d   : > { %v7606_v18 = vadd.low.f32.bf16 %v11029_v49, %v12868_v55  ;;  %v2113_v36 = vunpack.c.l.bf16 %v2097_v41  ;;  %v2114_v16 = vunpack.c.l.bf16 %v2098_v23  ;;  %v2115_v26 = vunpack.c.l.bf16 %v2099_v44  ;;  %v6056_v49 = vld [vmem:[%s12505_s1 + $0x33c] sm:$0xf]  ;;  %v12869_v44 = vld [vmem:[#allocation46_spill] sm:$0xff] }
 0xc2e   : > { %v2112_v30 = vunpack.c.l.bf16 %v2096_v47  ;;  %v11102_v52 = vunpack.c.l.bf16 %v2100_v50  ;;  %v11113_v59 = vunpack.c.l.bf16 %v2101_v9  ;;  %v11115_v61 = vunpack.c.l.bf16 %v2102_v20 }
 0xc2f   : > { %v2104_v47 = vmul.bf16 %v7475_v7, %v6051_v10  ;;  %v2106_v41 = vmul.bf16 %v7475_v7, %v6053_v25  ;;  %v11117_v57 = vunpack.c.l.bf16 %v2103_v45  ;;  %v2107_v23 = vmul.bf16 %v7476_v13, %v6054_v11  ;;  %v12873_v11 = vld [vmem:[#allocation48_spill] sm:$0xff] }
 0xc30   : > { %v7607_v50 = vadd.low.f32.bf16 %v7591_v39, %v12869_v44  ;;  %v2105_v6 = vmul.bf16 %v7476_v13, %v6052_v42  ;;  %v2108_v55 = vmul.bf16 %v7475_v7, %v6055_v28  ;;  %v2109_v62 = vmul.bf16 %v7476_v13, %v6056_v49  ;;  %v12871_v7 = vld [vmem:[#allocation47_spill] sm:$0xff]  ;;  %v11163_v42 = vld [vmem:[%s8230_s5 + $0x2c] sm:$0xf] }
 0xc31   : > { %v7608_v22 = vadd.high.f32.bf16 %v7592_v54, %v12869_v44  ;;  %v11121_v1 = vunpack.c.l.bf16 %v2104_v47  ;;  %v2122_v63 = vunpack.c.l.bf16 %v2106_v41  ;;  %v7609_v9 = vadd.low.f32.bf16 %v7603_v4, %v12870_v51  ;;  %v12876_v41 = vld [vmem:[#allocation68_spill] sm:$0xff] }
 0xc32   : > { %v7610_v20 = vadd.high.f32.bf16 %v7604_v19, %v12870_v51  ;;  %v2123_v14 = vunpack.c.l.bf16 %v2107_v23  ;;  %v11125_v10 = vadd.f32 %v7607_v50, %v2110_v24  ;;  %v11127_v45 = vunpack.c.l.bf16 %v2105_v6  ;;  %v12872_v51 = vld [vmem:[#allocation53_spill] sm:$0xff]  ;;  %v6103_v24 = vld [vmem:[%s12505_s1 + $0x3f0] sm:$0xf] }
 0xc33   : > { %v2124_v25 = vunpack.c.l.bf16 %v2108_v55  ;;  %v2125_v39 = vunpack.c.l.bf16 %v2109_v62  ;;  %v7611_v54 = vadd.high.f32.bf16 %v7593_v12, %v12871_v7  ;;  %v7612_v13 = vadd.low.f32.bf16 %v7594_v31, %v12871_v7  ;;  %v6104_v62 = vld [vmem:[%s12505_s1 + $0x3f4] sm:$0xf] }
 0xc34   : > { %v7613_v4 = vadd.high.f32.bf16 %v7605_v21, %v12872_v51  ;;  %v11138_v19 = vadd.f32 %v7608_v22, %v2111_v15  ;;  %v7614_v56 = vadd.low.f32.bf16 %v7595_v33, %v12873_v11  ;;  %v7615_v37 = vadd.high.f32.bf16 %v7596_v34, %v12873_v11  ;;  %v11159_v21 = vld [vmem:[%s8230_s5 + $0x28] sm:$0xf]  ;;  %v12874_v34 = vld [vmem:[#allocation60_spill] sm:$0xff] }
 0xc35   : > { %v7616_v12 = vadd.low.f32.bf16 %v7606_v18, %v12872_v51  ;;  %v2138_v31 = vadd.f32 %v7609_v9, %v2122_v63  ;;  %v2139_v22 = vadd.f32 %v7610_v20, %v2123_v14  ;;  %v2560_v15 = vmul.bf16 %v11159_v21, %v6103_v24  ;;  %v12875_v14 = vld [vmem:[#allocation61_spill] sm:$0xff] }
 0xc36   : > { %v2561_v2 = vmul.bf16 %v11163_v42, %v6104_v62  ;;  %v2141_v60 = vadd.f32 %v7613_v4, %v2125_v39  ;;  %v2563_v33 = vmul.bf16 %v11163_v42, %v6106_v38  ;;  %v2562_v47 = vmul.bf16 %v11159_v21, %v6105_v29  ;;  %v12877_v20 = vld [vmem:[#allocation69_spill] sm:$0xff] }
 0xc37   : > { %v7617_v28 = vadd.low.f32.bf16 %v2138_v31, %v12874_v34  ;;  %v7618_v63 = vadd.high.f32.bf16 %v2139_v22, %v12874_v34  ;;  %v2140_v49 = vadd.f32 %v7616_v12, %v2124_v25  ;;  %v2576_v50 = vunpack.c.l.bf16 %v2560_v15  ;;  %v12878_v51 = vld [vmem:[#allocation49_spill] sm:$0xff] }
 0xc38   : > { %v7619_v18 = vadd.high.f32.bf16 %v2141_v60, %v12875_v14  ;;  %v2577_v6 = vunpack.c.l.bf16 %v2561_v2  ;;  %v11176_v55 = vadd.f32 %v7611_v54, %v2113_v36  ;;  %v2579_v7 = vunpack.c.l.bf16 %v2563_v33  ;;  %v6153_v36 = vld [vmem:[%s12505_s1 + $0x4b0] sm:$0xf]  ;;  %v12881_v2 = vld [vmem:[#allocation76_spill] sm:$0xff]  ;;  %v12882_v34 = vld [vmem:[#allocation77_spill] sm:$0xff] }
 0xc39   : > { %v7620_v23 = vadd.low.f32.bf16 %v7617_v28, %v12876_v41  ;;  %v7621_v44 = vadd.high.f32.bf16 %v7618_v63, %v12876_v41  ;;  %v7622_v9 = vadd.low.f32.bf16 %v2140_v49, %v12875_v14  ;;  %v12879_v25 = vadd.high.f32.bf16 %v10996_v17, %v12864_v58  ;;  %v12883_v49 = vld [vmem:[#allocation84_spill] sm:$0xff] }
 0xc3a   : > { %v7623_v39 = vadd.high.f32.bf16 %v7619_v18, %v12877_v20  ;;  %v11184_v24 = vadd.f32 %v7612_v13, %v2112_v30  ;;  %v11186_v62 = vadd.f32 %v7614_v56, %v2114_v16  ;;  %v11188_v11 = vadd.f32 %v7615_v37, %v2115_v26  ;;  %v6154_v30 = vld [vmem:[%s12505_s1 + $0x4b4] sm:$0xf]  ;;  %v6156_v16 = vld [vmem:[%s12505_s1 + $0x4bc] sm:$0xf]  ;;  %v11205_v37 = vld [vmem:[%s8230_s5 + $0x30] sm:$0xf] }
 0xc3b   : > { %v7624_v4 = vadd.high.f32.bf16 %v12879_v25, %v12878_v51  ;;  %v12880_v54 = vadd.low.f32.bf16 %v11006_v32, %v12864_v58  ;;  %v7626_v12 = vadd.low.f32.bf16 %v7622_v9, %v12877_v20  ;;  %v2578_v17 = vunpack.c.l.bf16 %v2562_v47  ;;  %v6155_v32 = vld [vmem:[%s12505_s1 + $0x4b8] sm:$0xf]  ;;  %v11212_v58 = vld [vmem:[%s8230_s5 + $0x34] sm:$0xf]  ;;  %v6203_v20 = vld [vmem:[%s12505_s1 + $0x570] sm:$0xf] }
 0xc3c   : > { %v2592_v26 = vadd.f32 %v7620_v23, %v2576_v50  ;;  %v2593_v13 = vadd.f32 %v7621_v44, %v2577_v6  ;;  %v2595_v56 = vadd.f32 %v7623_v39, %v2579_v7  ;;  %v3014_v31 = vmul.bf16 %v11205_v37, %v6153_v36  ;;  %v12884_v44 = vld [vmem:[#allocation85_spill] sm:$0xff]  ;;  %v12885_v39 = vld [vmem:[#allocation50_spill] sm:$0xff]  ;;  %v6204_v36 = vld [vmem:[%s12505_s1 + $0x574] sm:$0xf] }
 0xc3d   : > { %v7625_v38 = vadd.low.f32.bf16 %v12880_v54, %v12878_v51  ;;  %v3015_v22 = vmul.bf16 %v11212_v58, %v6154_v30  ;;  %v3017_v15 = vmul.bf16 %v11212_v58, %v6156_v16  ;;  %v2594_v60 = vadd.f32 %v7626_v12, %v2578_v17  ;;  %v11249_v30 = vld [vmem:[%s8230_s5 + $0x38] sm:$0xf]  ;;  %v11256_v16 = vld [vmem:[%s8230_s5 + $0x3c] sm:$0xf] }
 0xc3e   : > { %v7627_v29 = vadd.low.f32.bf16 %v2592_v26, %v12881_v2  ;;  %v7628_v33 = vadd.high.f32.bf16 %v2593_v13, %v12881_v2  ;;  %v7629_v28 = vadd.high.f32.bf16 %v2595_v56, %v12882_v34  ;;  %v3016_v63 = vmul.bf16 %v11205_v37, %v6155_v32  ;;  %v12888_v13 = vld [vmem:[#allocation92_spill] sm:$0xff]  ;;  %v12889_v2 = vld [vmem:[#allocation93_spill] sm:$0xff] }
 0xc3f   : > { %v11221_v14 = vadd.f32 %v7624_v4, %v11113_v59  ;;  %v7630_v18 = vadd.low.f32.bf16 %v2594_v60, %v12882_v34  ;;  %v3030_v41 = vunpack.c.l.bf16 %v3014_v31  ;;  %v3031_v6 = vunpack.c.l.bf16 %v3015_v22  ;;  %v12890_v60 = vld [vmem:[#allocation100_spill] sm:$0xff] }
 0xc40   : > { %v7631_v47 = vadd.low.f32.bf16 %v7627_v29, %v12883_v49  ;;  %v7632_v23 = vadd.high.f32.bf16 %v7628_v33, %v12883_v49  ;;  %v7633_v50 = vadd.high.f32.bf16 %v7629_v28, %v12884_v44  ;;  %v3033_v9 = vunpack.c.l.bf16 %v3017_v15  ;;  %v12891_v28 = vld [vmem:[#allocation51_spill] sm:$0xff] }
 0xc41   : > { %v12886_v59 = vadd.low.f32.bf16 %v11008_v8, %v12865_v43  ;;  %v12887_v51 = vadd.high.f32.bf16 %v11015_v46, %v12865_v43  ;;  %v11239_v4 = vadd.f32 %v7625_v38, %v11102_v52  ;;  %v7636_v54 = vadd.low.f32.bf16 %v7630_v18, %v12884_v44  ;;  %v6206_v8 = vld [vmem:[%s12505_s1 + $0x57c] sm:$0xf]  ;;  %v6205_v43 = vld [vmem:[%s12505_s1 + $0x578] sm:$0xf] }
 0xc42   : > { %v3032_v12 = vunpack.c.l.bf16 %v3016_v63  ;;  %v3046_v17 = vadd.f32 %v7631_v47, %v3030_v41  ;;  %v3468_v46 = vmul.bf16 %v11249_v30, %v6203_v20  ;;  %v3047_v52 = vadd.f32 %v7632_v23, %v3031_v6  ;;  %v6253_v23 = vld [vmem:[%s12505_s1 + $0x630] sm:$0xf] }
 0xc43   : > { %v7634_v7 = vadd.low.f32.bf16 %v12886_v59, %v12885_v39  ;;  %v7635_v25 = vadd.high.f32.bf16 %v12887_v51, %v12885_v39  ;;  %v3049_v38 = vadd.f32 %v7633_v50, %v3033_v9  ;;  %v3469_v26 = vmul.bf16 %v11256_v16, %v6204_v36  ;;  %v12893_v50 = vld [vmem:[#allocation101_spill] sm:$0xff] }
 0xc44   : > { %v7637_v56 = vadd.low.f32.bf16 %v3046_v17, %v12888_v13  ;;  %v3471_v31 = vmul.bf16 %v11256_v16, %v6206_v8  ;;  %v7638_v32 = vadd.high.f32.bf16 %v3047_v52, %v12888_v13  ;;  %v3048_v22 = vadd.f32 %v7636_v54, %v3032_v12  ;;  %v7483_v36 = vld [vmem:[%s8230_s5 + $0x40] sm:$0xf]  ;;  %v6255_v12 = vld [vmem:[%s12505_s1 + $0x638] sm:$0xf]  ;;  %v6256_v8 = vld [vmem:[%s12505_s1 + $0x63c] sm:$0xf] }
 0xc45   : > { %v3470_v15 = vmul.bf16 %v11249_v30, %v6205_v43  ;;  %v7639_v29 = vadd.high.f32.bf16 %v3049_v38, %v12889_v2  ;;  %v3484_v34 = vunpack.c.l.bf16 %v3468_v46  ;;  %v12892_v63 = vadd.high.f32.bf16 %v11017_v48, %v12866_v40  ;;  %v6254_v48 = vld [vmem:[%s12505_s1 + $0x634] sm:$0xf] }
 0xc46   : > { %v7640_v33 = vadd.low.f32.bf16 %v7637_v56, %v12890_v60  ;;  %v11270_v49 = vadd.f32 %v7634_v7, %v11115_v61  ;;  %v7642_v47 = vadd.high.f32.bf16 %v7638_v32, %v12890_v60  ;;  %v3485_v41 = vunpack.c.l.bf16 %v3469_v26  ;;  %v12896_v56 = vld [vmem:[#allocation116_spill] sm:$0xff]  ;;  %v6303_v60 = vld [vmem:[%s12505_s1 + $0x6f0] sm:$0xf] }
 0xc47   : > { %v7641_v18 = vadd.high.f32.bf16 %v12892_v63, %v12891_v28  ;;  %v7643_v44 = vadd.low.f32.bf16 %v3048_v22, %v12889_v2  ;;  %v7644_v6 = vadd.high.f32.bf16 %v7639_v29, %v12893_v50  ;;  %v3487_v9 = vunpack.c.l.bf16 %v3471_v31 }
 0xc48   : > { %v12894_v61 = vadd.low.f32.bf16 %v11019_v35, %v12866_v40  ;;  %v11286_v39 = vadd.f32 %v7635_v25, %v11117_v57  ;;  %v3486_v59 = vunpack.c.l.bf16 %v3470_v15  ;;  %v3500_v51 = vadd.f32 %v7640_v33, %v3484_v34  ;;  %v7484_v35 = vld [vmem:[%s8230_s5 + $0x44] sm:$0xf]  ;;  %v12895_v25 = vld [vmem:[#allocation108_spill] sm:$0xff]  ;;  %v6304_v34 = vld [vmem:[%s12505_s1 + $0x6f4] sm:$0xf] }
 0xc49   : > { %v7646_v7 = vadd.low.f32.bf16 %v7643_v44, %v12893_v50  ;;  %v3922_v54 = vmul.bf16 %v7483_v36, %v6253_v23  ;;  %v3501_v17 = vadd.f32 %v7642_v47, %v3485_v41  ;;  %v3923_v40 = vmul.bf16 %v7484_v35, %v6254_v48  ;;  %v12897_v15 = vld [vmem:[#allocation109_spill] sm:$0xff]  ;;  %v7485_v23 = vld [vmem:[%s8230_s5 + $0x48] sm:$0xf]  ;;  %v6306_v50 = vld [vmem:[%s12505_s1 + $0x6fc] sm:$0xf] }
 0xc4a   : > { %v7645_v20 = vadd.low.f32.bf16 %v12894_v61, %v12891_v28  ;;  %v11298_v57 = vadd.f32 %v7641_v18, %v11127_v45  ;;  %v7647_v46 = vadd.low.f32.bf16 %v3500_v51, %v12895_v25  ;;  %v3503_v43 = vadd.f32 %v7644_v6, %v3487_v9  ;;  %v12898_v28 = vld [vmem:[#allocation117_spill] sm:$0xff]  ;;  %v7486_v9 = vld [vmem:[%s8230_s5 + $0x4c] sm:$0xf]  ;;  %v6305_v61 = vld [vmem:[%s12505_s1 + $0x6f8] sm:$0xf] }
 0xc4b   : > { %v7648_v52 = vadd.high.f32.bf16 %v3501_v17, %v12895_v25  ;;  %v3924_v38 = vmul.bf16 %v7483_v36, %v6255_v12  ;;  %v3925_v26 = vmul.bf16 %v7484_v35, %v6256_v8  ;;  %v3502_v13 = vadd.f32 %v7646_v7, %v3486_v59  ;;  %v12900_v7 = vld [vmem:[#allocation124_spill] sm:$0xff] }
 0xc4c   : > { %v7649_v31 = vadd.low.f32.bf16 %v7647_v46, %v12896_v56  ;;  %v3938_v32 = vunpack.c.l.bf16 %v3922_v54  ;;  %v11304_v22 = vadd.f32 %v7645_v20, %v11121_v1  ;;  %v7650_v2 = vadd.high.f32.bf16 %v3503_v43, %v12897_v15  ;;  %v12899_v20 = vld [vmem:[#allocation54_spill] sm:$0xff]  ;;  %v12901_v17 = vld [vmem:[#allocation132_spill] sm:$0xff]  ;;  %v6353_v43 = vld [vmem:[%s12505_s1 + $0x7b0] sm:$0xf] }
 0xc4d   : > { %v7651_v45 = vadd.high.f32.bf16 %v7648_v52, %v12896_v56  ;;  %v3939_v29 = vunpack.c.l.bf16 %v3923_v40  ;;  %v7652_v33 = vadd.low.f32.bf16 %v3502_v13, %v12897_v15  ;;  %v3940_v1 = vunpack.c.l.bf16 %v3924_v38  ;;  %v12902_v52 = vld [vmem:[#allocation125_spill] sm:$0xff] }
 0xc4e   : > { %v7653_v63 = vadd.high.f32.bf16 %v7650_v2, %v12898_v28  ;;  %v3941_v18 = vunpack.c.l.bf16 %v3925_v26  ;;  %v3954_v41 = vadd.f32 %v7649_v31, %v3938_v32  ;;  %v4376_v44 = vmul.bf16 %v7485_v23, %v6303_v60  ;;  %v6354_v32 = vld [vmem:[%s12505_s1 + $0x7b4] sm:$0xf]  ;;  %v12903_v15 = vld [vmem:[#allocation133_spill] sm:$0xff] }
 0xc4f   : > { %v7654_v47 = vadd.low.f32.bf16 %v7652_v33, %v12898_v28  ;;  %v3955_v6 = vadd.f32 %v7651_v45, %v3939_v29  ;;  %v4377_v48 = vmul.bf16 %v7486_v9, %v6304_v34  ;;  %v4379_v12 = vmul.bf16 %v7486_v9, %v6306_v50  ;;  %v11345_v29 = vld [vmem:[%s8230_s5 + $0x50] sm:$0xf]  ;;  %v6355_v50 = vld [vmem:[%s12505_s1 + $0x7b8] sm:$0xf] }
 0xc50   : > { %v7656_v51 = vadd.low.f32.bf16 %v3954_v41, %v12900_v7  ;;  %v3957_v54 = vadd.f32 %v7653_v63, %v3941_v18  ;;  %v4392_v40 = vunpack.c.l.bf16 %v4376_v44  ;;  %v4378_v25 = vmul.bf16 %v7485_v23, %v6305_v61  ;;  %v12904_v33 = vld [vmem:[#allocation55_spill] sm:$0xff] }
 0xc51   : > { %v7657_v36 = vadd.high.f32.bf16 %v3955_v6, %v12900_v7  ;;  %v3956_v8 = vadd.f32 %v7654_v47, %v3940_v1  ;;  %v4393_v13 = vunpack.c.l.bf16 %v4377_v48  ;;  %v4395_v45 = vunpack.c.l.bf16 %v4379_v12  ;;  %v11356_v23 = vld [vmem:[%s8230_s5 + $0x54] sm:$0xf]  ;;  %v6356_v6 = vld [vmem:[%s12505_s1 + $0x7bc] sm:$0xf] }
 0xc52   : > { %v7658_v35 = vadd.low.f32.bf16 %v7656_v51, %v12901_v17  ;;  %v7659_v38 = vadd.high.f32.bf16 %v3957_v54, %v12902_v52  ;;  %v4830_v60 = vmul.bf16 %v11345_v29, %v6353_v43  ;;  %v4394_v63 = vunpack.c.l.bf16 %v4378_v25  ;;  %v12905_v48 = vld [vmem:[#allocation140_spill] sm:$0xff] }
 0xc53   : > { %v7660_v26 = vadd.high.f32.bf16 %v7657_v36, %v12901_v17  ;;  %v7662_v31 = vadd.low.f32.bf16 %v3956_v8, %v12902_v52  ;;  %v4831_v44 = vmul.bf16 %v11356_v23, %v6354_v32  ;;  %v4832_v17 = vmul.bf16 %v11345_v29, %v6355_v50  ;;  %v12906_v52 = vld [vmem:[#allocation141_spill] sm:$0xff] }
 0xc54   : > { %v7663_v2 = vadd.high.f32.bf16 %v7659_v38, %v12903_v15  ;;  %v4408_v28 = vadd.f32 %v7658_v35, %v4392_v40  ;;  %v4846_v36 = vunpack.c.l.bf16 %v4830_v60  ;;  %v4833_v35 = vmul.bf16 %v11356_v23, %v6356_v6  ;;  %v6091_v60 = vld [vmem:[%s12505_s1 + $0x3c0] sm:$0xf] }
 0xc55   : > { %v7665_v47 = vadd.low.f32.bf16 %v7662_v31, %v12903_v15  ;;  %v4409_v41 = vadd.f32 %v7660_v26, %v4393_v13  ;;  %v4847_v43 = vunpack.c.l.bf16 %v4831_v44  ;;  %v12912_v44 = vld [vmem:[#allocation57_spill] sm:$0xff] }
 0xc56   : > { %v7667_v61 = vadd.low.f32.bf16 %v4408_v28, %v12905_v48  ;;  %v4411_v51 = vadd.f32 %v7663_v2, %v4395_v45  ;;  %v4848_v2 = vunpack.c.l.bf16 %v4832_v17  ;;  %v4849_v45 = vunpack.c.l.bf16 %v4833_v35  ;;  %v12914_v35 = vld [vmem:[#allocation59_spill] sm:$0xff]  ;;  %v6100_v17 = vld [vmem:[%s12505_s1 + $0x3e4] sm:$0xf] }
 0xc57   : > { %v7668_v7 = vadd.high.f32.bf16 %v4409_v41, %v12905_v48  ;;  %v4410_v40 = vadd.f32 %v7665_v47, %v4394_v63  ;;  %v12911_v63 = vld [vmem:[#allocation56_spill] sm:$0xff]  ;;  %v12913_v48 = vld [vmem:[#allocation58_spill] sm:$0xff] }
 0xc58   : > { %v7669_v54 = vadd.low.f32.bf16 %v7667_v61, %v10480_v53  ;;  %v7671_v38 = vadd.high.f32.bf16 %v4411_v51, %v12906_v52  ;;  %v6094_v51 = vld [vmem:[%s12505_s1 + $0x3cc] sm:$0xf] }
 0xc59   : > { %v7670_v25 = vadd.high.f32.bf16 %v7668_v7, %v10480_v53  ;;  %v7672_v26 = vadd.low.f32.bf16 %v4410_v40, %v12906_v52  ;;  %v6093_v7 = vld [vmem:[%s12505_s1 + $0x3c8] sm:$0xf]  ;;  %v6096_v52 = vld [vmem:[%s12505_s1 + $0x3d4] sm:$0xf]  ;;  %v6099_v40 = vld [vmem:[%s12505_s1 + $0x3e0] sm:$0xf]  ;;  %v2551_v41 = vmul.bf16 %v11163_v42, %v6094_v51 }
 0xc5a   : > { %v7673_v13 = vadd.high.f32.bf16 %v7671_v38, %v10492_v27  ;;  %v11384_v15 = vadd.f32 %v7669_v54, %v4846_v36  ;;  %v6097_v38 = vld [vmem:[%s12505_s1 + $0x3d8] sm:$0xf]  ;;  %v2550_v50 = vmul.bf16 %v11159_v21, %v6093_v7  ;;  %v2553_v9 = vmul.bf16 %v11163_v42, %v6096_v52 }
 0xc5b   : > { %v7674_v53 = vadd.low.f32.bf16 %v7672_v26, %v10492_v27  ;;  %v11390_v28 = vadd.f32 %v7670_v25, %v4847_v43  ;;  %v6092_v27 = vld [vmem:[%s12505_s1 + $0x3c4] sm:$0xf]  ;;  %v2548_v25 = vmul.bf16 %v11159_v21, %v6091_v60  ;;  %v6095_v43 = vld [vmem:[%s12505_s1 + $0x3d0] sm:$0xf]  ;;  %v6098_v60 = vld [vmem:[%s12505_s1 + $0x3dc] sm:$0xf]  ;;  %v2556_v51 = vmul.bf16 %v11159_v21, %v6099_v40 }
 0xc5c   : > { %12909 = vst [vmem:[#allocation10_spill] sm:$0xff] %v11384_v15  ;;  %v11429_v26 = vadd.f32 %v7673_v13, %v4849_v45  ;;  %v2549_v6 = vmul.bf16 %v11163_v42, %v6092_v27  ;;  %v2552_v47 = vmul.bf16 %v11159_v21, %v6095_v43  ;;  %v2554_v27 = vmul.bf16 %v11159_v21, %v6097_v38  ;;  %v6102_v40 = vld [vmem:[%s12505_s1 + $0x3ec] sm:$0xf] }
 0xc5d   : > { %12910 = vst [vmem:[#allocation7_spill] sm:$0xff] %v11390_v28  ;;  %v11442_v61 = vadd.f32 %v7674_v53, %v4848_v2  ;;  %v6101_v2 = vld [vmem:[%s12505_s1 + $0x3e8] sm:$0xf]  ;;  %v2555_v7 = vmul.bf16 %v11163_v42, %v6098_v60  ;;  %v2557_v43 = vmul.bf16 %v11163_v42, %v6100_v17  ;;  %v2564_v34 = vunpack.c.l.bf16 %v2548_v25 }
 0xc5e   : > { %12915 = vst [vmem:[#allocation11_spill] sm:$0xff] %v11429_v26  ;;  %v2565_v53 = vunpack.c.l.bf16 %v2549_v6  ;;  %v2566_v26 = vunpack.c.l.bf16 %v2550_v50  ;;  %v2568_v38 = vunpack.c.l.bf16 %v2552_v47  ;;  %v2570_v60 = vunpack.c.l.bf16 %v2554_v27 }
 0xc5f   : > { %12917 = vst [vmem:[#allocation12_spill] sm:$0xff] %v11442_v61  ;;  %v2567_v61 = vunpack.c.l.bf16 %v2551_v41  ;;  %v2572_v25 = vunpack.c.l.bf16 %v2556_v51  ;;  %v2573_v15 = vunpack.c.l.bf16 %v2557_v43  ;;  %v12918_v41 = vld [vmem:[#allocation62_spill] sm:$0xff] }
 0xc61   : > { %v11330_v46 = vpop.permute.xlu0 %7308 }
 0xc65   : > { %v11350_v1 = vpop.permute.xlu1 %7313 }
 0xc69   : > { %v11352_v18 = vpop.permute.xlu0 %7318 }
 0xc6d   : > { %v11370_v12 = vpop.permute.xlu1 %7323 }
 0xc71   : > { %v11372_v8 = vpop.permute.xlu0 %7328 }
 0xc75   : > { %v11380_v31 = vpop.permute.xlu1 %7333 }
 0xc76   : > { %12907 = vst [vmem:[#allocation5_spill] sm:$0xff] %v11380_v31 }
 0xc79   : > { %v11382_v32 = vpop.permute.xlu0 %7338 }
 0xc7a   : > { %12908 = vst [vmem:[#allocation6_spill] sm:$0xff] %v11382_v32  ;;  %v2571_v32 = vunpack.c.l.bf16 %v2555_v7 }
 0xc7d   : > { %v11431_v54 = vpop.permute.xlu1 %7343  ;;  %v5093_v36 = vpop.permute.xlu0 %5092 }
 0xc7e   : > { %12916 = vst [vmem:[#allocation8_spill] sm:$0xff] %v11431_v54  ;;  %v5140_v13 = vmul.bf16 %v11345_v29, %v5093_v36  ;;  %v2558_v36 = vmul.bf16 %v11159_v21, %v6101_v2  ;;  %v2569_v54 = vunpack.c.l.bf16 %v2553_v9  ;;  %v12919_v9 = vadd.low.f32.bf16 %v11125_v10, %v12899_v20 }
 0xc7f   : > { %v2559_v2 = vmul.bf16 %v11163_v42, %v6102_v40 }
 0xc80   : > { %v5156_v59 = vunpack.c.l.bf16 %v5140_v13  ;;  %v7687_v47 = vadd.low.f32.bf16 %v12919_v9, %v12918_v41 }
 0xc81   : > { %v5095_v45 = vpop.permute.xlu1 %5094  ;;  %v5097_v52 = vpop.permute.xlu0 %5096  ;;  %v2575_v42 = vunpack.c.l.bf16 %v2559_v2  ;;  %v12931_v2 = vadd.low.f32.bf16 %v11270_v49, %v12913_v48 }
 0xc82   : > { %v5141_v56 = vmul.bf16 %v11356_v23, %v5095_v45  ;;  %v5142_v28 = vmul.bf16 %v11345_v29, %v5097_v52 }
 0xc84   : > { %v5157_v17 = vunpack.c.l.bf16 %v5141_v56  ;;  %v5158_v50 = vunpack.c.l.bf16 %v5142_v28  ;;  %v2574_v56 = vunpack.c.l.bf16 %v2558_v36  ;;  %v12921_v36 = vld [vmem:[#allocation63_spill] sm:$0xff] }
 0xc85   : > { %v5099_v45 = vpop.permute.xlu1 %5098  ;;  %v5101_v13 = vpop.permute.xlu0 %5100 }
 0xc86   : > { %v7347_v31 = vpack.i.bf16 %v5157_v17, %v5156_v59  ;;  %v5143_v6 = vmul.bf16 %v11356_v23, %v5099_v45  ;;  %v5144_v21 = vmul.bf16 %v11345_v29, %v5101_v13  ;;  %v12920_v17 = vadd.high.f32.bf16 %v11138_v19, %v12899_v20 }
 0xc87   : > { %v11483_v45 = vadd.f32 %v7687_v47, %v2564_v34  ;;  %v12923_v13 = vadd.low.f32.bf16 %v11184_v24, %v12904_v33  ;;  %v12926_v20 = vadd.high.f32.bf16 %v11188_v11, %v12911_v63  ;;  %v12929_v24 = vadd.low.f32.bf16 %v11239_v4, %v12912_v44 }
 0xc88   : > { %v5159_v27 = vunpack.c.l.bf16 %v5143_v6  ;;  %7348 = vrot.lane.b32.xlu0 %v7347_v31, %s7962_s7  ;;  %v5160_v52 = vunpack.c.l.bf16 %v5144_v21  ;;  %v7688_v10 = vadd.high.f32.bf16 %v12920_v17, %v12918_v41  ;;  %v12922_v31 = vadd.high.f32.bf16 %v11176_v55, %v12904_v33  ;;  %v12927_v55 = vld [vmem:[#allocation65_spill] sm:$0xff] }
 0xc89   : > { %v5103_v7 = vpop.permute.xlu1 %5102  ;;  %v5105_v51 = vpop.permute.xlu0 %5104  ;;  %v7690_v6 = vadd.low.f32.bf16 %v12923_v13, %v12921_v36  ;;  %v12925_v21 = vadd.low.f32.bf16 %v11186_v62, %v12911_v63  ;;  %v12928_v41 = vadd.high.f32.bf16 %v11221_v14, %v12912_v44  ;;  %v7694_v33 = vadd.low.f32.bf16 %v12929_v24, %v12927_v55  ;;  %v12930_v62 = vld [vmem:[#allocation66_spill] sm:$0xff] }
 0xc8a   : > { %v7352_v43 = vpack.i.bf16 %v5159_v27, %v5158_v50  ;;  %v5145_v59 = vmul.bf16 %v11356_v23, %v5103_v7  ;;  %v5146_v28 = vmul.bf16 %v11345_v29, %v5105_v51  ;;  %v7689_v40 = vadd.high.f32.bf16 %v12922_v31, %v12921_v36  ;;  %v12924_v50 = vld [vmem:[#allocation64_spill] sm:$0xff] }
 0xc8b   : > { %v7691_v9 = vadd.low.f32.bf16 %v12925_v21, %v12924_v50  ;;  %v7692_v34 = vadd.high.f32.bf16 %v12926_v20, %v12924_v50  ;;  %v7693_v47 = vadd.high.f32.bf16 %v12928_v41, %v12927_v55  ;;  %v7695_v27 = vadd.low.f32.bf16 %v12931_v2, %v12930_v62 }
 0xc8c   : > { %v5161_v19 = vunpack.c.l.bf16 %v5145_v59  ;;  %7353 = vrot.lane.b32.xlu1 %v7352_v43, %s7962_s7  ;;  %v5162_v63 = vunpack.c.l.bf16 %v5146_v28  ;;  %v12932_v14 = vadd.high.f32.bf16 %v11286_v39, %v12913_v48  ;;  %v11520_v4 = vadd.f32 %v7688_v10, %v2565_v53  ;;  %v12933_v10 = vld [vmem:[#allocation67_spill] sm:$0xff] }
 0xc8d   : > { %v5107_v7 = vpop.permute.xlu1 %5106  ;;  %v5109_v51 = vpop.permute.xlu0 %5108  ;;  %v11522_v44 = vadd.f32 %v7689_v40, %v2567_v61  ;;  %v11524_v36 = vadd.f32 %v7690_v6, %v2566_v26  ;;  %v11526_v49 = vadd.f32 %v7691_v9, %v2568_v38  ;;  %v11531_v28 = vadd.f32 %v7693_v47, %v2571_v32 }
 0xc8e   : > { %v7357_v43 = vpack.i.bf16 %v5161_v19, %v5160_v52  ;;  %v5147_v11 = vmul.bf16 %v11356_v23, %v5107_v7  ;;  %v5148_v59 = vmul.bf16 %v11345_v29, %v5109_v51  ;;  %v7696_v17 = vadd.high.f32.bf16 %v12932_v14, %v12930_v62  ;;  %v6141_v62 = vld [vmem:[%s12505_s1 + $0x480] sm:$0xf] }
 0xc8f   : > { %v11529_v52 = vadd.f32 %v7692_v34, %v2569_v54  ;;  %v11533_v13 = vadd.f32 %v7694_v33, %v2570_v60  ;;  %v11535_v50 = vadd.f32 %v7695_v27, %v2572_v25  ;;  %v12934_v40 = vadd.high.f32.bf16 %v11298_v57, %v12914_v35  ;;  %v12936_v57 = vld [vmem:[#allocation70_spill] sm:$0xff]  ;;  %v12939_v27 = vld [vmem:[#allocation73_spill] sm:$0xff] }
 0xc90   : > { %v5163_v31 = vunpack.c.l.bf16 %v5147_v11  ;;  %7358 = vrot.lane.b32.xlu0 %v7357_v43, %s7962_s7  ;;  %v5164_v26 = vunpack.c.l.bf16 %v5148_v59  ;;  %v12935_v32 = vadd.low.f32.bf16 %v11304_v22, %v12914_v35  ;;  %v11547_v25 = vadd.f32 %v7696_v17, %v2573_v15  ;;  %v12937_v35 = vld [vmem:[#allocation71_spill] sm:$0xff]  ;;  %v6142_v43 = vld [vmem:[%s12505_s1 + $0x484] sm:$0xf]  ;;  %v6143_v11 = vld [vmem:[%s12505_s1 + $0x488] sm:$0xf] }
 0xc91   : > { %v5111_v39 = vpop.permute.xlu1 %5110  ;;  %v5113_v48 = vpop.permute.xlu0 %5112  ;;  %v7697_v54 = vadd.high.f32.bf16 %v12934_v40, %v12933_v10  ;;  %v7699_v41 = vadd.low.f32.bf16 %v11483_v45, %v12936_v57  ;;  %v7700_v15 = vadd.high.f32.bf16 %v11520_v4, %v12936_v57  ;;  %v7701_v24 = vadd.high.f32.bf16 %v11522_v44, %v12937_v35  ;;  %v12938_v45 = vld [vmem:[#allocation72_spill] sm:$0xff]  ;;  %v6145_v17 = vld [vmem:[%s12505_s1 + $0x490] sm:$0xf]  ;;  %v12945_v57 = vld [vmem:[#allocation81_spill] sm:$0xff] }
 0xc92   : > { %v7362_v53 = vpack.i.bf16 %v5163_v31, %v5162_v63  ;;  %v5149_v61 = vmul.bf16 %v11356_v23, %v5111_v39  ;;  %v5150_v38 = vmul.bf16 %v11345_v29, %v5113_v48  ;;  %v7698_v60 = vadd.low.f32.bf16 %v12935_v32, %v12933_v10  ;;  %v6144_v63 = vld [vmem:[%s12505_s1 + $0x48c] sm:$0xf]  ;;  %v6146_v31 = vld [vmem:[%s12505_s1 + $0x494] sm:$0xf]  ;;  %v6147_v39 = vld [vmem:[%s12505_s1 + $0x498] sm:$0xf] }
 0xc93   : > { %v11554_v47 = vadd.f32 %v7697_v54, %v2575_v42  ;;  %v7702_v33 = vadd.low.f32.bf16 %v11524_v36, %v12937_v35  ;;  %v7704_v42 = vadd.high.f32.bf16 %v11529_v52, %v12938_v45  ;;  %v7705_v7 = vadd.high.f32.bf16 %v11531_v28, %v12939_v27  ;;  %v6148_v40 = vld [vmem:[%s12505_s1 + $0x49c] sm:$0xf] }
 0xc94   : > { %v5165_v6 = vunpack.c.l.bf16 %v5149_v61  ;;  %7363 = vrot.lane.b32.xlu1 %v7362_v53, %s7962_s7  ;;  %v5166_v34 = vunpack.c.l.bf16 %v5150_v38  ;;  %v11556_v22 = vadd.f32 %v7698_v60, %v2574_v56  ;;  %v7703_v56 = vadd.low.f32.bf16 %v11526_v49, %v12938_v45  ;;  %v12940_v38 = vld [vmem:[#allocation74_spill] sm:$0xff]  ;;  %v12947_v45 = vld [vmem:[#allocation83_spill] sm:$0xff] }
 0xc95   : > { %v5115_v21 = vpop.permute.xlu1 %5114  ;;  %v5117_v9 = vpop.permute.xlu0 %5116  ;;  %v7706_v51 = vadd.low.f32.bf16 %v11533_v13, %v12939_v27  ;;  %v7707_v10 = vadd.low.f32.bf16 %v11535_v50, %v12940_v38  ;;  %v3002_v54 = vmul.bf16 %v11205_v37, %v6141_v62  ;;  %v3003_v32 = vmul.bf16 %v11212_v58, %v6142_v43  ;;  %v12941_v43 = vld [vmem:[#allocation75_spill] sm:$0xff] }
 0xc96   : > { %v7367_v19 = vpack.i.bf16 %v5165_v6, %v5164_v26  ;;  %v5151_v20 = vmul.bf16 %v11356_v23, %v5115_v21  ;;  %v5152_v55 = vmul.bf16 %v11345_v29, %v5117_v9  ;;  %v3004_v60 = vmul.bf16 %v11205_v37, %v6143_v11 }
 0xc97   : > { %v3005_v21 = vmul.bf16 %v11212_v58, %v6144_v63  ;;  %v3007_v9 = vmul.bf16 %v11212_v58, %v6146_v31  ;;  %v3008_v50 = vmul.bf16 %v11205_v37, %v6147_v39  ;;  %v7709_v11 = vadd.high.f32.bf16 %v11554_v47, %v12941_v43 }
 0xc98   : > { %v5167_v2 = vunpack.c.l.bf16 %v5151_v20  ;;  %7368 = vrot.lane.b32.xlu0 %v7367_v19, %s7962_s7  ;;  %v5168_v61 = vunpack.c.l.bf16 %v5152_v55  ;;  %v3009_v20 = vmul.bf16 %v11212_v58, %v6148_v40  ;;  %v7710_v63 = vadd.low.f32.bf16 %v11556_v22, %v12941_v43  ;;  %v12944_v43 = vld [vmem:[#allocation80_spill] sm:$0xff] }
 0xc99   : > { %v5119_v59 = vpop.permute.xlu1 %5118  ;;  %v5121_v14 = vpop.permute.xlu0 %5120  ;;  %v3020_v31 = vunpack.c.l.bf16 %v3004_v60  ;;  %v3021_v47 = vunpack.c.l.bf16 %v3005_v21  ;;  %v12942_v60 = vld [vmem:[#allocation78_spill] sm:$0xff]  ;;  %v7716_v4 = vadd.high.f32.bf16 %v7704_v42, %v12944_v43  ;;  %v7717_v36 = vadd.high.f32.bf16 %v7705_v7, %v12945_v57 }
 0xc9a   : > { %v7372_v48 = vpack.i.bf16 %v5167_v2, %v5166_v34  ;;  %v5153_v53 = vmul.bf16 %v11356_v23, %v5119_v59  ;;  %v5154_v26 = vmul.bf16 %v11345_v29, %v5121_v14  ;;  %v3006_v29 = vmul.bf16 %v11205_v37, %v6145_v17  ;;  %v6149_v59 = vld [vmem:[%s12505_s1 + $0x4a0] sm:$0xf]  ;;  %v6150_v14 = vld [vmem:[%s12505_s1 + $0x4a4] sm:$0xf] }
 0xc9b   : > { %v7708_v2 = vadd.high.f32.bf16 %v11547_v25, %v12940_v38  ;;  %v3018_v17 = vunpack.c.l.bf16 %v3002_v54  ;;  %v6151_v25 = vld [vmem:[%s12505_s1 + $0x4a8] sm:$0xf]  ;;  %v3025_v38 = vunpack.c.l.bf16 %v3009_v20  ;;  %v3010_v40 = vmul.bf16 %v11205_v37, %v6149_v59 }
 0xc9c   : > { %v5169_v6 = vunpack.c.l.bf16 %v5153_v53  ;;  %7373 = vrot.lane.b32.xlu1 %v7372_v48, %s7962_s7  ;;  %v5170_v62 = vunpack.c.l.bf16 %v5154_v26  ;;  %v3022_v22 = vunpack.c.l.bf16 %v3006_v29  ;;  %v3023_v48 = vunpack.c.l.bf16 %v3007_v9  ;;  %v6407_v26 = vld [vmem:[%s12505_s1 + $0x880] sm:$0xf]  ;;  %v6408_v9 = vld [vmem:[%s12505_s1 + $0x884] sm:$0xf] }
 0xc9d   : > { %v5123_v19 = vpop.permute.xlu1 %5122  ;;  %v3024_v53 = vunpack.c.l.bf16 %v3008_v50  ;;  %v3011_v54 = vmul.bf16 %v11212_v58, %v6150_v14  ;;  %v3012_v21 = vmul.bf16 %v11205_v37, %v6151_v25  ;;  %v6409_v50 = vld [vmem:[%s12505_s1 + $0x888] sm:$0xf]  ;;  %v7712_v37 = vadd.high.f32.bf16 %v7700_v15, %v12942_v60  ;;  %v6412_v14 = vld [vmem:[%s12505_s1 + $0x894] sm:$0xf] }
 0xc9e   : > { %v7377_v34 = vpack.i.bf16 %v5169_v6, %v5168_v61  ;;  %v5155_v55 = vmul.bf16 %v11356_v23, %v5123_v19  ;;  %v3019_v23 = vunpack.c.l.bf16 %v3003_v32  ;;  %v6152_v61 = vld [vmem:[%s12505_s1 + $0x4ac] sm:$0xf]  ;;  %v7711_v6 = vadd.low.f32.bf16 %v7699_v41, %v12942_v60  ;;  %v12950_v60 = vld [vmem:[#allocation88_spill] sm:$0xff] }
 0xc9f   : > { %v3013_v29 = vmul.bf16 %v11212_v58, %v6152_v61  ;;  %v3026_v19 = vunpack.c.l.bf16 %v3010_v40  ;;  %v3027_v20 = vunpack.c.l.bf16 %v3011_v54  ;;  %v12943_v58 = vld [vmem:[#allocation79_spill] sm:$0xff]  ;;  %v7715_v59 = vadd.low.f32.bf16 %v7703_v56, %v12944_v43  ;;  %v12946_v15 = vld [vmem:[#allocation82_spill] sm:$0xff] }
 0xca0   : > { %v5171_v39 = vunpack.c.l.bf16 %v5155_v55  ;;  %7378 = vrot.lane.b32.xlu0 %v7377_v34, %s7962_s7  ;;  %v7713_v41 = vadd.high.f32.bf16 %v7701_v24, %v12943_v58  ;;  %v11654_v34 = vadd.f32 %v7711_v6, %v3018_v17  ;;  %v3028_v55 = vunpack.c.l.bf16 %v3012_v21  ;;  %v6410_v24 = vld [vmem:[%s12505_s1 + $0x88c] sm:$0xf]  ;;  %v6413_v17 = vld [vmem:[%s12505_s1 + $0x898] sm:$0xf]  ;;  %v12949_v61 = vld [vmem:[#allocation87_spill] sm:$0xff] }
 0xca1   : > { %v3029_v44 = vunpack.c.l.bf16 %v3013_v29  ;;  %v7718_v49 = vadd.low.f32.bf16 %v7706_v51, %v12945_v57  ;;  %v7719_v35 = vadd.low.f32.bf16 %v7707_v10, %v12946_v15  ;;  %v7720_v52 = vadd.high.f32.bf16 %v7708_v2, %v12946_v15  ;;  %v6194_v40 = vld [vmem:[%s12505_s1 + $0x54c] sm:$0xf]  ;;  %v6195_v54 = vld [vmem:[%s12505_s1 + $0x550] sm:$0xf]  ;;  %v6197_v21 = vld [vmem:[%s12505_s1 + $0x558] sm:$0xf] }
 0xca2   : > { %v7382_v32 = vpack.i.bf16 %v5171_v39, %v5170_v62  ;;  %v7714_v62 = vadd.low.f32.bf16 %v7702_v33, %v12943_v58  ;;  %v6411_v33 = vld [vmem:[%s12505_s1 + $0x890] sm:$0xf]  ;;  %v7721_v28 = vadd.high.f32.bf16 %v7709_v11, %v12947_v45  ;;  %v7722_v56 = vadd.low.f32.bf16 %v7710_v63, %v12947_v45  ;;  %v6198_v29 = vld [vmem:[%s12505_s1 + $0x55c] sm:$0xf] }
 0xca3   : > { %v11688_v42 = vadd.f32 %v7712_v37, %v3019_v23  ;;  %v11690_v13 = vadd.f32 %v7713_v41, %v3021_v47  ;;  %v11694_v7 = vadd.f32 %v7715_v59, %v3022_v22  ;;  %v11696_v51 = vadd.f32 %v7716_v4, %v3023_v48  ;;  %v12948_v23 = vld [vmem:[#allocation86_spill] sm:$0xff]  ;;  %v6191_v22 = vld [vmem:[%s12505_s1 + $0x540] sm:$0xf]  ;;  %v6192_v48 = vld [vmem:[%s12505_s1 + $0x544] sm:$0xf] }
 0xca4   : > { %7383 = vrot.lane.b32.xlu1 %v7382_v32, %s7962_s7  ;;  %5353 = vrot.lane.b32.xlu0 %v6407_v26, %s7959_s30  ;;  %v11692_v27 = vadd.f32 %v7714_v62, %v3020_v31  ;;  %v11700_v10 = vadd.f32 %v7717_v36, %v3025_v38  ;;  %v11702_v2 = vadd.f32 %v7718_v49, %v3024_v53  ;;  %v6193_v53 = vld [vmem:[%s12505_s1 + $0x548] sm:$0xf]  ;;  %v6196_v32 = vld [vmem:[%s12505_s1 + $0x554] sm:$0xf]  ;;  %v12951_v62 = vld [vmem:[#allocation89_spill] sm:$0xff] }
 0xca5   : > { %v11704_v11 = vadd.f32 %v7719_v35, %v3026_v19  ;;  %v11706_v63 = vadd.f32 %v7720_v52, %v3027_v20  ;;  %v7723_v31 = vadd.low.f32.bf16 %v11654_v34, %v12948_v23  ;;  %v7724_v25 = vadd.high.f32.bf16 %v11688_v42, %v12948_v23  ;;  %v6414_v19 = vld [vmem:[%s12505_s1 + $0x89c] sm:$0xf]  ;;  %v6415_v20 = vld [vmem:[%s12505_s1 + $0x8a0] sm:$0xf]  ;;  %v12952_v36 = vld [vmem:[#allocation90_spill] sm:$0xff] }
 0xca6   : > { %v11718_v39 = vadd.f32 %v7721_v28, %v3029_v44  ;;  %v11720_v47 = vadd.f32 %v7722_v56, %v3028_v55  ;;  %v7725_v26 = vadd.high.f32.bf16 %v11690_v13, %v12949_v61  ;;  %v7726_v38 = vadd.low.f32.bf16 %v11692_v27, %v12949_v61  ;;  %v6199_v44 = vld [vmem:[%s12505_s1 + $0x560] sm:$0xf]  ;;  %v6200_v35 = vld [vmem:[%s12505_s1 + $0x564] sm:$0xf]  ;;  %v6201_v52 = vld [vmem:[%s12505_s1 + $0x568] sm:$0xf] }
 0xca7   : > { %v7727_v6 = vadd.low.f32.bf16 %v11694_v7, %v12950_v60  ;;  %v3458_v37 = vmul.bf16 %v11249_v30, %v6193_v53  ;;  %v3459_v58 = vmul.bf16 %v11256_v16, %v6194_v40  ;;  %v3460_v41 = vmul.bf16 %v11249_v30, %v6195_v54  ;;  %v6202_v42 = vld [vmem:[%s12505_s1 + $0x56c] sm:$0xf]  ;;  %v6416_v13 = vld [vmem:[%s12505_s1 + $0x8a4] sm:$0xf]  ;;  %v6417_v27 = vld [vmem:[%s12505_s1 + $0x8a8] sm:$0xf] }
 0xca8   : > { %5355 = vrot.lane.b32.xlu1 %v6408_v9, %s7959_s30  ;;  %5357 = vrot.lane.b32.xlu0 %v6409_v50, %s7959_s30  ;;  %v3456_v9 = vmul.bf16 %v11249_v30, %v6191_v22  ;;  %v3457_v50 = vmul.bf16 %v11256_v16, %v6192_v48  ;;  %v3461_v34 = vmul.bf16 %v11256_v16, %v6196_v32  ;;  %v12954_v23 = vld [vmem:[#allocation94_spill] sm:$0xff]  ;;  %v6419_v53 = vld [vmem:[%s12505_s1 + $0x8b0] sm:$0xf] }
 0xca9   : > { %v7728_v55 = vadd.high.f32.bf16 %v11696_v51, %v12950_v60  ;;  %v7729_v43 = vadd.high.f32.bf16 %v11700_v10, %v12951_v62  ;;  %v3462_v59 = vmul.bf16 %v11249_v30, %v6197_v21  ;;  %v3463_v4 = vmul.bf16 %v11256_v16, %v6198_v29  ;;  %v6418_v48 = vld [vmem:[%s12505_s1 + $0x8ac] sm:$0xf]  ;;  %v12955_v32 = vld [vmem:[#allocation95_spill] sm:$0xff]  ;;  %v12956_v29 = vld [vmem:[#allocation96_spill] sm:$0xff] }
 0xcaa   : > { %v7730_v57 = vadd.low.f32.bf16 %v11702_v2, %v12951_v62  ;;  %v7731_v49 = vadd.low.f32.bf16 %v11704_v11, %v12952_v36  ;;  %v7732_v15 = vadd.high.f32.bf16 %v11706_v63, %v12952_v36  ;;  %v3472_v28 = vunpack.c.l.bf16 %v3456_v9  ;;  %v6423_v36 = vld [vmem:[%s12505_s1 + $0x8c0] sm:$0xf] }
 0xcab   : > { %v3473_v56 = vunpack.c.l.bf16 %v3457_v50  ;;  %v3474_v7 = vunpack.c.l.bf16 %v3458_v37  ;;  %v3475_v51 = vunpack.c.l.bf16 %v3459_v58  ;;  %v3476_v10 = vunpack.c.l.bf16 %v3460_v41  ;;  %v12958_v41 = vld [vmem:[#allocation98_spill] sm:$0xff] }
 0xcac   : > { %5359 = vrot.lane.b32.xlu1 %v6410_v24, %s7959_s30  ;;  %5361 = vrot.lane.b32.xlu0 %v6411_v33, %s7959_s30  ;;  %v12953_v24 = vld [vmem:[#allocation91_spill] sm:$0xff]  ;;  %v3477_v2 = vunpack.c.l.bf16 %v3461_v34  ;;  %v3478_v11 = vunpack.c.l.bf16 %v3462_v59  ;;  %v3479_v63 = vunpack.c.l.bf16 %v3463_v4  ;;  %v3467_v22 = vmul.bf16 %v11256_v16, %v6202_v42 }
 0xcad   : > { %v7733_v33 = vadd.high.f32.bf16 %v11718_v39, %v12953_v24  ;;  %v7734_v45 = vadd.low.f32.bf16 %v11720_v47, %v12953_v24  ;;  %v7735_v39 = vadd.low.f32.bf16 %v7723_v31, %v12954_v23  ;;  %v3466_v47 = vmul.bf16 %v11249_v30, %v6201_v52  ;;  %v12959_v34 = vld [vmem:[#allocation99_spill] sm:$0xff]  ;;  %v6241_v24 = vld [vmem:[%s12505_s1 + $0x600] sm:$0xf] }
 0xcae   : > { %v7736_v31 = vadd.high.f32.bf16 %v7724_v25, %v12954_v23  ;;  %v7737_v60 = vadd.high.f32.bf16 %v7725_v26, %v12955_v32  ;;  %v7738_v21 = vadd.low.f32.bf16 %v7726_v38, %v12955_v32  ;;  %v7739_v9 = vadd.low.f32.bf16 %v7727_v6, %v12956_v29  ;;  %v6420_v25 = vld [vmem:[%s12505_s1 + $0x8b4] sm:$0xf]  ;;  %v6247_v23 = vld [vmem:[%s12505_s1 + $0x618] sm:$0xf] }
 0xcaf   : > { %v11816_v54 = vadd.f32 %v7735_v39, %v3472_v28  ;;  %v7740_v50 = vadd.high.f32.bf16 %v7728_v55, %v12956_v29  ;;  %v7743_v26 = vadd.low.f32.bf16 %v7731_v49, %v12958_v41  ;;  %v7744_v38 = vadd.high.f32.bf16 %v7732_v15, %v12958_v41  ;;  %v6248_v39 = vld [vmem:[%s12505_s1 + $0x61c] sm:$0xf]  ;;  %v12963_v29 = vld [vmem:[#allocation105_spill] sm:$0xff]  ;;  %v6427_v41 = vld [vmem:[%s12505_s1 + $0x8d0] sm:$0xf] }
 0xcb0   : > { %5363 = vrot.lane.b32.xlu1 %v6412_v14, %s7959_s30  ;;  %5365 = vrot.lane.b32.xlu0 %v6413_v17, %s7959_s30  ;;  %v3464_v14 = vmul.bf16 %v11249_v30, %v6199_v44  ;;  %v3465_v17 = vmul.bf16 %v11256_v16, %v6200_v35  ;;  %v3482_v30 = vunpack.c.l.bf16 %v3466_v47  ;;  %v3483_v16 = vunpack.c.l.bf16 %v3467_v22  ;;  %v6424_v47 = vld [vmem:[%s12505_s1 + $0x8c4] sm:$0xf]  ;;  %v6425_v22 = vld [vmem:[%s12505_s1 + $0x8c8] sm:$0xf] }
 0xcb1   : > { %v7745_v6 = vadd.high.f32.bf16 %v7733_v33, %v12959_v34  ;;  %v7746_v55 = vadd.low.f32.bf16 %v7734_v45, %v12959_v34  ;;  %v11836_v62 = vadd.f32 %v7736_v31, %v3473_v56  ;;  %v11840_v59 = vadd.f32 %v7737_v60, %v3475_v51  ;;  %v6242_v33 = vld [vmem:[%s12505_s1 + $0x604] sm:$0xf]  ;;  %v12960_v45 = vld [vmem:[#allocation102_spill] sm:$0xff]  ;;  %v6245_v51 = vld [vmem:[%s12505_s1 + $0x610] sm:$0xf] }
 0xcb2   : > { %v3480_v61 = vunpack.c.l.bf16 %v3464_v14  ;;  %v3481_v40 = vunpack.c.l.bf16 %v3465_v17  ;;  %v11842_v4 = vadd.f32 %v7738_v21, %v3474_v7  ;;  %v11846_v44 = vadd.f32 %v7740_v50, %v3477_v2  ;;  %v6244_v7 = vld [vmem:[%s12505_s1 + $0x60c] sm:$0xf]  ;;  %v6246_v17 = vld [vmem:[%s12505_s1 + $0x614] sm:$0xf] }
 0xcb3   : > { %v7747_v28 = vadd.low.f32.bf16 %v11816_v54, %v12960_v45  ;;  %v7748_v56 = vadd.high.f32.bf16 %v11836_v62, %v12960_v45  ;;  %v11872_v42 = vadd.f32 %v7745_v6, %v3483_v16  ;;  %v6250_v62 = vld [vmem:[%s12505_s1 + $0x624] sm:$0xf]  ;;  %v6429_v45 = vld [vmem:[%s12505_s1 + $0x8d8] sm:$0xf] }
 0xcb4   : > { %5367 = vrot.lane.b32.xlu1 %v6414_v19, %s7959_s30  ;;  %5369 = vrot.lane.b32.xlu0 %v6415_v20, %s7959_s30  ;;  %v6421_v19 = vld [vmem:[%s12505_s1 + $0x8b8] sm:$0xf]  ;;  %v12957_v20 = vld [vmem:[#allocation97_spill] sm:$0xff]  ;;  %v11858_v35 = vadd.f32 %v7743_v26, %v3480_v61  ;;  %v11860_v52 = vadd.f32 %v7744_v38, %v3481_v40  ;;  %v12965_v26 = vld [vmem:[#allocation107_spill] sm:$0xff] }
 0xcb5   : > { %v7741_v37 = vadd.high.f32.bf16 %v7729_v43, %v12957_v20  ;;  %v7742_v58 = vadd.low.f32.bf16 %v7730_v57, %v12957_v20  ;;  %v11844_v43 = vadd.f32 %v7739_v9, %v3476_v10  ;;  %v6422_v57 = vld [vmem:[%s12505_s1 + $0x8bc] sm:$0xf]  ;;  %v12961_v10 = vld [vmem:[#allocation103_spill] sm:$0xff]  ;;  %v7490_v61 = vld [vmem:[%s8230_s5 + $0x44] sm:$0xf]  ;;  %v7757_v38 = vadd.high.f32.bf16 %v11872_v42, %v12965_v26 }
 0xcb6   : > { %v7749_v2 = vadd.high.f32.bf16 %v11840_v59, %v12961_v10  ;;  %v3911_v40 = vmul.bf16 %v7490_v61, %v6242_v33  ;;  %v3913_v54 = vmul.bf16 %v7490_v61, %v6244_v7  ;;  %v3915_v16 = vmul.bf16 %v7490_v61, %v6246_v17  ;;  %v6251_v59 = vld [vmem:[%s12505_s1 + $0x628] sm:$0xf]  ;;  %v6428_v33 = vld [vmem:[%s12505_s1 + $0x8d4] sm:$0xf] }
 0xcb7   : > { %v11854_v49 = vadd.f32 %v7741_v37, %v3479_v63  ;;  %v11856_v15 = vadd.f32 %v7742_v58, %v3478_v11  ;;  %v7750_v11 = vadd.low.f32.bf16 %v11842_v4, %v12961_v10  ;;  %v12962_v63 = vld [vmem:[#allocation104_spill] sm:$0xff]  ;;  %v3917_v21 = vmul.bf16 %v7490_v61, %v6248_v39  ;;  %v6249_v37 = vld [vmem:[%s12505_s1 + $0x620] sm:$0xf]  ;;  %v6426_v58 = vld [vmem:[%s12505_s1 + $0x8cc] sm:$0xf] }
 0xcb8   : > { %5371 = vrot.lane.b32.xlu1 %v6416_v13, %s7959_s30  ;;  %5373 = vrot.lane.b32.xlu0 %v6417_v27, %s7959_s30  ;;  %v11874_v13 = vadd.f32 %v7746_v55, %v3482_v30  ;;  %v6243_v27 = vld [vmem:[%s12505_s1 + $0x608] sm:$0xf]  ;;  %v7751_v14 = vadd.low.f32.bf16 %v11844_v43, %v12962_v63  ;;  %v7752_v32 = vadd.high.f32.bf16 %v11846_v44, %v12962_v63  ;;  %v3927_v55 = vunpack.c.l.bf16 %v3911_v40  ;;  %v12967_v10 = vld [vmem:[#allocation111_spill] sm:$0xff]  ;;  %v6430_v39 = vld [vmem:[%s12505_s1 + $0x8dc] sm:$0xf] }
 0xcb9   : > { %v7753_v9 = vadd.high.f32.bf16 %v11854_v49, %v12963_v29  ;;  %v7754_v50 = vadd.low.f32.bf16 %v11856_v15, %v12963_v29  ;;  %v3929_v43 = vunpack.c.l.bf16 %v3913_v54  ;;  %v3933_v49 = vunpack.c.l.bf16 %v3917_v21  ;;  %v12970_v40 = vld [vmem:[#allocation114_spill] sm:$0xff] }
 0xcba   : > { %v7758_v34 = vadd.low.f32.bf16 %v11874_v13, %v12965_v26  ;;  %v12966_v13 = vld [vmem:[#allocation110_spill] sm:$0xff]  ;;  %v7761_v63 = vadd.high.f32.bf16 %v7749_v2, %v12967_v10  ;;  %v6291_v26 = vld [vmem:[%s12505_s1 + $0x6c0] sm:$0xf] }
 0xcbc   : > { %5375 = vrot.lane.b32.xlu1 %v6418_v48, %s7959_s30  ;;  %5377 = vrot.lane.b32.xlu0 %v6419_v53, %s7959_s30  ;;  %v7489_v48 = vld [vmem:[%s8230_s5 + $0x40] sm:$0xf] }
 0xcbd   : > { %v3910_v53 = vmul.bf16 %v7489_v48, %v6241_v24  ;;  %v3912_v31 = vmul.bf16 %v7489_v48, %v6243_v27  ;;  %v3914_v30 = vmul.bf16 %v7489_v48, %v6245_v51  ;;  %v3916_v60 = vmul.bf16 %v7489_v48, %v6247_v23 }
 0xcbe   : > { %v3918_v15 = vmul.bf16 %v7489_v48, %v6249_v37  ;;  %v3920_v24 = vmul.bf16 %v7489_v48, %v6251_v59  ;;  %v7759_v27 = vadd.low.f32.bf16 %v7747_v28, %v12966_v13  ;;  %v7760_v51 = vadd.high.f32.bf16 %v7748_v56, %v12966_v13  ;;  %v6293_v59 = vld [vmem:[%s12505_s1 + $0x6c8] sm:$0xf] }
 0xcbf   : > { %v3926_v6 = vunpack.c.l.bf16 %v3910_v53  ;;  %v3928_v4 = vunpack.c.l.bf16 %v3912_v31  ;;  %v3930_v44 = vunpack.c.l.bf16 %v3914_v30  ;;  %v7762_v28 = vadd.low.f32.bf16 %v7750_v11, %v12967_v10  ;;  %v12974_v10 = vld [vmem:[#allocation120_spill] sm:$0xff] }
 0xcc0   : > { %5379 = vrot.lane.b32.xlu1 %v6420_v25, %s7959_s30  ;;  %5381 = vrot.lane.b32.xlu0 %v6421_v19, %s7959_s30  ;;  %v12964_v25 = vld [vmem:[#allocation106_spill] sm:$0xff]  ;;  %v3934_v7 = vunpack.c.l.bf16 %v3918_v15  ;;  %v3936_v23 = vunpack.c.l.bf16 %v3920_v24  ;;  %v11976_v11 = vadd.f32 %v7760_v51, %v3927_v55  ;;  %v6295_v15 = vld [vmem:[%s12505_s1 + $0x6d0] sm:$0xf]  ;;  %v6298_v51 = vld [vmem:[%s12505_s1 + $0x6dc] sm:$0xf] }
 0xcc1   : > { %v7755_v19 = vadd.low.f32.bf16 %v11858_v35, %v12964_v25  ;;  %v7756_v20 = vadd.high.f32.bf16 %v11860_v52, %v12964_v25  ;;  %v6252_v35 = vld [vmem:[%s12505_s1 + $0x62c] sm:$0xf]  ;;  %v3919_v52 = vmul.bf16 %v7490_v61, %v6250_v62  ;;  %v11972_v29 = vadd.f32 %v7759_v27, %v3926_v6  ;;  %v6292_v62 = vld [vmem:[%s12505_s1 + $0x6c4] sm:$0xf]  ;;  %v7491_v24 = vld [vmem:[%s8230_s5 + $0x48] sm:$0xf] }
 0xcc2   : > { %v3921_v42 = vmul.bf16 %v7490_v61, %v6252_v35  ;;  %v12969_v61 = vld [vmem:[#allocation113_spill] sm:$0xff]  ;;  %v6296_v35 = vld [vmem:[%s12505_s1 + $0x6d4] sm:$0xf]  ;;  %v4366_v13 = vmul.bf16 %v7491_v24, %v6293_v59 }
 0xcc3   : > { %v3935_v17 = vunpack.c.l.bf16 %v3919_v52  ;;  %v7765_v56 = vadd.high.f32.bf16 %v7753_v9, %v12969_v61  ;;  %v7766_v2 = vadd.low.f32.bf16 %v7754_v50, %v12969_v61  ;;  %v7767_v31 = vadd.low.f32.bf16 %v7755_v19, %v12970_v40  ;;  %v6433_v9 = vld [vmem:[%s12505_s1 + $0x8e8] sm:$0xf] }
 0xcc4   : > { %5383 = vrot.lane.b32.xlu1 %v6422_v57, %s7959_s30  ;;  %5546 = vrot.lane.b32.xlu0 %v6423_v36, %s7960_s4  ;;  %v3931_v57 = vunpack.c.l.bf16 %v3915_v16  ;;  %v3932_v36 = vunpack.c.l.bf16 %v3916_v60  ;;  %v7768_v54 = vadd.high.f32.bf16 %v7756_v20, %v12970_v40  ;;  %v3937_v30 = vunpack.c.l.bf16 %v3921_v42  ;;  %v12971_v16 = vld [vmem:[#allocation115_spill] sm:$0xff]  ;;  %v12976_v61 = vld [vmem:[#allocation122_spill] sm:$0xff] }
 0xcc5   : > { %v7769_v60 = vadd.high.f32.bf16 %v7757_v38, %v12971_v16  ;;  %v7770_v21 = vadd.low.f32.bf16 %v7758_v34, %v12971_v16  ;;  %v11986_v50 = vadd.f32 %v7762_v28, %v3928_v4  ;;  %v11992_v20 = vadd.f32 %v7765_v56, %v3933_v49  ;;  %v12972_v38 = vld [vmem:[#allocation118_spill] sm:$0xff]  ;;  %v6435_v49 = vld [vmem:[%s12505_s1 + $0x8f0] sm:$0xf]  ;;  %v6437_v28 = vld [vmem:[%s12505_s1 + $0x8f8] sm:$0xf] }
 0xcc6   : > { %v11994_v37 = vadd.f32 %v7766_v2, %v3932_v36  ;;  %v7771_v34 = vadd.low.f32.bf16 %v11972_v29, %v12972_v38  ;;  %v7772_v4 = vadd.high.f32.bf16 %v11976_v11, %v12972_v38  ;;  %v6434_v36 = vld [vmem:[%s12505_s1 + $0x8ec] sm:$0xf]  ;;  %v12977_v40 = vld [vmem:[#allocation123_spill] sm:$0xff]  ;;  %v4382_v29 = vunpack.c.l.bf16 %v4366_v13 }
 0xcc7   : > { %v12005_v6 = vadd.f32 %v7769_v60, %v3937_v30  ;;  %v12007_v55 = vadd.f32 %v7770_v21, %v3936_v23  ;;  %v4368_v23 = vmul.bf16 %v7491_v24, %v6295_v15  ;;  %v12978_v38 = vld [vmem:[#allocation126_spill] sm:$0xff] }
 0xcc8   : > { %5548 = vrot.lane.b32.xlu1 %v6424_v47, %s7960_s4  ;;  %5550 = vrot.lane.b32.xlu0 %v6425_v22, %s7960_s4  ;;  %v6431_v47 = vld [vmem:[%s12505_s1 + $0x8e0] sm:$0xf]  ;;  %v12968_v22 = vld [vmem:[#allocation112_spill] sm:$0xff] }
 0xcc9   : > { %v7763_v48 = vadd.low.f32.bf16 %v7751_v14, %v12968_v22  ;;  %v7764_v53 = vadd.high.f32.bf16 %v7752_v32, %v12968_v22  ;;  %v11978_v14 = vadd.f32 %v7761_v63, %v3929_v43  ;;  %v6432_v32 = vld [vmem:[%s12505_s1 + $0x8e4] sm:$0xf]  ;;  %v12973_v43 = vld [vmem:[#allocation119_spill] sm:$0xff] }
 0xcca   : > { %v7774_v52 = vadd.low.f32.bf16 %v11986_v50, %v12973_v43  ;;  %v12975_v22 = vld [vmem:[#allocation121_spill] sm:$0xff] }
 0xccb   : > { %v11988_v25 = vadd.f32 %v7763_v48, %v3930_v44  ;;  %v11990_v19 = vadd.f32 %v7764_v53, %v3931_v57  ;;  %v7773_v44 = vadd.high.f32.bf16 %v11978_v14, %v12973_v43  ;;  %v6294_v57 = vld [vmem:[%s12505_s1 + $0x6cc] sm:$0xf]  ;;  %v7777_v48 = vadd.high.f32.bf16 %v11992_v20, %v12975_v22  ;;  %v6300_v50 = vld [vmem:[%s12505_s1 + $0x6e4] sm:$0xf]  ;;  %v12979_v43 = vld [vmem:[#allocation127_spill] sm:$0xff] }
 0xccc   : > { %5552 = vrot.lane.b32.xlu1 %v6426_v58, %s7960_s4  ;;  %5554 = vrot.lane.b32.xlu0 %v6427_v41, %s7960_s4  ;;  %v11996_v58 = vadd.f32 %v7767_v31, %v3934_v7  ;;  %v11998_v41 = vadd.f32 %v7768_v54, %v3935_v17  ;;  %v6297_v7 = vld [vmem:[%s12505_s1 + $0x6d8] sm:$0xf]  ;;  %v7778_v53 = vadd.low.f32.bf16 %v11994_v37, %v12975_v22  ;;  %v4384_v14 = vunpack.c.l.bf16 %v4368_v23  ;;  %v6302_v20 = vld [vmem:[%s12505_s1 + $0x6ec] sm:$0xf] }
 0xccd   : > { %v7775_v63 = vadd.low.f32.bf16 %v11988_v25, %v12974_v10  ;;  %v7776_v17 = vadd.high.f32.bf16 %v11990_v19, %v12974_v10  ;;  %v7781_v31 = vadd.high.f32.bf16 %v12005_v6, %v12977_v40  ;;  %v7782_v54 = vadd.low.f32.bf16 %v12007_v55, %v12977_v40  ;;  %v6438_v25 = vld [vmem:[%s12505_s1 + $0x8fc] sm:$0xf]  ;;  %v6301_v19 = vld [vmem:[%s12505_s1 + $0x6e8] sm:$0xf] }
 0xcce   : > { %v7779_v56 = vadd.low.f32.bf16 %v11996_v58, %v12976_v61  ;;  %v7780_v2 = vadd.high.f32.bf16 %v11998_v41, %v12976_v61  ;;  %v4370_v30 = vmul.bf16 %v7491_v24, %v6297_v7  ;;  %v7783_v6 = vadd.low.f32.bf16 %v7771_v34, %v12978_v38 }
 0xccf   : > { %v7784_v55 = vadd.high.f32.bf16 %v7772_v4, %v12978_v38 }
 0xcd0   : > { %5556 = vrot.lane.b32.xlu1 %v6428_v33, %s7960_s4  ;;  %5558 = vrot.lane.b32.xlu0 %v6429_v45, %s7960_s4  ;;  %v4364_v33 = vmul.bf16 %v7491_v24, %v6291_v26  ;;  %v7492_v45 = vld [vmem:[%s8230_s5 + $0x4c] sm:$0xf]  ;;  %v4386_v37 = vunpack.c.l.bf16 %v4370_v30 }
 0xcd1   : > { %v4365_v42 = vmul.bf16 %v7492_v45, %v6292_v62  ;;  %v4367_v27 = vmul.bf16 %v7492_v45, %v6294_v57  ;;  %v4371_v16 = vmul.bf16 %v7492_v45, %v6298_v51  ;;  %v4373_v26 = vmul.bf16 %v7492_v45, %v6300_v50 }
 0xcd2   : > { %v4380_v60 = vunpack.c.l.bf16 %v4364_v33  ;;  %v4374_v62 = vmul.bf16 %v7491_v24, %v6301_v19  ;;  %v4375_v59 = vmul.bf16 %v7492_v45, %v6302_v20  ;;  %v7785_v57 = vadd.high.f32.bf16 %v7773_v44, %v12979_v43  ;;  %v12981_v33 = vld [vmem:[#allocation129_spill] sm:$0xff]  ;;  %v12986_v19 = vld [vmem:[#allocation136_spill] sm:$0xff] }
 0xcd3   : > { %v4381_v21 = vunpack.c.l.bf16 %v4365_v42  ;;  %v4383_v11 = vunpack.c.l.bf16 %v4367_v27  ;;  %v4387_v58 = vunpack.c.l.bf16 %v4371_v16  ;;  %v7789_v42 = vadd.high.f32.bf16 %v7777_v48, %v12981_v33  ;;  %v12982_v27 = vld [vmem:[#allocation130_spill] sm:$0xff]  ;;  %v12123_v16 = vld [vmem:[%s8230_s5 + $0x54] sm:$0xf] }
 0xcd4   : > { %5560 = vrot.lane.b32.xlu1 %v6430_v39, %s7960_s4  ;;  %5562 = vrot.lane.b32.xlu0 %v6431_v47, %s7960_s4  ;;  %v4369_v39 = vmul.bf16 %v7492_v45, %v6296_v35  ;;  %v6436_v47 = vld [vmem:[%s12505_s1 + $0x8f4] sm:$0xf]  ;;  %v7790_v13 = vadd.low.f32.bf16 %v7778_v53, %v12981_v33  ;;  %v7791_v7 = vadd.low.f32.bf16 %v7779_v56, %v12982_v27  ;;  %v4389_v4 = vunpack.c.l.bf16 %v4373_v26  ;;  %v6341_v56 = vld [vmem:[%s12505_s1 + $0x780] sm:$0xf]  ;;  %v12989_v33 = vld [vmem:[#allocation142_spill] sm:$0xff] }
 0xcd5   : > { %v7792_v34 = vadd.high.f32.bf16 %v7780_v2, %v12982_v27  ;;  %v4397_v45 = vadd.f32 %v7784_v55, %v4381_v21  ;;  %v4390_v10 = vunpack.c.l.bf16 %v4374_v62  ;;  %v4391_v44 = vunpack.c.l.bf16 %v4375_v59  ;;  %v6342_v2 = vld [vmem:[%s12505_s1 + $0x784] sm:$0xf]  ;;  %v12984_v21 = vld [vmem:[#allocation134_spill] sm:$0xff] }
 0xcd6   : > { %v12100_v22 = vadd.f32 %v7789_v42, %v4387_v58  ;;  %v12102_v48 = vadd.f32 %v7790_v13, %v4386_v37  ;;  %v6345_v58 = vld [vmem:[%s12505_s1 + $0x790] sm:$0xf]  ;;  %v12987_v26 = vld [vmem:[#allocation137_spill] sm:$0xff]  ;;  %v12988_v55 = vld [vmem:[#allocation138_spill] sm:$0xff] }
 0xcd7   : > { %v12106_v61 = vadd.f32 %v7792_v34, %v4389_v4 }
 0xcd8   : > { %5564 = vrot.lane.b32.xlu1 %v6432_v32, %s7960_s4  ;;  %5566 = vrot.lane.b32.xlu0 %v6433_v9, %s7960_s4  ;;  %v4385_v32 = vunpack.c.l.bf16 %v4369_v39  ;;  %v6299_v9 = vld [vmem:[%s12505_s1 + $0x6e0] sm:$0xf]  ;;  %v12983_v39 = vld [vmem:[#allocation131_spill] sm:$0xff]  ;;  %v7801_v38 = vadd.high.f32.bf16 %v12100_v22, %v12987_v26 }
 0xcd9   : > { %v4372_v41 = vmul.bf16 %v7491_v24, %v6299_v9  ;;  %v4396_v24 = vadd.f32 %v7783_v6, %v4380_v60  ;;  %v4819_v60 = vmul.bf16 %v12123_v16, %v6342_v2  ;;  %v12985_v9 = vld [vmem:[#allocation135_spill] sm:$0xff]  ;;  %v7802_v6 = vadd.low.f32.bf16 %v12102_v48, %v12987_v26 }
 0xcda   : > { %v7804_v59 = vadd.high.f32.bf16 %v12106_v61, %v12988_v55 }
 0xcdb   : > { %v4388_v51 = vunpack.c.l.bf16 %v4372_v41  ;;  %v6346_v41 = vld [vmem:[%s12505_s1 + $0x794] sm:$0xf] }
 0xcdc   : > { %5568 = vrot.lane.b32.xlu1 %v6434_v36, %s7960_s4  ;;  %5570 = vrot.lane.b32.xlu0 %v6435_v49, %s7960_s4  ;;  %v7786_v36 = vadd.low.f32.bf16 %v7774_v52, %v12979_v43  ;;  %v12980_v49 = vld [vmem:[#allocation128_spill] sm:$0xff]  ;;  %v4399_v52 = vadd.f32 %v7785_v57, %v4383_v11  ;;  %v7796_v11 = vadd.high.f32.bf16 %v4397_v45, %v12984_v21 }
 0xcdd   : > { %v7787_v15 = vadd.low.f32.bf16 %v7775_v63, %v12980_v49  ;;  %v7788_v35 = vadd.high.f32.bf16 %v7776_v17, %v12980_v49  ;;  %v12104_v53 = vadd.f32 %v7791_v7, %v4388_v51  ;;  %v6347_v43 = vld [vmem:[%s12505_s1 + $0x798] sm:$0xf]  ;;  %v6348_v57 = vld [vmem:[%s12505_s1 + $0x79c] sm:$0xf]  ;;  %v4835_v49 = vunpack.c.l.bf16 %v4819_v60 }
 0xcde   : > { %v4398_v63 = vadd.f32 %v7786_v36, %v4382_v29  ;;  %v7795_v29 = vadd.low.f32.bf16 %v4396_v24, %v12984_v21  ;;  %v7797_v50 = vadd.high.f32.bf16 %v4399_v52, %v12985_v9  ;;  %v7806_v13 = vadd.high.f32.bf16 %v7796_v11, %v12989_v33 }
 0xcdf   : > { %v4400_v23 = vadd.f32 %v7787_v15, %v4384_v14  ;;  %v4401_v17 = vadd.f32 %v7788_v35, %v4385_v32  ;;  %v6343_v14 = vld [vmem:[%s12505_s1 + $0x788] sm:$0xf]  ;;  %v6344_v32 = vld [vmem:[%s12505_s1 + $0x78c] sm:$0xf]  ;;  %v7803_v62 = vadd.low.f32.bf16 %v12104_v53, %v12988_v55  ;;  %v4823_v7 = vmul.bf16 %v12123_v16, %v6346_v41 }
 0xce0   : > { %5572 = vrot.lane.b32.xlu1 %v6436_v47, %s7960_s4  ;;  %5574 = vrot.lane.b32.xlu0 %v6437_v28, %s7960_s4  ;;  %v7793_v47 = vadd.high.f32.bf16 %v7781_v31, %v12983_v39  ;;  %v7794_v28 = vadd.low.f32.bf16 %v7782_v54, %v12983_v39  ;;  %v12119_v54 = vld [vmem:[%s8230_s5 + $0x50] sm:$0xf]  ;;  %v4821_v35 = vmul.bf16 %v12123_v16, %v6344_v32 }
 0xce1   : > { %v4818_v30 = vmul.bf16 %v12119_v54, %v6341_v56  ;;  %v7799_v20 = vadd.low.f32.bf16 %v4400_v23, %v12986_v19  ;;  %v7800_v37 = vadd.high.f32.bf16 %v4401_v17, %v12986_v19  ;;  %v4820_v15 = vmul.bf16 %v12119_v54, %v6343_v14 }
 0xce2   : > { %v12114_v40 = vadd.f32 %v7793_v47, %v4391_v44  ;;  %v12116_v31 = vadd.f32 %v7794_v28, %v4390_v10  ;;  %v7805_v42 = vadd.low.f32.bf16 %v7795_v29, %v12989_v33  ;;  %v4822_v27 = vmul.bf16 %v12119_v54, %v6345_v58  ;;  %v6349_v47 = vld [vmem:[%s12505_s1 + $0x7a0] sm:$0xf]  ;;  %v6350_v28 = vld [vmem:[%s12505_s1 + $0x7a4] sm:$0xf]  ;;  %v12991_v33 = vld [vmem:[#allocation139_spill] sm:$0xff] }
 0xce3   : > { %v4834_v36 = vunpack.c.l.bf16 %v4818_v30  ;;  %v4824_v34 = vmul.bf16 %v12119_v54, %v6347_v43  ;;  %v4825_v51 = vmul.bf16 %v12123_v16, %v6348_v57  ;;  %v4836_v4 = vunpack.c.l.bf16 %v4820_v15 }
 0xce4   : > { %5576 = vrot.lane.b32.xlu1 %v6438_v25, %s7960_s4  ;;  %v7798_v25 = vadd.low.f32.bf16 %v4398_v63, %v12985_v9  ;;  %v4837_v24 = vunpack.c.l.bf16 %v4821_v35  ;;  %v4851_v10 = vadd.f32 %v7806_v13, %v4835_v49  ;;  %v4838_v44 = vunpack.c.l.bf16 %v4822_v27  ;;  %s12448_s4 = scalar_lea.hbm %s12507_s3, %s6444_s23 }
 0xce5   : > { %v4850_v45 = vadd.f32 %v7805_v42, %v4834_v36  ;;  %v4839_v52 = vunpack.c.l.bf16 %v4823_v7  ;;  %v7807_v63 = vadd.high.f32.bf16 %v7797_v50, %v10438_v5  ;;  %v4840_v17 = vunpack.c.l.bf16 %v4824_v34  ;;  %v6352_v50 = vld [vmem:[%s12505_s1 + $0x7ac] sm:$0xf]  ;;  %v12990_v36 = vld [vmem:[#allocation143_spill] sm:$0xff]  ;;  %v12992_v34 = vld [vmem:[#allocation144_spill] sm:$0xff] }
 0xce6   : > { %v7808_v23 = vadd.low.f32.bf16 %v7798_v25, %v10438_v5  ;;  %v4841_v39 = vunpack.c.l.bf16 %v4825_v51  ;;  %v7809_v22 = vadd.low.f32.bf16 %v7799_v20, %v10440_v0  ;;  %v7810_v48 = vadd.high.f32.bf16 %v7800_v37, %v10440_v0 }
 0xce7   : > { %v7811_v53 = vadd.low.f32.bf16 %v4850_v45, %v11330_v46  ;;  %v7812_v61 = vadd.high.f32.bf16 %v4851_v10, %v11330_v46  ;;  %v4826_v5 = vmul.bf16 %v12119_v54, %v6349_v47  ;;  %v4827_v2 = vmul.bf16 %v12123_v16, %v6350_v28  ;;  %v6351_v46 = vld [vmem:[%s12505_s1 + $0x7a8] sm:$0xf] }
 0xce8   : > { %v4853_v30 = vadd.f32 %v7807_v63, %v4837_v24  ;;  %v4852_v60 = vadd.f32 %v7808_v23, %v4836_v4  ;;  %v4854_v11 = vadd.f32 %v7809_v22, %v4838_v44  ;;  %v4855_v14 = vadd.f32 %v7810_v48, %v4839_v52 }
 0xce9   : > { %v7817_v25 = vadd.high.f32.bf16 %v7801_v38, %v10456_v3  ;;  %v7818_v19 = vadd.low.f32.bf16 %v7802_v6, %v10456_v3  ;;  %v4842_v20 = vunpack.c.l.bf16 %v4826_v5  ;;  %v4843_v37 = vunpack.c.l.bf16 %v4827_v2  ;;  %v12997_v5 = vld [vmem:[#allocation7_spill] sm:$0xff] }
 0xcea   : > { %v7815_v0 = vadd.high.f32.bf16 %v4853_v30, %v11350_v1  ;;  %v7816_v9 = vadd.low.f32.bf16 %v4852_v60, %v11350_v1  ;;  %v7821_v1 = vadd.low.f32.bf16 %v4854_v11, %v11352_v18  ;;  %v7822_v26 = vadd.high.f32.bf16 %v4855_v14, %v11352_v18  ;;  %v12243_v11 = vld [vmem:[%s8230_s5 + $0x58] sm:$0xf] }
 0xceb   : > { %v4828_v55 = vmul.bf16 %v12119_v54, %v6351_v46  ;;  %v4829_v43 = vmul.bf16 %v12123_v16, %v6352_v50  ;;  %v7823_v49 = vadd.low.f32.bf16 %v7803_v62, %v12990_v36  ;;  %v7824_v38 = vadd.high.f32.bf16 %v7804_v59, %v12990_v36 }
 0xcec   : > { %v4857_v3 = vadd.f32 %v7817_v25, %v4841_v39  ;;  %v4856_v6 = vadd.f32 %v7818_v19, %v4840_v17  ;;  %v7827_v42 = vadd.high.f32.bf16 %v12114_v40, %v12991_v33  ;;  %v7828_v18 = vadd.low.f32.bf16 %v12116_v31, %v12991_v33  ;;  %v12993_v17 = vld [vmem:[#allocation5_spill] sm:$0xff]  ;;  %v13002_v25 = vld [vmem:[#allocation12_spill] sm:$0xff] }
 0xced   : > { %v4858_v62 = vadd.f32 %v7823_v49, %v4842_v20  ;;  %v4859_v27 = vadd.f32 %v7824_v38, %v4843_v37  ;;  %v4844_v59 = vunpack.c.l.bf16 %v4828_v55  ;;  %v4845_v7 = vunpack.c.l.bf16 %v4829_v43  ;;  %v12257_v37 = vld [vmem:[%s8230_s5 + $0x5c] sm:$0xf]  ;;  %s5855_s5 = sshll.u32 %s218_s11, 7 }
 0xcee   : > { %v7829_v16 = vadd.high.f32.bf16 %v4857_v3, %v11370_v12  ;;  %v7830_v13 = vadd.low.f32.bf16 %v4856_v6, %v11370_v12  ;;  %v7831_v51 = vadd.high.f32.bf16 %v7827_v42, %v12992_v34  ;;  %v7832_v4 = vadd.low.f32.bf16 %v7828_v18, %v12992_v34  ;;  %s12363_s28 = scalar_lea.vmem [#allocation2], %s5855_s5 }
 0xcef   : > { %v7835_v40 = vadd.low.f32.bf16 %v4858_v62, %v11372_v8  ;;  %v7836_v31 = vadd.high.f32.bf16 %v4859_v27, %v11372_v8  ;;  %v12995_v8 = vld [vmem:[#allocation6_spill] sm:$0xff]  ;;  %s5739_s26 = sshll.u32 %s12363_s28, 4  ;;  %s12450_s26 = int_to_ptr.vmem [resolvable:$true] %s5739_s26 }
 0xcf0   : > { %v4861_v44 = vadd.f32 %v7831_v51, %v4845_v7  ;;  %v4860_v12 = vadd.f32 %v7832_v4, %v4844_v59  ;;  %v12998_v2 = vadd.high.f32.bf16 %v12997_v5, %v12995_v8  ;;  %s7879_s29 = scalar_lea.vmem %s12450_s26, 2048  ;;  %p7886_p1 = scmp.lt.s32.totalorder %s12450_s26, %s7884_s9 }
 0xcf1   : > { %p7880_p12 = scmp.ne.s32.totalorder %s12450_s26, %s7879_s29  ;;  %p7887_p2 = scmp.lt.s32.totalorder %s7885_s10, %s7879_s29 }
 0xcf2   : > { %v7839_v39 = vadd.high.f32.bf16 %v4861_v44, %v12993_v17  ;;  %v7840_v47 = vadd.low.f32.bf16 %v4860_v12, %v12993_v17 }
 0xcf3   : > { %p7881_p13 = pnand %p7880_p12, %p8026_p4  ;;  %p7888_p3 = por %p7887_p2, %p7886_p1 }
 0xcf5   : > { %p7882_p0 = pneg %p7881_p13 }
 0xcf7   : > { %p7889_p5 = pnand %p7888_p3, %p7882_p0 }
 0xcfa   : > { %v7349_v56 = vpop.permute.xlu0 %7348 }
 0xcfb   : > { %v12180_v21 = vadd.low.f32.bf16 %v7811_v53, %v7349_v56  ;;  %v12182_v29 = vadd.high.f32.bf16 %v7812_v61, %v7349_v56  ;;  %v12994_v53 = vld [vmem:[#allocation10_spill] sm:$0xff] }
 0xcfc   : > { %v12996_v61 = vadd.low.f32.bf16 %v12994_v53, %v12995_v8 }
 0xcfe   : > { %v7354_v32 = vpop.permute.xlu1 %7353 }
 0xcff   : > { %v12194_v58 = vadd.high.f32.bf16 %v7815_v0, %v7354_v32  ;;  %v12196_v41 = vadd.low.f32.bf16 %v7816_v9, %v7354_v32  ;;  %v12999_v0 = vld [vmem:[#allocation11_spill] sm:$0xff]  ;;  %v13000_v9 = vld [vmem:[#allocation8_spill] sm:$0xff] }
 0xd00   : > { %v13001_v46 = vadd.high.f32.bf16 %v12999_v0, %v13000_v9  ;;  %v13003_v19 = vadd.low.f32.bf16 %v13002_v25, %v13000_v9 }
 0xd02   : > { %v7359_v57 = vpop.permute.xlu0 %7358 }
 0xd03   : > { %v12204_v15 = vadd.low.f32.bf16 %v7821_v1, %v7359_v57  ;;  %v12206_v35 = vadd.high.f32.bf16 %v7822_v26, %v7359_v57 }
 0xd06   : > { %v7364_v54 = vpop.permute.xlu1 %7363 }
 0xd07   : > { %v12216_v24 = vadd.high.f32.bf16 %v7829_v16, %v7364_v54  ;;  %v12218_v45 = vadd.low.f32.bf16 %v7830_v13, %v7364_v54 }
 0xd0a   : > { %v7369_v10 = vpop.permute.xlu0 %7368 }
 0xd0b   : > { %v12222_v52 = vadd.low.f32.bf16 %v7835_v40, %v7369_v10  ;;  %v12224_v63 = vadd.high.f32.bf16 %v7836_v31, %v7369_v10 }
 0xd0e   : > { %v7374_v23 = vpop.permute.xlu1 %7373 }
 0xd0f   : > { %v12228_v28 = vadd.high.f32.bf16 %v7839_v39, %v7374_v23  ;;  %v12230_v22 = vadd.low.f32.bf16 %v7840_v47, %v7374_v23 }
 0xd12   : > { %v7379_v48 = vpop.permute.xlu0 %7378 }
 0xd13   : > { %v12235_v56 = vadd.low.f32.bf16 %v12996_v61, %v7379_v48  ;;  %v12240_v30 = vadd.high.f32.bf16 %v12998_v2, %v7379_v48 }
 0xd16   : > { %v7384_v60 = vpop.permute.xlu1 %7383  ;;  %v5354_v14 = vpop.permute.xlu0 %5353 }
 0xd17   : > { %v5401_v32 = vmul.bf16 %v12243_v11, %v5354_v14  ;;  %v12249_v50 = vadd.high.f32.bf16 %v13001_v46, %v7384_v60  ;;  %v12254_v20 = vadd.low.f32.bf16 %v13003_v19, %v7384_v60 }
 0xd19   : > { %v5417_v43 = vunpack.c.l.bf16 %v5401_v32 }
 0xd1a   : > { %v5356_v1 = vpop.permute.xlu1 %5355  ;;  %v5358_v26 = vpop.permute.xlu0 %5357 }
 0xd1b   : > { %v5402_v55 = vmul.bf16 %v12257_v37, %v5356_v1  ;;  %v5403_v57 = vmul.bf16 %v12243_v11, %v5358_v26 }
 0xd1d   : > { %v5418_v36 = vunpack.c.l.bf16 %v5402_v55  ;;  %v5419_v33 = vunpack.c.l.bf16 %v5403_v57 }
 0xd1e   : > { %v5360_v49 = vpop.permute.xlu1 %5359  ;;  %v5362_v38 = vpop.permute.xlu0 %5361 }
 0xd1f   : > { %v7387_v3 = vpack.i.bf16 %v5418_v36, %v5417_v43  ;;  %v5404_v6 = vmul.bf16 %v12257_v37, %v5360_v49  ;;  %v5405_v42 = vmul.bf16 %v12243_v11, %v5362_v38 }
 0xd21   : > { %v5420_v18 = vunpack.c.l.bf16 %v5404_v6  ;;  %7388 = vrot.lane.b32.xlu0 %v7387_v3, %s7961_s6  ;;  %v5421_v27 = vunpack.c.l.bf16 %v5405_v42 }
 0xd22   : > { %v5364_v54 = vpop.permute.xlu1 %5363  ;;  %v5366_v16 = vpop.permute.xlu0 %5365 }
 0xd23   : > { %v7392_v13 = vpack.i.bf16 %v5420_v18, %v5419_v33  ;;  %v5406_v62 = vmul.bf16 %v12257_v37, %v5364_v54  ;;  %v5407_v59 = vmul.bf16 %v12243_v11, %v5366_v16 }
 0xd25   : > { %v5422_v7 = vunpack.c.l.bf16 %v5406_v62  ;;  %7393 = vrot.lane.b32.xlu1 %v7392_v13, %s7961_s6  ;;  %v5423_v31 = vunpack.c.l.bf16 %v5407_v59 }
 0xd26   : > { %v5368_v34 = vpop.permute.xlu1 %5367  ;;  %v5370_v51 = vpop.permute.xlu0 %5369 }
 0xd27   : > { %v7397_v4 = vpack.i.bf16 %v5422_v7, %v5421_v27  ;;  %v5408_v40 = vmul.bf16 %v12257_v37, %v5368_v34  ;;  %v5409_v10 = vmul.bf16 %v12243_v11, %v5370_v51 }
 0xd29   : > { %v5424_v44 = vunpack.c.l.bf16 %v5408_v40  ;;  %7398 = vrot.lane.b32.xlu0 %v7397_v4, %s7961_s6  ;;  %v5425_v47 = vunpack.c.l.bf16 %v5409_v10 }
 0xd2a   : > { %v5372_v12 = vpop.permute.xlu1 %5371  ;;  %v5374_v23 = vpop.permute.xlu0 %5373 }
 0xd2b   : > { %v7402_v17 = vpack.i.bf16 %v5424_v44, %v5423_v31  ;;  %v5410_v39 = vmul.bf16 %v12257_v37, %v5372_v12  ;;  %v5411_v48 = vmul.bf16 %v12243_v11, %v5374_v23 }
 0xd2d   : > { %v5426_v53 = vunpack.c.l.bf16 %v5410_v39  ;;  %7403 = vrot.lane.b32.xlu1 %v7402_v17, %s7961_s6  ;;  %v5427_v60 = vunpack.c.l.bf16 %v5411_v48 }
 0xd2e   : > { %v5376_v8 = vpop.permute.xlu1 %5375  ;;  %v5378_v61 = vpop.permute.xlu0 %5377 }
 0xd2f   : > { %v7407_v5 = vpack.i.bf16 %v5426_v53, %v5425_v47  ;;  %v5412_v2 = vmul.bf16 %v12257_v37, %v5376_v8  ;;  %v5413_v14 = vmul.bf16 %v12243_v11, %v5378_v61 }
 0xd31   : > { %v5428_v32 = vunpack.c.l.bf16 %v5412_v2  ;;  %7408 = vrot.lane.b32.xlu0 %v7407_v5, %s7961_s6  ;;  %v5429_v19 = vunpack.c.l.bf16 %v5413_v14 }
 0xd32   : > { %v5380_v0 = vpop.permute.xlu1 %5379  ;;  %v5382_v9 = vpop.permute.xlu0 %5381 }
 0xd33   : > { %v7412_v46 = vpack.i.bf16 %v5428_v32, %v5427_v60  ;;  %v5414_v25 = vmul.bf16 %v12257_v37, %v5380_v0  ;;  %v5415_v1 = vmul.bf16 %v12243_v11, %v5382_v9 }
 0xd35   : > { %v5430_v26 = vunpack.c.l.bf16 %v5414_v25  ;;  %7413 = vrot.lane.b32.xlu1 %v7412_v46, %s7961_s6  ;;  %v5431_v49 = vunpack.c.l.bf16 %v5415_v1 }
 0xd36   : > { %v5384_v55 = vpop.permute.xlu1 %5383  ;;  %v5547_v43 = vpop.permute.xlu0 %5546 }
 0xd37   : > { %v7417_v57 = vpack.i.bf16 %v5430_v26, %v5429_v19  ;;  %v5416_v36 = vmul.bf16 %v12257_v37, %v5384_v55  ;;  %v5594_v38 = vmul.bf16 %v12243_v11, %v5547_v43 }
 0xd39   : > { %v5432_v3 = vunpack.c.l.bf16 %v5416_v36  ;;  %7418 = vrot.lane.b32.xlu0 %v7417_v57, %s7961_s6  ;;  %v5610_v54 = vunpack.c.l.bf16 %v5594_v38 }
 0xd3a   : > { %v5549_v6 = vpop.permute.xlu1 %5548  ;;  %v5551_v33 = vpop.permute.xlu0 %5550 }
 0xd3b   : > { %v7422_v42 = vpack.i.bf16 %v5432_v3, %v5431_v49  ;;  %v5595_v18 = vmul.bf16 %v12257_v37, %v5549_v6  ;;  %v5596_v16 = vmul.bf16 %v12243_v11, %v5551_v33 }
 0xd3d   : > { %v5611_v13 = vunpack.c.l.bf16 %v5595_v18  ;;  %7423 = vrot.lane.b32.xlu1 %v7422_v42, %s7961_s6  ;;  %v5612_v34 = vunpack.c.l.bf16 %v5596_v16 }
 0xd3e   : > { %v5553_v62 = vpop.permute.xlu1 %5552  ;;  %v5555_v27 = vpop.permute.xlu0 %5554 }
 0xd3f   : > { %v7427_v59 = vpack.i.bf16 %v5611_v13, %v5610_v54  ;;  %v5597_v7 = vmul.bf16 %v12257_v37, %v5553_v62  ;;  %v5598_v51 = vmul.bf16 %v12243_v11, %v5555_v27 }
 0xd41   : > { %v5613_v4 = vunpack.c.l.bf16 %v5597_v7  ;;  %7428 = vrot.lane.b32.xlu0 %v7427_v59, %s7962_s7  ;;  %v5614_v12 = vunpack.c.l.bf16 %v5598_v51  ;;  %v6391_v7 = vld [vmem:[%s12505_s1 + $0x840] sm:$0xf] }
 0xd42   : > { %v5557_v40 = vpop.permute.xlu1 %5556  ;;  %v5559_v31 = vpop.permute.xlu0 %5558 }
 0xd43   : > { %v7432_v10 = vpack.i.bf16 %v5613_v4, %v5612_v34  ;;  %v5599_v44 = vmul.bf16 %v12257_v37, %v5557_v40  ;;  %v5600_v23 = vmul.bf16 %v12243_v11, %v5559_v31  ;;  %v6392_v34 = vld [vmem:[%s12505_s1 + $0x844] sm:$0xf]  ;;  %v5272_v40 = vmul.bf16 %v6391_v7, %v12243_v11  ;;  %v6402_v7 = vld [vmem:[%s12505_s1 + $0x86c] sm:$0xf] }
 0xd44   : > { %v5273_v31 = vmul.bf16 %v6392_v34, %v12257_v37 }
 0xd45   : > { %v5615_v17 = vunpack.c.l.bf16 %v5599_v44  ;;  %7433 = vrot.lane.b32.xlu1 %v7432_v10, %s7962_s7  ;;  %v5616_v8 = vunpack.c.l.bf16 %v5600_v23  ;;  %v6393_v10 = vld [vmem:[%s12505_s1 + $0x848] sm:$0xf]  ;;  %v6394_v44 = vld [vmem:[%s12505_s1 + $0x84c] sm:$0xf] }
 0xd46   : > { %v5561_v39 = vpop.permute.xlu1 %5560  ;;  %v5563_v47 = vpop.permute.xlu0 %5562 }
 0xd47   : > { %v7437_v48 = vpack.i.bf16 %v5615_v17, %v5614_v12  ;;  %v5601_v53 = vmul.bf16 %v12257_v37, %v5561_v39  ;;  %v5602_v61 = vmul.bf16 %v12243_v11, %v5563_v47  ;;  %v6395_v17 = vld [vmem:[%s12505_s1 + $0x850] sm:$0xf]  ;;  %v5288_v39 = vunpack.c.l.bf16 %v5272_v40 }
 0xd48   : > { %v5289_v47 = vunpack.c.l.bf16 %v5273_v31 }
 0xd49   : > { %v5617_v5 = vunpack.c.l.bf16 %v5601_v53  ;;  %7438 = vrot.lane.b32.xlu0 %v7437_v48, %s7962_s7  ;;  %v5618_v0 = vunpack.c.l.bf16 %v5602_v61  ;;  %v5274_v48 = vmul.bf16 %v6393_v10, %v12243_v11  ;;  %v5275_v53 = vmul.bf16 %v6394_v44, %v12257_v37 }
 0xd4a   : > { %v5565_v2 = vpop.permute.xlu1 %5564  ;;  %v5567_v60 = vpop.permute.xlu0 %5566  ;;  %v5276_v61 = vmul.bf16 %v6395_v17, %v12243_v11  ;;  %v5283_v17 = vmul.bf16 %v6402_v7, %v12257_v37 }
 0xd4b   : > { %v7442_v14 = vpack.i.bf16 %v5617_v5, %v5616_v8  ;;  %v5603_v32 = vmul.bf16 %v12257_v37, %v5565_v2  ;;  %v5604_v9 = vmul.bf16 %v12243_v11, %v5567_v60  ;;  %v6396_v8 = vld [vmem:[%s12505_s1 + $0x854] sm:$0xf]  ;;  %v5304_v60 = vadd.f32 %v12180_v21, %v5288_v39 }
 0xd4d   : > { %v5619_v46 = vunpack.c.l.bf16 %v5603_v32  ;;  %7443 = vrot.lane.b32.xlu1 %v7442_v14, %s7962_s7  ;;  %v5620_v55 = vunpack.c.l.bf16 %v5604_v9  ;;  %v5305_v14 = vadd.f32 %v12182_v29, %v5289_v47  ;;  %v5277_v32 = vmul.bf16 %v6396_v8, %v12257_v37 }
 0xd4e   : > { %v5569_v25 = vpop.permute.xlu1 %5568  ;;  %v5571_v19 = vpop.permute.xlu0 %5570  ;;  %v5291_v9 = vunpack.c.l.bf16 %v5275_v53 }
 0xd4f   : > { %v7447_v1 = vpack.i.bf16 %v5619_v46, %v5618_v0  ;;  %v5605_v26 = vmul.bf16 %v12257_v37, %v5569_v25  ;;  %v5606_v43 = vmul.bf16 %v12243_v11, %v5571_v19  ;;  %v5290_v0 = vunpack.c.l.bf16 %v5274_v48  ;;  %v6397_v46 = vld [vmem:[%s12505_s1 + $0x858] sm:$0xf]  ;;  %v6398_v25 = vld [vmem:[%s12505_s1 + $0x85c] sm:$0xf]  ;;  %v6404_v48 = vld [vmem:[%s12505_s1 + $0x874] sm:$0xf] }
 0xd51   : > { %v5621_v57 = vunpack.c.l.bf16 %v5605_v26  ;;  %7448 = vrot.lane.b32.xlu0 %v7447_v1, %s7962_s7  ;;  %v5622_v6 = vunpack.c.l.bf16 %v5606_v43  ;;  %v5292_v26 = vunpack.c.l.bf16 %v5276_v61  ;;  %v5278_v43 = vmul.bf16 %v6397_v46, %v12243_v11 }
 0xd52   : > { %v5573_v36 = vpop.permute.xlu1 %5572  ;;  %v5575_v49 = vpop.permute.xlu0 %5574  ;;  %v5299_v46 = vunpack.c.l.bf16 %v5283_v17 }
 0xd53   : > { %v7452_v38 = vpack.i.bf16 %v5621_v57, %v5620_v55  ;;  %v5607_v3 = vmul.bf16 %v12257_v37, %v5573_v36  ;;  %v5608_v33 = vmul.bf16 %v12243_v11, %v5575_v49  ;;  %v5293_v55 = vunpack.c.l.bf16 %v5277_v32 }
 0xd54   : > { %v5279_v57 = vmul.bf16 %v6398_v25, %v12257_v37  ;;  %v5307_v36 = vadd.f32 %v12194_v58, %v5291_v9  ;;  %v5306_v49 = vadd.f32 %v12196_v41, %v5290_v0  ;;  %v5308_v58 = vadd.f32 %v12204_v15, %v5292_v26  ;;  %v6406_v25 = vld [vmem:[%s12505_s1 + $0x87c] sm:$0xf] }
 0xd55   : > { %v5623_v42 = vunpack.c.l.bf16 %v5607_v3  ;;  %7453 = vrot.lane.b32.xlu1 %v7452_v38, %s7962_s7  ;;  %v5624_v13 = vunpack.c.l.bf16 %v5608_v33  ;;  %v6399_v38 = vld [vmem:[%s12505_s1 + $0x860] sm:$0xf]  ;;  %v6400_v3 = vld [vmem:[%s12505_s1 + $0x864] sm:$0xf]  ;;  %v5309_v41 = vadd.f32 %v12206_v35, %v5293_v55  ;;  %v5285_v0 = vmul.bf16 %v6404_v48, %v12257_v37 }
 0xd56   : > { %v5577_v18 = vpop.permute.xlu1 %5576 }
 0xd57   : > { %v7457_v54 = vpack.i.bf16 %v5623_v42, %v5622_v6  ;;  %v5609_v16 = vmul.bf16 %v12257_v37, %v5577_v18  ;;  %v5301_v55 = vunpack.c.l.bf16 %v5285_v0 }
 0xd59   : > { %v5625_v62 = vunpack.c.l.bf16 %v5609_v16  ;;  %7458 = vrot.lane.b32.xlu0 %v7457_v54, %s7962_s7  ;;  %v5280_v16 = vmul.bf16 %v6399_v38, %v12243_v11 }
 0xd5b   : > { %v7462_v27 = vpack.i.bf16 %v5625_v62, %v5624_v13  ;;  %v5281_v13 = vmul.bf16 %v6400_v3, %v12257_v37  ;;  %v5294_v62 = vunpack.c.l.bf16 %v5278_v43  ;;  %v5296_v31 = vunpack.c.l.bf16 %v5280_v16 }
 0xd5d   : > { %7463 = vrot.lane.b32.xlu1 %v7462_v27, %s7962_s7  ;;  %v5295_v27 = vunpack.c.l.bf16 %v5279_v57  ;;  %v5297_v10 = vunpack.c.l.bf16 %v5281_v13  ;;  %v5310_v47 = vadd.f32 %v12218_v45, %v5294_v62  ;;  %v5287_v57 = vmul.bf16 %v6406_v25, %v12257_v37 }
 0xd5f   : > { %v5311_v39 = vadd.f32 %v12216_v24, %v5295_v27  ;;  %v5312_v24 = vadd.f32 %v12222_v52, %v5296_v31  ;;  %v5313_v45 = vadd.f32 %v12224_v63, %v5297_v10  ;;  %v5303_v37 = vunpack.c.l.bf16 %v5287_v57 }
 0xd93   : > { %v7389_v59 = vpop.permute.xlu0 %7388 }
 0xd94   : > { %v7847_v19 = vadd.low.f32.bf16 %v5304_v60, %v7389_v59  ;;  %v7848_v1 = vadd.high.f32.bf16 %v5305_v14, %v7389_v59  ;;  %v6401_v59 = vld [vmem:[%s12505_s1 + $0x868] sm:$0xf] }
 0xd95   : > { %v5282_v44 = vmul.bf16 %v6401_v59, %v12243_v11 }
 0xd97   : > { %v7394_v51 = vpop.permute.xlu1 %7393  ;;  %v5298_v9 = vunpack.c.l.bf16 %v5282_v44 }
 0xd98   : > { %v7851_v18 = vadd.high.f32.bf16 %v5307_v36, %v7394_v51  ;;  %v7852_v54 = vadd.low.f32.bf16 %v5306_v49, %v7394_v51  ;;  %v5315_v36 = vadd.f32 %v12228_v28, %v5299_v46  ;;  %v5317_v28 = vadd.f32 %v12240_v30, %v5301_v55 }
 0xd99   : > { %v5314_v49 = vadd.f32 %v12230_v22, %v5298_v9 }
 0xd9b   : > { %v12312_v4 = vpop.permute.xlu0 %7398 }
 0xd9c   : > { %v7855_v15 = vadd.low.f32.bf16 %v5308_v58, %v12312_v4  ;;  %v7856_v35 = vadd.high.f32.bf16 %v5309_v41, %v12312_v4  ;;  %v6403_v4 = vld [vmem:[%s12505_s1 + $0x870] sm:$0xf] }
 0xd9d   : > { %v5284_v32 = vmul.bf16 %v6403_v4, %v12243_v11 }
 0xd9f   : > { %v12322_v12 = vpop.permute.xlu1 %7403 }
 0xda0   : > { %v7859_v60 = vadd.high.f32.bf16 %v5311_v39, %v12322_v12  ;;  %v7860_v14 = vadd.low.f32.bf16 %v5310_v47, %v12322_v12  ;;  %v6405_v12 = vld [vmem:[%s12505_s1 + $0x878] sm:$0xf] }
 0xda1   : > { %v5286_v43 = vmul.bf16 %v6405_v12, %v12243_v11 }
 0xda3   : > { %v12324_v23 = vpop.permute.xlu0 %7408  ;;  %v5302_v22 = vunpack.c.l.bf16 %v5286_v43 }
 0xda4   : > { %v7863_v52 = vadd.low.f32.bf16 %v5312_v24, %v12324_v23  ;;  %v7864_v63 = vadd.high.f32.bf16 %v5313_v45, %v12324_v23 }
 0xda5   : > { %v5318_v30 = vadd.f32 %v12254_v20, %v5302_v22 }
 0xda7   : > { %v12335_v5 = vpop.permute.xlu1 %7413 }
 0xdab   : > { %v12337_v2 = vpop.permute.xlu0 %7418 }
 0xdaf   : > { %v12351_v21 = vpop.permute.xlu1 %7423 }
 0xdb0   : > { %v7876_v62 = vadd.low.f32.bf16 %v5318_v30, %v12351_v21 }
 0xdb3   : > { %v7429_v29 = vpop.permute.xlu0 %7428 }
 0xdb4   : > { %v7849_v6 = vadd.low.f32.bf16 %v7847_v19, %v7429_v29  ;;  %v7850_v33 = vadd.high.f32.bf16 %v7848_v1, %v7429_v29  ;;  %v5300_v29 = vunpack.c.l.bf16 %v5284_v32 }
 0xdb6   : > { %5707 = vst.msk [vmem:[%s12363_s28] sm:$0xff] %vm5706_vm0, %v7849_v6  ;;  %5708 = vst.msk [vmem:[%s12363_s28 + $0x8] sm:$0xff] %vm5706_vm0, %v7850_v33  ;;  %v7867_v6 = vadd.high.f32.bf16 %v5315_v36, %v12335_v5  ;;  %v7868_v33 = vadd.low.f32.bf16 %v5314_v49, %v12335_v5  ;;  %v5316_v11 = vadd.f32 %v12235_v56, %v5300_v29 }
 0xdb7   : > { %v7434_v42 = vpop.permute.xlu1 %7433  ;;  %v7872_v5 = vadd.high.f32.bf16 %v5317_v28, %v12337_v2  ;;  %v5319_v56 = vadd.f32 %v12249_v50, %v5303_v37 }
 0xdb8   : > { %v7853_v34 = vadd.high.f32.bf16 %v7851_v18, %v7434_v42  ;;  %v7854_v51 = vadd.low.f32.bf16 %v7852_v54, %v7434_v42  ;;  %v7871_v54 = vadd.low.f32.bf16 %v5316_v11, %v12337_v2 }
 0xdb9   : > { %v7875_v2 = vadd.high.f32.bf16 %v5319_v56, %v12351_v21 }
 0xdba   : > { %5709 = vst.msk [vmem:[%s12363_s28 + $0x10] sm:$0xff] %vm5706_vm0, %v7854_v51  ;;  %5710 = vst.msk [vmem:[%s12363_s28 + $0x18] sm:$0xff] %vm5706_vm0, %v7853_v34 }
 0xdbb   : > { %v7439_v40 = vpop.permute.xlu0 %7438 }
 0xdbc   : > { %v7857_v53 = vadd.low.f32.bf16 %v7855_v15, %v7439_v40  ;;  %v7858_v8 = vadd.high.f32.bf16 %v7856_v35, %v7439_v40 }
 0xdbe   : > { %5711 = vst.msk [vmem:[%s12363_s28 + $0x20] sm:$0xff] %vm5706_vm0, %v7857_v53  ;;  %5712 = vst.msk [vmem:[%s12363_s28 + $0x28] sm:$0xff] %vm5706_vm0, %v7858_v8 }
 0xdbf   : > { %v7444_v61 = vpop.permute.xlu1 %7443 }
 0xdc0   : > { %v7861_v19 = vadd.high.f32.bf16 %v7859_v60, %v7444_v61  ;;  %v7862_v1 = vadd.low.f32.bf16 %v7860_v14, %v7444_v61 }
 0xdc2   : > { %5713 = vst.msk [vmem:[%s12363_s28 + $0x30] sm:$0xff] %vm5706_vm0, %v7862_v1  ;;  %5714 = vst.msk [vmem:[%s12363_s28 + $0x38] sm:$0xff] %vm5706_vm0, %v7861_v19 }
 0xdc3   : > { %v7449_v26 = vpop.permute.xlu0 %7448 }
 0xdc4   : > { %v7865_v38 = vadd.low.f32.bf16 %v7863_v52, %v7449_v26  ;;  %v7866_v3 = vadd.high.f32.bf16 %v7864_v63, %v7449_v26 }
 0xdc6   : > { %5715 = vst.msk [vmem:[%s12363_s28 + $0x40] sm:$0xff] %vm5706_vm0, %v7865_v38  ;;  %5716 = vst.msk [vmem:[%s12363_s28 + $0x48] sm:$0xff] %vm5706_vm0, %v7866_v3 }
 0xdc7   : > { %v7454_v23 = vpop.permute.xlu1 %7453 }
 0xdc8   : > { %v7869_v42 = vadd.high.f32.bf16 %v7867_v6, %v7454_v23  ;;  %v7870_v18 = vadd.low.f32.bf16 %v7868_v33, %v7454_v23 }
 0xdca   : > { %5717 = vst.msk [vmem:[%s12363_s28 + $0x50] sm:$0xff] %vm5706_vm0, %v7870_v18  ;;  %5718 = vst.msk [vmem:[%s12363_s28 + $0x58] sm:$0xff] %vm5706_vm0, %v7869_v42 }
 0xdcb   : > { %v7459_v58 = vpop.permute.xlu0 %7458 }
 0xdcc   : > { %v7873_v41 = vadd.low.f32.bf16 %v7871_v54, %v7459_v58  ;;  %v7874_v16 = vadd.high.f32.bf16 %v7872_v5, %v7459_v58 }
 0xdce   : > { %5719 = vst.msk [vmem:[%s12363_s28 + $0x60] sm:$0xff] %vm5706_vm0, %v7873_v41  ;;  %5720 = vst.msk [vmem:[%s12363_s28 + $0x68] sm:$0xff] %vm5706_vm0, %v7874_v16 }
 0xdcf   : > { %v7464_v13 = vpop.permute.xlu1 %7463 }
 0xdd0   : > { %v7877_v50 = vadd.high.f32.bf16 %v7875_v2, %v7464_v13  ;;  %v7878_v20 = vadd.low.f32.bf16 %v7876_v62, %v7464_v13 }
 0xdd2   : > { %5721 = vst.msk [vmem:[%s12363_s28 + $0x70] sm:$0xff] %vm5706_vm0, %v7878_v20  ;;  %5722 = vst.msk [vmem:[%s12363_s28 + $0x78] sm:$0xff] %vm5706_vm0, %v7877_v50 }
 0xdd3   : > { %7892 = shalt.err (!%p7889_p5)
}
 0xdd4   : > { %s7893_s11 = scalar_lea.hbm %s12448_s4, 2048  ;;  %s7897_s19 = scalar_lea.hbm %s12507_s3, 4096 }
 0xdd5   : > { %p7894_p6 = scmp.ne.s32.totalorder %s12448_s4, %s7893_s11  ;;  %p7898_p10 = scmp.lt.u32.totalorder %s12448_s4, %s12507_s3 }
 0xdd6   : > { %p7899_p11 = scmp.lt.u32.totalorder %s7897_s19, %s7893_s11  ;;  %p7901_p13 = scmp.lt.u32.totalorder %s7893_s11, %s12448_s4 }
 0xdd7   : > { %p7895_p7 = pnand %p7894_p6, %p8026_p4 }
 0xdd8   : > { %p7900_p12 = por %p7899_p11, %p7898_p10 }
 0xdd9   : > { %p7896_p9 = pneg %p7895_p7 }
 0xdda   : > { %p7902_p0 = por %p7901_p13, %p7900_p12 }
 0xddc   : > { %p7903_p1 = pnand %p7902_p0, %p7896_p9 }
 0xdde   : > { %7906 = shalt.err (!%p7903_p1)
}
 0xddf   : > { %s7964_s5 = smov 128   ;;  %s7965_s6 = smov 8  }
 0xde0   : > { %6446 = dma.vmem_to_hbm [thread:$0]  (%p8026_p4), %s12450_s26, 2048, %s12448_s4, %s12458_s15, %s7964_s5, %s7964_s5, %s7965_s6  }
 0xde1 PF: > { %p6452_p2 = scmp.ge.s32.totalorder %s7957_s17, 2  ;;  %s5754_s23 = sand.u32 1, %s7937_s12  }
 0xde2   : > { %s5755_s27 = scalar_lea.sflag [#allocation3], %s5754_s23 }
 0xde3   : > { %p6449_p3 = pnand %p6452_p2, %p8033_p8 }
 0xde5   : > { %7932 = dma.done.wait (!%p6449_p3), %s5755_s27, 2048  }
 0xde6   : > { %7934 = vsyncadd (!%p6449_p3), %s5755_s27, 4294965248  ;;  %s16_s17 = sadd.s32 1, %s7957_s17   ;;  %s13004_s12 = smov %s7941_s13 }
 0xde7   : > { %p13_p5 = scmp.ge.s32.totalorder %s16_s17, 4   ;;  %s13005_s13 = smov %s7945_s14 }
 0xde8   : > { %s13006_s14 = smov %s8039_s25  ;;  %s13007_s15 = smov %s7953_s16 }
 0xde9   : > { %s13008_s16 = smov %s13010_s20  ;;  %15 = sbr.rel (!%p13_p5) target bundleno = 4 (0x4), region = 119 }
 0xdf0   :  { %5760 = vsyncpa [#allocation3], 1 }
 0xdf1   :  { %5762 = vsyncpa [#allocation3 + $0x1], 1 }

</bundles_post_ra>
